<compile_context>
chip_gen: v5e
topology: v5e:2x2
jax: 0.10.0
libtpu: 0.0.40
codegen_flags: <defaults>
</compile_context>

<pallas_src>
import jax
import jax.numpy as jnp
from jax.experimental import pallas as pl
from jax.experimental.pallas import tpu as pltpu

NUM_CLASSES = 10
C1P = 32      # conv1 out channels padded 20 -> 32
C2P = 64      # conv2 out channels padded 50 -> 64
NHID_P = 512  # fc1 out features padded 500 -> 512
NCLS_P = 128  # fc2 out features padded 10 -> 128 (lane-dense output)

_COMPILER_PARAMS = pltpu.CompilerParams(
    dimension_semantics=("parallel",),
    vmem_limit_bytes=32 * 1024 * 1024,   # safe on v5e/v6e/v7x; ~7 MB actually used
)


# ---------------- the single fused kernel ----------------

def _network_kernel(x_ref, a1_ref, b1_ref, a2_ref, b2_ref,
                    wf1_ref, bf1_ref, wf2_ref, bf2_ref, o_ref):
    tb = x_ref.shape[0]                 # samples in this grid step
    f32 = jnp.float32
    bf16 = jnp.bfloat16

    # ---- stage 1: conv1(1->20, 5x5) + maxpool(2,2) + bias + ReLU -----------------
    # banded-row matmuls: rows=(b, oh), lanes=(ow_parity, pw, oc)   [24x24 -> pooled 12x12]
    x = x_ref[...]                                            # (tb, 28, 28) f32
    acc1 = None
    for i in range(5):
        xi = x[:, i:i + 24, :].reshape(tb * 24, 28).astype(bf16)
        part = jnp.dot(xi, a1_ref[i], preferred_element_type=f32)   # (tb*24, 768)
        acc1 = part if acc1 is None else acc1 + part
    # width pool: columns are parity-major -> max of the two 384-lane halves
    wp1 = jnp.maximum(acc1[:, :384], acc1[:, 384:])           # (tb*24, 384)
    # height pool: adjacent row pairs
    hp1 = wp1.reshape(tb * 12, 2, 384)
    hp1 = jnp.maximum(hp1[:, 0, :], hp1[:, 1, :])             # (tb*12, 384)
    # bias + ReLU commute with max, so applying them after the pool is exact
    x1 = jnp.maximum(hp1 + b1_ref[...], 0.0)
    x1 = x1.reshape(tb, 12, 384)                              # rows=(b,h), lanes=(w, c_pad32)

    # ---- stage 2: conv2(20->50, 5x5) + maxpool(2,2) + bias + ReLU -----------------
    acc2 = None
    for i in range(5):
        xi = x1[:, i:i + 8, :].reshape(tb * 8, 384).astype(bf16)
        part = jnp.dot(xi, a2_ref[i], preferred_element_type=f32)   # (tb*8, 512)
        acc2 = part if acc2 is None else acc2 + part
    wp2 = jnp.maximum(acc2[:, :256], acc2[:, 256:])           # (tb*8, 256)
    hp2 = wp2.reshape(tb * 4, 2, 256)
    hp2 = jnp.maximum(hp2[:, 0, :], hp2[:, 1, :])             # (tb*4, 256)
    x2 = jnp.maximum(hp2 + b2_ref[...], 0.0)                  # rows=(b,h), lanes=(w, c_pad64)
    x2 = x2.reshape(tb, 4, 256)

    # ---- stage 3: fc1 + ReLU -> fc2 -> masked log_softmax -------------------------
    # fc1 as 4 row-group matmuls (one per spatial h) so no sublane->lane flatten is needed;
    # the (h, w, c_pad) column permutation of wf1 was done at init.
    hacc = None
    for hh in range(4):
        xh = x2[:, hh, :].astype(bf16)                        # (tb, 256)
        part = jnp.dot(xh, wf1_ref[hh], preferred_element_type=f32)  # (tb, 512)
        hacc = part if hacc is None else hacc + part
    hid = jnp.maximum(hacc + bf1_ref[...], 0.0).astype(bf16)
    logits = jnp.dot(hid, wf2_ref[...], preferred_element_type=f32) + bf2_ref[...]  # (tb,128)

    lane = jax.lax.broadcasted_iota(jnp.int32, logits.shape, 1)
    valid = lane < NUM_CLASSES
    z = jnp.where(valid, logits, -1e30)                       # mask padded class lanes
    m = jnp.max(z, axis=-1, keepdims=True)
    e = jnp.where(valid, jnp.exp(z - m), 0.0)
    lse = jnp.log(jnp.sum(e, axis=-1, keepdims=True))
    o_ref[0] = (z - m) - lse


# ---------------- wrapper ----------------

def _pick_block_batch(batch):
    """Largest divisor of `batch` that is <= 8 (keeps per-step footprint small and gives
    >=2 grid steps at larger batches for v7x megacore)."""
    for cand in range(min(8, batch), 0, -1):
        if batch % cand == 0:
            return cand
    return batch


def network_forward(x_nchw, prep):
    batch = x_nchw.shape[0]
    assert x_nchw.shape[1:] == (1, 28, 28), x_nchw.shape
    x = x_nchw.reshape(batch, 28, 28).astype(jnp.float32)
    tb = _pick_block_batch(batch)
    grid_n = batch // tb

    out = pl.pallas_call(
        _network_kernel,
        out_shape=jax.ShapeDtypeStruct((grid_n, tb, NCLS_P), jnp.float32),
        grid_spec=pltpu.PrefetchScalarGridSpec(
            num_scalar_prefetch=0,
            grid=(grid_n,),
            in_specs=[
                pl.BlockSpec((tb, 28, 28), lambda n: (n, 0, 0)),        # images
                pl.BlockSpec((5, 28, 768), lambda n: (0, 0, 0)),        # conv1 banded (bf16)
                pl.BlockSpec((1, 384), lambda n: (0, 0)),               # conv1 bias (tiled)
                pl.BlockSpec((5, 384, 512), lambda n: (0, 0, 0)),       # conv2 banded (bf16)
                pl.BlockSpec((1, 256), lambda n: (0, 0)),               # conv2 bias (tiled)
                pl.BlockSpec((4, 256, 512), lambda n: (0, 0, 0)),       # fc1 (bf16, row groups)
                pl.BlockSpec((1, 512), lambda n: (0, 0)),               # fc1 bias
                pl.BlockSpec((512, 128), lambda n: (0, 0)),             # fc2 (bf16)
                pl.BlockSpec((1, 128), lambda n: (0, 0)),               # fc2 bias
            ],
            out_specs=pl.BlockSpec((1, tb, NCLS_P), lambda n: (n, 0, 0)),
        ),
        compiler_params=_COMPILER_PARAMS,
    )(x, prep['a1'], prep['b1'], prep['a2'], prep['b2'],
      prep['wf1'], prep['bf1'], prep['wf2'], prep['bf2'])

    return out.reshape(batch, NCLS_P)[:, :NUM_CLASSES]


# ---------------- model params ----------------

def init_params(key):
    """PyTorch-default U(-1/sqrt(fan_in), 1/sqrt(fan_in)) init, PyTorch layouts."""
    def uni(k, shape, fan_in):
        bound = 1.0 / float(fan_in) ** 0.5
        return jax.random.uniform(k, shape, jnp.float32, -bound, bound)

    ks = jax.random.split(key, 8)
    return dict(
        w_conv1=uni(ks[0], (20, 1, 5, 5), 25),
        b_conv1=uni(ks[1], (20,), 25),
        w_conv2=uni(ks[2], (50, 20, 5, 5), 500),
        b_conv2=uni(ks[3], (50,), 500),
        w_fc1=uni(ks[4], (500, 4 * 4 * 50), 800),
        b_fc1=uni(ks[5], (500,), 800),
        w_fc2=uni(ks[6], (10, 500), 500),
        b_fc2=uni(ks[7], (10,), 500),
    )


def prepare_params(p):
    """One-time weight transform: banded conv matrices with parity-major output columns
    (makes the 2x2 pool a max of lane halves), fc1 column permutation for the (h,w,c_pad)
    flatten, zero-padding to lane-friendly sizes, bf16 matmul operands, f32 biases."""
    bf16 = jnp.bfloat16

    # conv1 banded matrices A1[i]: (28, 768); rows = input width w', cols = (ow%2, ow//2, oc)
    w1 = jnp.transpose(p['w_conv1'][:, 0, :, :], (1, 2, 0))          # (i, j, oc) = (5,5,20)
    w1 = jnp.pad(w1, ((0, 0), (0, 0), (0, C1P - 20)))                # (5,5,32)
    a1 = jnp.zeros((5, 28, 24, C1P), jnp.float32)
    for ow in range(24):
        for j in range(5):
            a1 = a1.at[:, ow + j, ow, :].set(w1[:, j, :])
    a1 = a1.reshape(5, 28, 12, 2, C1P)                               # (i, w', pw, parity, oc)
    a1 = jnp.transpose(a1, (0, 1, 3, 2, 4)).reshape(5, 28, 2 * 12 * C1P)
    b1 = jnp.tile(jnp.pad(p['b_conv1'], (0, C1P - 20)), 12).reshape(1, 12 * C1P)

    # conv2 banded matrices A2[i]: (384, 512); rows = (pw, c_pad32), cols = (ow2%2, ow2//2, oc2)
    w2 = jnp.transpose(p['w_conv2'], (2, 3, 1, 0))                   # (i, j, c, oc2)
    w2 = jnp.pad(w2, ((0, 0), (0, 0), (0, C1P - 20), (0, C2P - 50)))  # (5,5,32,64)
    a2 = jnp.zeros((5, 12, C1P, 8, C2P), jnp.float32)
    for ow2 in range(8):
        for j in range(5):
            a2 = a2.at[:, ow2 + j, :, ow2, :].set(w2[:, j, :, :])
    a2 = a2.reshape(5, 12, C1P, 4, 2, C2P)                           # (i, pw, c, pw2, parity, oc2)
    a2 = jnp.transpose(a2, (0, 1, 2, 4, 3, 5)).reshape(5, 12 * C1P, 2 * 4 * C2P)
    b2 = jnp.tile(jnp.pad(p['b_conv2'], (0, C2P - 50)), 4).reshape(1, 4 * C2P)

    # fc1: PyTorch flatten order is (c,h,w); permute columns so the kernel's (h, w, c_pad)
    # layout is accepted directly, then split rows into 4 h-groups.
    wf1 = p['w_fc1'].reshape(500, 50, 4, 4)                          # (n, c, h, w)
    wf1 = jnp.transpose(wf1, (2, 3, 1, 0))                           # (h, w, c, n)
    wf1 = jnp.pad(wf1, ((0, 0), (0, 0), (0, C2P - 50), (0, NHID_P - 500)))
    wf1 = wf1.reshape(4, 4 * C2P, NHID_P)                            # (h, 256, 512)
    bf1 = jnp.pad(p['b_fc1'], (0, NHID_P - 500)).reshape(1, NHID_P)

    wf2 = jnp.pad(p['w_fc2'].T, ((0, NHID_P - 500), (0, NCLS_P - 10)))
    bf2 = jnp.pad(p['b_fc2'], (0, NCLS_P - 10)).reshape(1, NCLS_P)

    return dict(a1=a1.astype(bf16), b1=b1.astype(jnp.float32),
                a2=a2.astype(bf16), b2=b2.astype(jnp.float32),
                wf1=wf1.astype(bf16), bf1=bf1.astype(jnp.float32),
                wf2=wf2.astype(bf16), bf2=bf2.astype(jnp.float32))


# ---------------- plain-XLA f32 reference (for self-check) ----------------

def _reference_forward(x_nchw, p):
    dn = ('NCHW', 'OIHW', 'NCHW')
    x = jax.lax.conv_general_dilated(x_nchw, p['w_conv1'], (1, 1), 'VALID',
                                     dimension_numbers=dn)
    x = jax.nn.relu(x + p['b_conv1'][None, :, None, None])
    b, c, h, w = x.shape
    x = x.reshape(b, c, h // 2, 2, w // 2, 2).max(axis=(3, 5))
    x = jax.lax.conv_general_dilated(x, p['w_conv2'], (1, 1), 'VALID',
                                     dimension_numbers=dn)
    x = jax.nn.relu(x + p['b_conv2'][None, :, None, None])
    b, c, h, w = x.shape
    x = x.reshape(b, c, h // 2, 2, w // 2, 2).max(axis=(3, 5))
    x = x.reshape(b, -1)
    x = jax.nn.relu(x @ p['w_fc1'].T + p['b_fc1'])
    x = x @ p['w_fc2'].T + p['b_fc2']
    return jax.nn.log_softmax(x, axis=-1)


if __name__ == "__main__":
    key = jax.random.PRNGKey(0)
    pkey, xkey = jax.random.split(key)
    params = init_params(pkey)
    prep = prepare_params(params)            # one-time weight transform (not per forward)
    # spatial size 28 is dictated by the module (4*4*50 flatten after two conv+pool stages)
    x = jax.random.normal(xkey, (2, 1, 28, 28), dtype=jnp.float32)

    fwd = jax.jit(network_forward)
    out = jax.block_until_ready(fwd(x, prep))
    assert out.shape == (2, NUM_CLASSES), out.shape

    # log_softmax sanity: exp(out) rows sum to 1
    row_sums = jnp.sum(jnp.exp(out), axis=1)
    assert bool(jnp.all(jnp.abs(row_sums - 1.0) < 1e-4)), row_sums

    # end-to-end numeric check against a plain-XLA f32 reference of the same module.
    # Tolerance accounts for bf16 matmul operands (f32 accumulation) in the kernel.
    ref = _reference_forward(x, params)
    max_err = float(jnp.max(jnp.abs(out - ref)))
    assert max_err < 1e-1, max_err

    print("KERNEL_OK")
</pallas_src>

<mosaic_0001>
module attributes {stable_mosaic.version = 11 : i64} {
  func.func @_network_kernel(%arg0: i32, %arg1: memref<2x28x28xf32, #tpu.memory_space<vmem>>, %arg2: memref<5x28x768xbf16, #tpu.memory_space<vmem>>, %arg3: memref<1x384xf32, #tpu.memory_space<vmem>>, %arg4: memref<5x384x512xbf16, #tpu.memory_space<vmem>>, %arg5: memref<1x256xf32, #tpu.memory_space<vmem>>, %arg6: memref<4x256x512xbf16, #tpu.memory_space<vmem>>, %arg7: memref<1x512xf32, #tpu.memory_space<vmem>>, %arg8: memref<512x128xbf16, #tpu.memory_space<vmem>>, %arg9: memref<1x128xf32, #tpu.memory_space<vmem>>, %arg10: memref<1x2x128xf32, #tpu.memory_space<vmem>>) attributes {dimension_semantics = [#tpu.dimension_semantics<parallel>], iteration_bounds = array<i64: 1>, scalar_prefetch = 0 : i64, scratch_operands = 0 : i64, tpu.core_type = #tpu.core_type<tc>, window_params = [{transform_indices = @transform_0, window_bounds = array<i64: 2, 28, 28>}, {pipeline_mode = #tpu.pipeline_mode<synchronous>, transform_indices = @transform_1, window_bounds = array<i64: 5, 28, 768>}, {pipeline_mode = #tpu.pipeline_mode<synchronous>, transform_indices = @transform_2, window_bounds = array<i64: 1, 384>}, {pipeline_mode = #tpu.pipeline_mode<synchronous>, transform_indices = @transform_3, window_bounds = array<i64: 5, 384, 512>}, {pipeline_mode = #tpu.pipeline_mode<synchronous>, transform_indices = @transform_4, window_bounds = array<i64: 1, 256>}, {pipeline_mode = #tpu.pipeline_mode<synchronous>, transform_indices = @transform_5, window_bounds = array<i64: 4, 256, 512>}, {pipeline_mode = #tpu.pipeline_mode<synchronous>, transform_indices = @transform_6, window_bounds = array<i64: 1, 512>}, {pipeline_mode = #tpu.pipeline_mode<synchronous>, transform_indices = @transform_7, window_bounds = array<i64: 512, 128>}, {pipeline_mode = #tpu.pipeline_mode<synchronous>, transform_indices = @transform_8, window_bounds = array<i64: 1, 128>}, {transform_indices = @transform_9, window_bounds = array<i64: 1, 2, 128>}]} {
    %c0 = arith.constant 0 : index
    %c0_0 = arith.constant 0 : index
    %c0_1 = arith.constant 0 : index
    %0 = vector.load %arg1[%c0, %c0_0, %c0_1] : memref<2x28x28xf32, #tpu.memory_space<vmem>>, vector<2x28x28xf32>
    %1 = vector.extract_strided_slice %0 {offsets = [0, 0, 0], sizes = [2, 24, 28], strides = [1, 1, 1]} : vector<2x28x28xf32> to vector<2x24x28xf32>
    %2 = vector.shape_cast %1 : vector<2x24x28xf32> to vector<48x28xf32>
    %3 = arith.truncf %2 : vector<48x28xf32> to vector<48x28xbf16>
    %c0_2 = arith.constant 0 : index
    %c0_3 = arith.constant 0 : index
    %c0_4 = arith.constant 0 : index
    %4 = vector.load %arg2[%c0_2, %c0_3, %c0_4] : memref<5x28x768xbf16, #tpu.memory_space<vmem>>, vector<1x28x768xbf16>
    %5 = vector.shape_cast %4 : vector<1x28x768xbf16> to vector<28x768xbf16>
    %cst = arith.constant dense<0.000000e+00> : vector<48x768xf32>
    %6 = tpu.matmul %3, %5, %cst {dimension_numbers = #tpu.dot_dimension_numbers<[1], [0], [0], [1], [0, 0, 1, 1], [], []>} : vector<48x28xbf16>, vector<28x768xbf16>, vector<48x768xf32> -> vector<48x768xf32>
    %7 = vector.extract_strided_slice %0 {offsets = [0, 1, 0], sizes = [2, 24, 28], strides = [1, 1, 1]} : vector<2x28x28xf32> to vector<2x24x28xf32>
    %8 = vector.shape_cast %7 : vector<2x24x28xf32> to vector<48x28xf32>
    %9 = arith.truncf %8 : vector<48x28xf32> to vector<48x28xbf16>
    %c1 = arith.constant 1 : index
    %c0_5 = arith.constant 0 : index
    %c0_6 = arith.constant 0 : index
    %10 = vector.load %arg2[%c1, %c0_5, %c0_6] : memref<5x28x768xbf16, #tpu.memory_space<vmem>>, vector<1x28x768xbf16>
    %11 = vector.shape_cast %10 : vector<1x28x768xbf16> to vector<28x768xbf16>
    %cst_7 = arith.constant dense<0.000000e+00> : vector<48x768xf32>
    %12 = tpu.matmul %9, %11, %cst_7 {dimension_numbers = #tpu.dot_dimension_numbers<[1], [0], [0], [1], [0, 0, 1, 1], [], []>} : vector<48x28xbf16>, vector<28x768xbf16>, vector<48x768xf32> -> vector<48x768xf32>
    %13 = arith.addf %6, %12 : vector<48x768xf32>
    %14 = vector.extract_strided_slice %0 {offsets = [0, 2, 0], sizes = [2, 24, 28], strides = [1, 1, 1]} : vector<2x28x28xf32> to vector<2x24x28xf32>
    %15 = vector.shape_cast %14 : vector<2x24x28xf32> to vector<48x28xf32>
    %16 = arith.truncf %15 : vector<48x28xf32> to vector<48x28xbf16>
    %c2 = arith.constant 2 : index
    %c0_8 = arith.constant 0 : index
    %c0_9 = arith.constant 0 : index
    %17 = vector.load %arg2[%c2, %c0_8, %c0_9] : memref<5x28x768xbf16, #tpu.memory_space<vmem>>, vector<1x28x768xbf16>
    %18 = vector.shape_cast %17 : vector<1x28x768xbf16> to vector<28x768xbf16>
    %cst_10 = arith.constant dense<0.000000e+00> : vector<48x768xf32>
    %19 = tpu.matmul %16, %18, %cst_10 {dimension_numbers = #tpu.dot_dimension_numbers<[1], [0], [0], [1], [0, 0, 1, 1], [], []>} : vector<48x28xbf16>, vector<28x768xbf16>, vector<48x768xf32> -> vector<48x768xf32>
    %20 = arith.addf %13, %19 : vector<48x768xf32>
    %21 = vector.extract_strided_slice %0 {offsets = [0, 3, 0], sizes = [2, 24, 28], strides = [1, 1, 1]} : vector<2x28x28xf32> to vector<2x24x28xf32>
    %22 = vector.shape_cast %21 : vector<2x24x28xf32> to vector<48x28xf32>
    %23 = arith.truncf %22 : vector<48x28xf32> to vector<48x28xbf16>
    %c3 = arith.constant 3 : index
    %c0_11 = arith.constant 0 : index
    %c0_12 = arith.constant 0 : index
    %24 = vector.load %arg2[%c3, %c0_11, %c0_12] : memref<5x28x768xbf16, #tpu.memory_space<vmem>>, vector<1x28x768xbf16>
    %25 = vector.shape_cast %24 : vector<1x28x768xbf16> to vector<28x768xbf16>
    %cst_13 = arith.constant dense<0.000000e+00> : vector<48x768xf32>
    %26 = tpu.matmul %23, %25, %cst_13 {dimension_numbers = #tpu.dot_dimension_numbers<[1], [0], [0], [1], [0, 0, 1, 1], [], []>} : vector<48x28xbf16>, vector<28x768xbf16>, vector<48x768xf32> -> vector<48x768xf32>
    %27 = arith.addf %20, %26 : vector<48x768xf32>
    %28 = vector.extract_strided_slice %0 {offsets = [0, 4, 0], sizes = [2, 24, 28], strides = [1, 1, 1]} : vector<2x28x28xf32> to vector<2x24x28xf32>
    %29 = vector.shape_cast %28 : vector<2x24x28xf32> to vector<48x28xf32>
    %30 = arith.truncf %29 : vector<48x28xf32> to vector<48x28xbf16>
    %c4 = arith.constant 4 : index
    %c0_14 = arith.constant 0 : index
    %c0_15 = arith.constant 0 : index
    %31 = vector.load %arg2[%c4, %c0_14, %c0_15] : memref<5x28x768xbf16, #tpu.memory_space<vmem>>, vector<1x28x768xbf16>
    %32 = vector.shape_cast %31 : vector<1x28x768xbf16> to vector<28x768xbf16>
    %cst_16 = arith.constant dense<0.000000e+00> : vector<48x768xf32>
    %33 = tpu.matmul %30, %32, %cst_16 {dimension_numbers = #tpu.dot_dimension_numbers<[1], [0], [0], [1], [0, 0, 1, 1], [], []>} : vector<48x28xbf16>, vector<28x768xbf16>, vector<48x768xf32> -> vector<48x768xf32>
    %34 = arith.addf %27, %33 : vector<48x768xf32>
    %35 = vector.extract_strided_slice %34 {offsets = [0, 0], sizes = [48, 384], strides = [1, 1]} : vector<48x768xf32> to vector<48x384xf32>
    %36 = vector.extract_strided_slice %34 {offsets = [0, 384], sizes = [48, 384], strides = [1, 1]} : vector<48x768xf32> to vector<48x384xf32>
    %37 = arith.maximumf %35, %36 : vector<48x384xf32>
    %38 = vector.shape_cast %37 : vector<48x384xf32> to vector<24x2x384xf32>
    %39 = vector.extract_strided_slice %38 {offsets = [0, 0, 0], sizes = [24, 1, 384], strides = [1, 1, 1]} : vector<24x2x384xf32> to vector<24x1x384xf32>
    %40 = vector.shape_cast %39 : vector<24x1x384xf32> to vector<24x384xf32>
    %41 = vector.extract_strided_slice %38 {offsets = [0, 1, 0], sizes = [24, 1, 384], strides = [1, 1, 1]} : vector<24x2x384xf32> to vector<24x1x384xf32>
    %42 = vector.shape_cast %41 : vector<24x1x384xf32> to vector<24x384xf32>
    %43 = arith.maximumf %40, %42 : vector<24x384xf32>
    %c0_17 = arith.constant 0 : index
    %c0_18 = arith.constant 0 : index
    %44 = vector.load %arg3[%c0_17, %c0_18] : memref<1x384xf32, #tpu.memory_space<vmem>>, vector<1x384xf32>
    %45 = vector.broadcast %44 : vector<1x384xf32> to vector<24x384xf32>
    %46 = arith.addf %43, %45 : vector<24x384xf32>
    %cst_19 = arith.constant 0.000000e+00 : f32
    %47 = vector.broadcast %cst_19 : f32 to vector<24x384xf32>
    %48 = arith.maximumf %46, %47 : vector<24x384xf32>
    %49 = vector.shape_cast %48 : vector<24x384xf32> to vector<2x12x384xf32>
    %50 = vector.extract_strided_slice %49 {offsets = [0, 0, 0], sizes = [2, 8, 384], strides = [1, 1, 1]} : vector<2x12x384xf32> to vector<2x8x384xf32>
    %51 = vector.shape_cast %50 : vector<2x8x384xf32> to vector<16x384xf32>
    %52 = arith.truncf %51 : vector<16x384xf32> to vector<16x384xbf16>
    %c0_20 = arith.constant 0 : index
    %c0_21 = arith.constant 0 : index
    %c0_22 = arith.constant 0 : index
    %53 = vector.load %arg4[%c0_20, %c0_21, %c0_22] : memref<5x384x512xbf16, #tpu.memory_space<vmem>>, vector<1x384x512xbf16>
    %54 = vector.shape_cast %53 : vector<1x384x512xbf16> to vector<384x512xbf16>
    %cst_23 = arith.constant dense<0.000000e+00> : vector<16x512xf32>
    %55 = tpu.matmul %52, %54, %cst_23 {dimension_numbers = #tpu.dot_dimension_numbers<[1], [0], [0], [1], [0, 0, 1, 1], [], []>} : vector<16x384xbf16>, vector<384x512xbf16>, vector<16x512xf32> -> vector<16x512xf32>
    %56 = vector.extract_strided_slice %49 {offsets = [0, 1, 0], sizes = [2, 8, 384], strides = [1, 1, 1]} : vector<2x12x384xf32> to vector<2x8x384xf32>
    %57 = vector.shape_cast %56 : vector<2x8x384xf32> to vector<16x384xf32>
    %58 = arith.truncf %57 : vector<16x384xf32> to vector<16x384xbf16>
    %c1_24 = arith.constant 1 : index
    %c0_25 = arith.constant 0 : index
    %c0_26 = arith.constant 0 : index
    %59 = vector.load %arg4[%c1_24, %c0_25, %c0_26] : memref<5x384x512xbf16, #tpu.memory_space<vmem>>, vector<1x384x512xbf16>
    %60 = vector.shape_cast %59 : vector<1x384x512xbf16> to vector<384x512xbf16>
    %cst_27 = arith.constant dense<0.000000e+00> : vector<16x512xf32>
    %61 = tpu.matmul %58, %60, %cst_27 {dimension_numbers = #tpu.dot_dimension_numbers<[1], [0], [0], [1], [0, 0, 1, 1], [], []>} : vector<16x384xbf16>, vector<384x512xbf16>, vector<16x512xf32> -> vector<16x512xf32>
    %62 = arith.addf %55, %61 : vector<16x512xf32>
    %63 = vector.extract_strided_slice %49 {offsets = [0, 2, 0], sizes = [2, 8, 384], strides = [1, 1, 1]} : vector<2x12x384xf32> to vector<2x8x384xf32>
    %64 = vector.shape_cast %63 : vector<2x8x384xf32> to vector<16x384xf32>
    %65 = arith.truncf %64 : vector<16x384xf32> to vector<16x384xbf16>
    %c2_28 = arith.constant 2 : index
    %c0_29 = arith.constant 0 : index
    %c0_30 = arith.constant 0 : index
    %66 = vector.load %arg4[%c2_28, %c0_29, %c0_30] : memref<5x384x512xbf16, #tpu.memory_space<vmem>>, vector<1x384x512xbf16>
    %67 = vector.shape_cast %66 : vector<1x384x512xbf16> to vector<384x512xbf16>
    %cst_31 = arith.constant dense<0.000000e+00> : vector<16x512xf32>
    %68 = tpu.matmul %65, %67, %cst_31 {dimension_numbers = #tpu.dot_dimension_numbers<[1], [0], [0], [1], [0, 0, 1, 1], [], []>} : vector<16x384xbf16>, vector<384x512xbf16>, vector<16x512xf32> -> vector<16x512xf32>
    %69 = arith.addf %62, %68 : vector<16x512xf32>
    %70 = vector.extract_strided_slice %49 {offsets = [0, 3, 0], sizes = [2, 8, 384], strides = [1, 1, 1]} : vector<2x12x384xf32> to vector<2x8x384xf32>
    %71 = vector.shape_cast %70 : vector<2x8x384xf32> to vector<16x384xf32>
    %72 = arith.truncf %71 : vector<16x384xf32> to vector<16x384xbf16>
    %c3_32 = arith.constant 3 : index
    %c0_33 = arith.constant 0 : index
    %c0_34 = arith.constant 0 : index
    %73 = vector.load %arg4[%c3_32, %c0_33, %c0_34] : memref<5x384x512xbf16, #tpu.memory_space<vmem>>, vector<1x384x512xbf16>
    %74 = vector.shape_cast %73 : vector<1x384x512xbf16> to vector<384x512xbf16>
    %cst_35 = arith.constant dense<0.000000e+00> : vector<16x512xf32>
    %75 = tpu.matmul %72, %74, %cst_35 {dimension_numbers = #tpu.dot_dimension_numbers<[1], [0], [0], [1], [0, 0, 1, 1], [], []>} : vector<16x384xbf16>, vector<384x512xbf16>, vector<16x512xf32> -> vector<16x512xf32>
    %76 = arith.addf %69, %75 : vector<16x512xf32>
    %77 = vector.extract_strided_slice %49 {offsets = [0, 4, 0], sizes = [2, 8, 384], strides = [1, 1, 1]} : vector<2x12x384xf32> to vector<2x8x384xf32>
    %78 = vector.shape_cast %77 : vector<2x8x384xf32> to vector<16x384xf32>
    %79 = arith.truncf %78 : vector<16x384xf32> to vector<16x384xbf16>
    %c4_36 = arith.constant 4 : index
    %c0_37 = arith.constant 0 : index
    %c0_38 = arith.constant 0 : index
    %80 = vector.load %arg4[%c4_36, %c0_37, %c0_38] : memref<5x384x512xbf16, #tpu.memory_space<vmem>>, vector<1x384x512xbf16>
    %81 = vector.shape_cast %80 : vector<1x384x512xbf16> to vector<384x512xbf16>
    %cst_39 = arith.constant dense<0.000000e+00> : vector<16x512xf32>
    %82 = tpu.matmul %79, %81, %cst_39 {dimension_numbers = #tpu.dot_dimension_numbers<[1], [0], [0], [1], [0, 0, 1, 1], [], []>} : vector<16x384xbf16>, vector<384x512xbf16>, vector<16x512xf32> -> vector<16x512xf32>
    %83 = arith.addf %76, %82 : vector<16x512xf32>
    %84 = vector.extract_strided_slice %83 {offsets = [0, 0], sizes = [16, 256], strides = [1, 1]} : vector<16x512xf32> to vector<16x256xf32>
    %85 = vector.extract_strided_slice %83 {offsets = [0, 256], sizes = [16, 256], strides = [1, 1]} : vector<16x512xf32> to vector<16x256xf32>
    %86 = arith.maximumf %84, %85 : vector<16x256xf32>
    %87 = vector.shape_cast %86 : vector<16x256xf32> to vector<8x2x256xf32>
    %88 = vector.extract_strided_slice %87 {offsets = [0, 0, 0], sizes = [8, 1, 256], strides = [1, 1, 1]} : vector<8x2x256xf32> to vector<8x1x256xf32>
    %89 = vector.shape_cast %88 : vector<8x1x256xf32> to vector<8x256xf32>
    %90 = vector.extract_strided_slice %87 {offsets = [0, 1, 0], sizes = [8, 1, 256], strides = [1, 1, 1]} : vector<8x2x256xf32> to vector<8x1x256xf32>
    %91 = vector.shape_cast %90 : vector<8x1x256xf32> to vector<8x256xf32>
    %92 = arith.maximumf %89, %91 : vector<8x256xf32>
    %c0_40 = arith.constant 0 : index
    %c0_41 = arith.constant 0 : index
    %93 = vector.load %arg5[%c0_40, %c0_41] : memref<1x256xf32, #tpu.memory_space<vmem>>, vector<1x256xf32>
    %94 = vector.broadcast %93 : vector<1x256xf32> to vector<8x256xf32>
    %95 = arith.addf %92, %94 : vector<8x256xf32>
    %cst_42 = arith.constant 0.000000e+00 : f32
    %96 = vector.broadcast %cst_42 : f32 to vector<8x256xf32>
    %97 = arith.maximumf %95, %96 : vector<8x256xf32>
    %98 = vector.shape_cast %97 : vector<8x256xf32> to vector<2x4x256xf32>
    %99 = vector.extract_strided_slice %98 {offsets = [0, 0, 0], sizes = [2, 1, 256], strides = [1, 1, 1]} : vector<2x4x256xf32> to vector<2x1x256xf32>
    %100 = vector.shape_cast %99 : vector<2x1x256xf32> to vector<2x256xf32>
    %101 = arith.truncf %100 : vector<2x256xf32> to vector<2x256xbf16>
    %c0_43 = arith.constant 0 : index
    %c0_44 = arith.constant 0 : index
    %c0_45 = arith.constant 0 : index
    %102 = vector.load %arg6[%c0_43, %c0_44, %c0_45] : memref<4x256x512xbf16, #tpu.memory_space<vmem>>, vector<1x256x512xbf16>
    %103 = vector.shape_cast %102 : vector<1x256x512xbf16> to vector<256x512xbf16>
    %cst_46 = arith.constant dense<0.000000e+00> : vector<2x512xf32>
    %104 = tpu.matmul %101, %103, %cst_46 {dimension_numbers = #tpu.dot_dimension_numbers<[1], [0], [0], [1], [0, 0, 1, 1], [], []>} : vector<2x256xbf16>, vector<256x512xbf16>, vector<2x512xf32> -> vector<2x512xf32>
    %105 = vector.extract_strided_slice %98 {offsets = [0, 1, 0], sizes = [2, 1, 256], strides = [1, 1, 1]} : vector<2x4x256xf32> to vector<2x1x256xf32>
    %106 = vector.shape_cast %105 : vector<2x1x256xf32> to vector<2x256xf32>
    %107 = arith.truncf %106 : vector<2x256xf32> to vector<2x256xbf16>
    %c1_47 = arith.constant 1 : index
    %c0_48 = arith.constant 0 : index
    %c0_49 = arith.constant 0 : index
    %108 = vector.load %arg6[%c1_47, %c0_48, %c0_49] : memref<4x256x512xbf16, #tpu.memory_space<vmem>>, vector<1x256x512xbf16>
    %109 = vector.shape_cast %108 : vector<1x256x512xbf16> to vector<256x512xbf16>
    %cst_50 = arith.constant dense<0.000000e+00> : vector<2x512xf32>
    %110 = tpu.matmul %107, %109, %cst_50 {dimension_numbers = #tpu.dot_dimension_numbers<[1], [0], [0], [1], [0, 0, 1, 1], [], []>} : vector<2x256xbf16>, vector<256x512xbf16>, vector<2x512xf32> -> vector<2x512xf32>
    %111 = arith.addf %104, %110 : vector<2x512xf32>
    %112 = vector.extract_strided_slice %98 {offsets = [0, 2, 0], sizes = [2, 1, 256], strides = [1, 1, 1]} : vector<2x4x256xf32> to vector<2x1x256xf32>
    %113 = vector.shape_cast %112 : vector<2x1x256xf32> to vector<2x256xf32>
    %114 = arith.truncf %113 : vector<2x256xf32> to vector<2x256xbf16>
    %c2_51 = arith.constant 2 : index
    %c0_52 = arith.constant 0 : index
    %c0_53 = arith.constant 0 : index
    %115 = vector.load %arg6[%c2_51, %c0_52, %c0_53] : memref<4x256x512xbf16, #tpu.memory_space<vmem>>, vector<1x256x512xbf16>
    %116 = vector.shape_cast %115 : vector<1x256x512xbf16> to vector<256x512xbf16>
    %cst_54 = arith.constant dense<0.000000e+00> : vector<2x512xf32>
    %117 = tpu.matmul %114, %116, %cst_54 {dimension_numbers = #tpu.dot_dimension_numbers<[1], [0], [0], [1], [0, 0, 1, 1], [], []>} : vector<2x256xbf16>, vector<256x512xbf16>, vector<2x512xf32> -> vector<2x512xf32>
    %118 = arith.addf %111, %117 : vector<2x512xf32>
    %119 = vector.extract_strided_slice %98 {offsets = [0, 3, 0], sizes = [2, 1, 256], strides = [1, 1, 1]} : vector<2x4x256xf32> to vector<2x1x256xf32>
    %120 = vector.shape_cast %119 : vector<2x1x256xf32> to vector<2x256xf32>
    %121 = arith.truncf %120 : vector<2x256xf32> to vector<2x256xbf16>
    %c3_55 = arith.constant 3 : index
    %c0_56 = arith.constant 0 : index
    %c0_57 = arith.constant 0 : index
    %122 = vector.load %arg6[%c3_55, %c0_56, %c0_57] : memref<4x256x512xbf16, #tpu.memory_space<vmem>>, vector<1x256x512xbf16>
    %123 = vector.shape_cast %122 : vector<1x256x512xbf16> to vector<256x512xbf16>
    %cst_58 = arith.constant dense<0.000000e+00> : vector<2x512xf32>
    %124 = tpu.matmul %121, %123, %cst_58 {dimension_numbers = #tpu.dot_dimension_numbers<[1], [0], [0], [1], [0, 0, 1, 1], [], []>} : vector<2x256xbf16>, vector<256x512xbf16>, vector<2x512xf32> -> vector<2x512xf32>
    %125 = arith.addf %118, %124 : vector<2x512xf32>
    %c0_59 = arith.constant 0 : index
    %c0_60 = arith.constant 0 : index
    %126 = vector.load %arg7[%c0_59, %c0_60] : memref<1x512xf32, #tpu.memory_space<vmem>>, vector<1x512xf32>
    %127 = vector.broadcast %126 : vector<1x512xf32> to vector<2x512xf32>
    %128 = arith.addf %125, %127 : vector<2x512xf32>
    %cst_61 = arith.constant 0.000000e+00 : f32
    %129 = vector.broadcast %cst_61 : f32 to vector<2x512xf32>
    %130 = arith.maximumf %128, %129 : vector<2x512xf32>
    %131 = arith.truncf %130 : vector<2x512xf32> to vector<2x512xbf16>
    %c0_62 = arith.constant 0 : index
    %c0_63 = arith.constant 0 : index
    %132 = vector.load %arg8[%c0_62, %c0_63] : memref<512x128xbf16, #tpu.memory_space<vmem>>, vector<512x128xbf16>
    %cst_64 = arith.constant dense<0.000000e+00> : vector<2x128xf32>
    %133 = tpu.matmul %131, %132, %cst_64 {dimension_numbers = #tpu.dot_dimension_numbers<[1], [0], [0], [1], [0, 0, 1, 1], [], []>} : vector<2x512xbf16>, vector<512x128xbf16>, vector<2x128xf32> -> vector<2x128xf32>
    %c0_65 = arith.constant 0 : index
    %c0_66 = arith.constant 0 : index
    %134 = vector.load %arg9[%c0_65, %c0_66] : memref<1x128xf32, #tpu.memory_space<vmem>>, vector<1x128xf32>
    %135 = vector.broadcast %134 : vector<1x128xf32> to vector<2x128xf32>
    %136 = arith.addf %133, %135 : vector<2x128xf32>
    %137 = tpu.iota {dimensions = array<i32: 1>} : vector<2x128xi32>
    %c10_i32 = arith.constant 10 : i32
    %138 = vector.broadcast %c10_i32 : i32 to vector<2x128xi32>
    %139 = arith.cmpi slt, %137, %138 : vector<2x128xi32>
    %cst_67 = arith.constant -1.000000e+30 : f32
    %140 = vector.broadcast %cst_67 : f32 to vector<2x128xf32>
    %141 = arith.select %139, %136, %140 : vector<2x128xi1>, vector<2x128xf32>
    %cst_68 = arith.constant dense<0xFF800000> : vector<2xf32>
    %142 = vector.multi_reduction <maximumf>, %141, %cst_68 [1] : vector<2x128xf32> to vector<2xf32>
    %143 = vector.shape_cast %142 : vector<2xf32> to vector<2x1xf32>
    %144 = vector.broadcast %143 : vector<2x1xf32> to vector<2x128xf32>
    %145 = arith.subf %141, %144 : vector<2x128xf32>
    %146 = math.exp %145 : vector<2x128xf32>
    %cst_69 = arith.constant 0.000000e+00 : f32
    %147 = vector.broadcast %cst_69 : f32 to vector<2x128xf32>
    %148 = arith.select %139, %146, %147 : vector<2x128xi1>, vector<2x128xf32>
    %cst_70 = arith.constant dense<0.000000e+00> : vector<2xf32>
    %149 = vector.multi_reduction <add>, %148, %cst_70 [1] : vector<2x128xf32> to vector<2xf32>
    %150 = vector.shape_cast %149 : vector<2xf32> to vector<2x1xf32>
    %151 = math.log %150 : vector<2x1xf32>
    %152 = vector.broadcast %143 : vector<2x1xf32> to vector<2x128xf32>
    %153 = arith.subf %141, %152 : vector<2x128xf32>
    %154 = vector.broadcast %151 : vector<2x1xf32> to vector<2x128xf32>
    %155 = arith.subf %153, %154 : vector<2x128xf32>
    %c0_71 = arith.constant 0 : index
    %c0_72 = arith.constant 0 : index
    %c0_73 = arith.constant 0 : index
    %156 = vector.load %arg10[%c0_71, %c0_72, %c0_73] : memref<1x2x128xf32, #tpu.memory_space<vmem>>, vector<1x2x128xf32>
    %157 = vector.shape_cast %156 : vector<1x2x128xf32> to vector<2x128xf32>
    %158 = vector.shape_cast %155 : vector<2x128xf32> to vector<1x2x128xf32>
    tpu.vector_store %arg10[%c0_71, %c0_72, %c0_73], %158 {strides = array<i32>} : memref<1x2x128xf32, #tpu.memory_space<vmem>>, vector<1x2x128xf32>,
    return
  }
  func.func @transform_0(%arg0: i32) -> (i32, i32, i32) {
    %c0_i32 = arith.constant 0 : i32
    %c0_i32_0 = arith.constant 0 : i32
    %c0_i32_1 = arith.constant 0 : i32
    return %arg0, %c0_i32, %c0_i32_0 : i32, i32, i32
  }
  func.func @transform_1(%arg0: i32) -> (i32, i32, i32) {
    %c0_i32 = arith.constant 0 : i32
    %c0_i32_0 = arith.constant 0 : i32
    %c0_i32_1 = arith.constant 0 : i32
    %c0_i32_2 = arith.constant 0 : i32
    return %c0_i32, %c0_i32_0, %c0_i32_1 : i32, i32, i32
  }
  func.func @transform_2(%arg0: i32) -> (i32, i32) {
    %c0_i32 = arith.constant 0 : i32
    %c0_i32_0 = arith.constant 0 : i32
    %c0_i32_1 = arith.constant 0 : i32
    return %c0_i32, %c0_i32_0 : i32, i32
  }
  func.func @transform_3(%arg0: i32) -> (i32, i32, i32) {
    %c0_i32 = arith.constant 0 : i32
    %c0_i32_0 = arith.constant 0 : i32
    %c0_i32_1 = arith.constant 0 : i32
    %c0_i32_2 = arith.constant 0 : i32
    return %c0_i32, %c0_i32_0, %c0_i32_1 : i32, i32, i32
  }
  func.func @transform_4(%arg0: i32) -> (i32, i32) {
    %c0_i32 = arith.constant 0 : i32
    %c0_i32_0 = arith.constant 0 : i32
    %c0_i32_1 = arith.constant 0 : i32
    return %c0_i32, %c0_i32_0 : i32, i32
  }
  func.func @transform_5(%arg0: i32) -> (i32, i32, i32) {
    %c0_i32 = arith.constant 0 : i32
    %c0_i32_0 = arith.constant 0 : i32
    %c0_i32_1 = arith.constant 0 : i32
    %c0_i32_2 = arith.constant 0 : i32
    return %c0_i32, %c0_i32_0, %c0_i32_1 : i32, i32, i32
  }
  func.func @transform_6(%arg0: i32) -> (i32, i32) {
    %c0_i32 = arith.constant 0 : i32
    %c0_i32_0 = arith.constant 0 : i32
    %c0_i32_1 = arith.constant 0 : i32
    return %c0_i32, %c0_i32_0 : i32, i32
  }
  func.func @transform_7(%arg0: i32) -> (i32, i32) {
    %c0_i32 = arith.constant 0 : i32
    %c0_i32_0 = arith.constant 0 : i32
    %c0_i32_1 = arith.constant 0 : i32
    return %c0_i32, %c0_i32_0 : i32, i32
  }
  func.func @transform_8(%arg0: i32) -> (i32, i32) {
    %c0_i32 = arith.constant 0 : i32
    %c0_i32_0 = arith.constant 0 : i32
    %c0_i32_1 = arith.constant 0 : i32
    return %c0_i32, %c0_i32_0 : i32, i32
  }
  func.func @transform_9(%arg0: i32) -> (i32, i32, i32) {
    %c0_i32 = arith.constant 0 : i32
    %c0_i32_0 = arith.constant 0 : i32
    %c0_i32_1 = arith.constant 0 : i32
    return %arg0, %c0_i32, %c0_i32_0 : i32, i32, i32
  }
}

</mosaic_0001>

<bundles_post_ra>
// kernel: network_forward.1
= control target key start
LH: loop header
LB: loop body
LE: loop exit
PB: predicated region body
PF: predicated region fallthrough
CT: control target
= control target key end

     0   :  { %14 = vsyncpa [#allocation3], 0  ;;  %s16221_s0 = inlined_call_operand.vmem [shape: f32[2,28,28], index: 0, kind: input, shape index: {}]   ;;  %s16222_s1 = inlined_call_operand.hbm [shape: bf16[5,28,768], index: 1, kind: input, shape index: {}]   ;;  %s16223_s2 = inlined_call_operand.hbm [shape: f32[1,384], index: 2, kind: input, shape index: {}]   ;;  %s16224_s3 = inlined_call_operand.hbm [shape: bf16[5,384,512], index: 3, kind: input, shape index: {}]   ;;  %s16225_s4 = inlined_call_operand.hbm [shape: f32[1,256], index: 4, kind: input, shape index: {}]   ;;  %s16226_s5 = inlined_call_operand.hbm [shape: bf16[4,256,512], index: 5, kind: input, shape index: {}]   ;;  %s16227_s6 = inlined_call_operand.hbm [shape: f32[1,512], index: 6, kind: input, shape index: {}]   ;;  %s16228_s7 = inlined_call_operand.hbm [shape: bf16[512,128], index: 7, kind: input, shape index: {}]   ;;  %s16229_s8 = inlined_call_operand.hbm [shape: f32[1,128], index: 8, kind: input, shape index: {}]   ;;  %s16230_s9 = inlined_call_operand.hbm [shape: f32[1,2,128], index: 9, kind: output, shape index: {}]  }
   0x1   :  { %15 = vsyncpa [#allocation6], 0 }
   0x2   :  { %16 = vsyncpa [#allocation9], 0 }
   0x3   :  { %17 = vsyncpa [#allocation12], 0 }
   0x4   :  { %18 = vsyncpa [#allocation15], 0  ;;  %s40_s11 = sshll.u32 %s16223_s2, 4  ;;  %s41_s11 = int_to_ptr.hbm [resolvable:$true] %s40_s11 }
   0x5   :  { %19 = vsyncpa [#allocation4], 0  ;;  %s13539_s12 = smov [#allocation5]   ;;  %s64_s16 = sshll.u32 %s16225_s4, 4  ;;  %s65_s16 = int_to_ptr.hbm [resolvable:$true] %s64_s16 }
   0x6   :  { %s42_s13 = sshll.u32 %s13539_s12, 4  ;;  %s13540_s17 = smov [#allocation8]   ;;  %s43_s13 = int_to_ptr.vmem [resolvable:$true] %s42_s13 }
   0x7   :  { %45 = dma.hbm_to_vmem [thread:$0]  %s41_s11, 48, %s43_s13, [#allocation6]  }
   0x8   :  { %s66_s18 = sshll.u32 %s13540_s17, 4  ;;  %s88_s21 = sshll.u32 %s16227_s6, 4  ;;  %s67_s18 = int_to_ptr.vmem [resolvable:$true] %s66_s18  ;;  %s89_s21 = int_to_ptr.hbm [resolvable:$true] %s88_s21 }
   0x9   :  { %69 = dma.hbm_to_vmem [thread:$0]  %s65_s16, 32, %s67_s18, [#allocation9]  }
   0xa   :  { %s26_s23 = sshll.u32 %s16222_s1, 4  ;;  %s13541_s24 = smov [#allocation11]   ;;  %s27_s23 = int_to_ptr.hbm [resolvable:$true] %s26_s23 }
   0xb   :  { %s90_s25 = sshll.u32 %s13541_s24, 4  ;;  %s13542_s4 = smov [#allocation2]   ;;  %s91_s25 = int_to_ptr.vmem [resolvable:$true] %s90_s25 }
   0xc   :  { %93 = dma.hbm_to_vmem [thread:$0]  %s89_s21, 64, %s91_s25, [#allocation12]  }
   0xd   :  { %s28_s26 = sshll.u32 %s13542_s4, 4  ;;  %s13543_s27 = smov 384   ;;  %s29_s26 = int_to_ptr.vmem [resolvable:$true] %s28_s26 }
   0xe   :  { %s13544_s28 = smov 24   ;;  %s50_s30 = sshll.u32 %s16224_s3, 4  ;;  %s51_s30 = int_to_ptr.hbm [resolvable:$true] %s50_s30 }
   0xf   :  { %34 = dma.hbm_to_vmem [thread:$0]  %s27_s23, 7680, %s29_s26, [#allocation3], %s13543_s27, %s13543_s27, %s13544_s28  }
  0x10   :  { %s13545_s10 = smov [#allocation7]   ;;  %s74_s13 = sshll.u32 %s16226_s5, 4  ;;  %s75_s13 = int_to_ptr.hbm [resolvable:$true] %s74_s13 }
  0x11   :  { %s52_s11 = sshll.u32 %s13545_s10, 4  ;;  %s13546_s14 = smov 256   ;;  %s53_s11 = int_to_ptr.vmem [resolvable:$true] %s52_s11 }
  0x12   :  { %s13547_s15 = smov 16   ;;  %s13548_s16 = smov [#allocation10]  }
  0x13   :  { %58 = dma.hbm_to_vmem [thread:$0]  %s51_s30, 61440, %s53_s11, [#allocation6], %s13546_s14, %s13546_s14, %s13547_s15  }
  0x14   :  { %s76_s17 = sshll.u32 %s13548_s16, 4  ;;  %s98_s20 = sshll.u32 %s16228_s7, 4  ;;  %s77_s17 = int_to_ptr.vmem [resolvable:$true] %s76_s17  ;;  %s99_s20 = int_to_ptr.hbm [resolvable:$true] %s98_s20 }
  0x15   :  { %82 = dma.hbm_to_vmem [thread:$0]  %s75_s13, 32768, %s77_s17, [#allocation9], %s13546_s14, %s13546_s14, %s13547_s15  }
  0x16   :  { %s13549_s3 = smov [#allocation13]   ;;  %s112_s5 = sshll.u32 %s16229_s8, 4  ;;  %s113_s5 = int_to_ptr.hbm [resolvable:$true] %s112_s5 }
  0x17   :  { %s100_s21 = sshll.u32 %s13549_s3, 4  ;;  %s13550_s23 = smov 64   ;;  %s101_s21 = int_to_ptr.vmem [resolvable:$true] %s100_s21 }
  0x18   :  { %s13551_s24 = smov 4   ;;  %s13552_s25 = smov [#allocation14]  }
  0x19   :  { %106 = dma.hbm_to_vmem [thread:$0]  %s99_s20, 4096, %s101_s21, [#allocation12], %s13550_s23, %s13550_s23, %s13551_s24  }
  0x1a   :  { %s114_s4 = sshll.u32 %s13552_s25, 4  ;;  %s115_s4 = int_to_ptr.vmem [resolvable:$true] %s114_s4 }
  0x1b   :  { %117 = dma.hbm_to_vmem [thread:$0]  %s113_s5, 16, %s115_s4, [#allocation15]  }
  0x1c   :  { %13527 = dma.done.wait [#allocation3], 7680  }
  0x1d   :  { %13528 = vsyncadd [#allocation3], 4294959616 }
  0x1e   :  { %13529 = dma.done.wait [#allocation6], 61488  }
  0x1f   :  { %13530 = vsyncadd [#allocation6], 4294905808 }
  0x20   :  { %13531 = dma.done.wait [#allocation9], 32800  }
  0x21   :  { %13532 = vsyncadd [#allocation9], 4294934496 }
  0x22   :  { %13533 = dma.done.wait [#allocation12], 4160  }
  0x23   :  { %13534 = vsyncadd [#allocation12], 4294963136 }
  0x24   :  { %13535 = dma.done.wait [#allocation15], 16  }
  0x25   :  { %13536 = vsyncadd [#allocation15], 4294967280  ;;  %vm283_vm0 = vcmask 1045504   ;;  %vm182_vm1 = vcmask 1046528   ;;  %v9055_v0 = vld [vmem:[#allocation2 + $0x90] sm:$0xf] }
  0x26   :  { %v12484_v1 = vld [vmem:[#allocation2 + $0xa4] sm:$0x30]  ;;  %v12481_v2 = vld [vmem:[#allocation2 + $0x94] sm:$0xf]  ;;  %v9057_v4 = vld [vmem:[#allocation2 + $0xa8] sm:$0x30] }
  0x27   :  { %v9056_v3 = vor.u32 %v12484_v1, %v9055_v0  ;;  %v9063_v5 = vld [vmem:[#allocation2 + $0x98] sm:$0xf]  ;;  %v12485_v6 = vld [vmem:[#allocation2 + $0xac] sm:$0x30]  ;;  %v9060_v7 = vor.u32 %v12481_v2, %v9057_v4  ;;  %v12482_v9 = vld [vmem:[#allocation2 + $0x9c] sm:$0xf] }
  0x28   :  { %v9064_v8 = vor.u32 %v12485_v6, %v9063_v5  ;;  %v9065_v10 = vld [vmem:[#allocation2 + $0xb0] sm:$0x30]  ;;  %v9031_v11 = vld [vmem:[#allocation2 + $0x60] sm:$0xf]  ;;  %v12478_v14 = vld [vmem:[#allocation2 + $0x74] sm:$0xf0] }
  0x29   :  { %v285_v12 = vsel %vm283_vm0, %v9056_v3, 0  ;;  %v9068_v13 = vor.u32 %v12482_v9, %v9065_v10  ;;  %v12475_v15 = vld [vmem:[#allocation2 + $0x64] sm:$0xf]  ;;  %v288_v17 = vsel %vm283_vm0, %v9060_v7, 0  ;;  %v9032_v19 = vor.u32 %v12478_v14, %v9031_v11  ;;  %v9033_v20 = vld [vmem:[#allocation2 + $0x78] sm:$0xf0] }
  0x2a   :  { %v13632_v16 = vld [vmem:[%s16221_s0] sm:$0xff]  ;;  %308 = vmatpush.bf16.msra.mxu0 %v285_v12  ;;  %v291_v18 = vsel %vm283_vm0, %v9064_v8, 0  ;;  %v9039_v21 = vld [vmem:[#allocation2 + $0x68] sm:$0xf]  ;;  %332 = vmatpush.bf16.msra.mxu1 %v288_v17  ;;  %v9036_v23 = vor.u32 %v12475_v15, %v9033_v20  ;;  %v12476_v25 = vld [vmem:[#allocation2 + $0x6c] sm:$0xf] }
  0x2b   :  { %356 = vmatpush.bf16.msra.mxu2 %v291_v18  ;;  %v294_v22 = vsel %vm283_vm0, %v9068_v13, 0  ;;  %v12479_v24 = vld [vmem:[#allocation2 + $0x7c] sm:$0xf0]  ;;  %v13640_v26 = vld [vmem:[%s16221_s0 + $0x8] sm:$0xff]  ;;  %v9041_v28 = vld [vmem:[#allocation2 + $0x80] sm:$0xf0] }
  0x2c   :  { %380 = vmatpush.bf16.msra.mxu3 %v294_v22  ;;  %v9040_v27 = vor.u32 %v12479_v24, %v9039_v21  ;;  %v13645_v29 = vld [vmem:[%s16221_s0 + $0x10] sm:$0xff]  ;;  %v183_v30 = vrot.slane %v13632_v16, 1  ;;  %v184_v31 = vrot.slane %v13640_v26, 1  ;;  %v9044_v32 = vor.u32 %v12476_v25, %v9041_v28  ;;  %v13655_v36 = vld [vmem:[%s16221_s0 + $0x18] sm:$0xf]  ;;  %v13660_v37 = vld [vmem:[%s16221_s0 + $0x20] sm:$0xff] }
  0x2d   :  { %v186_v33 = vrot.slane %v13645_v29, 1  ;;  %vm273_vm2 = vcmask 228352   ;;  %v13671_v39 = vld [vmem:[%s16221_s0 + $0x28] sm:$0xff]  ;;  %v188_v40 = vrot.slane %v13655_v36, 1  ;;  %v190_v41 = vrot.slane %v13660_v37, 1  ;;  %v13693_v10 = vld [vmem:[%s16221_s0 + $0x30] sm:$0xff] }
  0x2e   :  { %309 = vmatpush.bf16.msra.mxu0 %v9032_v19  ;;  %v185_v34 = vsel %vm182_vm1, %v183_v30, %v184_v31  ;;  %333 = vmatpush.bf16.msra.mxu1 %v9036_v23  ;;  %v9071_v42 = vld [vmem:[#allocation2 + $0xa0] sm:$0xf]  ;;  %v12486_v43 = vld [vmem:[#allocation2 + $0xb4] sm:$0x30]  ;;  %v12483_v44 = vld [vmem:[#allocation2 + $0xa4] sm:$0xf]  ;;  %v159_v18 = vpack.c.bf16 %v13640_v26, %v13632_v16 }
  0x2f   :  { %357 = vmatpush.bf16.msra.mxu2 %v9040_v27  ;;  %v187_v35 = vsel %vm182_vm1, %v184_v31, %v186_v33  ;;  %v9072_v45 = vor.u32 %v12486_v43, %v9071_v42  ;;  %v9073_v46 = vld [vmem:[#allocation2 + $0xb8] sm:$0x30]  ;;  %v9121_v47 = vld [vmem:[#allocation2 + $0x30] sm:$0xf]  ;;  %v12472_v48 = vld [vmem:[#allocation2 + $0x44] sm:$0x30]  ;;  %v189_v7 = vsel %vm182_vm1, %v186_v33, %v188_v40 }
  0x30   :  { %381 = vmatpush.bf16.msra.mxu3 %v9044_v32  ;;  %v13662_v38 = vpack.c.bf16 %v187_v35, %v185_v34  ;;  %v9076_v49 = vor.u32 %v12483_v44, %v9073_v46  ;;  %v9122_v50 = vor.u32 %v12472_v48, %v9121_v47  ;;  %v12469_v51 = vld [vmem:[#allocation2 + $0x34] sm:$0xf]  ;;  %v9123_v52 = vld [vmem:[#allocation2 + $0x48] sm:$0x30]  ;;  %v9047_v53 = vld [vmem:[#allocation2 + $0x70] sm:$0xf] }
  0x31   :  { %v191_v54 = vrot.slane %v13671_v39, 1  ;;  %v297_v55 = vsel %vm283_vm0, %v9072_v45, 0  ;;  %v9126_v56 = vor.u32 %v12469_v51, %v9123_v52  ;;  %v12480_v57 = vld [vmem:[#allocation2 + $0x84] sm:$0xf0]  ;;  %v12477_v58 = vld [vmem:[#allocation2 + $0x74] sm:$0xf]  ;;  %v160_v52 = vpack.c.bf16 %v13660_v37, %v13645_v29 }
  0x32   :  { %9077 = vmatmul.msk.bf16.vlgmr.msra.gmra.mxu0 %vm273_vm2, %v13662_v38  ;;  %9080 = vmatmul.msk.bf16.vlgmr.msra.gmra.mxu1 %vm273_vm2, %v13662_v38  ;;  %v300_v59 = vsel %vm283_vm0, %v9076_v49, 0  ;;  %v510_v60 = vsel %vm283_vm0, %v9122_v50, 0  ;;  %v9048_v61 = vor.u32 %v12480_v57, %v9047_v53  ;;  %v9049_v62 = vld [vmem:[#allocation2 + $0x88] sm:$0xf0]  ;;  %v9097_v63 = vld [vmem:[#allocation2] sm:$0xf]  ;;  %v161_v53 = vpack.c.bf16 %v13693_v10, %v13671_v39 }
  0x33   :  { %9083 = vmatmul.msk.bf16.vlgmr.msra.gmra.mxu2 %vm273_vm2, %v13662_v38  ;;  %9086 = vmatmul.msk.bf16.vlgmr.msra.gmra.mxu3 %vm273_vm2, %v13662_v38  ;;  %v513_v0 = vsel %vm283_vm0, %v9126_v56, 0  ;;  %v9052_v1 = vor.u32 %v12477_v58, %v9049_v62  ;;  %v12466_v2 = vld [vmem:[#allocation2 + $0x14] sm:$0xf0]  ;;  %v12463_v3 = vld [vmem:[#allocation2 + $0x4] sm:$0xf]  ;;  %v192_v8 = vsel %vm182_vm1, %v190_v41, %v191_v54  ;;  %v193_v12 = vrot.slane %v13693_v10, 1 }
  0x34   :  { %404 = vmatpush.bf16.msrb.mxu0 %v297_v55  ;;  %428 = vmatpush.bf16.msrb.mxu1 %v300_v59  ;;  %v9098_v4 = vor.u32 %v12466_v2, %v9097_v63  ;;  %v9099_v5 = vld [vmem:[#allocation2 + $0x18] sm:$0xf0]  ;;  %v204_v9 = vpack.c.bf16 %v192_v8, %v189_v7  ;;  %v13698_v11 = vld [vmem:[%s16221_s0 + $0x38] sm:$0xf]  ;;  %v12473_v20 = vld [vmem:[#allocation2 + $0x4c] sm:$0x30] }
  0x35   :  { %533 = vmatpush.bf16.msrb.mxu2 %v510_v60  ;;  %557 = vmatpush.bf16.msrb.mxu3 %v513_v0  ;;  %v9102_v6 = vor.u32 %v12463_v3, %v9099_v5  ;;  %v195_v13 = vrot.slane %v13698_v11, 1  ;;  %v194_v14 = vsel %vm182_vm1, %v191_v54, %v193_v12  ;;  %v9129_v19 = vld [vmem:[#allocation2 + $0x38] sm:$0xf]  ;;  %v12470_v21 = vld [vmem:[#allocation2 + $0x3c] sm:$0xf]  ;;  %vm968_vm3 = vcmask 1044480  }
  0x36   :  { %v9130_v22 = vor.u32 %v12473_v20, %v9129_v19  ;;  %v9131_v23 = vld [vmem:[#allocation2 + $0x50] sm:$0x30]  ;;  %v9137_v24 = vld [vmem:[#allocation2 + $0x40] sm:$0xf]  ;;  %v12474_v25 = vld [vmem:[#allocation2 + $0x54] sm:$0x30] }
  0x37   :  { %v196_v15 = vsel %vm182_vm1, %v193_v12, %v195_v13  ;;  %v9134_v27 = vor.u32 %v12470_v21, %v9131_v23  ;;  %v9138_v28 = vor.u32 %v12474_v25, %v9137_v24  ;;  %v12471_v30 = vld [vmem:[#allocation2 + $0x44] sm:$0xf]  ;;  %v9139_v31 = vld [vmem:[#allocation2 + $0x58] sm:$0x30]  ;;  %v9105_v32 = vld [vmem:[#allocation2 + $0x8] sm:$0xf] }
  0x38   :  { %405 = vmatpush.bf16.msrb.mxu0 %v9048_v61  ;;  %429 = vmatpush.bf16.msrb.mxu1 %v9052_v1  ;;  %v205_v17 = vpack.c.bf16 %v196_v15, %v194_v14  ;;  %v516_v33 = vsel %vm283_vm0, %v9130_v22, 0  ;;  %v9142_v34 = vor.u32 %v12471_v30, %v9139_v31  ;;  %v12467_v35 = vld [vmem:[#allocation2 + $0x1c] sm:$0xf0]  ;;  %v9107_v43 = vld [vmem:[#allocation2 + $0x20] sm:$0xf0]  ;;  %v672_v30 = vrot.slane %v13640_v26, 2 }
  0x39   :  { %534 = vmatpush.bf16.msrb.mxu2 %v9098_v4  ;;  %558 = vmatpush.bf16.msrb.mxu3 %v9102_v6  ;;  %v519_v40 = vsel %vm283_vm0, %v9134_v27, 0  ;;  %v522_v41 = vsel %vm283_vm0, %v9138_v28, 0  ;;  %v9106_v42 = vor.u32 %v12467_v35, %v9105_v32  ;;  %v9113_v44 = vld [vmem:[#allocation2 + $0x10] sm:$0xf]  ;;  %v12468_v47 = vld [vmem:[#allocation2 + $0x24] sm:$0xf0] }
  0x3a   :  { %v525_v45 = vsel %vm283_vm0, %v9142_v34, 0  ;;  %v12465_v48 = vld [vmem:[#allocation2 + $0x14] sm:$0xf]  ;;  %v9114_v49 = vor.u32 %v12468_v47, %v9113_v44  ;;  %v9115_v50 = vld [vmem:[#allocation2 + $0x28] sm:$0xf0]  ;;  %v671_v28 = vrot.slane %v13632_v16, 2 }
  0x3b   :  { %v9118_v51 = vor.u32 %v12465_v48, %v9115_v50  ;;  %v9187_v54 = vld [vmem:[#allocation2 + $0xf0] sm:$0xf]  ;;  %v12496_v55 = vld [vmem:[#allocation2 + $0x104] sm:$0x30]  ;;  %v12493_v56 = vld [vmem:[#allocation2 + $0xf4] sm:$0xf] }
  0x3c   :  { %581 = vmatpush.bf16.msra.mxu0 %v516_v33  ;;  %605 = vmatpush.bf16.msra.mxu1 %v519_v40  ;;  %v9188_v57 = vor.u32 %v12496_v55, %v9187_v54  ;;  %v9189_v58 = vld [vmem:[#allocation2 + $0x108] sm:$0x30]  ;;  %v9195_v59 = vld [vmem:[#allocation2 + $0xf8] sm:$0xf]  ;;  %v12497_v60 = vld [vmem:[#allocation2 + $0x10c] sm:$0x30]  ;;  %v673_v32 = vsel %vm283_vm0, %v671_v28, %v672_v30 }
  0x3d   :  { %629 = vmatpush.bf16.msra.mxu2 %v522_v41  ;;  %653 = vmatpush.bf16.msra.mxu3 %v525_v45  ;;  %v9192_v61 = vor.u32 %v12493_v56, %v9189_v58  ;;  %v9196_v62 = vor.u32 %v12497_v60, %v9195_v59  ;;  %v12494_v63 = vld [vmem:[#allocation2 + $0xfc] sm:$0xf]  ;;  %v9197_v0 = vld [vmem:[#allocation2 + $0x110] sm:$0x30]  ;;  %v9163_v6 = vld [vmem:[#allocation2 + $0xc0] sm:$0xf] }
  0x3e   :  { %v771_v1 = vsel %vm283_vm0, %v9188_v57, 0  ;;  %v9200_v2 = vor.u32 %v12494_v63, %v9197_v0  ;;  %v12490_v7 = vld [vmem:[#allocation2 + $0xd4] sm:$0xf0]  ;;  %v12487_v8 = vld [vmem:[#allocation2 + $0xc4] sm:$0xf]  ;;  %v674_v31 = vrot.slane %v13645_v29, 2 }
  0x3f   :  { %v774_v3 = vsel %vm283_vm0, %v9192_v61, 0  ;;  %v777_v4 = vsel %vm283_vm0, %v9196_v62, 0  ;;  %v9165_v12 = vld [vmem:[#allocation2 + $0xd8] sm:$0xf0]  ;;  %v9171_v13 = vld [vmem:[#allocation2 + $0xc8] sm:$0xf] }
  0x40   :  { %582 = vmatpush.bf16.msra.mxu0 %v9106_v42  ;;  %v780_v5 = vsel %vm283_vm0, %v9200_v2, 0  ;;  %v12491_v14 = vld [vmem:[#allocation2 + $0xdc] sm:$0xf0]  ;;  %v9168_v15 = vor.u32 %v12487_v8, %v9165_v12  ;;  %v9173_v19 = vld [vmem:[#allocation2 + $0xe0] sm:$0xf0]  ;;  %v675_v33 = vsel %vm283_vm0, %v672_v30, %v674_v31  ;;  %v676_v44 = vrot.slane %v13655_v36, 2 }
  0x41   :  { %630 = vmatpush.bf16.msra.mxu2 %v9114_v49  ;;  %654 = vmatpush.bf16.msra.mxu3 %v9118_v51  ;;  %v678_v45 = vrot.slane %v13660_v37, 2  ;;  %v9203_v49 = vld [vmem:[#allocation2 + $0x100] sm:$0xf]  ;;  %v12498_v50 = vld [vmem:[#allocation2 + $0x114] sm:$0x30]  ;;  %vm1266_vm4 = vcmask 1043456  }
  0x42   :  { %9078 = vmatmul.msk.bf16.gmra.mxu0 %vm273_vm2, %v204_v9  ;;  %9081 = vmatmul.msk.bf16.gmra.mxu1 %vm273_vm2, %v204_v9  ;;  %v12495_v51 = vld [vmem:[#allocation2 + $0x104] sm:$0xf]  ;;  %v9253_v54 = vld [vmem:[#allocation2 + $0x150] sm:$0xf]  ;;  %v12508_v55 = vld [vmem:[#allocation2 + $0x164] sm:$0x30]  ;;  %v677_v62 = vsel %vm283_vm0, %v674_v31, %v676_v44 }
  0x43   :  { %9084 = vmatmul.msk.bf16.gmra.mxu2 %vm273_vm2, %v204_v9  ;;  %9087 = vmatmul.msk.bf16.gmra.mxu3 %vm273_vm2, %v204_v9  ;;  %v9254_v57 = vor.u32 %v12508_v55, %v9253_v54  ;;  %v12505_v58 = vld [vmem:[#allocation2 + $0x154] sm:$0xf]  ;;  %v9255_v59 = vld [vmem:[#allocation2 + $0x168] sm:$0x30]  ;;  %v9231_v28 = vld [vmem:[#allocation2 + $0x138] sm:$0xf0] }
  0x44   :  { %v9258_v61 = vor.u32 %v12505_v58, %v9255_v59  ;;  %v9181_v12 = vld [vmem:[#allocation2 + $0xe8] sm:$0xf0]  ;;  %vm1612_vm5 = vcmask 1041408   ;;  %vm1615_vm6 = vcmask 1043458   ;;  %vm1620_vm7 = vcmask 1045508   ;;  %s13553_s0 = smov [#allocation16]  }
  0x45   :  { %vm1617_vm8 = vcmask 1045506   ;;  %vm2350_vm9 = vcmask 1041409   ;;  %vm2353_vm10 = vcmask 1042434   ;;  %vm2356_vm11 = vcmask 1043459   ;;  %s9013_s17 = sshll.u32 %s13553_s0, 4  ;;  %s9015_s20 = sshll.u32 %s16230_s9, 4  ;;  %s9014_s17 = int_to_ptr.vmem [resolvable:$true] %s9013_s17  ;;  %s9016_s20 = int_to_ptr.hbm [resolvable:$true] %s9015_s20 }
  0x46   :  { %v1072_v2 = vsel %vm283_vm0, %v9258_v61, 0  ;;  %vm2362_vm12 = vcmask 1045509   ;;  %vm2359_vm13 = vcmask 1044484   ;;  %vm2365_vm14 = vcmask 1046534  }
  0x47   :  { %vm2368_vm15 = vcmask 1047559  }
  0x52   :  { %9079 = vmatmul.msk.bf16.gmra.mxu0 %vm273_vm2, %v205_v17  ;;  %9082 = vmatmul.msk.bf16.gmra.mxu1 %vm273_vm2, %v205_v17 }
  0x53   :  { %9085 = vmatmul.msk.bf16.gmra.mxu2 %vm273_vm2, %v205_v17  ;;  %9088 = vmatmul.msk.bf16.gmra.mxu3 %vm273_vm2, %v205_v17 }
  0x62   :  { %9089 = vmatmul.msk.bf16.vlgmr.msrb.gmra.mxu0 %vm273_vm2, %v13662_v38  ;;  %9092 = vmatmul.msk.bf16.vlgmr.msrb.gmra.mxu1 %vm273_vm2, %v13662_v38  ;;  %v12464_v38 = vld [vmem:[#allocation2 + $0xc] sm:$0xf] }
  0x63   :  { %9143 = vmatmul.msk.bf16.vlgmr.msrb.gmra.mxu2 %vm273_vm2, %v159_v18  ;;  %9146 = vmatmul.msk.bf16.vlgmr.msrb.gmra.mxu3 %vm273_vm2, %v159_v18  ;;  %v9110_v46 = vor.u32 %v12464_v38, %v9107_v43  ;;  %v13769_v38 = vpack.c.bf16 %v675_v33, %v673_v32 }
  0x64   :  { %794 = vmatpush.bf16.msrb.mxu0 %v771_v1  ;;  %842 = vmatpush.bf16.msrb.mxu2 %v777_v4  ;;  %v1069_v1 = vsel %vm283_vm0, %v9254_v57, 0  ;;  %v12492_v4 = vld [vmem:[#allocation2 + $0xe4] sm:$0xf0] }
  0x65   :  { %606 = vmatpush.bf16.msra.mxu1 %v9110_v46  ;;  %866 = vmatpush.bf16.msrb.mxu3 %v780_v5  ;;  %v679_v46 = vrot.slane %v13671_v39, 2  ;;  %v12489_v5 = vld [vmem:[#allocation2 + $0xd4] sm:$0xf] }
  0x67   :  { %v680_v63 = vsel %vm283_vm0, %v678_v45, %v679_v46  ;;  %v681_v45 = vrot.slane %v13693_v10, 2 }
  0x68   :  { %v13804_v8 = vpack.c.bf16 %v680_v63, %v677_v62  ;;  %v969_v62 = vrot.slane %v13632_v16, 3  ;;  %v970_v63 = vrot.slane %v13640_v26, 3 }
  0x69   :  { %818 = vmatpush.bf16.msrb.mxu1 %v774_v3  ;;  %v9179_v3 = vld [vmem:[#allocation2 + $0xd0] sm:$0xf] }
  0x6d   :  { %819 = vmatpush.bf16.msrb.mxu1 %v9168_v15 }
  0x72   :  { %9090 = vmatmul.msk.bf16.gmra.mxu0 %vm273_vm2, %v204_v9  ;;  %9093 = vmatmul.msk.bf16.gmra.mxu1 %vm273_vm2, %v204_v9  ;;  %v9164_v9 = vor.u32 %v12490_v7, %v9163_v6 }
  0x73   :  { %9144 = vmatmul.msk.bf16.gmra.mxu2 %vm273_vm2, %v160_v52  ;;  %9147 = vmatmul.msk.bf16.gmra.mxu3 %vm273_vm2, %v160_v52 }
  0x74   :  { %795 = vmatpush.bf16.msrb.mxu0 %v9164_v9  ;;  %v9180_v9 = vor.u32 %v12492_v4, %v9179_v3 }
  0x82   :  { %9091 = vmatmul.msk.bf16.gmra.mxu0 %vm273_vm2, %v205_v17  ;;  %9094 = vmatmul.msk.bf16.gmra.mxu1 %vm273_vm2, %v205_v17  ;;  %v9172_v17 = vor.u32 %v12491_v14, %v9171_v13  ;;  %v9229_v13 = vld [vmem:[#allocation2 + $0x120] sm:$0xf]  ;;  %v12502_v14 = vld [vmem:[#allocation2 + $0x134] sm:$0xf0] }
  0x83   :  { %9145 = vmatmul.msk.bf16.gmra.mxu2 %vm273_vm2, %v161_v53  ;;  %9148 = vmatmul.msk.bf16.gmra.mxu3 %vm273_vm2, %v161_v53 }
  0x84   :  { %843 = vmatpush.bf16.msrb.mxu2 %v9172_v17 }
  0x92   :  { %9149 = vmatmul.msk.bf16.vlgmr.msra.gmra.mxu0 %vm273_vm2, %v159_v18  ;;  %9152 = vmatmul.msk.bf16.vlgmr.msra.gmra.mxu1 %vm273_vm2, %v159_v18 }
  0x93   :  { %9155 = vmatmul.msk.bf16.vlgmr.msra.gmra.mxu2 %vm273_vm2, %v159_v18  ;;  %9158 = vmatmul.msk.bf16.vlgmr.msra.gmra.mxu3 %vm273_vm2, %v159_v18  ;;  %v12488_v18 = vld [vmem:[#allocation2 + $0xcc] sm:$0xf] }
  0x94   :  { %v9176_v20 = vor.u32 %v12488_v18, %v9173_v19  ;;  %1092 = vmatpush.bf16.msra.mxu2 %v1069_v1  ;;  %v9184_v18 = vor.u32 %v12489_v5, %v9181_v12  ;;  %v9230_v19 = vor.u32 %v12502_v14, %v9229_v13  ;;  %v971_v1 = vsel %vm968_vm3, %v969_v62, %v970_v63 }
  0x95   :  { %v974_v13 = vrot.slane %v13655_v36, 3 }
  0x96   :  { %867 = vmatpush.bf16.msrb.mxu3 %v9176_v20  ;;  %v12499_v20 = vld [vmem:[#allocation2 + $0x124] sm:$0xf] }
  0x97   :  { %v9234_v30 = vor.u32 %v12499_v20, %v9231_v28  ;;  %v977_v28 = vrot.slane %v13671_v39, 3 }
  0x98   :  { %1093 = vmatpush.bf16.msra.mxu2 %v9230_v19 }
  0x9a   :  { %1116 = vmatpush.bf16.msra.mxu3 %v1072_v2 }
  0x9e   :  { %1117 = vmatpush.bf16.msra.mxu3 %v9234_v30  ;;  %v9261_v30 = vld [vmem:[#allocation2 + $0x158] sm:$0xf] }
  0xa2   :  { %9150 = vmatmul.msk.bf16.gmra.mxu0 %vm273_vm2, %v160_v52  ;;  %9153 = vmatmul.msk.bf16.gmra.mxu1 %vm273_vm2, %v160_v52 }
  0xa3   :  { %9156 = vmatmul.msk.bf16.gmra.mxu2 %vm273_vm2, %v160_v52  ;;  %9159 = vmatmul.msk.bf16.gmra.mxu3 %vm273_vm2, %v160_v52  ;;  %v9204_v52 = vor.u32 %v12498_v50, %v9203_v49  ;;  %v683_v49 = vrot.slane %v13698_v11, 2  ;;  %v682_v50 = vsel %vm283_vm0, %v679_v46, %v681_v45 }
  0xa5   :  { %v783_v60 = vsel %vm283_vm0, %v9204_v52, 0 }
  0xa6   :  { %890 = vmatpush.bf16.msra.mxu0 %v783_v60 }
  0xaa   :  { %891 = vmatpush.bf16.msra.mxu0 %v9180_v9 }
  0xaf   :  { %v13744_v21 = vpop.f32.mrf.mxu0  ;;  %v13746_v22 = vpop.f32.mrf.mxu1 }
  0xb2   :  { %9151 = vmatmul.msk.bf16.gmra.mxu0 %vm273_vm2, %v161_v53  ;;  %9154 = vmatmul.msk.bf16.gmra.mxu1 %vm273_vm2, %v161_v53 }
  0xb3   :  { %9157 = vmatmul.msk.bf16.gmra.mxu2 %vm273_vm2, %v161_v53  ;;  %9160 = vmatmul.msk.bf16.gmra.mxu3 %vm273_vm2, %v161_v53  ;;  %v9205_v53 = vld [vmem:[#allocation2 + $0x118] sm:$0x30] }
  0xb4   :  { %v9208_v56 = vor.u32 %v12495_v51, %v9205_v53  ;;  %v684_v51 = vsel %vm283_vm0, %v681_v45, %v683_v49  ;;  %v12509_v45 = vld [vmem:[#allocation2 + $0x16c] sm:$0x30]  ;;  %v12506_v49 = vld [vmem:[#allocation2 + $0x15c] sm:$0xf] }
  0xb5   :  { %v13834_v54 = vpack.c.bf16 %v684_v51, %v682_v50  ;;  %v9262_v50 = vor.u32 %v12509_v45, %v9261_v30  ;;  %v9263_v51 = vld [vmem:[#allocation2 + $0x170] sm:$0x30]  ;;  %v9237_v45 = vld [vmem:[#allocation2 + $0x128] sm:$0xf] }
  0xb6   :  { %v13752_v23 = vpop.f32.mrf.mxu2  ;;  %v13754_v24 = vpop.f32.mrf.mxu3  ;;  %v786_v0 = vsel %vm283_vm0, %v9208_v56, 0 }
  0xb7   :  { %v13756_v25 = vpop.f32.mrf.mxu0  ;;  %v13758_v27 = vpop.f32.mrf.mxu1  ;;  %914 = vmatpush.bf16.msra.mxu1 %v786_v0  ;;  %v972_v0 = vrot.slane %v13645_v29, 3 }
  0xb9   :  { %v973_v2 = vsel %vm968_vm3, %v970_v63, %v972_v0  ;;  %v12507_v63 = vld [vmem:[#allocation2 + $0x164] sm:$0xf] }
  0xba   :  { %v13873_v12 = vpack.c.bf16 %v973_v2, %v971_v1  ;;  %v1075_v1 = vsel %vm283_vm0, %v9262_v50, 0 }
  0xbb   :  { %915 = vmatpush.bf16.msra.mxu1 %v9184_v18 }
  0xbe   :  { %v13765_v34 = vpop.f32.mrf.mxu2  ;;  %v13767_v35 = vpop.f32.mrf.mxu3 }
  0xbf   :  { %16309 = vst [vmem:[#allocation23_spill] sm:$0xff] %v13765_v34  ;;  %v13771_v40 = vpop.f32.mrf.mxu0  ;;  %v13773_v41 = vpop.f32.mrf.mxu1 }
  0xc2   :  { %9209 = vmatmul.msk.bf16.vlgmr.msrb.gmra.mxu0 %vm273_vm2, %v13769_v38  ;;  %9212 = vmatmul.msk.bf16.vlgmr.msrb.gmra.mxu1 %vm273_vm2, %v13769_v38 }
  0xc3   :  { %9215 = vmatmul.msk.bf16.vlgmr.msrb.gmra.mxu2 %vm273_vm2, %v13769_v38  ;;  %9218 = vmatmul.msk.bf16.vlgmr.msrb.gmra.mxu3 %vm273_vm2, %v13769_v38 }
  0xc4   :  { %1140 = vmatpush.bf16.msrb.mxu0 %v1075_v1 }
  0xc6   :  { %v13783_v42 = vpop.f32.mrf.mxu2  ;;  %v13785_v43 = vpop.f32.mrf.mxu3 }
  0xc7   :  { %v13790_v47 = vpop.f32.mrf.mxu0  ;;  %v13792_v48 = vpop.f32.mrf.mxu1 }
  0xce   :  { %v13800_v6 = vpop.f32.mrf.mxu2  ;;  %v13802_v7 = vpop.f32.mrf.mxu3 }
  0xcf   :  { %16310 = vst [vmem:[#allocation24_spill] sm:$0xff] %v13800_v6  ;;  %v13806_v15 = vpop.f32.mrf.mxu0  ;;  %v13808_v17 = vpop.f32.mrf.mxu1  ;;  %v12521_v6 = vld [vmem:[#allocation2 + $0x1cc] sm:$0x30] }
  0xd2   :  { %9210 = vmatmul.msk.bf16.gmra.mxu0 %vm273_vm2, %v13804_v8  ;;  %9213 = vmatmul.msk.bf16.gmra.mxu1 %vm273_vm2, %v13804_v8 }
  0xd3   :  { %9216 = vmatmul.msk.bf16.gmra.mxu2 %vm273_vm2, %v13804_v8  ;;  %9219 = vmatmul.msk.bf16.gmra.mxu3 %vm273_vm2, %v13804_v8 }
  0xd6   :  { %v13818_v31 = vpop.f32.mrf.mxu2  ;;  %v13820_v32 = vpop.f32.mrf.mxu3 }
  0xd7   :  { %v13822_v33 = vpop.f32.mrf.mxu0  ;;  %v13824_v44 = vpop.f32.mrf.mxu1 }
  0xde   :  { %v13830_v52 = vpop.f32.mrf.mxu2  ;;  %v13832_v53 = vpop.f32.mrf.mxu3 }
  0xdf   :  { %16311 = vst [vmem:[#allocation25_spill] sm:$0xff] %v13830_v52  ;;  %v13836_v55 = vpop.f32.mrf.mxu0  ;;  %v13838_v56 = vpop.f32.mrf.mxu1  ;;  %v9327_v52 = vld [vmem:[#allocation2 + $0x1b8] sm:$0xf] }
  0xe0   :  { %16312 = vst [vmem:[#allocation26_spill] sm:$0xff] %v13832_v53 }
  0xe2   :  { %9211 = vmatmul.msk.bf16.gmra.mxu0 %vm273_vm2, %v13834_v54  ;;  %9214 = vmatmul.msk.bf16.gmra.mxu1 %vm273_vm2, %v13834_v54 }
  0xe3   :  { %9217 = vmatmul.msk.bf16.gmra.mxu2 %vm273_vm2, %v13834_v54  ;;  %9220 = vmatmul.msk.bf16.gmra.mxu3 %vm273_vm2, %v13834_v54 }
  0xe6   :  { %v536_v46 = vpop.f32.mrf.mxu2  ;;  %v560_v57 = vpop.f32.mrf.mxu3 }
  0xe7   :  { %v13849_v58 = vadd.f32 %v536_v46, %v13744_v21  ;;  %v13852_v59 = vadd.f32 %v560_v57, %v13746_v22  ;;  %v13854_v60 = vpop.f32.mrf.mxu0  ;;  %v13856_v61 = vpop.f32.mrf.mxu1  ;;  %v9269_v46 = vld [vmem:[#allocation2 + $0x160] sm:$0xf]  ;;  %v12510_v57 = vld [vmem:[#allocation2 + $0x174] sm:$0x30] }
  0xe8   :  { %v9270_v62 = vor.u32 %v12510_v57, %v9269_v46  ;;  %v12500_v57 = vld [vmem:[#allocation2 + $0x12c] sm:$0xf] }
  0xee   :  { %v538_v21 = vpop.f32.mrf.mxu2  ;;  %v562_v3 = vpop.f32.mrf.mxu3 }
  0xef   :  { %v13864_v22 = vadd.f32 %v538_v21, %v13756_v25  ;;  %v13867_v4 = vadd.f32 %v562_v3, %v13758_v27  ;;  %v13869_v5 = vpop.f32.mrf.mxu0  ;;  %v13871_v9 = vpop.f32.mrf.mxu1  ;;  %v975_v21 = vsel %vm968_vm3, %v972_v0, %v974_v13  ;;  %v9245_v0 = vld [vmem:[#allocation2 + $0x130] sm:$0xf] }
  0xf2   :  { %9221 = vmatmul.msk.bf16.vlgmr.msra.gmra.mxu0 %vm273_vm2, %v13769_v38  ;;  %9224 = vmatmul.msk.bf16.vlgmr.msra.gmra.mxu1 %vm273_vm2, %v13769_v38  ;;  %v976_v38 = vrot.slane %v13660_v37, 3 }
  0xf3   :  { %9275 = vmatmul.msk.bf16.vlgmr.msra.gmra.mxu2 %vm273_vm2, %v13873_v12  ;;  %9278 = vmatmul.msk.bf16.vlgmr.msra.gmra.mxu3 %vm273_vm2, %v13873_v12 }
  0xf4   :  { %v978_v3 = vsel %vm968_vm3, %v976_v38, %v977_v28 }
  0xf6   :  { %v541_v25 = vpop.f32.mrf.mxu2  ;;  %v565_v27 = vpop.f32.mrf.mxu3 }
  0xf7   :  { %v13885_v14 = vadd.f32 %v541_v25, %v13771_v40  ;;  %v13888_v18 = vadd.f32 %v565_v27, %v13773_v41  ;;  %v13890_v19 = vpop.f32.mrf.mxu0  ;;  %v13892_v20 = vpop.f32.mrf.mxu1  ;;  %v9266_v40 = vor.u32 %v12506_v49, %v9263_v51  ;;  %v9271_v41 = vld [vmem:[#allocation2 + $0x178] sm:$0x30]  ;;  %v1081_v27 = vsel %vm283_vm0, %v9270_v62, 0  ;;  %v12503_v49 = vld [vmem:[#allocation2 + $0x13c] sm:$0xf0] }
  0xf8   :  { %v9274_v2 = vor.u32 %v12507_v63, %v9271_v41  ;;  %1188 = vmatpush.bf16.msrb.mxu2 %v1081_v27  ;;  %v9238_v50 = vor.u32 %v12503_v49, %v9237_v45  ;;  %v9239_v63 = vld [vmem:[#allocation2 + $0x140] sm:$0xf0]  ;;  %v13912_v41 = vpack.c.bf16 %v978_v3, %v975_v21  ;;  %v9247_v27 = vld [vmem:[#allocation2 + $0x148] sm:$0xf0] }
  0xf9   :  { %v1078_v25 = vsel %vm283_vm0, %v9266_v40, 0  ;;  %v9242_v1 = vor.u32 %v12500_v57, %v9239_v63 }
  0xfa   :  { %1164 = vmatpush.bf16.msrb.mxu1 %v1078_v25  ;;  %v1084_v30 = vsel %vm283_vm0, %v9274_v2, 0  ;;  %v12504_v2 = vld [vmem:[#allocation2 + $0x144] sm:$0xf0]  ;;  %v12501_v25 = vld [vmem:[#allocation2 + $0x134] sm:$0xf]  ;;  %1141 = vmatpush.bf16.msrb.mxu0 %v9238_v50 }
  0xfb   :  { %1212 = vmatpush.bf16.msrb.mxu3 %v1084_v30  ;;  %v9246_v30 = vor.u32 %v12504_v2, %v9245_v0  ;;  %v9250_v45 = vor.u32 %v12501_v25, %v9247_v27 }
  0xfd   :  { %1189 = vmatpush.bf16.msrb.mxu2 %v9246_v30 }
  0xfe   :  { %v543_v51 = vpop.f32.mrf.mxu2  ;;  %v567_v46 = vpop.f32.mrf.mxu3  ;;  %1165 = vmatpush.bf16.msrb.mxu1 %v9242_v1 }
  0xff   :  { %v13903_v13 = vadd.f32 %v543_v51, %v13790_v47  ;;  %v13906_v38 = vadd.f32 %v567_v46, %v13792_v48  ;;  %v13908_v40 = vpop.f32.mrf.mxu0  ;;  %v13910_v62 = vpop.f32.mrf.mxu1  ;;  %1213 = vmatpush.bf16.msrb.mxu3 %v9250_v45  ;;  %v981_v46 = vrot.slane %v13698_v11, 3 }
 0x102   :  { %9222 = vmatmul.msk.bf16.gmra.mxu0 %vm273_vm2, %v13804_v8  ;;  %9225 = vmatmul.msk.bf16.gmra.mxu1 %vm273_vm2, %v13804_v8  ;;  %v979_v8 = vrot.slane %v13693_v10, 3 }
 0x103   :  { %9276 = vmatmul.msk.bf16.gmra.mxu2 %vm273_vm2, %v13912_v41  ;;  %9279 = vmatmul.msk.bf16.gmra.mxu3 %vm273_vm2, %v13912_v41 }
 0x104   :  { %v980_v50 = vsel %vm968_vm3, %v977_v28, %v979_v8  ;;  %v982_v57 = vsel %vm968_vm3, %v979_v8, %v981_v46 }
 0x105   :  { %v13946_v25 = vpack.c.bf16 %v982_v57, %v980_v50 }
 0x106   :  { %v546_v47 = vpop.f32.mrf.mxu2  ;;  %v570_v48 = vpop.f32.mrf.mxu3 }
 0x107   :  { %v13923_v21 = vadd.f32 %v546_v47, %v13806_v15  ;;  %v13926_v3 = vadd.f32 %v570_v48, %v13808_v17  ;;  %v13928_v49 = vpop.f32.mrf.mxu0  ;;  %v13930_v51 = vpop.f32.mrf.mxu1 }
 0x10e   :  { %v548_v63 = vpop.f32.mrf.mxu2  ;;  %v572_v0 = vpop.f32.mrf.mxu3 }
 0x10f   :  { %v13937_v15 = vadd.f32 %v548_v63, %v13822_v33  ;;  %v13940_v17 = vadd.f32 %v572_v0, %v13824_v44  ;;  %v13942_v1 = vpop.f32.mrf.mxu0  ;;  %v13944_v2 = vpop.f32.mrf.mxu1  ;;  %v9319_v0 = vld [vmem:[#allocation2 + $0x1b0] sm:$0xf] }
 0x112   :  { %9223 = vmatmul.msk.bf16.gmra.mxu0 %vm273_vm2, %v13834_v54  ;;  %9226 = vmatmul.msk.bf16.gmra.mxu1 %vm273_vm2, %v13834_v54 }
 0x113   :  { %9277 = vmatmul.msk.bf16.gmra.mxu2 %vm273_vm2, %v13946_v25  ;;  %9280 = vmatmul.msk.bf16.gmra.mxu3 %vm273_vm2, %v13946_v25 }
 0x116   :  { %v632_v33 = vpop.f32.mrf.mxu2  ;;  %v656_v44 = vpop.f32.mrf.mxu3 }
 0x117   :  { %v13957_v28 = vadd.f32 %v632_v33, %v13836_v55  ;;  %v13960_v27 = vadd.f32 %v656_v44, %v13838_v56  ;;  %v13962_v30 = vpop.f32.mrf.mxu0  ;;  %v13964_v45 = vpop.f32.mrf.mxu1  ;;  %v12520_v33 = vld [vmem:[#allocation2 + $0x1c4] sm:$0x30]  ;;  %v12517_v44 = vld [vmem:[#allocation2 + $0x1b4] sm:$0xf] }
 0x118   :  { %16313 = vst [vmem:[#allocation27_spill] sm:$0xff] %v13962_v30  ;;  %v9329_v30 = vld [vmem:[#allocation2 + $0x1d0] sm:$0x30] }
 0x11e   :  { %v634_v47 = vpop.f32.mrf.mxu2  ;;  %v658_v54 = vpop.f32.mrf.mxu3 }
 0x11f   :  { %v13967_v48 = vadd.f32 %v634_v47, %v13854_v60  ;;  %v13970_v8 = vadd.f32 %v658_v54, %v13856_v61  ;;  %v13972_v46 = vpop.f32.mrf.mxu0  ;;  %v13974_v50 = vpop.f32.mrf.mxu1  ;;  %v9320_v47 = vor.u32 %v12520_v33, %v9319_v0  ;;  %v9321_v54 = vld [vmem:[#allocation2 + $0x1c8] sm:$0x30]  ;;  %v9295_v0 = vld [vmem:[#allocation2 + $0x180] sm:$0xf]  ;;  %v12514_v33 = vld [vmem:[#allocation2 + $0x194] sm:$0xf0] }
 0x121   :  { %16314 = vst [vmem:[#allocation28_spill] sm:$0xff] %v13967_v48  ;;  %v12518_v48 = vld [vmem:[#allocation2 + $0x1bc] sm:$0xf] }
 0x122   :  { %16315 = vst [vmem:[#allocation29_spill] sm:$0xff] %v13970_v8  ;;  %9281 = vmatmul.msk.bf16.vlgmr.msrb.gmra.mxu0 %vm273_vm2, %v13873_v12  ;;  %9284 = vmatmul.msk.bf16.vlgmr.msrb.gmra.mxu1 %vm273_vm2, %v13873_v12  ;;  %v9328_v8 = vor.u32 %v12521_v6, %v9327_v52  ;;  %v9296_v6 = vor.u32 %v12514_v33, %v9295_v0  ;;  %v12511_v52 = vld [vmem:[#allocation2 + $0x184] sm:$0xf] }
 0x123   :  { %9287 = vmatmul.msk.bf16.vlgmr.msrb.gmra.mxu2 %vm273_vm2, %v13873_v12  ;;  %9290 = vmatmul.msk.bf16.vlgmr.msrb.gmra.mxu3 %vm273_vm2, %v13873_v12  ;;  %v9324_v12 = vor.u32 %v12517_v44, %v9321_v54  ;;  %v9297_v44 = vld [vmem:[#allocation2 + $0x198] sm:$0xf0]  ;;  %v9303_v54 = vld [vmem:[#allocation2 + $0x188] sm:$0xf] }
 0x126   :  { %v637_v55 = vpop.f32.mrf.mxu2  ;;  %v661_v56 = vpop.f32.mrf.mxu3 }
 0x127   :  { %v13985_v60 = vadd.f32 %v637_v55, %v13869_v5  ;;  %v13988_v61 = vadd.f32 %v661_v56, %v13871_v9  ;;  %v13990_v57 = vpop.f32.mrf.mxu0  ;;  %v13992_v63 = vpop.f32.mrf.mxu1  ;;  %v1367_v5 = vsel %vm283_vm0, %v9320_v47, 0  ;;  %v9332_v55 = vor.u32 %v12518_v48, %v9329_v30 }
 0x128   :  { %16316 = vst [vmem:[#allocation30_spill] sm:$0xff] %v13990_v57  ;;  %1390 = vmatpush.bf16.msra.mxu0 %v1367_v5  ;;  %v1370_v9 = vsel %vm283_vm0, %v9324_v12, 0  ;;  %v1373_v56 = vsel %vm283_vm0, %v9328_v8, 0  ;;  %v9300_v12 = vor.u32 %v12511_v52, %v9297_v44  ;;  %v12515_v5 = vld [vmem:[#allocation2 + $0x19c] sm:$0xf0] }
 0x129   :  { %1414 = vmatpush.bf16.msra.mxu1 %v1370_v9  ;;  %1438 = vmatpush.bf16.msra.mxu2 %v1373_v56  ;;  %v1376_v57 = vsel %vm283_vm0, %v9332_v55, 0  ;;  %v12512_v55 = vld [vmem:[#allocation2 + $0x18c] sm:$0xf]  ;;  %v9305_v9 = vld [vmem:[#allocation2 + $0x1a0] sm:$0xf0] }
 0x12a   :  { %1462 = vmatpush.bf16.msra.mxu3 %v1376_v57  ;;  %v9304_v57 = vor.u32 %v12515_v5, %v9303_v54  ;;  %v9308_v56 = vor.u32 %v12512_v55, %v9305_v9  ;;  %v1267_v5 = vrot.slane %v13632_v16, 4 }
 0x12c   :  { %1391 = vmatpush.bf16.msra.mxu0 %v9296_v6 }
 0x12d   :  { %1415 = vmatpush.bf16.msra.mxu1 %v9300_v12  ;;  %1439 = vmatpush.bf16.msra.mxu2 %v9304_v57 }
 0x12e   :  { %v639_v34 = vpop.f32.mrf.mxu2  ;;  %v663_v53 = vpop.f32.mrf.mxu3  ;;  %1463 = vmatpush.bf16.msra.mxu3 %v9308_v56 }
 0x12f   :  { %v13999_v30 = vadd.f32 %v639_v34, %v13890_v19  ;;  %v14002_v48 = vadd.f32 %v663_v53, %v13892_v20  ;;  %v14004_v8 = vpop.f32.mrf.mxu0  ;;  %v14006_v47 = vpop.f32.mrf.mxu1 }
 0x132   :  { %9282 = vmatmul.msk.bf16.gmra.mxu0 %vm273_vm2, %v13912_v41  ;;  %9285 = vmatmul.msk.bf16.gmra.mxu1 %vm273_vm2, %v13912_v41 }
 0x133   :  { %9288 = vmatmul.msk.bf16.gmra.mxu2 %vm273_vm2, %v13912_v41  ;;  %9291 = vmatmul.msk.bf16.gmra.mxu3 %vm273_vm2, %v13912_v41 }
 0x136   :  { %v642_v34 = vpop.f32.mrf.mxu2  ;;  %v666_v53 = vpop.f32.mrf.mxu3 }
 0x137   :  { %v14017_v19 = vadd.f32 %v642_v34, %v13908_v40  ;;  %v14020_v20 = vadd.f32 %v666_v53, %v13910_v62  ;;  %v14022_v0 = vpop.f32.mrf.mxu0  ;;  %v14024_v33 = vpop.f32.mrf.mxu1  ;;  %v1268_v34 = vrot.slane %v13640_v26, 4 }
 0x13e   :  { %v644_v6 = vpop.f32.mrf.mxu2  ;;  %v668_v52 = vpop.f32.mrf.mxu3 }
 0x13f   :  { %v14027_v44 = vadd.f32 %v644_v6, %v13928_v49  ;;  %v14030_v41 = vadd.f32 %v668_v52, %v13930_v51  ;;  %v797_v54 = vpop.f32.mrf.mxu0  ;;  %v821_v12 = vpop.f32.mrf.mxu1  ;;  %v585_v49 = vadd.f32 %v13942_v1, %v13752_v23 }
 0x140   :  { %v14033_v40 = vadd.f32 %v797_v54, %v13849_v58  ;;  %v14036_v62 = vadd.f32 %v821_v12, %v13852_v59  ;;  %v609_v58 = vadd.f32 %v13944_v2, %v13754_v24  ;;  %v1269_v24 = vsel %vm1266_vm4, %v1267_v5, %v1268_v34 }
 0x141   :  { %16317 = vst [vmem:[#allocation31_spill] sm:$0xff] %v14030_v41  ;;  %v1272_v12 = vrot.slane %v13655_v36, 4  ;;  %v1274_v5 = vrot.slane %v13660_v37, 4 }
 0x142   :  { %9283 = vmatmul.msk.bf16.gmra.mxu0 %vm273_vm2, %v13946_v25  ;;  %9286 = vmatmul.msk.bf16.gmra.mxu1 %vm273_vm2, %v13946_v25 }
 0x143   :  { %9289 = vmatmul.msk.bf16.gmra.mxu2 %vm273_vm2, %v13946_v25  ;;  %9292 = vmatmul.msk.bf16.gmra.mxu3 %vm273_vm2, %v13946_v25  ;;  %v1270_v25 = vrot.slane %v13645_v29, 4 }
 0x145   :  { %v1271_v16 = vsel %vm1266_vm4, %v1268_v34, %v1270_v25  ;;  %v9337_v34 = vld [vmem:[#allocation2 + $0x1d8] sm:$0x30] }
 0x146   :  { %v845_v59 = vpop.f32.mrf.mxu2  ;;  %v869_v51 = vpop.f32.mrf.mxu3  ;;  %v14069_v6 = vpack.c.bf16 %v1271_v16, %v1269_v24  ;;  %v1273_v16 = vsel %vm1266_vm4, %v1270_v25, %v1272_v12 }
 0x147   :  { %v14051_v55 = vadd.f32 %v845_v59, %v585_v49  ;;  %v14053_v9 = vadd.f32 %v869_v51, %v609_v58  ;;  %v799_v57 = vpop.f32.mrf.mxu0  ;;  %v823_v56 = vpop.f32.mrf.mxu1 }
 0x148   :  { %v14058_v53 = vadd.f32 %v799_v57, %v13864_v22  ;;  %v14061_v23 = vadd.f32 %v823_v56, %v13867_v4  ;;  %v590_v4 = vadd.f32 %v13972_v46, %v13783_v42  ;;  %v1275_v57 = vrot.slane %v13671_v39, 4  ;;  %v12522_v46 = vld [vmem:[#allocation2 + $0x1d4] sm:$0x30] }
 0x14e   :  { %v14065_v1 = vpop.f32.mrf.mxu2  ;;  %v14067_v2 = vpop.f32.mrf.mxu3 }
 0x14f   :  { %v802_v26 = vpop.f32.mrf.mxu0  ;;  %v826_v52 = vpop.f32.mrf.mxu1 }
 0x150   :  { %v14072_v29 = vadd.f32 %v802_v26, %v13885_v14  ;;  %v14075_v22 = vadd.f32 %v826_v52, %v13888_v18  ;;  %v614_v14 = vadd.f32 %v13974_v50, %v13785_v43  ;;  %v9335_v43 = vld [vmem:[#allocation2 + $0x1c0] sm:$0xf]  ;;  %v12519_v50 = vld [vmem:[#allocation2 + $0x1c4] sm:$0xf]  ;;  %v1276_v26 = vsel %vm1266_vm4, %v1274_v5, %v1275_v57  ;;  %v12516_v52 = vld [vmem:[#allocation2 + $0x1a4] sm:$0xf0] }
 0x151   :  { %v9336_v36 = vor.u32 %v12522_v46, %v9335_v43  ;;  %v9340_v24 = vor.u32 %v12519_v50, %v9337_v34 }
 0x152   :  { %9341 = vmatmul.msk.bf16.vlgmr.msra.gmra.mxu0 %vm273_vm2, %v14069_v6  ;;  %9344 = vmatmul.msk.bf16.vlgmr.msra.gmra.mxu1 %vm273_vm2, %v14069_v6 }
 0x153   :  { %9347 = vmatmul.msk.bf16.vlgmr.msra.gmra.mxu2 %vm273_vm2, %v14069_v6  ;;  %9350 = vmatmul.msk.bf16.vlgmr.msra.gmra.mxu3 %vm273_vm2, %v14069_v6  ;;  %v1379_v37 = vsel %vm283_vm0, %v9336_v36, 0  ;;  %v1382_v39 = vsel %vm283_vm0, %v9340_v24, 0 }
 0x154   :  { %1486 = vmatpush.bf16.msrb.mxu0 %v1379_v37  ;;  %1510 = vmatpush.bf16.msrb.mxu1 %v1382_v39  ;;  %v1279_v37 = vrot.slane %v13698_v11, 4 }
 0x156   :  { %v850_v18 = vpop.f32.mrf.mxu2  ;;  %v874_v54 = vpop.f32.mrf.mxu3 }
 0x157   :  { %v14090_v49 = vadd.f32 %v850_v18, %v590_v4  ;;  %v14092_v58 = vadd.f32 %v874_v54, %v614_v14  ;;  %v804_v59 = vpop.f32.mrf.mxu0  ;;  %v828_v51 = vpop.f32.mrf.mxu1  ;;  %v14110_v18 = vpack.c.bf16 %v1276_v26, %v1273_v16  ;;  %v1277_v26 = vrot.slane %v13693_v10, 4 }
 0x158   :  { %v14097_v56 = vadd.f32 %v804_v59, %v13903_v13  ;;  %v14100_v42 = vadd.f32 %v828_v51, %v13906_v38  ;;  %v9311_v13 = vld [vmem:[#allocation2 + $0x190] sm:$0xf]  ;;  %v12513_v38 = vld [vmem:[#allocation2 + $0x194] sm:$0xf]  ;;  %v9313_v59 = vld [vmem:[#allocation2 + $0x1a8] sm:$0xf0] }
 0x159   :  { %v9312_v54 = vor.u32 %v12516_v52, %v9311_v13  ;;  %v9316_v51 = vor.u32 %v12513_v38, %v9313_v59 }
 0x15b   :  { %1487 = vmatpush.bf16.msrb.mxu0 %v9312_v54  ;;  %1511 = vmatpush.bf16.msrb.mxu1 %v9316_v51 }
 0x15e   :  { %v14106_v4 = vpop.f32.mrf.mxu2  ;;  %v14108_v14 = vpop.f32.mrf.mxu3 }
 0x15f   :  { %v807_v25 = vpop.f32.mrf.mxu0  ;;  %v831_v12 = vpop.f32.mrf.mxu1 }
 0x160   :  { %v14113_v5 = vadd.f32 %v807_v25, %v13923_v21  ;;  %v14116_v43 = vadd.f32 %v831_v12, %v13926_v3  ;;  %v595_v21 = vadd.f32 %v14004_v8, %v13818_v31  ;;  %v619_v3 = vadd.f32 %v14006_v47, %v13820_v32 }
 0x161   :  { %v1278_v32 = vsel %vm1266_vm4, %v1275_v57, %v1277_v26  ;;  %v1280_v8 = vsel %vm1266_vm4, %v1277_v26, %v1279_v37 }
 0x162   :  { %9342 = vmatmul.msk.bf16.gmra.mxu0 %vm273_vm2, %v14110_v18  ;;  %9345 = vmatmul.msk.bf16.gmra.mxu1 %vm273_vm2, %v14110_v18  ;;  %v1289_v52 = vpack.c.bf16 %v1280_v8, %v1278_v32 }
 0x163   :  { %9348 = vmatmul.msk.bf16.gmra.mxu2 %vm273_vm2, %v14110_v18  ;;  %9351 = vmatmul.msk.bf16.gmra.mxu3 %vm273_vm2, %v14110_v18 }
 0x166   :  { %v855_v46 = vpop.f32.mrf.mxu2  ;;  %v879_v50 = vpop.f32.mrf.mxu3 }
 0x167   :  { %v14130_v36 = vadd.f32 %v855_v46, %v595_v21  ;;  %v14132_v34 = vadd.f32 %v879_v50, %v619_v3  ;;  %v809_v24 = vpop.f32.mrf.mxu0  ;;  %v833_v16 = vpop.f32.mrf.mxu1 }
 0x168   :  { %v14137_v39 = vadd.f32 %v809_v24, %v13937_v15  ;;  %v14140_v31 = vadd.f32 %v833_v16, %v13940_v17 }
 0x16a   :  { %16318 = vst [vmem:[#allocation32_spill] sm:$0xff] %v14140_v31 }
 0x16e   :  { %v14144_v47 = vpop.f32.mrf.mxu2  ;;  %v14146_v13 = vpop.f32.mrf.mxu3 }
 0x16f   :  { %v893_v38 = vpop.f32.mrf.mxu0  ;;  %v917_v54 = vpop.f32.mrf.mxu1 }
 0x170   :  { %v936_v10 = vadd.f32 %v893_v38, %v13957_v28  ;;  %v937_v11 = vadd.f32 %v917_v54, %v13960_v27 }
 0x172   :  { %9343 = vmatmul.msk.bf16.gmra.mxu0 %vm273_vm2, %v1289_v52  ;;  %9346 = vmatmul.msk.bf16.gmra.mxu1 %vm273_vm2, %v1289_v52 }
 0x173   :  { %9349 = vmatmul.msk.bf16.gmra.mxu2 %vm273_vm2, %v1289_v52  ;;  %9352 = vmatmul.msk.bf16.gmra.mxu3 %vm273_vm2, %v1289_v52 }
 0x176   :  { %v1095_v15 = vpop.f32.mrf.mxu2  ;;  %v1119_v17 = vpop.f32.mrf.mxu3 }
 0x177   :  { %v14155_v57 = vadd.f32 %v1095_v15, %v14033_v40  ;;  %v14158_v59 = vadd.f32 %v1119_v17, %v14036_v62  ;;  %v14160_v25 = vpop.f32.mrf.mxu0  ;;  %v14162_v28 = vpop.f32.mrf.mxu1 }
 0x17e   :  { %v14164_v27 = vpop.f32.mrf.mxu2  ;;  %v14166_v12 = vpop.f32.mrf.mxu3 }
 0x17f   :  { %v898_v51 = vpop.f32.mrf.mxu0  ;;  %v922_v21 = vpop.f32.mrf.mxu1 }
 0x180   :  { %v948_v3 = vadd.f32 %v898_v51, %v13985_v60  ;;  %v949_v46 = vadd.f32 %v922_v21, %v13988_v61 }
 0x182   :  { %9353 = vmatmul.msk.bf16.vlgmr.msrb.gmra.mxu0 %vm273_vm2, %v14069_v6  ;;  %9356 = vmatmul.msk.bf16.vlgmr.msrb.gmra.mxu1 %vm273_vm2, %v14069_v6 }
 0x186   :  { %v1100_v40 = vpop.f32.mrf.mxu2  ;;  %v1124_v62 = vpop.f32.mrf.mxu3 }
 0x187   :  { %v14175_v50 = vadd.f32 %v1100_v40, %v14072_v29  ;;  %v14178_v24 = vadd.f32 %v1124_v62, %v14075_v22  ;;  %v14180_v16 = vpop.f32.mrf.mxu0  ;;  %v14182_v26 = vpop.f32.mrf.mxu1 }
 0x18e   :  { %v14184_v60 = vpop.f32.mrf.mxu2  ;;  %v14186_v61 = vpop.f32.mrf.mxu3 }
 0x18f   :  { %v903_v37 = vpop.f32.mrf.mxu0  ;;  %v927_v32 = vpop.f32.mrf.mxu1 }
 0x190   :  { %v14189_v6 = vadd.f32 %v903_v37, %v14017_v19  ;;  %v14192_v8 = vadd.f32 %v927_v32, %v14020_v20 }
 0x192   :  { %16319 = vst [vmem:[#allocation33_spill] sm:$0xff] %v14189_v6  ;;  %9354 = vmatmul.msk.bf16.gmra.mxu0 %vm273_vm2, %v14110_v18  ;;  %9357 = vmatmul.msk.bf16.gmra.mxu1 %vm273_vm2, %v14110_v18 }
 0x193   :  { %16320 = vst [vmem:[#allocation34_spill] sm:$0xff] %v14192_v8 }
 0x196   :  { %v1105_v29 = vpop.f32.mrf.mxu2  ;;  %v1129_v22 = vpop.f32.mrf.mxu3 }
 0x197   :  { %v14199_v38 = vadd.f32 %v1105_v29, %v14113_v5  ;;  %v14202_v54 = vadd.f32 %v1129_v22, %v14116_v43  ;;  %v14204_v15 = vpop.f32.mrf.mxu0  ;;  %v14206_v19 = vpop.f32.mrf.mxu1 }
 0x198   :  { %16322 = vst [vmem:[#allocation36_spill] sm:$0xff] %v14204_v15 }
 0x199   :  { %16321 = vst [vmem:[#allocation35_spill] sm:$0xff] %v14202_v54 }
 0x19a   :  { %16323 = vst [vmem:[#allocation37_spill] sm:$0xff] %v14206_v19 }
 0x19e   :  { %v14208_v20 = vpop.f32.mrf.mxu2  ;;  %v14210_v17 = vpop.f32.mrf.mxu3 }
 0x19f   :  { %16324 = vst [vmem:[#allocation38_spill] sm:$0xff] %v14210_v17  ;;  %v1143_v51 = vpop.f32.mrf.mxu0  ;;  %v1167_v21 = vpop.f32.mrf.mxu1 }
 0x1a0   :  { %v14213_v18 = vadd.f32 %v1143_v51, %v14051_v55  ;;  %v1233_v40 = vadd.f32 %v1167_v21, %v14053_v9 }
 0x1a2   :  { %9355 = vmatmul.msk.bf16.gmra.mxu0 %vm273_vm2, %v1289_v52  ;;  %9358 = vmatmul.msk.bf16.gmra.mxu1 %vm273_vm2, %v1289_v52 }
 0x1a6   :  { %v1191_v5 = vpop.f32.mrf.mxu2  ;;  %v1215_v43 = vpop.f32.mrf.mxu3 }
 0x1a7   :  { %v14218_v62 = vadd.f32 %v1191_v5, %v936_v10  ;;  %v14220_v37 = vadd.f32 %v1215_v43, %v937_v11  ;;  %v14222_v32 = vpop.f32.mrf.mxu0  ;;  %v1169_v29 = vpop.f32.mrf.mxu1 }
 0x1ae   :  { %v14224_v22 = vpop.f32.mrf.mxu2  ;;  %v14226_v54 = vpop.f32.mrf.mxu3 }
 0x1af   :  { %v1148_v55 = vpop.f32.mrf.mxu0  ;;  %v1172_v51 = vpop.f32.mrf.mxu1 }
 0x1b0   :  { %v14229_v9 = vadd.f32 %v1148_v55, %v14090_v49  ;;  %v1245_v52 = vadd.f32 %v1172_v51, %v14092_v58 }
 0x1b6   :  { %v1196_v21 = vpop.f32.mrf.mxu2  ;;  %v1220_v8 = vpop.f32.mrf.mxu3 }
 0x1b7   :  { %v14232_v10 = vadd.f32 %v1196_v21, %v948_v3  ;;  %v14234_v11 = vadd.f32 %v1220_v8, %v949_v46  ;;  %v14236_v5 = vpop.f32.mrf.mxu0  ;;  %v1174_v43 = vpop.f32.mrf.mxu1 }
 0x1b8   :  { %16325 = vst [vmem:[#allocation39_spill] sm:$0xff] %v14236_v5 }
 0x1be   :  { %v14238_v6 = vpop.f32.mrf.mxu3 }
 0x1bf   :  { %16326 = vst [vmem:[#allocation40_spill] sm:$0xff] %v14238_v6  ;;  %v1153_v17 = vpop.f32.mrf.mxu0  ;;  %v1177_v31 = vpop.f32.mrf.mxu1 }
 0x1c0   :  { %v14241_v19 = vadd.f32 %v1153_v17, %v14130_v36  ;;  %v1257_v49 = vadd.f32 %v1177_v31, %v14132_v34  ;;  %v611_v34 = vadd.f32 %v13964_v45, %v13767_v35 }
 0x1c2   :  { %16327 = vst [vmem:[#allocation41_spill] sm:$0xff] %v14241_v19 }
 0x1c6   :  { %v14244_v55 = vpop.f32.mrf.mxu3 }
 0x1c7   :  { %16328 = vst [vmem:[#allocation42_spill] sm:$0xff] %v14244_v55  ;;  %v14246_v58 = vpop.f32.mrf.mxu0  ;;  %v14248_v3 = vpop.f32.mrf.mxu1 }
 0x1c8   :  { %16329 = vst [vmem:[#allocation43_spill] sm:$0xff] %v14246_v58  ;;  %v941_v58 = vadd.f32 %v14067_v2, %v611_v34 }
 0x1ce   :  { %v14250_v46 = vpop.f32.mrf.mxu3 }
 0x1cf   :  { %16330 = vst [vmem:[#allocation44_spill] sm:$0xff] %v14250_v46  ;;  %v1393_v8 = vpop.f32.mrf.mxu0  ;;  %v1417_v51 = vpop.f32.mrf.mxu1 }
 0x1d0   :  { %v1528_v21 = vadd.f32 %v1393_v8, %v14155_v57  ;;  %v14254_v6 = vadd.f32 %v1417_v51, %v14158_v59  ;;  %v14263_v46 = vpop.f32.mrf.mxu2  ;;  %v1236_v57 = vadd.f32 %v14164_v27, %v14058_v53  ;;  %v1239_v8 = vadd.f32 %v1169_v29, %v941_v58 }
 0x1d1   :  { %v616_v53 = vadd.f32 %v13992_v63, %v13802_v7 }
 0x1d3   :  { %v953_v29 = vadd.f32 %v14108_v14, %v616_v53  ;;  %v12681_v53 = vld [vmem:[#allocation7 + $0x4ec] sm:$0xf0] }
 0x1d6   :  { %v1465_v5 = vpop.f32.mrf.mxu3 }
 0x1d7   :  { %v1531_v36 = vadd.f32 %v1465_v5, %v1233_v40  ;;  %v1395_v17 = vpop.f32.mrf.mxu0  ;;  %v14256_v19 = vpop.f32.mrf.mxu1 }
 0x1d8   :  { %v1534_v51 = vadd.f32 %v1395_v17, %v1236_v57  ;;  %v14273_v45 = vpop.f32.mrf.mxu2 }
 0x1d9   :  { %v14260_v31 = vmax.f32 %v1528_v21, %v1531_v36 }
 0x1de   :  { %v1467_v59 = vpop.f32.mrf.mxu3 }
 0x1df   :  { %v1537_v55 = vadd.f32 %v1467_v59, %v1239_v8  ;;  %v1398_v40 = vpop.f32.mrf.mxu0  ;;  %v1422_v5 = vpop.f32.mrf.mxu1 }
 0x1e0   :  { %v1540_v41 = vadd.f32 %v1398_v40, %v14175_v50  ;;  %v14269_v15 = vadd.f32 %v1422_v5, %v14178_v24  ;;  %v1248_v50 = vadd.f32 %v14184_v60, %v14097_v56  ;;  %v1251_v24 = vadd.f32 %v1174_v43, %v953_v29  ;;  %v1802_v40 = vld [vmem:[#allocation5] sm:$0x7]  ;;  %v16333_v56 = vld [vmem:[#allocation26_spill] sm:$0xff] }
 0x1e1   :  { %v14271_v35 = vmax.f32 %v1534_v51, %v1537_v55  ;;  %v621_v60 = vadd.f32 %v14024_v33, %v16333_v56  ;;  %v9497_v5 = vld [vmem:[#allocation7 + $0x3e0] sm:$0xf]  ;;  %v12679_v29 = vld [vmem:[#allocation7 + $0x4e4] sm:$0xf]  ;;  %v1806_v33 = vperm.slane %v1802_v40, 2  ;;  %v1260_v56 = vadd.f32 %v14208_v20, %v14137_v39 }
 0x1e6   :  { %v1470_v2 = vpop.f32.mrf.mxu3 }
 0x1e7   :  { %v1543_v21 = vadd.f32 %v1470_v2, %v1245_v52  ;;  %v1400_v36 = vpop.f32.mrf.mxu0  ;;  %v14275_v34 = vpop.f32.mrf.mxu1  ;;  %v12649_v2 = vld [vmem:[#allocation7 + $0x3ec] sm:$0xf0] }
 0x1e8   :  { %v1546_v58 = vadd.f32 %v1400_v36, %v1248_v50  ;;  %v14286_v52 = vpop.f32.mrf.mxu2  ;;  %v9498_v36 = vor.u32 %v12649_v2, %v9497_v5  ;;  %v16335_v50 = vld [vmem:[#allocation23_spill] sm:$0xff]  ;;  %v9481_v2 = vld [vmem:[#allocation7 + $0x3c0] sm:$0xf] }
 0x1e9   :  { %v14279_v27 = vmax.f32 %v1540_v41, %v1543_v21  ;;  %v9625_v21 = vld [vmem:[#allocation7 + $0x4e0] sm:$0xf] }
 0x1ea   :  { %2926 = vmatpush.bf16.msrb.mxu2 %v9498_v36  ;;  %v12677_v36 = vld [vmem:[#allocation7 + $0x4cc] sm:$0xf0] }
 0x1ee   :  { %v1472_v55 = vpop.f32.mrf.mxu3 }
 0x1ef   :  { %v1549_v17 = vadd.f32 %v1472_v55, %v1251_v24  ;;  %v1403_v57 = vpop.f32.mrf.mxu0  ;;  %v14284_v8 = vpop.f32.mrf.mxu1  ;;  %v16336_v24 = vld [vmem:[#allocation27_spill] sm:$0xff] }
 0x1f0   :  { %v1552_v7 = vadd.f32 %v1403_v57, %v14199_v38  ;;  %v587_v55 = vadd.f32 %v16336_v24, %v16335_v50  ;;  %v965_v38 = vadd.f32 %v14146_v13, %v621_v60  ;;  %v12711_v57 = vld [vmem:[#allocation7 + $0x5e4] sm:$0xf]  ;;  %v12645_v50 = vld [vmem:[#allocation7 + $0x3cc] sm:$0xf0]  ;;  %v9609_v24 = vld [vmem:[#allocation7 + $0x4c0] sm:$0xf] }
 0x1f1   :  { %v14288_v59 = vmax.f32 %v1546_v58, %v1549_v17  ;;  %v9626_v58 = vor.u32 %v12681_v53, %v9625_v21  ;;  %v9627_v17 = vld [vmem:[#allocation7 + $0x4f0] sm:$0xf0]  ;;  %v9482_v53 = vor.u32 %v12645_v50, %v9481_v2 }
 0x1f2   :  { %v1263_v5 = vadd.f32 %v14248_v3, %v965_v38  ;;  %v940_v13 = vadd.f32 %v14065_v1, %v587_v55  ;;  %v9610_v3 = vor.u32 %v12677_v36, %v9609_v24 }
 0x1f3   :  { %16331 = vst [vmem:[#allocation45_spill] sm:$0xff] %v14288_v59  ;;  %v1805_v59 = vperm.slane %v1802_v40, 1  ;;  %2940 = vmatpush.bf16.msrb.mxu3 %v9626_v58  ;;  %v12707_v58 = vld [vmem:[#allocation7 + $0x5c4] sm:$0xf]  ;;  %2927 = vmatpush.bf16.msrb.mxu2 %v9482_v53 }
 0x1f5   :  { %v14309_v55 = vrot.slane %v1805_v59, 6  ;;  %v1237_v59 = vadd.f32 %v14166_v12, %v14061_v23 }
 0x1f6   :  { %v1475_v51 = vpop.f32.mrf.mxu3 }
 0x1f7   :  { %v1555_v63 = vadd.f32 %v1475_v51, %v1257_v49  ;;  %v1405_v41 = vpop.f32.mrf.mxu0  ;;  %v14291_v14 = vpop.f32.mrf.mxu1  ;;  %v9755_v51 = vld [vmem:[#allocation7 + $0x5f0] sm:$0xf0]  ;;  %2941 = vmatpush.bf16.msrb.mxu3 %v9610_v3 }
 0x1f8   :  { %16332 = vst [vmem:[#allocation46_spill] sm:$0xff] %v14291_v14  ;;  %v1441_v49 = vpop.f32.mrf.mxu2 }
 0x1f9   :  { %v14295_v43 = vmax.f32 %v1552_v7, %v1555_v63  ;;  %v9630_v7 = vor.u32 %v12679_v29, %v9627_v17  ;;  %v9758_v63 = vor.u32 %v12711_v57, %v9755_v51  ;;  %v1530_v60 = vadd.f32 %v1441_v49, %v14213_v18  ;;  %v12675_v29 = vld [vmem:[#allocation7 + $0x4c4] sm:$0xf]  ;;  %v9611_v17 = vld [vmem:[#allocation7 + $0x4d0] sm:$0xf0] }
 0x1fa   :  { %v1558_v57 = vadd.f32 %v1405_v41, %v1260_v56  ;;  %v9614_v38 = vor.u32 %v12675_v29, %v9611_v17  ;;  %v14307_v18 = vperm.slane %v1802_v40, 0  ;;  %v16337_v49 = vld [vmem:[#allocation28_spill] sm:$0xff]  ;;  %v16338_v56 = vld [vmem:[#allocation29_spill] sm:$0xff]  ;;  %v1238_v40 = vadd.f32 %v14222_v32, %v940_v13 }
 0x1fb   :  { %16334 = vst [vmem:[#allocation26_spill] sm:$0xff] %v14295_v43  ;;  %2982 = vmatpush.bf16.msra.mxu0 %v9630_v7  ;;  %2996 = vmatpush.bf16.msra.mxu1 %v9758_v63  ;;  %v9739_v43 = vld [vmem:[#allocation7 + $0x5d0] sm:$0xf0]  ;;  %v942_v7 = vadd.f32 %v14160_v25, %v16337_v49  ;;  %v14323_v25 = vrot.slane %v1806_v33, 4  ;;  %v1535_v29 = vadd.f32 %v14256_v19, %v1237_v59  ;;  %v9593_v19 = vld [vmem:[#allocation7 + $0x4a0] sm:$0xf] }
 0x1fc   :  { %v9742_v63 = vor.u32 %v12707_v58, %v9739_v43  ;;  %v1811_v23 = vsel %vm1615_vm6, %v14307_v18, %v14309_v55 }
 0x1fe   :  { %v1477_v21 = vpop.f32.mrf.mxu3 }
 0x1ff   :  { %v1561_v51 = vadd.f32 %v1477_v21, %v1263_v5  ;;  %v1489_v39 = vpop.f32.mrf.mxu0  ;;  %v1513_v20 = vpop.f32.mrf.mxu1  ;;  %v943_v5 = vadd.f32 %v14162_v28, %v16338_v56  ;;  %2983 = vmatpush.bf16.msra.mxu0 %v9614_v38  ;;  %2997 = vmatpush.bf16.msra.mxu1 %v9742_v63  ;;  %v9465_v56 = vld [vmem:[#allocation7 + $0x3a0] sm:$0xf] }
 0x200   :  { %v1532_v14 = vadd.f32 %v1489_v39, %v14218_v62  ;;  %v1533_v1 = vadd.f32 %v1513_v20, %v14220_v37  ;;  %v1809_v37 = vsel %vm1612_vm5, %v14307_v18, %v14309_v55  ;;  %v1443_v12 = vpop.f32.mrf.mxu2 }
 0x201   :  { %v14313_v41 = vmax.f32 %v1558_v57, %v1561_v51  ;;  %v14330_v50 = vsel %vm1266_vm4, %v1809_v37, %v14323_v25  ;;  %v1536_v39 = vadd.f32 %v1443_v12, %v1238_v40  ;;  %v12673_v40 = vld [vmem:[#allocation7 + $0x4ac] sm:$0xf0] }
 0x202   :  { %v1565_v62 = vmax.f32 %v14254_v6, %v1532_v14  ;;  %v1566_v2 = vmax.f32 %v1530_v60, %v1533_v1  ;;  %v1240_v6 = vadd.f32 %v14224_v22, %v942_v7  ;;  %v1241_v14 = vadd.f32 %v14226_v54, %v943_v5  ;;  %v12641_v5 = vld [vmem:[#allocation7 + $0x3ac] sm:$0xf0] }
 0x203   :  { %v14353_v49 = vrot.slane %v14330_v50, 1 }
 0x204   :  { %v1600_v43 = vrot.slane %v1565_v62, 6  ;;  %v1601_v28 = vrot.slane %v1566_v2, 4 }
 0x205   :  { %16339 = vst [vmem:[#allocation23_spill] sm:$0xff] %v14353_v49 }
 0x206   :  { %v1613_v33 = vsel %vm1612_vm5, %v14260_v31, %v1600_v43  ;;  %v1616_v32 = vsel %vm1615_vm6, %v14260_v31, %v1600_v43  ;;  %v1621_v22 = vsel %vm1620_vm7, %v14260_v31, %v1600_v43  ;;  %v1624_v54 = vsel %vm283_vm0, %v1600_v43, %v14260_v31 }
 0x207   :  { %v1614_v24 = vsel %vm1266_vm4, %v1613_v33, %v1601_v28  ;;  %v1618_v13 = vsel %vm1617_vm8, %v1616_v32, %v1601_v28  ;;  %v1622_v60 = vsel %vm1266_vm4, %v1601_v28, %v1621_v22  ;;  %v14347_v21 = vsel %vm1617_vm8, %v1601_v28, %v1624_v54  ;;  %v1491_v53 = vpop.f32.mrf.mxu0  ;;  %v1515_v36 = vpop.f32.mrf.mxu1 }
 0x208   :  { %v1619_v17 = vrot.slane %v1618_v13, 2  ;;  %v1623_v57 = vrot.slane %v1622_v60, 4  ;;  %v9359_v51 = vrot.slane %v1614_v24, 9  ;;  %v1812_v31 = vsel %vm1617_vm8, %v1811_v23, %v14323_v25 }
 0x209   :  { %v1538_v20 = vadd.f32 %v1491_v53, %v1240_v6  ;;  %v1539_v3 = vadd.f32 %v1515_v36, %v1241_v14  ;;  %v14355_v37 = vrot.slane %v1812_v31, 2  ;;  %v9466_v6 = vor.u32 %v12641_v5, %v9465_v56 }
 0x20a   :  { %v9360_v38 = vrot.slane %v1619_v17, 9  ;;  %v9361_v58 = vrot.slane %v1623_v57, 9  ;;  %v1778_v1 = vmax.f32 %v1614_v24, %v9359_v51  ;;  %v9594_v14 = vor.u32 %v12673_v40, %v9593_v19  ;;  %v1446_v19 = vpop.f32.mrf.mxu2 }
 0x20b   :  { %v1568_v7 = vmax.f32 %v1535_v29, %v1538_v20  ;;  %v1569_v63 = vmax.f32 %v1536_v39, %v1539_v3  ;;  %16340 = vst [vmem:[#allocation27_spill] sm:$0xff] %v14355_v37  ;;  %2928 = vmatpush.bf16.msrb.mxu2 %v9466_v6 }
 0x20c   :  { %v1779_v62 = vmax.f32 %v1619_v17, %v9360_v38  ;;  %v1780_v2 = vmax.f32 %v1623_v57, %v9361_v58  ;;  %v1832_v59 = vadd.f32 %v14330_v50, %v1778_v1  ;;  %2942 = vmatpush.bf16.msrb.mxu3 %v9594_v14 }
 0x20d   :  { %v1602_v43 = vrot.slane %v1568_v7, 6  ;;  %v14358_v28 = vrot.slane %v1569_v63, 4 }
 0x20e   :  { %v1833_v23 = vadd.f32 %v14353_v49, %v1779_v62  ;;  %v1834_v12 = vadd.f32 %v14355_v37, %v1780_v2  ;;  %v1856_v33 = vmax.f32 %v1832_v59, 0.0 }
 0x20f   :  { %v1627_v32 = vsel %vm1612_vm5, %v14271_v35, %v1602_v43  ;;  %v1629_v22 = vsel %vm1615_vm6, %v14271_v35, %v1602_v43  ;;  %v1632_v54 = vsel %vm1620_vm7, %v14271_v35, %v1602_v43  ;;  %v1635_v24 = vsel %vm283_vm0, %v1602_v43, %v14271_v35 }
 0x210   :  { %v1857_v13 = vmax.f32 %v1833_v23, 0.0  ;;  %v1858_v60 = vmax.f32 %v1834_v12, 0.0  ;;  %v1896_v53 = vperm.slane %v1856_v33, 0  ;;  %v14372_v36 = vsel %vm1266_vm4, %v1627_v32, %v14358_v28 }
 0x211   :  { %v14376_v29 = vsel %vm1617_vm8, %v1629_v22, %v14358_v28  ;;  %v1897_v31 = vperm.slane %v1856_v33, 2  ;;  %v1898_v20 = vperm.slane %v1856_v33, 4  ;;  %v1626_v12 = vrot.slane %v14347_v21, 6 }
 0x212   :  { %v1899_v17 = vperm.slane %v1857_v13, 0  ;;  %v1900_v57 = vperm.slane %v1857_v13, 2  ;;  %v1901_v51 = vperm.slane %v1857_v13, 4  ;;  %v1902_v39 = vperm.slane %v1858_v60, 0 }
 0x213   :  { %v1903_v35 = vperm.slane %v1858_v60, 2  ;;  %v1904_v3 = vperm.slane %v1858_v60, 4  ;;  %v1992_v63 = vpack.c.bf16 %v1896_v53, %v1896_v53  ;;  %v1993_v62 = vpack.c.bf16 %v1897_v31, %v1897_v31 }
 0x214   :  { %v1995_v38 = vpack.c.bf16 %v1899_v17, %v1899_v17  ;;  %v1996_v58 = vpack.c.bf16 %v1900_v57, %v1900_v57  ;;  %v1997_v1 = vpack.c.bf16 %v1901_v51, %v1901_v51  ;;  %v1998_v7 = vpack.c.bf16 %v1902_v39, %v1902_v39 }
 0x215   :  { %v1999_v56 = vpack.c.bf16 %v1903_v35, %v1903_v35  ;;  %v2000_v5 = vpack.c.bf16 %v1904_v3, %v1904_v3  ;;  %v1994_v2 = vpack.c.bf16 %v1898_v20, %v1898_v20  ;;  %v3100_v13 = vunpack.c.l.b16 %v1992_v63 }
 0x216   :  { %v2301_v59 = vunpack.c.l.b16 %v1995_v38  ;;  %v2302_v40 = vunpack.c.l.b16 %v1996_v58  ;;  %v2303_v43 = vunpack.c.l.b16 %v1997_v1  ;;  %v14378_v6 = vunpack.c.l.b16 %v1998_v7  ;;  %v1494_v58 = vpop.f32.mrf.mxu0  ;;  %v1518_v1 = vpop.f32.mrf.mxu1  ;;  %v12671_v7 = vld [vmem:[#allocation7 + $0x4a4] sm:$0xf] }
 0x217   :  { %v14380_v14 = vunpack.c.l.b16 %v1999_v56  ;;  %v14382_v23 = vunpack.c.l.b16 %v2000_v5  ;;  %v3101_v60 = vunpack.c.l.b16 %v1993_v62  ;;  %v3102_v53 = vunpack.c.l.b16 %v1994_v2  ;;  %v9595_v5 = vld [vmem:[#allocation7 + $0x4b0] sm:$0xf0]  ;;  %v12703_v62 = vld [vmem:[#allocation7 + $0x5a4] sm:$0xf] }
 0x218   :  { %16341 = vst [vmem:[#allocation28_spill] sm:$0xff] %v14378_v6  ;;  %v2349_v33 = vrot.slane %v14378_v6, 7  ;;  %v3106_v17 = vrot.slane %v2301_v59, 7  ;;  %v3120_v57 = vrot.slane %v2302_v40, 7  ;;  %v3134_v31 = vrot.slane %v2303_v43, 7 }
 0x219   :  { %16342 = vst [vmem:[#allocation29_spill] sm:$0xff] %v14380_v14  ;;  %v2370_v32 = vrot.slane %v14380_v14, 7  ;;  %v2384_v22 = vrot.slane %v14382_v23, 7  ;;  %v9362_v3 = vrot.slane %v1626_v12, 9  ;;  %v14408_v63 = vsel %vm1266_vm4, %v14358_v28, %v1632_v54  ;;  %v9723_v2 = vld [vmem:[#allocation7 + $0x5b0] sm:$0xf0] }
 0x21a   :  { %16343 = vst [vmem:[#allocation47_spill] sm:$0xff] %v14382_v23  ;;  %v14389_v51 = vsel %vm2350_vm9, %v2349_v33, %v2301_v59  ;;  %v14398_v20 = vsel %vm2350_vm9, %v3106_v17, %v3100_v13  ;;  %v14401_v35 = vsel %vm2350_vm9, %v3120_v57, %v3101_v60  ;;  %v14404_v38 = vsel %vm2350_vm9, %v3134_v31, %v3102_v53  ;;  %v16351_v53 = vld [vmem:[#allocation30_spill] sm:$0xff]  ;;  %v12669_v31 = vld [vmem:[#allocation7 + $0x48c] sm:$0xf0]  ;;  %v9531_v14 = vld [vmem:[#allocation7 + $0x430] sm:$0xf0] }
 0x21b   :  { %v14392_v39 = vsel %vm2350_vm9, %v2370_v32, %v2302_v40  ;;  %v14395_v21 = vsel %vm2350_vm9, %v2384_v22, %v2303_v43  ;;  %16346 = vst [vmem:[#allocation50_spill] sm:$0xff] %v14398_v20  ;;  %v14412_v56 = vsel %vm1617_vm8, %v14358_v28, %v1635_v24  ;;  %v1542_v59 = vadd.f32 %v1446_v19, %v14229_v9  ;;  %v14415_v40 = vpop.f32.mrf.mxu2  ;;  %v9449_v32 = vld [vmem:[#allocation7 + $0x380] sm:$0xf]  ;;  %v12637_v22 = vld [vmem:[#allocation7 + $0x38c] sm:$0xf0] }
 0x21c   :  { %16344 = vst [vmem:[#allocation48_spill] sm:$0xff] %v14392_v39  ;;  %v1544_v43 = vadd.f32 %v1494_v58, %v14232_v10  ;;  %v1545_v33 = vadd.f32 %v1518_v1, %v14234_v11  ;;  %v14420_v54 = vrot.slane %v14355_v37, 1  ;;  %v9598_v13 = vor.u32 %v12671_v7, %v9595_v5  ;;  %v9577_v28 = vld [vmem:[#allocation7 + $0x480] sm:$0xf]  ;;  %v16350_v24 = vld [vmem:[#allocation24_spill] sm:$0xff] }
 0x21d   :  { %16345 = vst [vmem:[#allocation49_spill] sm:$0xff] %v14395_v21  ;;  %v9726_v60 = vor.u32 %v12703_v62, %v9723_v2  ;;  %v592_v17 = vadd.f32 %v16351_v53, %v16350_v24  ;;  %v1781_v57 = vmax.f32 %v1626_v12, %v9362_v3  ;;  %v9579_v10 = vld [vmem:[#allocation7 + $0x490] sm:$0xf0]  ;;  %v16352_v58 = vld [vmem:[#allocation25_spill] sm:$0xff]  ;;  %v1814_v1 = vsel %vm1620_vm7, %v14307_v18, %v14309_v55  ;;  %v16358_v53 = vld [vmem:[#allocation39_spill] sm:$0xff] }
 0x21e   :  { %16347 = vst [vmem:[#allocation51_spill] sm:$0xff] %v14401_v35  ;;  %v1571_v9 = vmax.f32 %v14269_v15, %v1544_v43  ;;  %v1572_v19 = vmax.f32 %v1542_v59, %v1545_v33  ;;  %v597_v11 = vadd.f32 %v14022_v0, %v16352_v58  ;;  %2984 = vmatpush.bf16.msra.mxu0 %v9598_v13  ;;  %v1631_v43 = vrot.slane %v14376_v29, 2  ;;  %v16353_v29 = vld [vmem:[#allocation36_spill] sm:$0xff]  ;;  %v9753_v6 = vld [vmem:[#allocation7 + $0x5e0] sm:$0xf] }
 0x21f   :  { %16348 = vst [vmem:[#allocation52_spill] sm:$0xff] %v14404_v38  ;;  %v12667_v38 = vld [vmem:[#allocation7 + $0x484] sm:$0xf]  ;;  %2998 = vmatpush.bf16.msra.mxu1 %v9726_v60  ;;  %v9450_v7 = vor.u32 %v12637_v22, %v9449_v32  ;;  %v1817_v12 = vsel %vm283_vm0, %v14309_v55, %v14307_v18  ;;  %v952_v15 = vadd.f32 %v14106_v4, %v592_v17  ;;  %v9363_v18 = vrot.slane %v14372_v36, 9  ;;  %v16355_v22 = vld [vmem:[#allocation37_spill] sm:$0xff]  ;;  %v16356_v60 = vld [vmem:[#allocation32_spill] sm:$0xff] }
 0x220   :  { %16349 = vst [vmem:[#allocation53_spill] sm:$0xff] %v14420_v54  ;;  %v1604_v3 = vrot.slane %v1571_v9, 6  ;;  %v964_v5 = vadd.f32 %v14144_v47, %v597_v11  ;;  %v9578_v62 = vor.u32 %v12669_v31, %v9577_v28  ;;  %v9582_v2 = vor.u32 %v12667_v38, %v9579_v10  ;;  %v16357_v28 = vld [vmem:[#allocation38_spill] sm:$0xff]  ;;  %v16360_v9 = vld [vmem:[#allocation40_spill] sm:$0xff]  ;;  %v16361_v10 = vld [vmem:[#allocation33_spill] sm:$0xff] }
 0x221   :  { %2929 = vmatpush.bf16.msrb.mxu2 %v9450_v7  ;;  %v954_v0 = vadd.f32 %v14180_v16, %v13999_v30  ;;  %v1835_v59 = vadd.f32 %v14420_v54, %v1781_v57  ;;  %v1815_v33 = vsel %vm1266_vm4, %v14323_v25, %v1814_v1  ;;  %v1818_v4 = vsel %vm1617_vm8, %v14323_v25, %v1817_v12  ;;  %v16354_v25 = vld [vmem:[#allocation31_spill] sm:$0xff]  ;;  %v16362_v1 = vld [vmem:[#allocation34_spill] sm:$0xff] }
 0x222   :  { %v1638_v47 = vsel %vm1612_vm5, %v14279_v27, %v1604_v3  ;;  %v1640_v55 = vsel %vm1615_vm6, %v14279_v27, %v1604_v3  ;;  %2943 = vmatpush.bf16.msrb.mxu3 %v9578_v62  ;;  %2985 = vmatpush.bf16.msra.mxu0 %v9582_v2  ;;  %v955_v30 = vadd.f32 %v14182_v26, %v14002_v48  ;;  %v1634_v32 = vrot.slane %v14408_v63, 4  ;;  %v16364_v12 = vld [vmem:[#allocation43_spill] sm:$0xff] }
 0x223   :  { %v1249_v16 = vadd.f32 %v14186_v61, %v14100_v42  ;;  %v966_v38 = vadd.f32 %v16353_v29, %v14027_v44  ;;  %v967_v13 = vadd.f32 %v16355_v22, %v16354_v25  ;;  %v14459_v24 = vadd.f32 %v16357_v28, %v16356_v60  ;;  %v14463_v48 = vpop.f32.mrf.mxu2  ;;  %v9707_v25 = vld [vmem:[#allocation7 + $0x590] sm:$0xf0]  ;;  %v1520_v60 = vpop.f32.mrf.mxu1  ;;  %v12633_v28 = vld [vmem:[#allocation7 + $0x36c] sm:$0xf0] }
 0x224   :  { %v1250_v17 = vadd.f32 %v16358_v53, %v952_v15  ;;  %v1637_v57 = vrot.slane %v14412_v56, 6  ;;  %v1859_v26 = vmax.f32 %v1835_v59, 0.0  ;;  %v9364_v42 = vrot.slane %v1631_v43, 9  ;;  %v16363_v56 = vld [vmem:[#allocation42_spill] sm:$0xff] }
 0x225   :  { %v14465_v61 = vrot.slane %v1815_v33, 4  ;;  %v14467_v44 = vrot.slane %v1818_v4, 6  ;;  %v1252_v63 = vadd.f32 %v14263_v46, %v954_v0  ;;  %v1253_v31 = vadd.f32 %v16360_v9, %v955_v30  ;;  %v16365_v46 = vld [vmem:[#allocation44_spill] sm:$0xff] }
 0x226   :  { %v14473_v58 = vadd.f32 %v14273_v45, %v16361_v10  ;;  %v1782_v11 = vmax.f32 %v14372_v36, %v9363_v18  ;;  %v14478_v7 = vadd.f32 %v16363_v56, %v16362_v1  ;;  %v14481_v15 = vadd.f32 %v16364_v12, %v964_v5  ;;  %v12665_v9 = vld [vmem:[#allocation7 + $0x46c] sm:$0xf0]  ;;  %v9563_v1 = vld [vmem:[#allocation7 + $0x470] sm:$0xf0] }
 0x227   :  { %16359 = vst [vmem:[#allocation24_spill] sm:$0xff] %v14467_v44  ;;  %v9365_v62 = vrot.slane %v1634_v32, 9  ;;  %v1605_v2 = vrot.slane %v1572_v19, 4  ;;  %v14484_v59 = vadd.f32 %v14286_v52, %v966_v38  ;;  %v14487_v0 = vadd.f32 %v16365_v46, %v967_v13  ;;  %v12699_v38 = vld [vmem:[#allocation7 + $0x584] sm:$0xf]  ;;  %v1496_v13 = vpop.f32.mrf.mxu0 }
 0x228   :  { %v1547_v45 = vadd.f32 %v14275_v34, %v1249_v16  ;;  %v9366_v33 = vrot.slane %v1637_v57, 9  ;;  %v1905_v4 = vperm.slane %v1859_v26, 0  ;;  %v1783_v36 = vmax.f32 %v1631_v43, %v9364_v42  ;;  %v9561_v42 = vld [vmem:[#allocation7 + $0x460] sm:$0xf]  ;;  %v12695_v46 = vld [vmem:[#allocation7 + $0x564] sm:$0xf] }
 0x229   :  { %v14491_v18 = vrot.slane %v14465_v61, 1  ;;  %v14494_v30 = vrot.slane %v14467_v44, 1  ;;  %v14497_v5 = vadd.f32 %v14415_v40, %v1250_v17  ;;  %v1906_v19 = vperm.slane %v1859_v26, 2  ;;  %v9433_v40 = vld [vmem:[#allocation7 + $0x360] sm:$0xf] }
 0x22a   :  { %v1907_v52 = vperm.slane %v1859_v26, 4  ;;  %v1836_v29 = vadd.f32 %v14465_v61, %v1782_v11  ;;  %v1784_v22 = vmax.f32 %v1634_v32, %v9365_v62  ;;  %v1643_v34 = vsel %vm1620_vm7, %v14279_v27, %v1604_v3 }
 0x22b   :  { %16366 = vst [vmem:[#allocation30_spill] sm:$0xff] %v14491_v18  ;;  %v1646_v43 = vsel %vm283_vm0, %v1604_v3, %v14279_v27  ;;  %v14505_v16 = vsel %vm1266_vm4, %v1638_v47, %v1605_v2  ;;  %v1785_v53 = vmax.f32 %v1637_v57, %v9366_v33  ;;  %v14508_v17 = vsel %vm1617_vm8, %v1640_v55, %v1605_v2  ;;  %v16371_v27 = vld [vmem:[#allocation35_spill] sm:$0xff]  ;;  %v12663_v57 = vld [vmem:[#allocation7 + $0x464] sm:$0xf]  ;;  %v9691_v33 = vld [vmem:[#allocation7 + $0x570] sm:$0xf0] }
 0x22c   :  { %16367 = vst [vmem:[#allocation25_spill] sm:$0xff] %v14494_v30  ;;  %v14511_v26 = vsel %vm1266_vm4, %v1605_v2, %v1643_v34  ;;  %v14514_v32 = vsel %vm1617_vm8, %v1605_v2, %v1646_v43  ;;  %v14518_v3 = vadd.f32 %v14284_v8, %v16371_v27  ;;  %v2001_v47 = vpack.c.bf16 %v1905_v4, %v1905_v4  ;;  %v1453_v2 = vpop.f32.mrf.mxu2  ;;  %v9417_v27 = vld [vmem:[#allocation7 + $0x340] sm:$0xf]  ;;  %v12629_v4 = vld [vmem:[#allocation7 + $0x34c] sm:$0xf0] }
 0x22d   :  { %16368 = vst [vmem:[#allocation36_spill] sm:$0xff] %v14508_v17  ;;  %v1837_v10 = vadd.f32 %v14491_v18, %v1783_v36  ;;  %v9710_v11 = vor.u32 %v12699_v38, %v9707_v25  ;;  %v2002_v55 = vpack.c.bf16 %v1906_v19, %v1906_v19  ;;  %v1550_v56 = vadd.f32 %v1496_v13, %v1252_v63  ;;  %v12661_v19 = vld [vmem:[#allocation7 + $0x44c] sm:$0xf0]  ;;  %v16372_v13 = vld [vmem:[#allocation41_spill] sm:$0xff] }
 0x22e   :  { %16369 = vst [vmem:[#allocation31_spill] sm:$0xff] %v14511_v26  ;;  %v1551_v12 = vadd.f32 %v1520_v60, %v1253_v31  ;;  %v9434_v62 = vor.u32 %v12633_v28, %v9433_v40  ;;  %v2003_v34 = vpack.c.bf16 %v1907_v52, %v1907_v52  ;;  %v1838_v43 = vadd.f32 %v14467_v44, %v1784_v22  ;;  %v9545_v31 = vld [vmem:[#allocation7 + $0x440] sm:$0xf] }
 0x22f   :  { %16370 = vst [vmem:[#allocation37_spill] sm:$0xff] %v14514_v32  ;;  %v1860_v32 = vmax.f32 %v1836_v29, 0.0  ;;  %2999 = vmatpush.bf16.msra.mxu1 %v9710_v11  ;;  %v9562_v8 = vor.u32 %v12665_v9, %v9561_v42  ;;  %v1839_v36 = vadd.f32 %v14494_v30, %v1785_v53  ;;  %v1574_v38 = vmax.f32 %v1547_v45, %v1550_v56  ;;  %v16373_v52 = vld [vmem:[#allocation46_spill] sm:$0xff] }
 0x230   :  { %v1575_v25 = vmax.f32 %v14497_v5, %v1551_v12  ;;  %2930 = vmatpush.bf16.msrb.mxu2 %v9434_v62  ;;  %v9566_v63 = vor.u32 %v12663_v57, %v9563_v1  ;;  %v14526_v60 = vadd.f32 %v14463_v48, %v16372_v13  ;;  %v14530_v29 = vadd.f32 %v16373_v52, %v14459_v24  ;;  %v12659_v13 = vld [vmem:[#allocation7 + $0x444] sm:$0xf]  ;;  %v9547_v52 = vld [vmem:[#allocation7 + $0x450] sm:$0xf0] }
 0x231   :  { %v1861_v22 = vmax.f32 %v1837_v10, 0.0  ;;  %2944 = vmatpush.bf16.msrb.mxu3 %v9562_v8  ;;  %v9694_v40 = vor.u32 %v12695_v46, %v9691_v33  ;;  %v14533_v28 = vadd.f32 %v1453_v2, %v14481_v15  ;;  %v14535_v45 = vunpack.c.l.b16 %v2001_v47  ;;  %v16376_v15 = vld [vmem:[#allocation45_spill] sm:$0xff]  ;;  %v9675_v62 = vld [vmem:[#allocation7 + $0x550] sm:$0xf0]  ;;  %v1499_v10 = vpop.f32.mrf.mxu0 }
 0x232   :  { %v1606_v5 = vrot.slane %v1574_v38, 6  ;;  %2986 = vmatpush.bf16.msra.mxu0 %v9566_v63  ;;  %v9418_v53 = vor.u32 %v12629_v4, %v9417_v27  ;;  %v14537_v42 = vunpack.c.l.b16 %v2002_v55  ;;  %v14539_v9 = vmax.f32 %v1838_v43, 0.0  ;;  %v1523_v38 = vpop.f32.mrf.mxu1  ;;  %v12625_v4 = vld [vmem:[#allocation7 + $0x32c] sm:$0xf0]  ;;  %v9529_v43 = vld [vmem:[#allocation7 + $0x420] sm:$0xf] }
 0x233   :  { %v1908_v48 = vperm.slane %v1860_v32, 0  ;;  %3000 = vmatpush.bf16.msra.mxu1 %v9694_v40  ;;  %v9546_v11 = vor.u32 %v12661_v19, %v9545_v31  ;;  %v14541_v24 = vunpack.c.l.b16 %v2003_v34  ;;  %v14544_v57 = vmax.f32 %v1839_v36, 0.0  ;;  %v9401_v36 = vld [vmem:[#allocation7 + $0x320] sm:$0xf] }
 0x234   :  { %16374 = vst [vmem:[#allocation32_spill] sm:$0xff] %v14537_v42  ;;  %v1649_v47 = vsel %vm1612_vm5, %v16376_v15, %v1606_v5  ;;  %2931 = vmatpush.bf16.msrb.mxu2 %v9418_v53  ;;  %v1909_v1 = vperm.slane %v1860_v32, 2  ;;  %v1910_v56 = vperm.slane %v1860_v32, 4  ;;  %v1911_v12 = vperm.slane %v1861_v22, 0 }
 0x235   :  { %16375 = vst [vmem:[#allocation38_spill] sm:$0xff] %v14541_v24  ;;  %v1651_v55 = vsel %vm1615_vm6, %v16376_v15, %v1606_v5  ;;  %2945 = vmatpush.bf16.msrb.mxu3 %v9546_v11  ;;  %v1912_v46 = vperm.slane %v1861_v22, 2  ;;  %v1654_v33 = vsel %vm1620_vm7, %v16376_v15, %v1606_v5  ;;  %v1607_v2 = vrot.slane %v1575_v25, 4  ;;  %v12691_v11 = vld [vmem:[#allocation7 + $0x544] sm:$0xf] }
 0x236   :  { %v1913_v34 = vperm.slane %v1861_v22, 4  ;;  %v14554_v8 = vpack.c.bf16 %v1908_v48, %v1908_v48  ;;  %v9367_v27 = vrot.slane %v14505_v16, 9  ;;  %v1915_v32 = vperm.slane %v14539_v9, 2 }
 0x237   :  { %v14562_v31 = vpack.c.bf16 %v1909_v1, %v1909_v1  ;;  %v14564_v25 = vpack.c.bf16 %v1910_v56, %v1910_v56  ;;  %v14566_v19 = vpack.c.bf16 %v1911_v12, %v1911_v12  ;;  %v1657_v22 = vsel %vm283_vm0, %v1606_v5, %v16376_v15 }
 0x238   :  { %v1650_v40 = vsel %vm1266_vm4, %v1649_v47, %v1607_v2  ;;  %v1652_v53 = vsel %vm1617_vm8, %v1651_v55, %v1607_v2  ;;  %v1655_v48 = vsel %vm1266_vm4, %v1607_v2, %v1654_v33  ;;  %v14573_v1 = vpack.c.bf16 %v1912_v46, %v1912_v46  ;;  %v12657_v33 = vld [vmem:[#allocation7 + $0x42c] sm:$0xf0] }
 0x239   :  { %v14575_v56 = vpack.c.bf16 %v1913_v34, %v1913_v34  ;;  %v1786_v12 = vmax.f32 %v14505_v16, %v9367_v27  ;;  %v1653_v63 = vrot.slane %v1652_v53, 2  ;;  %v1656_v5 = vrot.slane %v1655_v48, 4  ;;  %v12655_v34 = vld [vmem:[#allocation7 + $0x424] sm:$0xf] }
 0x23a   :  { %v1658_v15 = vsel %vm1617_vm8, %v1607_v2, %v1657_v22  ;;  %v9371_v47 = vrot.slane %v1650_v40, 9  ;;  %v9550_v55 = vor.u32 %v12659_v13, %v9547_v52  ;;  %v9678_v23 = vor.u32 %v12691_v11, %v9675_v62  ;;  %v12687_v48 = vld [vmem:[#allocation7 + $0x524] sm:$0xf]  ;;  %v9659_v2 = vld [vmem:[#allocation7 + $0x530] sm:$0xf0] }
 0x23b   :  { %v1659_v26 = vrot.slane %v1658_v15, 6  ;;  %v9372_v17 = vrot.slane %v1653_v63, 9  ;;  %v1556_v46 = vadd.f32 %v1499_v10, %v14473_v58  ;;  %v9373_v35 = vrot.slane %v1656_v5, 9  ;;  %v9385_v62 = vld [vmem:[#allocation7 + $0x300] sm:$0xf] }
 0x23c   :  { %v1790_v16 = vmax.f32 %v1650_v40, %v9371_v47  ;;  %2987 = vmatpush.bf16.msra.mxu0 %v9550_v55  ;;  %v14581_v27 = vadd.f32 %v1523_v38, %v14478_v7  ;;  %v9402_v53 = vor.u32 %v12625_v4, %v9401_v36  ;;  %3001 = vmatpush.bf16.msra.mxu1 %v9678_v23  ;;  %v12621_v11 = vld [vmem:[#allocation7 + $0x30c] sm:$0xf0]  ;;  %v16379_v55 = vperm.slane %v14539_v9, 4 }
 0x23d   :  { %v9374_v22 = vrot.slane %v1659_v26, 9  ;;  %v1791_v13 = vmax.f32 %v1653_v63, %v9372_v17  ;;  %v1577_v52 = vmax.f32 %v14518_v3, %v1556_v46  ;;  %v9530_v15 = vor.u32 %v12657_v33, %v9529_v43 }
 0x23e   :  { %v1792_v58 = vmax.f32 %v1656_v5, %v9373_v35  ;;  %v1844_v10 = vadd.f32 %v14465_v61, %v1790_v16  ;;  %v1578_v40 = vmax.f32 %v14526_v60, %v14581_v27  ;;  %2932 = vmatpush.bf16.msrb.mxu2 %v9402_v53  ;;  %v9534_v7 = vor.u32 %v12655_v34, %v9531_v14  ;;  %v16378_v14 = vld [vmem:[#allocation26_spill] sm:$0xff] }
 0x23f   :  { %v1840_v4 = vadd.f32 %v14330_v50, %v1786_v12  ;;  %v1845_v36 = vadd.f32 %v14491_v18, %v1791_v13  ;;  %v14589_v38 = vrot.slane %v1577_v52, 6  ;;  %2946 = vmatpush.bf16.msrb.mxu3 %v9530_v15  ;;  %v9662_v23 = vor.u32 %v12687_v48, %v9659_v2 }
 0x240   :  { %v16377_v17 = vperm.slane %v14539_v9, 0  ;;  %v2011_v35 = vpack.c.bf16 %v1915_v32, %v1915_v32  ;;  %v1868_v43 = vmax.f32 %v1844_v10, 0.0  ;;  %2988 = vmatpush.bf16.msra.mxu0 %v9534_v7  ;;  %v9386_v63 = vor.u32 %v12621_v11, %v9385_v62 }
 0x241   :  { %v1793_v5 = vmax.f32 %v1659_v26, %v9374_v22  ;;  %v1869_v60 = vmax.f32 %v1845_v36, 0.0  ;;  %v14597_v12 = vsel %vm1612_vm5, %v16378_v14, %v14589_v38  ;;  %v14602_v47 = vsel %vm1615_vm6, %v16378_v14, %v14589_v38  ;;  %3002 = vmatpush.bf16.msra.mxu1 %v9662_v23 }
 0x242   :  { %v2010_v3 = vpack.c.bf16 %v16377_v17, %v16377_v17  ;;  %v14607_v32 = vpack.c.bf16 %v16379_v55, %v16379_v55  ;;  %v16380_v33 = vperm.slane %v14544_v57, 0  ;;  %v16381_v46 = vperm.slane %v14544_v57, 2  ;;  %2933 = vmatpush.bf16.msrb.mxu2 %v9386_v63 }
 0x243   :  { %v1846_v16 = vadd.f32 %v14467_v44, %v1792_v58  ;;  %v14620_v27 = vmax.f32 %v1840_v4, 0.0  ;;  %v1923_v53 = vperm.slane %v1869_v60, 0  ;;  %v1924_v9 = vperm.slane %v1869_v60, 2  ;;  %v12651_v44 = vld [vmem:[#allocation7 + $0x404] sm:$0xf] }
 0x244   :  { %v14612_v26 = vpack.c.bf16 %v16380_v33, %v16380_v33  ;;  %v14617_v34 = vpack.c.bf16 %v16381_v46, %v16381_v46  ;;  %v1925_v48 = vperm.slane %v1869_v60, 4  ;;  %v16382_v2 = vperm.slane %v14544_v57, 4  ;;  %v9643_v33 = vld [vmem:[#allocation7 + $0x510] sm:$0xf0] }
 0x245   :  { %v14628_v13 = vunpack.c.l.b16 %v14554_v8  ;;  %v1920_v52 = vperm.slane %v1868_v43, 0  ;;  %v1921_v15 = vperm.slane %v1868_v43, 2  ;;  %v14631_v62 = vunpack.c.l.b16 %v14562_v31 }
 0x246   :  { %v14625_v22 = vpack.c.bf16 %v16382_v2, %v16382_v2  ;;  %v14634_v11 = vunpack.c.l.b16 %v14564_v25  ;;  %v1847_v58 = vadd.f32 %v14494_v30, %v1793_v5  ;;  %v1922_v10 = vperm.slane %v1868_v43, 4  ;;  %v12713_v30 = vld [vmem:[#allocation7 + $0x5ec] sm:$0xf0] }
 0x247   :  { %16383 = vst [vmem:[#allocation39_spill] sm:$0xff] %v14631_v62  ;;  %v14637_v7 = vmax.f32 %v1846_v16, 0.0  ;;  %v14639_v57 = vpack.c.bf16 %v1923_v53, %v1923_v53  ;;  %v14641_v4 = vpack.c.bf16 %v1924_v9, %v1924_v9  ;;  %v14643_v36 = vpack.c.bf16 %v1925_v48, %v1925_v48 }
 0x248   :  { %16384 = vst [vmem:[#allocation40_spill] sm:$0xff] %v14634_v11  ;;  %v14646_v8 = vunpack.c.l.b16 %v14566_v19  ;;  %v14649_v31 = vunpack.c.l.b16 %v14573_v1  ;;  %v2138_v25 = vperm.slane %v14620_v27, 0  ;;  %v2139_v23 = vperm.slane %v14620_v27, 2 }
 0x249   :  { %16385 = vst [vmem:[#allocation33_spill] sm:$0xff] %v14641_v4  ;;  %v2016_v17 = vpack.c.bf16 %v1920_v52, %v1920_v52  ;;  %v2017_v43 = vpack.c.bf16 %v1921_v15, %v1921_v15  ;;  %v16241_v63 = vunpack.c.l.b16 %v14639_v57  ;;  %v16242_v5 = vunpack.c.l.b16 %v14641_v4  ;;  %v9737_v4 = vld [vmem:[#allocation7 + $0x5c0] sm:$0xf] }
 0x24a   :  { %16386 = vst [vmem:[#allocation34_spill] sm:$0xff] %v14643_v36  ;;  %v14656_v60 = vunpack.c.l.b16 %v14575_v56  ;;  %v14658_v55 = vmax.f32 %v1847_v58, 0.0  ;;  %v2018_v19 = vpack.c.bf16 %v1922_v10, %v1922_v10  ;;  %v14661_v1 = vunpack.c.l.b16 %v2010_v3  ;;  %v12653_v10 = vld [vmem:[#allocation7 + $0x40c] sm:$0xf0] }
 0x24b   :  { %16387 = vst [vmem:[#allocation42_spill] sm:$0xff] %v14649_v31  ;;  %v14663_v46 = vunpack.c.l.b16 %v2011_v35  ;;  %v1926_v16 = vperm.slane %v14637_v7, 0  ;;  %v1927_v53 = vperm.slane %v14637_v7, 2  ;;  %v14668_v48 = vpack.c.bf16 %v2138_v25, %v2138_v25  ;;  %v9513_v35 = vld [vmem:[#allocation7 + $0x400] sm:$0xf]  ;;  %v1501_v31 = vpop.f32.mrf.mxu0 }
 0x24c   :  { %16388 = vst [vmem:[#allocation43_spill] sm:$0xff] %v14656_v60  ;;  %v14670_v2 = vpack.c.bf16 %v2139_v23, %v2139_v23  ;;  %v1609_v56 = vrot.slane %v1578_v40, 4  ;;  %v3103_v52 = vunpack.c.l.b16 %v2016_v17  ;;  %v3104_v15 = vunpack.c.l.b16 %v2017_v43  ;;  %v9515_v40 = vld [vmem:[#allocation7 + $0x410] sm:$0xf0]  ;;  %v12683_v17 = vld [vmem:[#allocation7 + $0x504] sm:$0xf] }
 0x24d   :  { %16389 = vst [vmem:[#allocation44_spill] sm:$0xff] %v14663_v46  ;;  %v3148_v58 = vrot.slane %v16241_v63, 7  ;;  %v3162_v3 = vrot.slane %v16242_v5, 7  ;;  %v3105_v9 = vunpack.c.l.b16 %v2018_v19  ;;  %v16390_v25 = vunpack.c.l.b16 %v14643_v36 }
 0x24e   :  { %v14680_v43 = vpack.c.bf16 %v1926_v16, %v1926_v16  ;;  %v14682_v18 = vpack.c.bf16 %v1927_v53, %v1927_v53  ;;  %v1668_v16 = vsel %vm283_vm0, %v14589_v38, %v16378_v14  ;;  %v1661_v53 = vsel %vm1266_vm4, %v14597_v12, %v1609_v56 }
 0x24f   :  { %v3176_v23 = vrot.slane %v16390_v25, 7  ;;  %v14685_v63 = vsel %vm2350_vm9, %v3148_v58, %v3103_v52  ;;  %v14688_v5 = vsel %vm2350_vm9, %v3162_v3, %v3104_v15  ;;  %v1665_v25 = vsel %vm1620_vm7, %v16378_v14, %v14589_v38  ;;  %v12647_v52 = vld [vmem:[#allocation7 + $0x3e4] sm:$0xf]  ;;  %v9499_v15 = vld [vmem:[#allocation7 + $0x3f0] sm:$0xf0] }
 0x250   :  { %16391 = vst [vmem:[#allocation35_spill] sm:$0xff] %v14685_v63  ;;  %v9761_v58 = vld [vmem:[#allocation7 + $0x5e8] sm:$0xf]  ;;  %v1663_v3 = vsel %vm1617_vm8, %v14602_v47, %v1609_v56  ;;  %v12648_v63 = vld [vmem:[#allocation7 + $0x3ec] sm:$0xf]  ;;  %v9514_v38 = vor.u32 %v12653_v10, %v9513_v35  ;;  %v9518_v12 = vor.u32 %v12651_v44, %v9515_v40  ;;  %v9646_v11 = vor.u32 %v12683_v17, %v9643_v33 }
 0x251   :  { %16392 = vst [vmem:[#allocation41_spill] sm:$0xff] %v14688_v5  ;;  %v14691_v19 = vsel %vm2350_vm9, %v3176_v23, %v3105_v9  ;;  %v1666_v9 = vsel %vm1266_vm4, %v1609_v56, %v1665_v25  ;;  %v1669_v23 = vsel %vm1617_vm8, %v1609_v56, %v1668_v16  ;;  %v12714_v5 = vld [vmem:[#allocation7 + $0x5f4] sm:$0xf0]  ;;  %v1664_v20 = vrot.slane %v1663_v3, 2  ;;  %v9507_v14 = vld [vmem:[#allocation7 + $0x3f8] sm:$0xf0]  ;;  %v1525_v56 = vpop.f32.mrf.mxu1 }
 0x252   :  { %16393 = vst [vmem:[#allocation46_spill] sm:$0xff] %v14691_v19  ;;  %v9375_v19 = vrot.slane %v1661_v53, 9  ;;  %v1667_v36 = vrot.slane %v1666_v9, 4  ;;  %v1670_v21 = vrot.slane %v1669_v23, 6  ;;  %v9754_v24 = vor.u32 %v12713_v30, %v9753_v6  ;;  %2947 = vmatpush.bf16.msrb.mxu3 %v9514_v38  ;;  %v12709_v16 = vld [vmem:[#allocation7 + $0x5cc] sm:$0xf0]  ;;  %2989 = vmatpush.bf16.msra.mxu0 %v9518_v12 }
 0x253   :  { %v9376_v39 = vrot.slane %v1664_v20, 9  ;;  %v9502_v25 = vor.u32 %v12647_v52, %v9499_v15  ;;  %v1930_v62 = vperm.slane %v14658_v55, 2  ;;  %3003 = vmatpush.bf16.msra.mxu1 %v9646_v11  ;;  %v9762_v35 = vor.u32 %v12714_v5, %v9761_v58  ;;  %v12643_v44 = vld [vmem:[#allocation7 + $0x3c4] sm:$0xf]  ;;  %v9483_v33 = vld [vmem:[#allocation7 + $0x3d0] sm:$0xf0] }
 0x254   :  { %v1794_v60 = vmax.f32 %v1661_v53, %v9375_v19  ;;  %v9377_v46 = vrot.slane %v1667_v36, 9  ;;  %v9378_v47 = vrot.slane %v1670_v21, 9  ;;  %v9510_v10 = vor.u32 %v12648_v63, %v9507_v14  ;;  %2954 = vmatpush.bf16.msra.mxu2 %v9754_v24  ;;  %v12701_v38 = vld [vmem:[#allocation7 + $0x58c] sm:$0xf0] }
 0x255   :  { %v1931_v6 = vperm.slane %v14658_v55, 4  ;;  %v1795_v30 = vmax.f32 %v1664_v20, %v9376_v39  ;;  %v14709_v19 = vunpack.c.l.b16 %v14607_v32  ;;  %v14713_v11 = vadd.f32 %v1525_v56, %v14487_v0 }
 0x256   :  { %v1848_v3 = vadd.f32 %v14330_v50, %v1794_v60  ;;  %v1796_v40 = vmax.f32 %v1667_v36, %v9377_v46  ;;  %v1797_v17 = vmax.f32 %v1670_v21, %v9378_v47  ;;  %2968 = vmatpush.bf16.msra.mxu3 %v9502_v25  ;;  %3038 = vmatpush.bf16.msrb.mxu0 %v9762_v35  ;;  %v16395_v5 = vperm.slane %v14620_v27, 4  ;;  %v9745_v47 = vld [vmem:[#allocation7 + $0x5c8] sm:$0xf]  ;;  %v12710_v25 = vld [vmem:[#allocation7 + $0x5d4] sm:$0xf0] }
 0x257   :  { %16394 = vst [vmem:[#allocation45_spill] sm:$0xff] %v14709_v19  ;;  %3052 = vmatpush.bf16.msrb.mxu1 %v9510_v10  ;;  %v1562_v50 = vadd.f32 %v1501_v31, %v14484_v59  ;;  %v9738_v63 = vor.u32 %v12709_v16, %v9737_v4  ;;  %v16396_v39 = vperm.slane %v14637_v7, 4  ;;  %v16397_v20 = vperm.slane %v14658_v55, 0  ;;  %v12644_v10 = vld [vmem:[#allocation7 + $0x3cc] sm:$0xf] }
 0x258   :  { %v2152_v60 = vpack.c.bf16 %v16395_v5, %v16395_v5  ;;  %v9486_v32 = vor.u32 %v12643_v44, %v9483_v33  ;;  %v2026_v36 = vpack.c.bf16 %v1930_v62, %v1930_v62  ;;  %v1849_v59 = vadd.f32 %v14353_v49, %v1795_v30  ;;  %v9491_v44 = vld [vmem:[#allocation7 + $0x3d8] sm:$0xf0]  ;;  %v9721_v33 = vld [vmem:[#allocation7 + $0x5a0] sm:$0xf]  ;;  %v12639_v30 = vld [vmem:[#allocation7 + $0x3a4] sm:$0xf] }
 0x259   :  { %v2024_v21 = vpack.c.bf16 %v16396_v39, %v16396_v39  ;;  %v2025_v24 = vpack.c.bf16 %v16397_v20, %v16397_v20  ;;  %v14725_v31 = vmax.f32 %v1848_v3, 0.0  ;;  %v1580_v0 = vmax.f32 %v14530_v29, %v1562_v50  ;;  %2955 = vmatpush.bf16.msra.mxu2 %v9738_v63  ;;  %v9467_v63 = vld [vmem:[#allocation7 + $0x3b0] sm:$0xf0]  ;;  %v9729_v5 = vld [vmem:[#allocation7 + $0x5a8] sm:$0xf] }
 0x25a   :  { %v14729_v27 = vunpack.c.l.b16 %v14612_v26  ;;  %v2027_v4 = vpack.c.bf16 %v1931_v6, %v1931_v6  ;;  %v1850_v7 = vadd.f32 %v14355_v37, %v1796_v40  ;;  %v1581_v46 = vmax.f32 %v14533_v28, %v14713_v11  ;;  %2969 = vmatpush.bf16.msra.mxu3 %v9486_v32  ;;  %v12705_v6 = vld [vmem:[#allocation7 + $0x5ac] sm:$0xf0] }
 0x25b   :  { %v14735_v55 = vunpack.c.l.b16 %v14617_v34  ;;  %v14738_v62 = vunpack.c.l.b16 %v14680_v43  ;;  %v14741_v53 = vunpack.c.l.b16 %v14682_v18  ;;  %v1851_v29 = vadd.f32 %v14420_v54, %v1797_v17  ;;  %v9451_v54 = vld [vmem:[#allocation7 + $0x390] sm:$0xf0] }
 0x25c   :  { %v14745_v26 = vunpack.c.l.b16 %v14625_v22  ;;  %v14748_v52 = vunpack.c.l.b16 %v14668_v48  ;;  %v14751_v28 = vunpack.c.l.b16 %v14670_v2  ;;  %v14753_v15 = vunpack.c.l.b16 %v2024_v21  ;;  %v12635_v2 = vld [vmem:[#allocation7 + $0x384] sm:$0xf] }
 0x25d   :  { %v14755_v34 = vunpack.c.l.b16 %v2152_v60  ;;  %v14757_v43 = vmax.f32 %v1849_v59, 0.0  ;;  %v1932_v18 = vperm.slane %v14725_v31, 0  ;;  %v1933_v58 = vperm.slane %v14725_v31, 2 }
 0x25e   :  { %16398 = vst [vmem:[#allocation26_spill] sm:$0xff] %v14745_v26  ;;  %v14761_v9 = vunpack.c.l.b16 %v2025_v24  ;;  %v14763_v22 = vunpack.c.l.b16 %v2026_v36  ;;  %v14765_v23 = vunpack.c.l.b16 %v2027_v4  ;;  %v14767_v48 = vmax.f32 %v1850_v7, 0.0  ;;  %v12706_v24 = vld [vmem:[#allocation7 + $0x5b4] sm:$0xf0] }
 0x25f   :  { %16399 = vst [vmem:[#allocation54_spill] sm:$0xff] %v14748_v52  ;;  %v14771_v14 = vmax.f32 %v1851_v29, 0.0  ;;  %v1610_v12 = vrot.slane %v1580_v0, 6  ;;  %v1934_v35 = vperm.slane %v14725_v31, 4  ;;  %v1935_v40 = vperm.slane %v14757_v43, 0 }
 0x260   :  { %16400 = vst [vmem:[#allocation55_spill] sm:$0xff] %v14751_v28  ;;  %v1936_v17 = vperm.slane %v14757_v43, 2  ;;  %v14779_v50 = vpack.c.bf16 %v1932_v18, %v1932_v18  ;;  %v14781_v11 = vpack.c.bf16 %v1933_v58, %v1933_v58  ;;  %v1937_v60 = vperm.slane %v14757_v43, 4  ;;  %v12640_v0 = vld [vmem:[#allocation7 + $0x3ac] sm:$0xf] }
 0x261   :  { %16401 = vst [vmem:[#allocation56_spill] sm:$0xff] %v14753_v15  ;;  %v1938_v39 = vperm.slane %v14767_v48, 0  ;;  %v1939_v21 = vperm.slane %v14767_v48, 2  ;;  %v1940_v20 = vperm.slane %v14767_v48, 4  ;;  %v1941_v32 = vperm.slane %v14771_v14, 0 }
 0x262   :  { %16402 = vst [vmem:[#allocation57_spill] sm:$0xff] %v14755_v34  ;;  %v1942_v36 = vperm.slane %v14771_v14, 2  ;;  %v1671_v59 = vsel %vm1612_vm5, %v14313_v41, %v1610_v12  ;;  %v1673_v31 = vsel %vm1615_vm6, %v14313_v41, %v1610_v12  ;;  %v1676_v4 = vsel %vm1620_vm7, %v14313_v41, %v1610_v12  ;;  %v9475_v18 = vld [vmem:[#allocation7 + $0x3b8] sm:$0xf0]  ;;  %v9705_v58 = vld [vmem:[#allocation7 + $0x580] sm:$0xf] }
 0x263   :  { %16403 = vst [vmem:[#allocation58_spill] sm:$0xff] %v14763_v22  ;;  %v1679_v7 = vsel %vm283_vm0, %v1610_v12, %v14313_v41  ;;  %v1611_v29 = vrot.slane %v1581_v46, 4  ;;  %v9746_v43 = vor.u32 %v12710_v25, %v9745_v47  ;;  %v9494_v48 = vor.u32 %v12644_v10, %v9491_v44  ;;  %v9713_v46 = vld [vmem:[#allocation7 + $0x588] sm:$0xf]  ;;  %v12702_v44 = vld [vmem:[#allocation7 + $0x594] sm:$0xf0] }
 0x264   :  { %16404 = vst [vmem:[#allocation59_spill] sm:$0xff] %v14765_v23  ;;  %v9722_v3 = vor.u32 %v12705_v6, %v9721_v33  ;;  %v9470_v16 = vor.u32 %v12639_v30, %v9467_v63  ;;  %v9730_v56 = vor.u32 %v12706_v24, %v9729_v5  ;;  %v1943_v12 = vperm.slane %v14771_v14, 4  ;;  %v14808_v33 = vld [vmem:[#allocation7 + $0x38c] sm:$0xf]  ;;  %v9459_v24 = vld [vmem:[#allocation7 + $0x398] sm:$0xf0] }
 0x265   :  { %v1672_v37 = vsel %vm1266_vm4, %v1671_v59, %v1611_v29  ;;  %v14799_v49 = vsel %vm1617_vm8, %v1673_v31, %v1611_v29  ;;  %v14802_v34 = vsel %vm1266_vm4, %v1611_v29, %v1676_v4  ;;  %v14805_v41 = vsel %vm1617_vm8, %v1611_v29, %v1679_v7  ;;  %3039 = vmatpush.bf16.msrb.mxu0 %v9746_v43  ;;  %v9689_v59 = vld [vmem:[#allocation7 + $0x560] sm:$0xf]  ;;  %v12697_v31 = vld [vmem:[#allocation7 + $0x56c] sm:$0xf0]  ;;  %v14810_v43 = vld [vmem:[#allocation7 + $0x568] sm:$0xf] }
 0x266   :  { %16405 = vst [vmem:[#allocation60_spill] sm:$0xff] %v14799_v49  ;;  %v2030_v47 = vpack.c.bf16 %v1934_v35, %v1934_v35  ;;  %v2031_v25 = vpack.c.bf16 %v1935_v40, %v1935_v40  ;;  %v9379_v10 = vrot.slane %v1672_v37, 9  ;;  %3053 = vmatpush.bf16.msrb.mxu1 %v9494_v48  ;;  %2956 = vmatpush.bf16.msra.mxu2 %v9722_v3  ;;  %v12631_v35 = vld [vmem:[#allocation7 + $0x364] sm:$0xf]  ;;  %v9435_v40 = vld [vmem:[#allocation7 + $0x370] sm:$0xf0] }
 0x267   :  { %16406 = vst [vmem:[#allocation61_spill] sm:$0xff] %v14802_v34  ;;  %v2032_v6 = vpack.c.bf16 %v1936_v17, %v1936_v17  ;;  %2970 = vmatpush.bf16.msra.mxu3 %v9470_v16  ;;  %v9478_v30 = vor.u32 %v12640_v0, %v9475_v18  ;;  %v9706_v63 = vor.u32 %v12701_v38, %v9705_v58  ;;  %v12698_v16 = vld [vmem:[#allocation7 + $0x574] sm:$0xf0]  ;;  %v14812_v0 = vld [vmem:[#allocation7 + $0x36c] sm:$0xf]  ;;  %v14817_v38 = vunpack.c.l.b16 %v14779_v50 }
 0x268   :  { %16407 = vst [vmem:[#allocation62_spill] sm:$0xff] %v14805_v41  ;;  %v9454_v5 = vor.u32 %v12635_v2, %v9451_v54  ;;  %v2033_v4 = vpack.c.bf16 %v1937_v60, %v1937_v60  ;;  %v2034_v7 = vpack.c.bf16 %v1938_v39, %v1938_v39  ;;  %v2035_v29 = vpack.c.bf16 %v1939_v21, %v1939_v21  ;;  %v14814_v54 = vld [vmem:[#allocation7 + $0x378] sm:$0xf0]  ;;  %v14821_v39 = vld [vmem:[#allocation7 + $0x540] sm:$0xf] }
 0x269   :  { %v1798_v14 = vmax.f32 %v1672_v37, %v9379_v10  ;;  %v2036_v3 = vpack.c.bf16 %v1940_v20, %v1940_v20  ;;  %v2037_v48 = vpack.c.bf16 %v1941_v32, %v1941_v32  ;;  %v2038_v41 = vpack.c.bf16 %v1942_v36, %v1942_v36  ;;  %3040 = vmatpush.bf16.msrb.mxu0 %v9730_v56  ;;  %v14823_v21 = vld [vmem:[#allocation7 + $0x54c] sm:$0xf0]  ;;  %v14825_v56 = vld [vmem:[#allocation7 + $0x344] sm:$0xf]  ;;  %v9419_v18 = vld [vmem:[#allocation7 + $0x350] sm:$0xf0] }
 0x26a   :  { %v9714_v17 = vor.u32 %v12702_v44, %v9713_v46  ;;  %v2039_v2 = vpack.c.bf16 %v1943_v12, %v1943_v12  ;;  %3054 = vmatpush.bf16.msrb.mxu1 %v9478_v30  ;;  %v9462_v60 = vor.u32 %v14808_v33, %v9459_v24  ;;  %v14828_v20 = vunpack.c.l.b16 %v14781_v11  ;;  %2957 = vmatpush.bf16.msra.mxu2 %v9706_v63  ;;  %v14834_v58 = vld [vmem:[#allocation7 + $0x554] sm:$0xf0]  ;;  %v14842_v11 = vld [vmem:[#allocation7 + $0x34c] sm:$0xf]  ;;  %v14844_v33 = vld [vmem:[#allocation7 + $0x520] sm:$0xf] }
 0x26b   :  { %v1852_v37 = vadd.f32 %v14465_v61, %v1798_v14  ;;  %v14830_v32 = vunpack.c.l.b16 %v2030_v47  ;;  %2971 = vmatpush.bf16.msra.mxu3 %v9454_v5  ;;  %v9690_v50 = vor.u32 %v12697_v31, %v9689_v59  ;;  %v9438_v36 = vor.u32 %v12631_v35, %v9435_v40  ;;  %v14832_v61 = vld [vmem:[#allocation7 + $0x548] sm:$0xf]  ;;  %v9427_v47 = vld [vmem:[#allocation7 + $0x358] sm:$0xf0]  ;;  %v14846_v30 = vld [vmem:[#allocation7 + $0x52c] sm:$0xf0] }
 0x26c   :  { %16408 = vst [vmem:[#allocation63_spill] sm:$0xff] %v14828_v20  ;;  %v14836_v46 = vunpack.c.l.b16 %v2031_v25  ;;  %v14838_v12 = vunpack.c.l.b16 %v2032_v6  ;;  %v14840_v10 = vunpack.c.l.b16 %v2033_v4  ;;  %v14848_v63 = vld [vmem:[#allocation7 + $0x324] sm:$0xf]  ;;  %v14850_v5 = vld [vmem:[#allocation7 + $0x330] sm:$0xf0]  ;;  %v14852_v24 = vunpack.c.l.b16 %v2034_v7 }
 0x26d   :  { %16409 = vst [vmem:[#allocation64_spill] sm:$0xff] %v14830_v32  ;;  %v1876_v44 = vmax.f32 %v1852_v37, 0.0  ;;  %v14854_v25 = vunpack.c.l.b16 %v2035_v29  ;;  %v14856_v6 = vunpack.c.l.b16 %v2036_v3  ;;  %3041 = vmatpush.bf16.msrb.mxu0 %v9714_v17  ;;  %v9698_v59 = vor.u32 %v12698_v16, %v14810_v43  ;;  %v14859_v31 = vld [vmem:[#allocation7 + $0x528] sm:$0xf]  ;;  %v14861_v4 = vld [vmem:[#allocation7 + $0x534] sm:$0xf0] }
 0x26e   :  { %16410 = vst [vmem:[#allocation65_spill] sm:$0xff] %v14838_v12  ;;  %v14863_v14 = vld [vmem:[#allocation7 + $0x32c] sm:$0xf]  ;;  %v14865_v35 = vld [vmem:[#allocation7 + $0x338] sm:$0xf0]  ;;  %v14867_v40 = vunpack.c.l.b16 %v2037_v48  ;;  %v14869_v37 = vunpack.c.l.b16 %v2038_v41  ;;  %3055 = vmatpush.bf16.msrb.mxu1 %v9462_v60  ;;  %v9446_v29 = vor.u32 %v14812_v0, %v14814_v54  ;;  %2958 = vmatpush.bf16.msra.mxu2 %v9690_v50  ;;  %v9674_v34 = vor.u32 %v14823_v21, %v14821_v39 }
 0x26f   :  { %16411 = vst [vmem:[#allocation66_spill] sm:$0xff] %v14840_v10  ;;  %v2141_v7 = vperm.slane %v1876_v44, 0  ;;  %v14873_v3 = vld [vmem:[#allocation7 + $0x500] sm:$0xf]  ;;  %v14875_v43 = vld [vmem:[#allocation7 + $0x50c] sm:$0xf0]  ;;  %2972 = vmatpush.bf16.msra.mxu3 %v9438_v36  ;;  %v9422_v48 = vor.u32 %v14825_v56, %v9419_v18  ;;  %v14880_v26 = vunpack.c.l.b16 %v2039_v2  ;;  %v9682_v0 = vor.u32 %v14834_v58, %v14832_v61 }
 0x270   :  { %16412 = vst [vmem:[#allocation67_spill] sm:$0xff] %v14854_v25  ;;  %v2142_v17 = vperm.slane %v1876_v44, 2  ;;  %v2143_v16 = vperm.slane %v1876_v44, 4  ;;  %v12619_v41 = vld [vmem:[#allocation7 + $0x304] sm:$0xf]  ;;  %v2352_v50 = vrot.slane %v14535_v45, 6  ;;  %v9430_v39 = vor.u32 %v14842_v11, %v9427_v47 }
 0x271   :  { %16413 = vst [vmem:[#allocation68_spill] sm:$0xff] %v14856_v6  ;;  %v9387_v49 = vld [vmem:[#allocation7 + $0x310] sm:$0xf0]  ;;  %v2153_v60 = vpack.c.bf16 %v2141_v7, %v2141_v7  ;;  %v14884_v54 = vld [vmem:[#allocation7 + $0x508] sm:$0xf]  ;;  %3042 = vmatpush.bf16.msrb.mxu0 %v9698_v59  ;;  %v9658_v21 = vor.u32 %v14846_v30, %v14844_v33  ;;  %v9406_v2 = vor.u32 %v14848_v63, %v14850_v5  ;;  %v2355_v59 = vrot.slane %v14628_v13, 5 }
 0x272   :  { %16414 = vst [vmem:[#allocation69_spill] sm:$0xff] %v14869_v37  ;;  %v14886_v6 = vld [vmem:[#allocation7 + $0x514] sm:$0xf0]  ;;  %v2154_v36 = vpack.c.bf16 %v2142_v17, %v2142_v17  ;;  %v12620_v56 = vld [vmem:[#allocation7 + $0x30c] sm:$0xf]  ;;  %v14894_v44 = vpack.c.bf16 %v2143_v16, %v2143_v16  ;;  %3056 = vmatpush.bf16.msrb.mxu1 %v9446_v29  ;;  %v9666_v61 = vor.u32 %v14861_v4, %v14859_v31  ;;  %v2358_v31 = vrot.slane %v14646_v8, 4 }
 0x273   :  { %16415 = vst [vmem:[#allocation70_spill] sm:$0xff] %v14880_v26  ;;  %v9395_v18 = vld [vmem:[#allocation7 + $0x318] sm:$0xf0]  ;;  %v9414_v58 = vor.u32 %v14863_v14, %v14865_v35  ;;  %v9642_v11 = vor.u32 %v14875_v43, %v14873_v3  ;;  %v14902_v47 = vunpack.c.l.b16 %v2153_v60  ;;  %2959 = vmatpush.bf16.msra.mxu2 %v9674_v34  ;;  %2973 = vmatpush.bf16.msra.mxu3 %v9422_v48  ;;  %v2361_v14 = vrot.slane %v14661_v1, 3 }
 0x274   :  { %v14904_v33 = vunpack.c.l.b16 %v2154_v36  ;;  %v9390_v30 = vor.u32 %v12619_v41, %v9387_v49  ;;  %v9650_v63 = vor.u32 %v14886_v6, %v14884_v54  ;;  %v9398_v5 = vor.u32 %v12620_v56, %v9395_v18  ;;  %v16420_v36 = vld [vmem:[#allocation39_spill] sm:$0xff]  ;;  %v16421_v56 = vld [vmem:[#allocation42_spill] sm:$0xff] }
 0x275   :  { %16416 = vst [vmem:[#allocation71_spill] sm:$0xff] %v14902_v47  ;;  %3043 = vmatpush.bf16.msrb.mxu0 %v9682_v0  ;;  %v2354_v4 = vsel %vm2353_vm10, %v2352_v50, %v14389_v51  ;;  %v2364_v34 = vrot.slane %v14729_v27, 2  ;;  %v2367_v35 = vrot.slane %v14748_v52, 1  ;;  %v16418_v7 = vunpack.c.l.b16 %v14639_v57 }
 0x276   :  { %16417 = vst [vmem:[#allocation72_spill] sm:$0xff] %v14904_v33  ;;  %3057 = vmatpush.bf16.msrb.mxu1 %v9430_v39  ;;  %v2357_v49 = vsel %vm2356_vm11, %v2355_v59, %v2354_v4  ;;  %v16419_v51 = vrot.slane %v14738_v62, 7  ;;  %v2400_v3 = vrot.slane %v14761_v9, 6  ;;  %v2402_v17 = vrot.slane %v14817_v38, 5 }
 0x277   :  { %2960 = vmatpush.bf16.msra.mxu2 %v9658_v21  ;;  %2974 = vmatpush.bf16.msra.mxu3 %v9406_v2  ;;  %v2360_v6 = vsel %vm2359_vm13, %v2358_v31, %v2357_v49  ;;  %v2404_v16 = vrot.slane %v14836_v46, 4  ;;  %v2406_v48 = vrot.slane %v14852_v24, 3  ;;  %v2408_v60 = vrot.slane %v14867_v40, 2  ;;  %v16423_v31 = vld [vmem:[#allocation48_spill] sm:$0xff]  ;;  %v16424_v49 = vld [vmem:[#allocation33_spill] sm:$0xff] }
 0x278   :  { %v2399_v29 = vsel %vm2350_vm9, %v16419_v51, %v16418_v7  ;;  %v2363_v43 = vsel %vm2362_vm12, %v2361_v14, %v2360_v6  ;;  %v2410_v54 = vrot.slane %v14902_v47, 1  ;;  %v2372_v50 = vrot.slane %v14537_v42, 6  ;;  %v12678_v47 = vld [vmem:[#allocation7 + $0x4d4] sm:$0xf0] }
 0x279   :  { %3044 = vmatpush.bf16.msrb.mxu0 %v9666_v61  ;;  %v2366_v41 = vsel %vm2365_vm14, %v2364_v34, %v2363_v43  ;;  %v2401_v57 = vsel %vm2353_vm10, %v2400_v3, %v2399_v29  ;;  %v2374_v39 = vrot.slane %v16420_v36, 5  ;;  %v2376_v18 = vrot.slane %v16421_v56, 4  ;;  %v16422_v61 = vld [vmem:[#allocation44_spill] sm:$0xff] }
 0x27a   :  { %3058 = vmatpush.bf16.msrb.mxu1 %v9414_v58  ;;  %v2403_v0 = vsel %vm2356_vm11, %v2402_v17, %v2401_v57  ;;  %v2369_v21 = vsel %vm2368_vm15, %v2367_v35, %v2366_v41  ;;  %v2378_v59 = vrot.slane %v16422_v61, 3  ;;  %v2373_v4 = vsel %vm2353_vm10, %v2372_v50, %v16423_v31 }
 0x27b   :  { %2961 = vmatpush.bf16.msra.mxu2 %v9642_v11  ;;  %2975 = vmatpush.bf16.msra.mxu3 %v9390_v30  ;;  %v2405_v2 = vsel %vm2359_vm13, %v2404_v16, %v2403_v0  ;;  %v2382_v14 = vrot.slane %v14751_v28, 1  ;;  %v16425_v34 = vunpack.c.l.b16 %v16424_v49  ;;  %v16426_v11 = vrot.slane %v14741_v53, 7  ;;  %v16427_v0 = vld [vmem:[#allocation38_spill] sm:$0xff]  ;;  %v16431_v49 = vld [vmem:[#allocation49_spill] sm:$0xff] }
 0x27c   :  { %v2407_v58 = vsel %vm2362_vm12, %v2406_v48, %v2405_v2  ;;  %v2375_v35 = vsel %vm2356_vm11, %v2374_v39, %v2373_v4  ;;  %v2414_v7 = vrot.slane %v14763_v22, 6  ;;  %v2416_v51 = vrot.slane %v14828_v20, 5  ;;  %v9617_v28 = vld [vmem:[#allocation7 + $0x4c8] sm:$0xf] }
 0x27d   :  { %v2413_v30 = vsel %vm2350_vm9, %v16426_v11, %v16425_v34  ;;  %3045 = vmatpush.bf16.msrb.mxu0 %v9650_v63  ;;  %v2409_v6 = vsel %vm2365_vm14, %v2408_v60, %v2407_v58  ;;  %v2377_v3 = vsel %vm2359_vm13, %v2376_v18, %v2375_v35  ;;  %v2418_v43 = vrot.slane %v14838_v12, 4  ;;  %v16429_v18 = vld [vmem:[#allocation43_spill] sm:$0xff]  ;;  %v16432_v35 = vld [vmem:[#allocation34_spill] sm:$0xff] }
 0x27e   :  { %3059 = vmatpush.bf16.msrb.mxu1 %v9398_v5  ;;  %v2411_v29 = vsel %vm2368_vm15, %v2410_v54, %v2409_v6  ;;  %v2420_v17 = vrot.slane %v14854_v25, 3  ;;  %v2379_v63 = vsel %vm2362_vm12, %v2378_v59, %v2377_v3  ;;  %v2380_v48 = vrot.slane %v14735_v55, 2  ;;  %v12650_v3 = vld [vmem:[#allocation7 + $0x3f4] sm:$0xf0] }
 0x27f   :  { %v14955_v16 = vpack.c.b16 %v2411_v29, %v2369_v21  ;;  %v2415_v41 = vsel %vm2353_vm10, %v2414_v7, %v2413_v30  ;;  %v2422_v5 = vrot.slane %v14869_v37, 2  ;;  %v2424_v60 = vrot.slane %v14904_v33, 1  ;;  %v16428_v21 = vld [vmem:[#allocation40_spill] sm:$0xff]  ;;  %v9505_v29 = vld [vmem:[#allocation7 + $0x3e8] sm:$0xf] }
 0x280   :  { %v2417_v57 = vsel %vm2356_vm11, %v2416_v51, %v2415_v41  ;;  %v2386_v54 = vrot.slane %v16427_v0, 6  ;;  %v2381_v50 = vsel %vm2365_vm14, %v2380_v48, %v2379_v63  ;;  %v2388_v2 = vrot.slane %v16428_v21, 5  ;;  %v9633_v48 = vld [vmem:[#allocation7 + $0x4e8] sm:$0xf]  ;;  %v12682_v41 = vld [vmem:[#allocation7 + $0x4f4] sm:$0xf0] }
 0x281   :  { %2934 = vmatmul.bf16.vlgmr.msrb.gmra.mxu2 %v14955_v16  ;;  %v2419_v39 = vsel %vm2359_vm13, %v2418_v43, %v2417_v57  ;;  %v2390_v59 = vrot.slane %v16429_v18, 4  ;;  %v14970_v58 = vunpack.c.l.b16 %v14894_v44  ;;  %v2383_v31 = vsel %vm2368_vm15, %v2382_v14, %v2381_v50  ;;  %v15042_v18 = vld [vmem:[#allocation7 + $0x454] sm:$0xf0] }
 0x282   :  { %v2421_v4 = vsel %vm2362_vm12, %v2420_v17, %v2419_v39  ;;  %v2387_v34 = vsel %vm2353_vm10, %v2386_v54, %v16431_v49  ;;  %v2392_v6 = vrot.slane %v14709_v19, 3  ;;  %v16433_v7 = vunpack.c.l.b16 %v16432_v35  ;;  %v16435_v54 = vld [vmem:[#allocation68_spill] sm:$0xff]  ;;  %v9881_v39 = vld [vmem:[#allocation7 + $0xe0] sm:$0xf]  ;;  %v9489_v35 = vld [vmem:[#allocation7 + $0x3c8] sm:$0xf] }
 0x283   :  { %16430 = vst [vmem:[#allocation39_spill] sm:$0xff] %v14970_v58  ;;  %v2423_v11 = vsel %vm2365_vm14, %v2422_v5, %v2421_v4  ;;  %v2389_v30 = vsel %vm2356_vm11, %v2388_v2, %v2387_v34  ;;  %v16434_v51 = vrot.slane %v14753_v15, 7  ;;  %v2428_v17 = vrot.slane %v14765_v23, 6  ;;  %v12553_v2 = vld [vmem:[#allocation7 + $0xec] sm:$0xf0]  ;;  %v16436_v4 = vld [vmem:[#allocation26_spill] sm:$0xff] }
 0x284   :  { %v2425_v14 = vsel %vm2368_vm15, %v2424_v60, %v2423_v11  ;;  %v2391_v43 = vsel %vm2359_vm13, %v2390_v59, %v2389_v30  ;;  %v2430_v63 = vrot.slane %v14830_v32, 5  ;;  %v2432_v5 = vrot.slane %v14840_v10, 4  ;;  %v16437_v34 = vld [vmem:[#allocation57_spill] sm:$0xff]  ;;  %v12585_v30 = vld [vmem:[#allocation7 + $0x1ec] sm:$0xf0] }
 0x285   :  { %v2427_v44 = vsel %vm2350_vm9, %v16434_v51, %v16433_v7  ;;  %v14988_v57 = vpack.c.b16 %v2425_v14, %v2383_v31  ;;  %v2434_v50 = vrot.slane %v16435_v54, 3  ;;  %v2394_v49 = vrot.slane %v16436_v4, 2  ;;  %v10009_v11 = vld [vmem:[#allocation7 + $0x1e0] sm:$0xf]  ;;  %v12646_v7 = vld [vmem:[#allocation7 + $0x3d4] sm:$0xf0] }
 0x286   :  { %v2396_v60 = vrot.slane %v16437_v34, 1  ;;  %v2429_v59 = vsel %vm2353_vm10, %v2428_v17, %v2427_v44  ;;  %v2393_v31 = vsel %vm2362_vm12, %v2392_v6, %v2391_v43  ;;  %v2438_v14 = vrot.slane %v14970_v58, 1  ;;  %v9865_v4 = vld [vmem:[#allocation7 + $0xc0] sm:$0xf]  ;;  %v12549_v54 = vld [vmem:[#allocation7 + $0xcc] sm:$0xf0] }
 0x287   :  { %2948 = vmatmul.bf16.vlgmr.msrb.gmra.mxu3 %v14988_v57  ;;  %2990 = vmatmul.bf16.vlgmr.msra.gmra.mxu0 %v14988_v57  ;;  %v2431_v51 = vsel %vm2356_vm11, %v2430_v63, %v2429_v59  ;;  %v9506_v33 = vor.u32 %v12650_v3, %v9505_v29  ;;  %v2436_v44 = vrot.slane %v14880_v26, 2  ;;  %v9634_v17 = vor.u32 %v12682_v41, %v9633_v48  ;;  %v9473_v6 = vld [vmem:[#allocation7 + $0x3a8] sm:$0xf]  ;;  %v12642_v43 = vld [vmem:[#allocation7 + $0x3b4] sm:$0xf0] }
 0x288   :  { %v2433_v34 = vsel %vm2359_vm13, %v2432_v5, %v2431_v51  ;;  %v9882_v52 = vor.u32 %v12553_v2, %v9881_v39  ;;  %v9490_v32 = vor.u32 %v12646_v7, %v9489_v35  ;;  %v9601_v63 = vld [vmem:[#allocation7 + $0x4a8] sm:$0xf]  ;;  %v2395_v59 = vsel %vm2365_vm14, %v2394_v49, %v2393_v31  ;;  %v9993_v5 = vld [vmem:[#allocation7 + $0x1c0] sm:$0xf]  ;;  %v12581_v51 = vld [vmem:[#allocation7 + $0x1cc] sm:$0xf0] }
 0x289   :  { %v2435_v10 = vsel %vm2362_vm12, %v2434_v50, %v2433_v34  ;;  %3010 = vmatpush.bf16.msrb.mxu2 %v9506_v33  ;;  %3024 = vmatpush.bf16.msrb.mxu3 %v9634_v17  ;;  %v9618_v3 = vor.u32 %v12678_v47, %v9617_v28  ;;  %v12674_v48 = vld [vmem:[#allocation7 + $0x4b4] sm:$0xf0]  ;;  %v9849_v41 = vld [vmem:[#allocation7 + $0xa0] sm:$0xf]  ;;  %v12545_v39 = vld [vmem:[#allocation7 + $0xac] sm:$0xf0]  ;;  %v2397_v2 = vsel %vm2368_vm15, %v2396_v60, %v2395_v59 }
 0x28a   :  { %v2437_v29 = vsel %vm2365_vm14, %v2436_v44, %v2435_v10  ;;  %3676 = vmatpush.bf16.msra.mxu0 %v9882_v52  ;;  %v10010_v50 = vor.u32 %v12585_v30, %v10009_v11  ;;  %v9866_v34 = vor.u32 %v12549_v54, %v9865_v4  ;;  %v15007_v35 = vld [vmem:[#allocation7 + $0x1a0] sm:$0xf]  ;;  %v15009_v7 = vld [vmem:[#allocation7 + $0x1ac] sm:$0xf0]  ;;  %v9457_v49 = vld [vmem:[#allocation7 + $0x388] sm:$0xf]  ;;  %v9474_v54 = vor.u32 %v12642_v43, %v9473_v6 }
 0x28b   :  { %v2439_v33 = vsel %vm2368_vm15, %v2438_v14, %v2437_v29  ;;  %v12638_v10 = vld [vmem:[#allocation7 + $0x394] sm:$0xf0]  ;;  %v9585_v31 = vld [vmem:[#allocation7 + $0x488] sm:$0xf]  ;;  %v9833_v28 = vld [vmem:[#allocation7 + $0x80] sm:$0xf]  ;;  %v9602_v14 = vor.u32 %v12674_v48, %v9601_v63  ;;  %v9850_v6 = vor.u32 %v12545_v39, %v9849_v41 }
 0x28c   :  { %v12670_v52 = vld [vmem:[#allocation7 + $0x494] sm:$0xf0]  ;;  %v12541_v47 = vld [vmem:[#allocation7 + $0x8c] sm:$0xf0]  ;;  %v15011_v44 = vpack.c.b16 %v2439_v33, %v2397_v2  ;;  %v15013_v17 = vld [vmem:[#allocation7 + $0x180] sm:$0xf]  ;;  %v9458_v63 = vor.u32 %v12638_v10, %v9457_v49 }
 0x28d   :  { %v15015_v58 = vld [vmem:[#allocation7 + $0x18c] sm:$0xf0]  ;;  %v15017_v60 = vld [vmem:[#allocation7 + $0x368] sm:$0xf]  ;;  %3011 = vmatpush.bf16.msrb.mxu2 %v9490_v32  ;;  %v15019_v4 = vld [vmem:[#allocation7 + $0x374] sm:$0xf0]  ;;  %3025 = vmatpush.bf16.msrb.mxu3 %v9618_v3  ;;  %v9994_v32 = vor.u32 %v12581_v51, %v9993_v5  ;;  %v9978_v3 = vor.u32 %v15009_v7, %v15007_v35  ;;  %v9586_v48 = vor.u32 %v12670_v52, %v9585_v31 }
 0x28e   :  { %v15021_v11 = vld [vmem:[#allocation7 + $0x468] sm:$0xf]  ;;  %v15023_v30 = vld [vmem:[#allocation7 + $0x474] sm:$0xf0]  ;;  %3004 = vmatmul.bf16.vlgmr.msra.gmra.mxu1 %v15011_v44  ;;  %v15026_v59 = vld [vmem:[#allocation7 + $0x60] sm:$0xf]  ;;  %3677 = vmatpush.bf16.msra.mxu0 %v9866_v34  ;;  %v9834_v23 = vor.u32 %v12541_v47, %v9833_v28  ;;  %v9962_v5 = vor.u32 %v15015_v58, %v15013_v17  ;;  %v9442_v51 = vor.u32 %v15019_v4, %v15017_v60 }
 0x28f   :  { %v15028_v29 = vld [vmem:[#allocation7 + $0x6c] sm:$0xf0]  ;;  %v15030_v2 = vld [vmem:[#allocation7 + $0x160] sm:$0xf]  ;;  %3690 = vmatpush.bf16.msra.mxu1 %v10010_v50  ;;  %v15034_v33 = vld [vmem:[#allocation7 + $0x348] sm:$0xf]  ;;  %v9570_v41 = vor.u32 %v15023_v30, %v15021_v11 }
 0x290   :  { %v15032_v43 = vld [vmem:[#allocation7 + $0x16c] sm:$0xf0]  ;;  %v15036_v26 = vld [vmem:[#allocation7 + $0x354] sm:$0xf0]  ;;  %v15040_v19 = vld [vmem:[#allocation7 + $0x448] sm:$0xf]  ;;  %v9818_v39 = vor.u32 %v15028_v29, %v15026_v59 }
 0x291   :  { %3012 = vmatpush.bf16.msrb.mxu2 %v9474_v54  ;;  %3026 = vmatpush.bf16.msrb.mxu3 %v9602_v14  ;;  %v9426_v34 = vor.u32 %v15036_v26, %v15034_v33  ;;  %v3110_v58 = vrot.slane %v14535_v45, 5  ;;  %v3112_v35 = vrot.slane %v14628_v13, 4  ;;  %v9554_v7 = vor.u32 %v15042_v18, %v15040_v19  ;;  %v16438_v49 = vld [vmem:[#allocation50_spill] sm:$0xff]  ;;  %v16439_v10 = vld [vmem:[#allocation28_spill] sm:$0xff]  ;;  %v16441_v60 = vld [vmem:[#allocation35_spill] sm:$0xff] }
 0x292   :  { %2962 = vmatmul.bf16.vlgmr.msra.gmra.mxu2 %v15011_v44  ;;  %3678 = vmatpush.bf16.msra.mxu0 %v9850_v6  ;;  %v16440_v31 = vrot.slane %v16439_v10, 6  ;;  %v3114_v28 = vrot.slane %v14646_v8, 3  ;;  %v3116_v47 = vrot.slane %v14661_v1, 2  ;;  %v16442_v54 = vrot.slane %v14738_v62, 6  ;;  %v9785_v50 = vld [vmem:[#allocation7 + $0x20] sm:$0xf] }
 0x293   :  { %3691 = vmatpush.bf16.msra.mxu1 %v9994_v32  ;;  %v3152_v11 = vrot.slane %v14761_v9, 5  ;;  %v3154_v30 = vrot.slane %v14817_v38, 4  ;;  %v3118_v59 = vrot.slane %v14729_v27, 1  ;;  %v3156_v29 = vrot.slane %v14836_v46, 3  ;;  %v12654_v19 = vld [vmem:[#allocation7 + $0x414] sm:$0xf0] }
 0x294   :  { %v3109_v52 = vsel %vm2353_vm10, %v16440_v31, %v16438_v49  ;;  %v3151_v4 = vsel %vm2353_vm10, %v16442_v54, %v16441_v60  ;;  %v3158_v32 = vrot.slane %v14852_v24, 2  ;;  %v16443_v49 = vld [vmem:[#allocation51_spill] sm:$0xff]  ;;  %v16444_v31 = vld [vmem:[#allocation29_spill] sm:$0xff]  ;;  %v3126_v54 = vrot.slane %v16420_v36, 4 }
 0x295   :  { %v3111_v17 = vsel %vm2356_vm11, %v3110_v58, %v3109_v52  ;;  %3013 = vmatpush.bf16.msrb.mxu2 %v9458_v63  ;;  %3027 = vmatpush.bf16.msrb.mxu3 %v9586_v48  ;;  %v3153_v58 = vsel %vm2356_vm11, %v3152_v11, %v3151_v4  ;;  %v16445_v52 = vrot.slane %v16444_v31, 6  ;;  %v3124_v63 = vrot.slane %v14537_v42, 5  ;;  %v12533_v4 = vld [vmem:[#allocation7 + $0x4c] sm:$0xf0]  ;;  %v12680_v18 = vld [vmem:[#allocation7 + $0x4ec] sm:$0xf] }
 0x296   :  { %v3113_v14 = vsel %vm2359_vm13, %v3112_v35, %v3111_v17  ;;  %3679 = vmatpush.bf16.msra.mxu0 %v9834_v23  ;;  %v3155_v17 = vsel %vm2359_vm13, %v3154_v30, %v3153_v58  ;;  %v3128_v48 = vrot.slane %v16421_v56, 3  ;;  %v3160_v23 = vrot.slane %v14867_v40, 1  ;;  %v16446_v58 = vld [vmem:[#allocation41_spill] sm:$0xff] }
 0x297   :  { %v3115_v6 = vsel %vm2362_vm12, %v3114_v28, %v3113_v14  ;;  %v3123_v60 = vsel %vm2353_vm10, %v16445_v52, %v16443_v49  ;;  %3692 = vmatpush.bf16.msra.mxu1 %v9978_v3  ;;  %2976 = vmatmul.bf16.vlgmr.msra.gmra.mxu3 %v14955_v16  ;;  %v9801_v28 = vld [vmem:[#allocation7 + $0x40] sm:$0xf]  ;;  %v3157_v14 = vsel %vm2362_vm12, %v3156_v29, %v3155_v17  ;;  %v16447_v49 = vrot.slane %v14741_v53, 6  ;;  %v12626_v29 = vld [vmem:[#allocation7 + $0x334] sm:$0xf0] }
 0x298   :  { %v3117_v35 = vsel %vm2365_vm14, %v3116_v47, %v3115_v6  ;;  %3046 = vmatmul.bf16.vlgmr.msrb.gmra.mxu0 %v15011_v44  ;;  %v3125_v3 = vsel %vm2356_vm11, %v3124_v63, %v3123_v60  ;;  %v3159_v47 = vsel %vm2365_vm14, %v3158_v32, %v3157_v14  ;;  %v3130_v6 = vrot.slane %v16422_v61, 2  ;;  %v12658_v14 = vld [vmem:[#allocation7 + $0x434] sm:$0xf0] }
 0x299   :  { %v3119_v11 = vsel %vm2368_vm15, %v3118_v59, %v3117_v35  ;;  %3014 = vmatpush.bf16.msrb.mxu2 %v9442_v51  ;;  %v3127_v30 = vsel %vm2359_vm13, %v3126_v54, %v3125_v3  ;;  %v3165_v52 = vsel %vm2353_vm10, %v16447_v49, %v16446_v58  ;;  %3028 = vmatpush.bf16.msrb.mxu3 %v9570_v41  ;;  %v9929_v59 = vld [vmem:[#allocation7 + $0x140] sm:$0xf]  ;;  %v9409_v35 = vld [vmem:[#allocation7 + $0x328] sm:$0xf]  ;;  %v3166_v51 = vrot.slane %v14763_v22, 5 }
 0x29a   :  { %v3161_v17 = vsel %vm2368_vm15, %v3160_v23, %v3159_v47  ;;  %v3129_v60 = vsel %vm2362_vm12, %v3128_v48, %v3127_v30  ;;  %v3168_v32 = vrot.slane %v14828_v20, 4  ;;  %3680 = vmatpush.bf16.msra.mxu0 %v9818_v39  ;;  %v9802_v63 = vor.u32 %v12533_v4, %v9801_v28  ;;  %v9537_v54 = vld [vmem:[#allocation7 + $0x428] sm:$0xf]  ;;  %v12565_v49 = vld [vmem:[#allocation7 + $0x14c] sm:$0xf0] }
 0x29b   :  { %3693 = vmatpush.bf16.msra.mxu1 %v9962_v5  ;;  %v15106_v3 = vpack.c.b16 %v3161_v17, %v3119_v11  ;;  %v3170_v41 = vrot.slane %v14838_v12, 3  ;;  %v3172_v58 = vrot.slane %v14854_v25, 2  ;;  %v12529_v23 = vld [vmem:[#allocation7 + $0x2c] sm:$0xf0]  ;;  %v3167_v48 = vsel %vm2356_vm11, %v3166_v51, %v3165_v52  ;;  %v9393_v39 = vld [vmem:[#allocation7 + $0x308] sm:$0xf] }
 0x29c   :  { %v16448_v47 = vld [vmem:[#allocation47_spill] sm:$0xff]  ;;  %v9410_v5 = vor.u32 %v12626_v29, %v9409_v35  ;;  %v3131_v28 = vsel %vm2365_vm14, %v3130_v6, %v3129_v60  ;;  %v3169_v4 = vsel %vm2359_vm13, %v3168_v32, %v3167_v48  ;;  %v9538_v11 = vor.u32 %v12658_v14, %v9537_v54  ;;  %v9913_v52 = vld [vmem:[#allocation7 + $0x120] sm:$0xf]  ;;  %v12622_v51 = vld [vmem:[#allocation7 + $0x314] sm:$0xf0] }
 0x29d   :  { %v3136_v30 = vrot.slane %v16448_v47, 6  ;;  %3015 = vmatpush.bf16.msrb.mxu2 %v9426_v34  ;;  %3029 = vmatpush.bf16.msrb.mxu3 %v9554_v7  ;;  %v12561_v17 = vld [vmem:[#allocation7 + $0x12c] sm:$0xf0]  ;;  %v9521_v47 = vld [vmem:[#allocation7 + $0x408] sm:$0xf]  ;;  %v3132_v26 = vrot.slane %v14735_v55, 1  ;;  %v3171_v33 = vsel %vm2362_vm12, %v3170_v41, %v3169_v4  ;;  %v16449_v6 = vor.u32 %v15032_v43, %v15030_v2 }
 0x29e   :  { %3060 = vmatmul.bf16.vlgmr.msrb.gmra.mxu1 %v14955_v16  ;;  %v3174_v34 = vrot.slane %v14869_v37, 1  ;;  %3681 = vmatpush.bf16.msra.mxu0 %v9802_v63  ;;  %v9930_v35 = vor.u32 %v12565_v49, %v9929_v59  ;;  %v9786_v29 = vor.u32 %v12529_v23, %v9785_v50  ;;  %v9635_v7 = vld [vmem:[#allocation7 + $0x4f8] sm:$0xf0]  ;;  %v3173_v60 = vsel %vm2365_vm14, %v3172_v58, %v3171_v33  ;;  %v9769_v32 = vld [vmem:[#allocation7] sm:$0xf] }
 0x29f   :  { %3694 = vmatpush.bf16.msra.mxu1 %v16449_v6  ;;  %v12525_v54 = vld [vmem:[#allocation7 + $0xc] sm:$0xf0]  ;;  %v12712_v14 = vld [vmem:[#allocation7 + $0x5ec] sm:$0xf]  ;;  %v3133_v48 = vsel %vm2368_vm15, %v3132_v26, %v3131_v28  ;;  %v9394_v4 = vor.u32 %v12622_v51, %v9393_v39  ;;  %v9763_v37 = vld [vmem:[#allocation7 + $0x5f8] sm:$0xf0]  ;;  %v9522_v50 = vor.u32 %v12654_v19, %v9521_v47  ;;  %v9638_v59 = vor.u32 %v12680_v18, %v9635_v7 }
 0x2a0   :  { %v3175_v41 = vsel %vm2368_vm15, %v3174_v34, %v3173_v60  ;;  %v12583_v2 = vld [vmem:[#allocation7 + $0x1e4] sm:$0xf]  ;;  %v10011_v43 = vld [vmem:[#allocation7 + $0x1f0] sm:$0xf0]  ;;  %v3178_v49 = vrot.slane %v14753_v15, 6  ;;  %v9914_v58 = vor.u32 %v12561_v17, %v9913_v52  ;;  %v9770_v23 = vor.u32 %v12525_v54, %v9769_v32 }
 0x2a1   :  { %3016 = vmatpush.bf16.msrb.mxu2 %v9410_v5  ;;  %v15130_v63 = vpack.c.b16 %v3175_v41, %v3133_v48  ;;  %3030 = vmatpush.bf16.msrb.mxu3 %v9538_v11  ;;  %v12676_v33 = vld [vmem:[#allocation7 + $0x4cc] sm:$0xf]  ;;  %v9619_v28 = vld [vmem:[#allocation7 + $0x4d8] sm:$0xf0]  ;;  %v9897_v26 = vld [vmem:[#allocation7 + $0x100] sm:$0xf]  ;;  %v9766_v5 = vor.u32 %v12712_v14, %v9763_v37  ;;  %v10014_v39 = vor.u32 %v12583_v2, %v10011_v43 }
 0x2a2   :  { %3682 = vmatpush.bf16.msra.mxu0 %v9786_v29  ;;  %v12557_v34 = vld [vmem:[#allocation7 + $0x10c] sm:$0xf0]  ;;  %v12615_v51 = vld [vmem:[#allocation7 + $0x2e4] sm:$0xf]  ;;  %v10139_v11 = vld [vmem:[#allocation7 + $0x2f0] sm:$0xf0] }
 0x2a3   :  { %16450 = vst [vmem:[#allocation42_spill] sm:$0xff] %v15130_v63  ;;  %3695 = vmatpush.bf16.msra.mxu1 %v9930_v35  ;;  %v16451_v6 = vld [vmem:[#allocation52_spill] sm:$0xff]  ;;  %v12708_v47 = vld [vmem:[#allocation7 + $0x5cc] sm:$0xf]  ;;  %v9747_v19 = vld [vmem:[#allocation7 + $0x5d8] sm:$0xf0]  ;;  %v9622_v35 = vor.u32 %v12676_v33, %v9619_v28  ;;  %v9898_v18 = vor.u32 %v12557_v34, %v9897_v26 }
 0x2a4   :  { %v3137_v60 = vsel %vm2353_vm10, %v3136_v30, %v16451_v6  ;;  %v12579_v29 = vld [vmem:[#allocation7 + $0x1c4] sm:$0xf]  ;;  %v9995_v52 = vld [vmem:[#allocation7 + $0x1d0] sm:$0xf0]  ;;  %v12672_v7 = vld [vmem:[#allocation7 + $0x4ac] sm:$0xf]  ;;  %v10142_v30 = vor.u32 %v12615_v51, %v10139_v11  ;;  %v9750_v14 = vor.u32 %v12708_v47, %v9747_v19 }
 0x2a5   :  { %3017 = vmatpush.bf16.msrb.mxu2 %v9394_v4  ;;  %3031 = vmatpush.bf16.msrb.mxu3 %v9522_v50  ;;  %v12611_v17 = vld [vmem:[#allocation7 + $0x2c4] sm:$0xf]  ;;  %v9603_v37 = vld [vmem:[#allocation7 + $0x4b8] sm:$0xf0]  ;;  %v3138_v32 = vrot.slane %v16427_v0, 5  ;;  %v3140_v54 = vrot.slane %v16428_v21, 4  ;;  %v9998_v2 = vor.u32 %v12579_v29, %v9995_v52 }
 0x2a6   :  { %3683 = vmatpush.bf16.msra.mxu0 %v9770_v23  ;;  %v10123_v48 = vld [vmem:[#allocation7 + $0x2d0] sm:$0xf0]  ;;  %v12704_v41 = vld [vmem:[#allocation7 + $0x5ac] sm:$0xf]  ;;  %v9731_v4 = vld [vmem:[#allocation7 + $0x5b8] sm:$0xf0]  ;;  %v9606_v50 = vor.u32 %v12672_v7, %v9603_v37 }
 0x2a7   :  { %3696 = vmatpush.bf16.msra.mxu1 %v9914_v58  ;;  %v3139_v43 = vsel %vm2356_vm11, %v3138_v32, %v3137_v60  ;;  %v9979_v58 = vld [vmem:[#allocation7 + $0x1b0] sm:$0xf0]  ;;  %v16452_v33 = vld [vmem:[#allocation43_spill] sm:$0xff]  ;;  %v16453_v26 = vld [vmem:[#allocation46_spill] sm:$0xff] }
 0x2a8   :  { %3018 = vmatmul.bf16.vlgmr.msrb.gmra.mxu2 %v14955_v16  ;;  %3032 = vmatmul.bf16.vlgmr.msrb.gmra.mxu3 %v14988_v57  ;;  %v3141_v23 = vsel %vm2359_vm13, %v3140_v54, %v3139_v43  ;;  %v3142_v28 = vrot.slane %v16452_v33, 3  ;;  %v3179_v34 = vsel %vm2353_vm10, %v3178_v49, %v16453_v26  ;;  %v10126_v16 = vor.u32 %v12611_v17, %v10123_v48  ;;  %v9587_v51 = vld [vmem:[#allocation7 + $0x498] sm:$0xf0]  ;;  %v16455_v11 = vld [vmem:[#allocation59_spill] sm:$0xff]  ;;  %v12607_v19 = vld [vmem:[#allocation7 + $0x2a4] sm:$0xf] }
 0x2a9   :  { %3066 = vmatpush.bf16.msra.mxu2 %v9638_v59  ;;  %3080 = vmatpush.bf16.msra.mxu3 %v9766_v5  ;;  %v12575_v59 = vld [vmem:[#allocation7 + $0x1a4] sm:$0xf]  ;;  %v9734_v5 = vor.u32 %v12704_v41, %v9731_v4  ;;  %v16454_v6 = vld [vmem:[#allocation45_spill] sm:$0xff]  ;;  %v3180_v47 = vrot.slane %v16455_v11, 5  ;;  %v16456_v29 = vld [vmem:[#allocation64_spill] sm:$0xff] }
 0x2aa   :  { %3732 = vmatpush.bf16.msrb.mxu0 %v10014_v39  ;;  %v12668_v39 = vld [vmem:[#allocation7 + $0x48c] sm:$0xf]  ;;  %v3144_v60 = vrot.slane %v16454_v6, 2  ;;  %v3182_v52 = vrot.slane %v16456_v29, 4  ;;  %v16457_v7 = vld [vmem:[#allocation66_spill] sm:$0xff]  ;;  %v16458_v32 = vld [vmem:[#allocation68_spill] sm:$0xff]  ;;  %v9982_v17 = vor.u32 %v12575_v59, %v9979_v58 }
 0x2ab   :  { %3684 = vmatmul.bf16.vlgmr.msra.gmra.mxu0 %v15106_v3  ;;  %3697 = vmatpush.bf16.msra.mxu1 %v9898_v18  ;;  %v3184_v37 = vrot.slane %v16457_v7, 3  ;;  %v3186_v49 = vrot.slane %v16458_v32, 2  ;;  %v10107_v18 = vld [vmem:[#allocation7 + $0x2b0] sm:$0xf0]  ;;  %v12700_v54 = vld [vmem:[#allocation7 + $0x58c] sm:$0xf]  ;;  %v3181_v41 = vsel %vm2356_vm11, %v3180_v47, %v3179_v34 }
 0x2ac   :  { %v9715_v48 = vld [vmem:[#allocation7 + $0x598] sm:$0xf0]  ;;  %v9963_v4 = vld [vmem:[#allocation7 + $0x190] sm:$0xf0]  ;;  %v16459_v32 = vld [vmem:[#allocation26_spill] sm:$0xff]  ;;  %v10110_v34 = vor.u32 %v12607_v19, %v10107_v18  ;;  %v4015_v29 = vrot.slane %v14761_v9, 7 }
 0x2ad   :  { %3067 = vmatpush.bf16.msra.mxu2 %v9622_v35  ;;  %3081 = vmatpush.bf16.msra.mxu3 %v9750_v14  ;;  %v3143_v35 = vsel %vm2362_vm12, %v3142_v28, %v3141_v23  ;;  %v12571_v14 = vld [vmem:[#allocation7 + $0x184] sm:$0xf]  ;;  %v3183_v23 = vsel %vm2359_vm13, %v3182_v52, %v3181_v41  ;;  %v12664_v28 = vld [vmem:[#allocation7 + $0x46c] sm:$0xf]  ;;  %v9571_v26 = vld [vmem:[#allocation7 + $0x478] sm:$0xf0]  ;;  %v9718_v47 = vor.u32 %v12700_v54, %v9715_v48 }
 0x2ae   :  { %3733 = vmatpush.bf16.msrb.mxu0 %v9998_v2  ;;  %3698 = vmatmul.bf16.vlgmr.msra.gmra.mxu1 %v15130_v63  ;;  %v3145_v43 = vsel %vm2365_vm14, %v3144_v60, %v3143_v35  ;;  %v3146_v2 = vrot.slane %v16459_v32, 1  ;;  %v3185_v59 = vsel %vm2362_vm12, %v3184_v37, %v3183_v23  ;;  %v16460_v58 = vld [vmem:[#allocation70_spill] sm:$0xff]  ;;  %v10091_v60 = vld [vmem:[#allocation7 + $0x290] sm:$0xf0]  ;;  %v12696_v35 = vld [vmem:[#allocation7 + $0x56c] sm:$0xf]  ;;  %v9574_v37 = vor.u32 %v12664_v28, %v9571_v26 }
 0x2af   :  { %3746 = vmatpush.bf16.msrb.mxu1 %v10142_v30  ;;  %v9590_v30 = vor.u32 %v12668_v39, %v9587_v51  ;;  %v3188_v7 = vrot.slane %v16460_v58, 1  ;;  %v3187_v39 = vsel %vm2365_vm14, %v3186_v49, %v3185_v59  ;;  %v9966_v51 = vor.u32 %v12571_v14, %v9963_v4  ;;  %v9699_v52 = vld [vmem:[#allocation7 + $0x578] sm:$0xf0]  ;;  %v12567_v23 = vld [vmem:[#allocation7 + $0x164] sm:$0xf]  ;;  %v16462_v6 = vld [vmem:[#allocation31_spill] sm:$0xff] }
 0x2b0   :  { %v3147_v41 = vsel %vm2368_vm15, %v3146_v2, %v3145_v43  ;;  %v9947_v58 = vld [vmem:[#allocation7 + $0x170] sm:$0xf0]  ;;  %v9555_v19 = vld [vmem:[#allocation7 + $0x458] sm:$0xf0]  ;;  %v12599_v18 = vld [vmem:[#allocation7 + $0x264] sm:$0xf] }
 0x2b1   :  { %3068 = vmatpush.bf16.msra.mxu2 %v9606_v50  ;;  %3082 = vmatpush.bf16.msra.mxu3 %v9734_v5  ;;  %v12603_v50 = vld [vmem:[#allocation7 + $0x284] sm:$0xf]  ;;  %v3189_v32 = vsel %vm2368_vm15, %v3188_v7, %v3187_v39  ;;  %v12660_v5 = vld [vmem:[#allocation7 + $0x44c] sm:$0xf]  ;;  %v9950_v54 = vor.u32 %v12567_v23, %v9947_v58  ;;  %v10075_v48 = vld [vmem:[#allocation7 + $0x270] sm:$0xf0] }
 0x2b2   :  { %3734 = vmatpush.bf16.msrb.mxu0 %v9982_v17  ;;  %v10094_v49 = vor.u32 %v12603_v50, %v10091_v60  ;;  %v9702_v17 = vor.u32 %v12696_v35, %v9699_v52  ;;  %v12692_v14 = vld [vmem:[#allocation7 + $0x54c] sm:$0xf]  ;;  %v9683_v4 = vld [vmem:[#allocation7 + $0x558] sm:$0xf0]  ;;  %v9558_v7 = vor.u32 %v12660_v5, %v9555_v19  ;;  %v9931_v43 = vld [vmem:[#allocation7 + $0x150] sm:$0xf0] }
 0x2b3   :  { %3747 = vmatpush.bf16.msrb.mxu1 %v10126_v16  ;;  %v15161_v16 = vpack.c.b16 %v3189_v32, %v3147_v41  ;;  %v12656_v28 = vld [vmem:[#allocation7 + $0x42c] sm:$0xf]  ;;  %v9539_v26 = vld [vmem:[#allocation7 + $0x438] sm:$0xf0]  ;;  %v10078_v32 = vor.u32 %v12599_v18, %v10075_v48  ;;  %v9686_v2 = vor.u32 %v12692_v14, %v9683_v4  ;;  %v12595_v59 = vld [vmem:[#allocation7 + $0x244] sm:$0xf] }
 0x2b4   :  { %v12688_v50 = vld [vmem:[#allocation7 + $0x52c] sm:$0xf]  ;;  %v9667_v39 = vld [vmem:[#allocation7 + $0x538] sm:$0xf0]  ;;  %v9542_v58 = vor.u32 %v12656_v28, %v9539_v26  ;;  %v9915_v60 = vld [vmem:[#allocation7 + $0x130] sm:$0xf0] }
 0x2b5   :  { %3069 = vmatpush.bf16.msra.mxu2 %v9590_v30  ;;  %3083 = vmatpush.bf16.msra.mxu3 %v9718_v47  ;;  %v12563_v30 = vld [vmem:[#allocation7 + $0x144] sm:$0xf]  ;;  %v10059_v47 = vld [vmem:[#allocation7 + $0x250] sm:$0xf0]  ;;  %v12652_v52 = vld [vmem:[#allocation7 + $0x40c] sm:$0xf]  ;;  %v9670_v23 = vor.u32 %v12688_v50, %v9667_v39 }
 0x2b6   :  { %3735 = vmatpush.bf16.msrb.mxu0 %v9966_v51  ;;  %v12559_v51 = vld [vmem:[#allocation7 + $0x124] sm:$0xf]  ;;  %v9523_v41 = vld [vmem:[#allocation7 + $0x418] sm:$0xf0]  ;;  %v10043_v5 = vld [vmem:[#allocation7 + $0x230] sm:$0xf0] }
 0x2b7   :  { %3748 = vmatpush.bf16.msrb.mxu1 %v10110_v34  ;;  %v9934_v34 = vor.u32 %v12563_v30, %v9931_v43  ;;  %v12591_v35 = vld [vmem:[#allocation7 + $0x224] sm:$0xf]  ;;  %v10137_v19 = vld [vmem:[#allocation7 + $0x2e0] sm:$0xf]  ;;  %v12684_v18 = vld [vmem:[#allocation7 + $0x50c] sm:$0xf]  ;;  %v9526_v14 = vor.u32 %v12652_v52, %v9523_v41 }
 0x2b8   :  { %v12555_v48 = vld [vmem:[#allocation7 + $0x104] sm:$0xf]  ;;  %v9899_v4 = vld [vmem:[#allocation7 + $0x110] sm:$0xf0]  ;;  %v10145_v28 = vld [vmem:[#allocation7 + $0x2e8] sm:$0xf] }
 0x2b9   :  { %3070 = vmatpush.bf16.msra.mxu2 %v9574_v37  ;;  %3084 = vmatpush.bf16.msra.mxu3 %v9702_v17  ;;  %v10062_v37 = vor.u32 %v12595_v59, %v10059_v47  ;;  %v9918_v17 = vor.u32 %v12559_v51, %v9915_v60  ;;  %v9883_v30 = vld [vmem:[#allocation7 + $0xf0] sm:$0xf0]  ;;  %v12618_v26 = vld [vmem:[#allocation7 + $0x2f4] sm:$0xf0]  ;;  %v10046_v59 = vor.u32 %v12591_v35, %v10043_v5  ;;  %v10121_v50 = vld [vmem:[#allocation7 + $0x2c0] sm:$0xf] }
 0x2ba   :  { %3736 = vmatpush.bf16.msrb.mxu0 %v9950_v54  ;;  %v9651_v54 = vld [vmem:[#allocation7 + $0x518] sm:$0xf0]  ;;  %v9902_v39 = vor.u32 %v12555_v48, %v9899_v4  ;;  %v12587_v51 = vld [vmem:[#allocation7 + $0x204] sm:$0xf]  ;;  %v10027_v60 = vld [vmem:[#allocation7 + $0x210] sm:$0xf0]  ;;  %v10146_v41 = vor.u32 %v12618_v26, %v10145_v28 }
 0x2bb   :  { %3749 = vmatpush.bf16.msrb.mxu1 %v10094_v49  ;;  %v12617_v49 = vld [vmem:[#allocation7 + $0x2ec] sm:$0xf0]  ;;  %v9654_v47 = vor.u32 %v12684_v18, %v9651_v54  ;;  %v12552_v52 = vld [vmem:[#allocation7 + $0xec] sm:$0xf]  ;;  %v9891_v15 = vld [vmem:[#allocation7 + $0xf8] sm:$0xf0] }
 0x2bc   :  { %v10138_v43 = vor.u32 %v12617_v49, %v10137_v19  ;;  %v12547_v19 = vld [vmem:[#allocation7 + $0xc4] sm:$0xf]  ;;  %v9867_v49 = vld [vmem:[#allocation7 + $0xd0] sm:$0xf0]  ;;  %v1645_v33 = vrot.slane %v16462_v6, 4 }
 0x2bd   :  { %3071 = vmatpush.bf16.msra.mxu2 %v9558_v7  ;;  %3085 = vmatpush.bf16.msra.mxu3 %v9686_v2  ;;  %v12551_v7 = vld [vmem:[#allocation7 + $0xe4] sm:$0xf]  ;;  %v12614_v5 = vld [vmem:[#allocation7 + $0x2d4] sm:$0xf0]  ;;  %v10105_v18 = vld [vmem:[#allocation7 + $0x2a0] sm:$0xf]  ;;  %v9870_v4 = vor.u32 %v12547_v19, %v9867_v49 }
 0x2be   :  { %3737 = vmatpush.bf16.msrb.mxu0 %v9934_v34  ;;  %v12613_v34 = vld [vmem:[#allocation7 + $0x2cc] sm:$0xf0]  ;;  %v9851_v28 = vld [vmem:[#allocation7 + $0xb0] sm:$0xf0]  ;;  %v9369_v26 = vrot.slane %v1645_v33, 9 }
 0x2bf   :  { %3750 = vmatpush.bf16.msrb.mxu1 %v10078_v32  ;;  %v16461_v32 = vld [vmem:[#allocation36_spill] sm:$0xff]  ;;  %v10122_v35 = vor.u32 %v12613_v34, %v10121_v50  ;;  %v12539_v19 = vld [vmem:[#allocation7 + $0x84] sm:$0xf]  ;;  %v10249_v0 = vld [vmem:[#allocation7 + $0x6c0] sm:$0xf] }
 0x2c0   :  { %v1642_v2 = vrot.slane %v16461_v32, 2  ;;  %v16463_v32 = vld [vmem:[#allocation60_spill] sm:$0xff]  ;;  %v1788_v49 = vmax.f32 %v1645_v33, %v9369_v26 }
 0x2c1   :  { %3072 = vmatpush.bf16.msra.mxu2 %v9542_v58  ;;  %3086 = vmatpush.bf16.msra.mxu3 %v9670_v23  ;;  %v9886_v58 = vor.u32 %v12551_v7, %v9883_v30  ;;  %v10129_v23 = vld [vmem:[#allocation7 + $0x2c8] sm:$0xf]  ;;  %v12609_v54 = vld [vmem:[#allocation7 + $0x2ac] sm:$0xf0]  ;;  %v12548_v7 = vld [vmem:[#allocation7 + $0xcc] sm:$0xf] }
 0x2c2   :  { %3738 = vmatpush.bf16.msrb.mxu0 %v9918_v17  ;;  %v10030_v17 = vor.u32 %v12587_v51, %v10027_v60  ;;  %v9368_v48 = vrot.slane %v1642_v2, 9  ;;  %v10130_v6 = vor.u32 %v12614_v5, %v10129_v23  ;;  %v9875_v30 = vld [vmem:[#allocation7 + $0xd8] sm:$0xf0]  ;;  %v12610_v34 = vld [vmem:[#allocation7 + $0x2b4] sm:$0xf0] }
 0x2c3   :  { %3751 = vmatpush.bf16.msrb.mxu1 %v10062_v37  ;;  %v1675_v37 = vrot.slane %v16463_v32, 2  ;;  %v10097_v23 = vld [vmem:[#allocation7 + $0x288] sm:$0xf]  ;;  %v12606_v5 = vld [vmem:[#allocation7 + $0x294] sm:$0xf0] }
 0x2c4   :  { %v1787_v51 = vmax.f32 %v1642_v2, %v9368_v48  ;;  %v16465_v48 = vld [vmem:[#allocation23_spill] sm:$0xff]  ;;  %v10098_v33 = vor.u32 %v12606_v5, %v10097_v23  ;;  %v9803_v23 = vld [vmem:[#allocation7 + $0x50] sm:$0xf0] }
 0x2c5   :  { %3073 = vmatpush.bf16.msra.mxu2 %v9526_v14  ;;  %3087 = vmatpush.bf16.msra.mxu3 %v9654_v47  ;;  %v9894_v14 = vor.u32 %v12552_v52, %v9891_v15  ;;  %v9380_v50 = vrot.slane %v1675_v37, 9  ;;  %v10113_v47 = vld [vmem:[#allocation7 + $0x2a8] sm:$0xf]  ;;  %v10089_v15 = vld [vmem:[#allocation7 + $0x280] sm:$0xf] }
 0x2c6   :  { %3739 = vmatpush.bf16.msrb.mxu0 %v9902_v39  ;;  %v12605_v39 = vld [vmem:[#allocation7 + $0x28c] sm:$0xf0]  ;;  %v10114_v52 = vor.u32 %v12610_v34, %v10113_v47  ;;  %v10081_v34 = vld [vmem:[#allocation7 + $0x268] sm:$0xf] }
 0x2c7   :  { %3752 = vmatpush.bf16.msrb.mxu1 %v10046_v59  ;;  %v10106_v59 = vor.u32 %v12609_v54, %v10105_v18  ;;  %v1799_v32 = vmax.f32 %v1675_v37, %v9380_v50  ;;  %v10073_v18 = vld [vmem:[#allocation7 + $0x260] sm:$0xf]  ;;  %v12601_v54 = vld [vmem:[#allocation7 + $0x26c] sm:$0xf0]  ;;  %v9843_v37 = vld [vmem:[#allocation7 + $0x98] sm:$0xf0] }
 0x2c8   :  { %3074 = vmatmul.bf16.vlgmr.msra.gmra.mxu2 %v14988_v57  ;;  %3088 = vmatmul.bf16.vlgmr.msra.gmra.mxu3 %v15011_v44  ;;  %v9878_v57 = vor.u32 %v12548_v7, %v9875_v30  ;;  %v9835_v44 = vld [vmem:[#allocation7 + $0x90] sm:$0xf0]  ;;  %v12535_v30 = vld [vmem:[#allocation7 + $0x64] sm:$0xf]  ;;  %v10074_v47 = vor.u32 %v12601_v54, %v10073_v18  ;;  %v12598_v18 = vld [vmem:[#allocation7 + $0x254] sm:$0xf0] }
 0x2c9   :  { %3704 = vmatpush.bf16.msrb.mxu2 %v10138_v43  ;;  %3718 = vmatpush.bf16.msrb.mxu3 %v9886_v58  ;;  %v12543_v43 = vld [vmem:[#allocation7 + $0xa4] sm:$0xf]  ;;  %v12544_v58 = vld [vmem:[#allocation7 + $0xac] sm:$0xf]  ;;  %v9838_v7 = vor.u32 %v12539_v19, %v9835_v44  ;;  %v9827_v44 = vld [vmem:[#allocation7 + $0x78] sm:$0xf0] }
 0x2ca   :  { %3788 = vmatpush.bf16.msra.mxu0 %v10146_v41  ;;  %v9854_v60 = vor.u32 %v12543_v43, %v9851_v28  ;;  %v9859_v41 = vld [vmem:[#allocation7 + $0xb8] sm:$0xf0]  ;;  %v9819_v43 = vld [vmem:[#allocation7 + $0x70] sm:$0xf0]  ;;  %v16466_v28 = vld [vmem:[#allocation27_spill] sm:$0xff]  ;;  %v3973_v54 = vrot.slane %v14535_v45, 7 }
 0x2cb   :  { %3753 = vmatpush.bf16.msrb.mxu1 %v10030_v17  ;;  %3740 = vmatmul.bf16.vlgmr.msrb.gmra.mxu0 %v15130_v63  ;;  %v16464_v17 = vld [vmem:[#allocation61_spill] sm:$0xff]  ;;  %v1842_v26 = vadd.f32 %v16466_v28, %v1788_v49  ;;  %v16467_v50 = vld [vmem:[#allocation30_spill] sm:$0xff]  ;;  %v12741_v63 = vld [vmem:[#allocation7 + $0x6cc] sm:$0xf0] }
 0x2cc   :  { %v1678_v2 = vrot.slane %v16464_v17, 4  ;;  %v12531_v49 = vld [vmem:[#allocation7 + $0x44] sm:$0xf]  ;;  %v10065_v17 = vld [vmem:[#allocation7 + $0x248] sm:$0xf] }
 0x2cd   :  { %3705 = vmatpush.bf16.msrb.mxu2 %v10122_v35  ;;  %3719 = vmatpush.bf16.msrb.mxu3 %v9870_v4  ;;  %v10090_v35 = vor.u32 %v12605_v39, %v10089_v15  ;;  %v9862_v4 = vor.u32 %v12544_v58, %v9859_v41  ;;  %v12602_v15 = vld [vmem:[#allocation7 + $0x274] sm:$0xf0]  ;;  %v12536_v41 = vld [vmem:[#allocation7 + $0x6c] sm:$0xf]  ;;  %v10066_v28 = vor.u32 %v12598_v18, %v10065_v17 }
 0x2ce   :  { %3789 = vmatpush.bf16.msra.mxu0 %v10130_v6  ;;  %3754 = vmatmul.bf16.vlgmr.msrb.gmra.mxu1 %v15161_v16  ;;  %v12540_v6 = vld [vmem:[#allocation7 + $0x8c] sm:$0xf]  ;;  %v9381_v39 = vrot.slane %v1678_v2, 9  ;;  %v10082_v19 = vor.u32 %v12602_v15, %v10081_v34  ;;  %v10049_v15 = vld [vmem:[#allocation7 + $0x228] sm:$0xf] }
 0x2cf   :  { %3802 = vmatpush.bf16.msra.mxu1 %v9894_v14  ;;  %v1841_v14 = vadd.f32 %v16465_v48, %v1787_v51  ;;  %v10057_v51 = vld [vmem:[#allocation7 + $0x240] sm:$0xf]  ;;  %v9846_v58 = vor.u32 %v12540_v6, %v9843_v37  ;;  %v9830_v37 = vor.u32 %v12536_v41, %v9827_v44  ;;  %v12589_v41 = vld [vmem:[#allocation7 + $0x20c] sm:$0xf0]  ;;  %v12554_v17 = vld [vmem:[#allocation7 + $0xf4] sm:$0xf0] }
 0x2d0   :  { %v9771_v48 = vld [vmem:[#allocation7 + $0x10] sm:$0xf0] }
 0x2d1   :  { %3706 = vmatpush.bf16.msrb.mxu2 %v10106_v59  ;;  %3720 = vmatpush.bf16.msrb.mxu3 %v9854_v60  ;;  %v1853_v59 = vadd.f32 %v16467_v50, %v1799_v32  ;;  %v15174_v60 = vmax.f32 %v1841_v14, 0.0  ;;  %v15176_v32 = vmax.f32 %v1842_v26, 0.0  ;;  %v1800_v14 = vmax.f32 %v1678_v2, %v9381_v39  ;;  %v9811_v26 = vld [vmem:[#allocation7 + $0x58] sm:$0xf0]  ;;  %v12527_v50 = vld [vmem:[#allocation7 + $0x24] sm:$0xf] }
 0x2d2   :  { %3790 = vmatpush.bf16.msra.mxu0 %v10114_v52  ;;  %v9822_v52 = vor.u32 %v12535_v30, %v9819_v43  ;;  %v9806_v30 = vor.u32 %v12531_v49, %v9803_v23  ;;  %v12532_v43 = vld [vmem:[#allocation7 + $0x4c] sm:$0xf]  ;;  %v12594_v39 = vld [vmem:[#allocation7 + $0x234] sm:$0xf0]  ;;  %v9795_v49 = vld [vmem:[#allocation7 + $0x38] sm:$0xf0] }
 0x2d3   :  { %3803 = vmatpush.bf16.msra.mxu1 %v9878_v57  ;;  %v12597_v57 = vld [vmem:[#allocation7 + $0x24c] sm:$0xf0]  ;;  %16468 = vst [vmem:[#allocation44_spill] sm:$0xff] %v15174_v60  ;;  %v3846_v6 = vperm.slane %v15174_v60, 0  ;;  %v9889_v23 = vld [vmem:[#allocation7 + $0xe8] sm:$0xf]  ;;  %v10050_v18 = vor.u32 %v12594_v39, %v10049_v15  ;;  %v3974_v39 = vsel %vm2350_vm9, %v3973_v54, %v16439_v10 }
 0x2d4   :  { %v10058_v5 = vor.u32 %v12597_v57, %v10057_v51  ;;  %v16469_v51 = vld [vmem:[#allocation24_spill] sm:$0xff]  ;;  %v3977_v10 = vrot.slane %v14646_v8, 5  ;;  %v4019_v54 = vrot.slane %v14836_v46, 5 }
 0x2d5   :  { %3707 = vmatpush.bf16.msrb.mxu2 %v10090_v35  ;;  %3721 = vmatpush.bf16.msrb.mxu3 %v9838_v7  ;;  %v15178_v35 = vmax.f32 %v1853_v59, 0.0  ;;  %v12593_v7 = vld [vmem:[#allocation7 + $0x22c] sm:$0xf0]  ;;  %v9787_v59 = vld [vmem:[#allocation7 + $0x30] sm:$0xf0]  ;;  %v1854_v57 = vadd.f32 %v16469_v51, %v1800_v14 }
 0x2d6   :  { %3791 = vmatpush.bf16.msra.mxu0 %v10098_v33  ;;  %v3847_v33 = vperm.slane %v15174_v60, 2  ;;  %v9790_v44 = vor.u32 %v12527_v50, %v9787_v59  ;;  %v12590_v60 = vld [vmem:[#allocation7 + $0x214] sm:$0xf0]  ;;  %v10017_v14 = vld [vmem:[#allocation7 + $0x1e8] sm:$0xf] }
 0x2d7   :  { %3804 = vmatpush.bf16.msra.mxu1 %v9862_v4  ;;  %v10041_v4 = vld [vmem:[#allocation7 + $0x220] sm:$0xf]  ;;  %v3849_v2 = vperm.slane %v15178_v35, 0  ;;  %v12586_v51 = vld [vmem:[#allocation7 + $0x1f4] sm:$0xf0] }
 0x2d8   :  { %v10042_v34 = vor.u32 %v12593_v7, %v10041_v4  ;;  %v3858_v4 = vpack.c.bf16 %v3846_v6, %v3846_v6  ;;  %v9873_v59 = vld [vmem:[#allocation7 + $0xc8] sm:$0xf]  ;;  %v12550_v15 = vld [vmem:[#allocation7 + $0xd4] sm:$0xf0]  ;;  %v3975_v6 = vrot.slane %v14628_v13, 6  ;;  %v3859_v21 = vpack.c.bf16 %v3847_v33, %v3847_v33 }
 0x2d9   :  { %3708 = vmatpush.bf16.msrb.mxu2 %v10074_v47  ;;  %3722 = vmatpush.bf16.msrb.mxu3 %v9822_v52  ;;  %v10025_v52 = vld [vmem:[#allocation7 + $0x200] sm:$0xf]  ;;  %v12523_v47 = vld [vmem:[#allocation7 + $0x4] sm:$0xf]  ;;  %v9874_v11 = vor.u32 %v12550_v15, %v9873_v59  ;;  %v3850_v33 = vperm.slane %v15178_v35, 2 }
 0x2da   :  { %3792 = vmatpush.bf16.msra.mxu0 %v10082_v19  ;;  %v9814_v19 = vor.u32 %v12532_v43, %v9811_v26  ;;  %v10026_v7 = vor.u32 %v12589_v41, %v10025_v52  ;;  %v10265_v43 = vld [vmem:[#allocation7 + $0x6e0] sm:$0xf]  ;;  %v12745_v26 = vld [vmem:[#allocation7 + $0x6ec] sm:$0xf0]  ;;  %v9774_v50 = vor.u32 %v12523_v47, %v9771_v48  ;;  %v9779_v41 = vld [vmem:[#allocation7 + $0x18] sm:$0xf0] }
 0x2db   :  { %3805 = vmatpush.bf16.msra.mxu1 %v9846_v58  ;;  %v12528_v58 = vld [vmem:[#allocation7 + $0x2c] sm:$0xf]  ;;  %v10266_v48 = vor.u32 %v12745_v26, %v10265_v43  ;;  %v12777_v47 = vld [vmem:[#allocation7 + $0x7ec] sm:$0xf0]  ;;  %v16470_v43 = vrot.slane %v14537_v42, 7 }
 0x2dc   :  { %v12773_v59 = vld [vmem:[#allocation7 + $0x7cc] sm:$0xf0]  ;;  %v9985_v15 = vld [vmem:[#allocation7 + $0x1a8] sm:$0xf] }
 0x2dd   :  { %3709 = vmatpush.bf16.msrb.mxu2 %v10058_v5  ;;  %3723 = vmatpush.bf16.msrb.mxu3 %v9806_v30  ;;  %v10033_v5 = vld [vmem:[#allocation7 + $0x208] sm:$0xf]  ;;  %v9890_v30 = vor.u32 %v12554_v17, %v9889_v23  ;;  %v10018_v23 = vor.u32 %v12586_v51, %v10017_v14  ;;  %v10393_v17 = vld [vmem:[#allocation7 + $0x7e0] sm:$0xf]  ;;  %v15209_v26 = vsel %vm2350_vm9, %v16470_v43, %v16444_v31 }
 0x2de   :  { %3793 = vmatpush.bf16.msra.mxu0 %v10066_v28  ;;  %v9798_v28 = vor.u32 %v12528_v58, %v9795_v49  ;;  %v10034_v52 = vor.u32 %v12590_v60, %v10033_v5  ;;  %v3861_v58 = vpack.c.bf16 %v3849_v2, %v3849_v2  ;;  %v12582_v49 = vld [vmem:[#allocation7 + $0x1d4] sm:$0xf0]  ;;  %v4016_v60 = vsel %vm2350_vm9, %v4015_v29, %v14738_v62 }
 0x2df   :  { %3806 = vmatpush.bf16.msra.mxu1 %v9830_v37  ;;  %v15188_v37 = vmax.f32 %v1854_v57, 0.0  ;;  %v12524_v57 = vld [vmem:[#allocation7 + $0xc] sm:$0xf]  ;;  %v12546_v5 = vld [vmem:[#allocation7 + $0xb4] sm:$0xf0]  ;;  %v10394_v14 = vor.u32 %v12777_v47, %v10393_v17  ;;  %v3979_v62 = vrot.slane %v14661_v1, 4 }
 0x2e0   :  { %v9782_v2 = vor.u32 %v12524_v57, %v9779_v41  ;;  %v4021_v29 = vrot.slane %v14852_v24, 4  ;;  %v4029_v41 = vrot.slane %v14763_v22, 7  ;;  %v15222_v17 = vunpack.c.l.b16 %v3861_v58 }
 0x2e1   :  { %3710 = vmatpush.bf16.msrb.mxu2 %v10042_v34  ;;  %3724 = vmatpush.bf16.msrb.mxu3 %v9790_v44  ;;  %v4017_v34 = vrot.slane %v14817_v38, 6  ;;  %v10001_v44 = vld [vmem:[#allocation7 + $0x1c8] sm:$0xf]  ;;  %v4724_v43 = vperm.slane %v15188_v37, 0  ;;  %v4896_v22 = vrot.slane %v14867_v40, 4 }
 0x2e2   :  { %3794 = vmatpush.bf16.msra.mxu0 %v10050_v18  ;;  %v9857_v18 = vld [vmem:[#allocation7 + $0xa8] sm:$0xf]  ;;  %v10002_v51 = vor.u32 %v12582_v49, %v10001_v44  ;;  %v10361_v44 = vld [vmem:[#allocation7 + $0x7a0] sm:$0xf]  ;;  %v12769_v49 = vld [vmem:[#allocation7 + $0x7ac] sm:$0xf0] }
 0x2e3   :  { %3807 = vmatpush.bf16.msra.mxu1 %v9814_v19  ;;  %v15194_v19 = vunpack.c.l.b16 %v3858_v4  ;;  %v3976_v4 = vsel %vm2353_vm10, %v3975_v6, %v3974_v39  ;;  %v12578_v6 = vld [vmem:[#allocation7 + $0x1b4] sm:$0xf0]  ;;  %v10233_v39 = vld [vmem:[#allocation7 + $0x6a0] sm:$0xf]  ;;  %v4900_v42 = vrot.slane %v15222_v17, 2 }
 0x2e4   :  { %v3978_v57 = vsel %vm2356_vm11, %v3977_v10, %v3976_v4  ;;  %v9986_v47 = vor.u32 %v12578_v6, %v9985_v15  ;;  %v16472_v10 = vld [vmem:[#allocation54_spill] sm:$0xff]  ;;  %v4850_v4 = vrot.slane %v14646_v8, 6  ;;  %v16473_v15 = vld [vmem:[#allocation71_spill] sm:$0xff] }
 0x2e5   :  { %3711 = vmatpush.bf16.msrb.mxu2 %v10026_v7  ;;  %3725 = vmatpush.bf16.msrb.mxu3 %v9774_v50  ;;  %v4018_v7 = vsel %vm2353_vm10, %v4017_v34, %v4016_v60  ;;  %v10250_v50 = vor.u32 %v12741_v63, %v10249_v0  ;;  %v9858_v34 = vor.u32 %v12546_v5, %v9857_v18  ;;  %v9841_v0 = vld [vmem:[#allocation7 + $0x88] sm:$0xf]  ;;  %v12542_v63 = vld [vmem:[#allocation7 + $0x94] sm:$0xf0] }
 0x2e6   :  { %3795 = vmatpush.bf16.msra.mxu0 %v10034_v52  ;;  %v12737_v52 = vld [vmem:[#allocation7 + $0x6ac] sm:$0xf0]  ;;  %v4020_v31 = vsel %vm2356_vm11, %v4019_v54, %v4018_v7  ;;  %v12574_v18 = vld [vmem:[#allocation7 + $0x194] sm:$0xf0]  ;;  %v15228_v5 = vsel %vm2359_vm13, %v3979_v62, %v3978_v57  ;;  %v9842_v7 = vor.u32 %v12542_v63, %v9841_v0  ;;  %v10362_v57 = vor.u32 %v12769_v49, %v10361_v44  ;;  %v10345_v0 = vld [vmem:[#allocation7 + $0x780] sm:$0xf] }
 0x2e7   :  { %3808 = vmatpush.bf16.msra.mxu1 %v9798_v28  ;;  %v15211_v28 = vunpack.c.l.b16 %v3859_v21  ;;  %v4848_v21 = vrot.slane %v14628_v13, 7  ;;  %v4022_v58 = vsel %vm2359_vm13, %v4021_v29, %v4020_v31  ;;  %v12538_v62 = vld [vmem:[#allocation7 + $0x74] sm:$0xf0]  ;;  %v4852_v63 = vrot.slane %v14661_v1, 5  ;;  %v9953_v29 = vld [vmem:[#allocation7 + $0x168] sm:$0xf] }
 0x2e8   :  { %3712 = vmatmul.bf16.vlgmr.msrb.gmra.mxu2 %v15161_v16  ;;  %3726 = vmatmul.bf16.vlgmr.msrb.gmra.mxu3 %v15106_v3  ;;  %v12570_v60 = vld [vmem:[#allocation7 + $0x174] sm:$0xf0]  ;;  %v10201_v44 = vld [vmem:[#allocation7 + $0x660] sm:$0xf]  ;;  %v12729_v49 = vld [vmem:[#allocation7 + $0x66c] sm:$0xf0] }
 0x2e9   :  { %3760 = vmatpush.bf16.msra.mxu2 %v9890_v30  ;;  %3774 = vmatpush.bf16.msra.mxu3 %v10018_v23  ;;  %v10377_v30 = vld [vmem:[#allocation7 + $0x7c0] sm:$0xf]  ;;  %16471 = vst [vmem:[#allocation48_spill] sm:$0xff] %v15211_v28  ;;  %v15219_v23 = vpack.c.bf16 %v3850_v33, %v3850_v33  ;;  %v10234_v33 = vor.u32 %v12737_v52, %v10233_v39 }
 0x2ea   :  { %4543 = vmatpush.bf16.msrb.mxu0 %v10266_v48  ;;  %v10378_v48 = vor.u32 %v12773_v59, %v10377_v30  ;;  %v4023_v30 = vrot.slane %v14867_v40, 3  ;;  %v9825_v59 = vld [vmem:[#allocation7 + $0x68] sm:$0xf]  ;;  %v4030_v39 = vsel %vm2350_vm9, %v4029_v41, %v14741_v53  ;;  %v10313_v41 = vld [vmem:[#allocation7 + $0x740] sm:$0xf] }
 0x2eb   :  { %3809 = vmatpush.bf16.msra.mxu1 %v9782_v2  ;;  %3796 = vmatmul.bf16.vlgmr.msra.gmra.mxu0 %v15161_v16  ;;  %v9969_v2 = vld [vmem:[#allocation7 + $0x188] sm:$0xf] }
 0x2ec   :  { %v9970_v31 = vor.u32 %v12574_v18, %v9969_v2  ;;  %v15249_v53 = vsel %vm2362_vm12, %v4023_v30, %v4022_v58  ;;  %v4031_v18 = vrot.slane %v14828_v20, 6  ;;  %v16475_v30 = vld [vmem:[#allocation55_spill] sm:$0xff]  ;;  %v12566_v2 = vld [vmem:[#allocation7 + $0x154] sm:$0xf0]  ;;  %v10443_v20 = vld [vmem:[#allocation7 + $0x850] sm:$0xf0] }
 0x2ed   :  { %3761 = vmatpush.bf16.msra.mxu2 %v9874_v11  ;;  %3775 = vmatpush.bf16.msra.mxu3 %v10002_v51  ;;  %v12733_v51 = vld [vmem:[#allocation7 + $0x68c] sm:$0xf0]  ;;  %v4892_v11 = vrot.slane %v14836_v46, 6 }
 0x2ee   :  { %4544 = vmatpush.bf16.msrb.mxu0 %v10250_v50  ;;  %3810 = vmatmul.bf16.vlgmr.msra.gmra.mxu1 %v15106_v3  ;;  %v4849_v50 = vsel %vm2350_vm9, %v4848_v21, %v14535_v45  ;;  %v12765_v45 = vld [vmem:[#allocation7 + $0x78c] sm:$0xf0]  ;;  %v3989_v21 = vrot.slane %v16420_v36, 6  ;;  %v4032_v58 = vsel %vm2353_vm10, %v4031_v18, %v4030_v39 }
 0x2ef   :  { %4557 = vmatpush.bf16.msrb.mxu1 %v10394_v14  ;;  %v10217_v14 = vld [vmem:[#allocation7 + $0x680] sm:$0xf]  ;;  %v12757_v39 = vld [vmem:[#allocation7 + $0x74c] sm:$0xf0] }
 0x2f0   :  { %v10218_v54 = vor.u32 %v12733_v51, %v10217_v14  ;;  %v9809_v14 = vld [vmem:[#allocation7 + $0x48] sm:$0xf]  ;;  %v12534_v51 = vld [vmem:[#allocation7 + $0x54] sm:$0xf0]  ;;  %v15265_v6 = vsel %vm2353_vm10, %v3989_v21, %v15209_v26  ;;  %v4858_v21 = vrot.slane %v15194_v19, 2 }
 0x2f1   :  { %3762 = vmatpush.bf16.msra.mxu2 %v9858_v34  ;;  %v16474_v34 = vperm.slane %v15176_v32, 0  ;;  %3776 = vmatpush.bf16.msra.mxu3 %v9986_v47  ;;  %v9826_v47 = vor.u32 %v12538_v62, %v9825_v59  ;;  %v4856_v62 = vrot.slane %v16472_v10, 3 }
 0x2f2   :  { %4545 = vmatpush.bf16.msrb.mxu0 %v10234_v33  ;;  %v10346_v33 = vor.u32 %v12765_v45, %v10345_v0  ;;  %v10202_v0 = vor.u32 %v12729_v49, %v10201_v44  ;;  %v9937_v45 = vld [vmem:[#allocation7 + $0x148] sm:$0xf]  ;;  %v12530_v49 = vld [vmem:[#allocation7 + $0x34] sm:$0xf0] }
 0x2f3   :  { %v15244_v52 = vpack.c.bf16 %v16474_v34, %v16474_v34  ;;  %4558 = vmatpush.bf16.msrb.mxu1 %v10378_v48  ;;  %v4851_v48 = vsel %vm2353_vm10, %v4850_v4, %v4849_v50  ;;  %v15255_v34 = vpack.c.bf16 %v4724_v43, %v4724_v43  ;;  %v9954_v4 = vor.u32 %v12570_v60, %v9953_v29  ;;  %v12761_v50 = vld [vmem:[#allocation7 + $0x76c] sm:$0xf0] }
 0x2f4   :  { %v4853_v59 = vsel %vm2356_vm11, %v4852_v63, %v4851_v48  ;;  %v4890_v43 = vrot.slane %v14817_v38, 7  ;;  %v4854_v60 = vrot.slane %v14729_v27, 4  ;;  %v9810_v29 = vor.u32 %v12534_v51, %v9809_v14  ;;  %v12725_v63 = vld [vmem:[#allocation7 + $0x64c] sm:$0xf0]  ;;  %v9793_v48 = vld [vmem:[#allocation7 + $0x28] sm:$0xf] }
 0x2f5   :  { %3763 = vmatpush.bf16.msra.mxu2 %v9842_v7  ;;  %3777 = vmatpush.bf16.msra.mxu3 %v9970_v31  ;;  %v10329_v7 = vld [vmem:[#allocation7 + $0x760] sm:$0xf]  ;;  %v9938_v51 = vor.u32 %v12566_v2, %v9937_v45  ;;  %v12721_v2 = vld [vmem:[#allocation7 + $0x62c] sm:$0xf0] }
 0x2f6   :  { %4546 = vmatpush.bf16.msrb.mxu0 %v10218_v54  ;;  %v10185_v31 = vld [vmem:[#allocation7 + $0x640] sm:$0xf]  ;;  %v4891_v44 = vsel %vm2350_vm9, %v4890_v43, %v14761_v9  ;;  %v4855_v26 = vsel %vm2359_vm13, %v4854_v60, %v4853_v59  ;;  %v10330_v14 = vor.u32 %v12761_v50, %v10329_v7  ;;  %v4898_v54 = vrot.slane %v16473_v15, 3  ;;  %v9921_v43 = vld [vmem:[#allocation7 + $0x128] sm:$0xf] }
 0x2f7   :  { %4559 = vmatpush.bf16.msrb.mxu1 %v10362_v57  ;;  %v4033_v57 = vrot.slane %v14838_v12, 5  ;;  %v4857_v18 = vsel %vm2362_vm12, %v4856_v62, %v4855_v26  ;;  %v10186_v9 = vor.u32 %v12725_v63, %v10185_v31  ;;  %v12562_v59 = vld [vmem:[#allocation7 + $0x134] sm:$0xf0]  ;;  %v4893_v60 = vsel %vm2353_vm10, %v4892_v11, %v4891_v44  ;;  %v15286_v45 = vld [vmem:[#allocation7 + $0x720] sm:$0xf] }
 0x2f8   :  { %v16476_v50 = vunpack.c.l.b16 %v15244_v52  ;;  %v9777_v31 = vld [vmem:[#allocation7 + $0x8] sm:$0xf]  ;;  %v12526_v63 = vld [vmem:[#allocation7 + $0x14] sm:$0xf0]  ;;  %v4035_v11 = vrot.slane %v14854_v25, 4  ;;  %v4859_v44 = vsel %vm2365_vm14, %v4858_v21, %v4857_v18 }
 0x2f9   :  { %3764 = vmatpush.bf16.msra.mxu2 %v9826_v47  ;;  %v4894_v47 = vrot.slane %v14852_v24, 5  ;;  %3778 = vmatpush.bf16.msra.mxu3 %v9954_v4  ;;  %v10169_v4 = vld [vmem:[#allocation7 + $0x620] sm:$0xf]  ;;  %v4034_v7 = vsel %vm2356_vm11, %v4033_v57, %v4032_v58  ;;  %v10314_v58 = vor.u32 %v12757_v39, %v10313_v41  ;;  %v9922_v57 = vor.u32 %v12562_v59, %v9921_v43  ;;  %v12753_v26 = vld [vmem:[#allocation7 + $0x72c] sm:$0xf0] }
 0x2fa   :  { %4547 = vmatpush.bf16.msrb.mxu0 %v10202_v0  ;;  %v4860_v62 = vrot.slane %v16476_v50, 1  ;;  %v12584_v50 = vld [vmem:[#allocation7 + $0x1ec] sm:$0xf]  ;;  %v10170_v25 = vor.u32 %v12721_v2, %v10169_v4  ;;  %v9905_v21 = vld [vmem:[#allocation7 + $0x108] sm:$0xf]  ;;  %v16480_v41 = vrot.slane %v16473_v15, 2  ;;  %v9778_v39 = vor.u32 %v12526_v63, %v9777_v31 }
 0x2fb   :  { %4560 = vmatpush.bf16.msrb.mxu1 %v10346_v33  ;;  %v9794_v33 = vor.u32 %v12530_v49, %v9793_v48  ;;  %v4895_v0 = vsel %vm2356_vm11, %v4894_v47, %v4893_v60  ;;  %v16477_v48 = vunpack.c.l.b16 %v15255_v34  ;;  %v10019_v47 = vld [vmem:[#allocation7 + $0x1f8] sm:$0xf0]  ;;  %v15294_v60 = vunpack.c.l.b16 %v15219_v23  ;;  %v12558_v18 = vld [vmem:[#allocation7 + $0x114] sm:$0xf0] }
 0x2fc   :  { %v10147_v43 = vld [vmem:[#allocation7 + $0x2f8] sm:$0xf0]  ;;  %v16481_v59 = vrot.slane %v16421_v56, 5  ;;  %v4861_v2 = vsel %vm2368_vm15, %v4860_v62, %v4859_v44  ;;  %v10298_v31 = vor.u32 %v12753_v26, %v15286_v45  ;;  %v9906_v63 = vor.u32 %v12558_v18, %v9905_v21  ;;  %v12580_v44 = vld [vmem:[#allocation7 + $0x1cc] sm:$0xf] }
 0x2fd   :  { %3765 = vmatpush.bf16.msra.mxu2 %v9810_v29  ;;  %v4897_v29 = vsel %vm2359_vm13, %v4896_v22, %v4895_v0  ;;  %v4902_v49 = vrot.slane %v16477_v48, 1  ;;  %3779 = vmatpush.bf16.msra.mxu3 %v9938_v51  ;;  %16478 = vst [vmem:[#allocation33_spill] sm:$0xff] %v15294_v60  ;;  %v10153_v22 = vld [vmem:[#allocation7 + $0x600] sm:$0xf]  ;;  %v16479_v0 = vrot.slane %v14729_v27, 3  ;;  %v4026_v51 = vsel %vm2365_vm14, %v16480_v41, %v15249_v53 }
 0x2fe   :  { %v4899_v12 = vsel %vm2362_vm12, %v4898_v54, %v4897_v29  ;;  %4548 = vmatpush.bf16.msrb.mxu0 %v10186_v9  ;;  %v12717_v54 = vld [vmem:[#allocation7 + $0x60c] sm:$0xf0]  ;;  %v12616_v9 = vld [vmem:[#allocation7 + $0x2ec] sm:$0xf]  ;;  %v3992_v4 = vsel %vm2356_vm11, %v16481_v59, %v15265_v6  ;;  %v10022_v29 = vor.u32 %v12584_v50, %v10019_v47  ;;  %v12775_v48 = vld [vmem:[#allocation7 + $0x7e4] sm:$0xf]  ;;  %v4036_v53 = vsel %vm2359_vm13, %v4035_v11, %v4034_v7 }
 0x2ff   :  { %4561 = vmatpush.bf16.msrb.mxu1 %v10330_v14  ;;  %v3982_v14 = vsel %vm2362_vm12, %v16479_v0, %v15228_v5  ;;  %v4901_v23 = vsel %vm2365_vm14, %v4900_v42, %v4899_v12  ;;  %v10395_v0 = vld [vmem:[#allocation7 + $0x7f0] sm:$0xf0]  ;;  %v16484_v41 = vld [vmem:[#allocation69_spill] sm:$0xff]  ;;  %v4041_v62 = vrot.slane %v15294_v60, 1  ;;  %v10154_v50 = vor.u32 %v12717_v54, %v10153_v22  ;;  %v12807_v11 = vld [vmem:[#allocation7 + $0x8e4] sm:$0xf] }
 0x300   :  { %v4903_v5 = vsel %vm2368_vm15, %v4902_v49, %v4901_v23  ;;  %v16482_v42 = vld [vmem:[#allocation72_spill] sm:$0xff]  ;;  %v4037_v6 = vrot.slane %v16484_v41, 3  ;;  %v10003_v49 = vld [vmem:[#allocation7 + $0x1d8] sm:$0xf0]  ;;  %v10281_v47 = vld [vmem:[#allocation7 + $0x700] sm:$0xf]  ;;  %v10150_v7 = vor.u32 %v12616_v9, %v10147_v43  ;;  %v10398_v26 = vor.u32 %v12775_v48, %v10395_v0 }
 0x301   :  { %3766 = vmatpush.bf16.msra.mxu2 %v9794_v33  ;;  %v4039_v12 = vrot.slane %v16482_v42, 2  ;;  %v15314_v33 = vpack.c.b16 %v4903_v5, %v4861_v2  ;;  %3780 = vmatpush.bf16.msra.mxu3 %v9922_v57  ;;  %v12749_v23 = vld [vmem:[#allocation7 + $0x70c] sm:$0xf0]  ;;  %v16485_v59 = vrot.slane %v16472_v10, 2  ;;  %v16486_v57 = vrot.slane %v16422_v61, 4 }
 0x302   :  { %4549 = vmatpush.bf16.msrb.mxu0 %v10170_v25  ;;  %v10523_v21 = vld [vmem:[#allocation7 + $0x8f0] sm:$0xf0]  ;;  %v4038_v18 = vsel %vm2362_vm12, %v4037_v6, %v4036_v53  ;;  %v12612_v2 = vld [vmem:[#allocation7 + $0x2cc] sm:$0xf]  ;;  %v10131_v25 = vld [vmem:[#allocation7 + $0x2d8] sm:$0xf0]  ;;  %v10006_v43 = vor.u32 %v12580_v44, %v10003_v49 }
 0x303   :  { %16483 = vst [vmem:[#allocation49_spill] sm:$0xff] %v15314_v33  ;;  %4562 = vmatpush.bf16.msrb.mxu1 %v10314_v58  ;;  %v3984_v58 = vsel %vm2365_vm14, %v16485_v59, %v3982_v14  ;;  %v3994_v45 = vsel %vm2359_vm13, %v16486_v57, %v3992_v4  ;;  %v16487_v22 = vrot.slane %v15222_v17, 1  ;;  %v4040_v9 = vsel %vm2365_vm14, %v4039_v12, %v4038_v18  ;;  %v12771_v14 = vld [vmem:[#allocation7 + $0x7c4] sm:$0xf]  ;;  %v10379_v5 = vld [vmem:[#allocation7 + $0x7d0] sm:$0xf0] }
 0x304   :  { %v10282_v4 = vor.u32 %v12749_v23, %v10281_v47  ;;  %v16489_v0 = vrot.slane %v14735_v55, 3  ;;  %v3999_v53 = vrot.slane %v15211_v28, 1  ;;  %v12576_v6 = vld [vmem:[#allocation7 + $0x1ac] sm:$0xf]  ;;  %v10526_v12 = vor.u32 %v12807_v11, %v10523_v21  ;;  %v12803_v49 = vld [vmem:[#allocation7 + $0x8c4] sm:$0xf] }
 0x305   :  { %3767 = vmatpush.bf16.msra.mxu2 %v9778_v39  ;;  %v4028_v54 = vsel %vm2368_vm15, %v16487_v22, %v4026_v51  ;;  %3781 = vmatpush.bf16.msra.mxu3 %v9906_v63  ;;  %v16488_v39 = vrot.slane %v15194_v19, 1  ;;  %v9987_v51 = vld [vmem:[#allocation7 + $0x1b8] sm:$0xf0]  ;;  %v16490_v44 = vrot.slane %v16475_v30, 2  ;;  %v10134_v63 = vor.u32 %v12612_v2, %v10131_v25  ;;  %v12608_v57 = vld [vmem:[#allocation7 + $0x2ac] sm:$0xf] }
 0x306   :  { %4550 = vmatpush.bf16.msrb.mxu0 %v10154_v50  ;;  %v4042_v23 = vsel %vm2368_vm15, %v4041_v62, %v4040_v9  ;;  %v10382_v59 = vor.u32 %v12771_v14, %v10379_v5  ;;  %v16492_v50 = vld [vmem:[#allocation42_spill] sm:$0xff]  ;;  %v10363_v21 = vld [vmem:[#allocation7 + $0x7b0] sm:$0xf0]  ;;  %v9971_v18 = vld [vmem:[#allocation7 + $0x198] sm:$0xf0]  ;;  %v15350_v5 = vpop.f32.mrf.mxu0 }
 0x307   :  { %4563 = vmatpush.bf16.msrb.mxu1 %v10298_v31  ;;  %v3986_v48 = vsel %vm2368_vm15, %v16488_v39, %v3984_v58  ;;  %v10507_v58 = vld [vmem:[#allocation7 + $0x8d0] sm:$0xf0]  ;;  %v12767_v11 = vld [vmem:[#allocation7 + $0x7a4] sm:$0xf]  ;;  %v16493_v2 = vld [vmem:[#allocation37_spill] sm:$0xff] }
 0x308   :  { %3768 = vmatmul.bf16.vlgmr.msra.gmra.mxu2 %v15106_v3  ;;  %v15341_v47 = vpack.c.b16 %v4028_v54, %v3986_v48  ;;  %3782 = vmatmul.bf16.vlgmr.msra.gmra.mxu3 %v16492_v50  ;;  %v12572_v3 = vld [vmem:[#allocation7 + $0x18c] sm:$0xf]  ;;  %v16294_v25 = vrot.slane %v16493_v2, 6  ;;  %v10510_v22 = vor.u32 %v12803_v49, %v10507_v58  ;;  %v12799_v9 = vld [vmem:[#allocation7 + $0x8a4] sm:$0xf]  ;;  %v2935_v48 = vpop.f32.mrf.mxu2  ;;  %v16507_v41 = vld [vmem:[#allocation56_spill] sm:$0xff] }
 0x309   :  { %3816 = vmatpush.bf16.msrb.mxu2 %v10022_v29  ;;  %v3996_v29 = vsel %vm2362_vm12, %v16489_v0, %v3994_v45  ;;  %3830 = vmatpush.bf16.msrb.mxu3 %v10150_v7  ;;  %v10115_v45 = vld [vmem:[#allocation7 + $0x2b8] sm:$0xf0]  ;;  %v9990_v7 = vor.u32 %v12576_v6, %v9987_v51  ;;  %v10491_v14 = vld [vmem:[#allocation7 + $0x8b0] sm:$0xf0]  ;;  %v9974_v0 = vor.u32 %v12572_v3, %v9971_v18  ;;  %v12568_v6 = vld [vmem:[#allocation7 + $0x16c] sm:$0xf] }
 0x30a   :  { %v3998_v31 = vsel %vm2365_vm14, %v16490_v44, %v3996_v29  ;;  %4599 = vmatpush.bf16.msra.mxu0 %v10398_v26  ;;  %16491 = vst [vmem:[#allocation34_spill] sm:$0xff] %v15341_v47  ;;  %v10118_v54 = vor.u32 %v12608_v57, %v10115_v45  ;;  %v10099_v39 = vld [vmem:[#allocation7 + $0x298] sm:$0xf0]  ;;  %v12763_v29 = vld [vmem:[#allocation7 + $0x784] sm:$0xf] }
 0x30b   :  { %4564 = vmatpush.bf16.msrb.mxu1 %v10282_v4  ;;  %4551 = vmatmul.bf16.vlgmr.msrb.gmra.mxu0 %v15341_v47  ;;  %v4000_v26 = vsel %vm2368_vm15, %v3999_v53, %v3998_v31  ;;  %v12604_v4 = vld [vmem:[#allocation7 + $0x28c] sm:$0xf]  ;;  %v10347_v53 = vld [vmem:[#allocation7 + $0x790] sm:$0xf0]  ;;  %v9955_v51 = vld [vmem:[#allocation7 + $0x178] sm:$0xf0] }
 0x30c   :  { %v15348_v62 = vpack.c.b16 %v4042_v23, %v4000_v26  ;;  %v15356_v31 = vrot.slane %v16294_v25, 9  ;;  %v10102_v49 = vor.u32 %v12604_v4, %v10099_v39  ;;  %v12795_v23 = vld [vmem:[#allocation7 + $0x884] sm:$0xf]  ;;  %v10475_v58 = vld [vmem:[#allocation7 + $0x890] sm:$0xf0]  ;;  %v9958_v26 = vor.u32 %v12568_v6, %v9955_v51  ;;  %v16496_v25 = vld [vmem:[#allocation59_spill] sm:$0xff] }
 0x30d   :  { %3817 = vmatpush.bf16.msrb.mxu2 %v10006_v43  ;;  %3831 = vmatpush.bf16.msrb.mxu3 %v10134_v63  ;;  %v10366_v43 = vor.u32 %v12767_v11, %v10363_v21  ;;  %v10494_v63 = vor.u32 %v12799_v9, %v10491_v14  ;;  %v12600_v57 = vld [vmem:[#allocation7 + $0x26c] sm:$0xf]  ;;  %v10083_v45 = vld [vmem:[#allocation7 + $0x278] sm:$0xf0]  ;;  %v3851_v21 = vperm.slane %v15178_v35, 4  ;;  %v16497_v14 = vld [vmem:[#allocation40_spill] sm:$0xff]  ;;  %v10478_v39 = vor.u32 %v12795_v23, %v10475_v58 }
 0x30e   :  { %4600 = vmatpush.bf16.msra.mxu0 %v10382_v59  ;;  %4565 = vmatmul.bf16.vlgmr.msrb.gmra.mxu1 %v15348_v62  ;;  %v10350_v59 = vor.u32 %v12763_v29, %v10347_v53  ;;  %v12759_v3 = vld [vmem:[#allocation7 + $0x764] sm:$0xf]  ;;  %v10331_v18 = vld [vmem:[#allocation7 + $0x770] sm:$0xf0]  ;;  %v9939_v9 = vld [vmem:[#allocation7 + $0x158] sm:$0xf0]  ;;  %v10086_v53 = vor.u32 %v12600_v57, %v10083_v45  ;;  %v15369_v60 = vpop.f32.mrf.mxu0 }
 0x30f   :  { %4613 = vmatpush.bf16.msra.mxu1 %v10526_v12  ;;  %v16494_v12 = vld [vmem:[#allocation38_spill] sm:$0xff]  ;;  %v4003_v4 = vrot.slane %v16497_v14, 6  ;;  %v16500_v51 = vld [vmem:[#allocation47_spill] sm:$0xff]  ;;  %v10459_v33 = vld [vmem:[#allocation7 + $0x870] sm:$0xf0]  ;;  %16501 = vst [vmem:[#allocation28_spill] sm:$0xff] %v15369_v60  ;;  %v3863_v57 = vpack.c.bf16 %v3851_v21, %v3851_v21 }
 0x310   :  { %v4001_v44 = vrot.slane %v16494_v12, 7  ;;  %v4043_v12 = vrot.slane %v16496_v25, 7  ;;  %v12791_v35 = vld [vmem:[#allocation7 + $0x864] sm:$0xf]  ;;  %v10334_v25 = vor.u32 %v12759_v3, %v10331_v18  ;;  %v12596_v14 = vld [vmem:[#allocation7 + $0x24c] sm:$0xf]  ;;  %v15371_v42 = vpop.f32.mrf.mxu2 }
 0x311   :  { %3818 = vmatpush.bf16.msrb.mxu2 %v9990_v7  ;;  %3832 = vmatpush.bf16.msrb.mxu3 %v10118_v54  ;;  %v16495_v7 = vld [vmem:[#allocation62_spill] sm:$0xff]  ;;  %v12564_v54 = vld [vmem:[#allocation7 + $0x14c] sm:$0xf]  ;;  %16502 = vst [vmem:[#allocation35_spill] sm:$0xff] %v15371_v42  ;;  %v16506_v60 = vld [vmem:[#allocation45_spill] sm:$0xff] }
 0x312   :  { %4601 = vmatpush.bf16.msra.mxu0 %v10366_v43  ;;  %v15362_v43 = vpop.f32.mrf.mxu1  ;;  %v4002_v11 = vsel %vm2350_vm9, %v4001_v44, %v16500_v51  ;;  %v9942_v45 = vor.u32 %v12564_v54, %v9939_v9  ;;  %v12560_v44 = vld [vmem:[#allocation7 + $0x12c] sm:$0xf]  ;;  %v4044_v42 = vsel %vm2350_vm9, %v4043_v12, %v16507_v41  ;;  %v12787_v21 = vld [vmem:[#allocation7 + $0x844] sm:$0xf]  ;;  %v10299_v12 = vld [vmem:[#allocation7 + $0x730] sm:$0xf0] }
 0x313   :  { %4614 = vmatpush.bf16.msra.mxu1 %v10510_v22  ;;  %v2949_v22 = vpop.f32.mrf.mxu3  ;;  %16498 = vst [vmem:[#allocation50_spill] sm:$0xff] %v15362_v43  ;;  %v4004_v3 = vsel %vm2353_vm10, %v4003_v4, %v4002_v11  ;;  %v16505_v18 = vld [vmem:[#allocation43_spill] sm:$0xff]  ;;  %v4007_v43 = vrot.slane %v16506_v60, 4  ;;  %v16509_v9 = vld [vmem:[#allocation66_spill] sm:$0xff]  ;;  %v10051_v4 = vld [vmem:[#allocation7 + $0x238] sm:$0xf0] }
 0x314   :  { %v15364_v29 = vadd.f32 %v2949_v22, %v2935_v48  ;;  %v16504_v48 = vrot.slane %v16495_v7, 6  ;;  %v12755_v22 = vld [vmem:[#allocation7 + $0x744] sm:$0xf]  ;;  %v4005_v51 = vrot.slane %v16505_v18, 5  ;;  %v4047_v28 = vrot.slane %v16509_v9, 5 }
 0x315   :  { %3819 = vmatpush.bf16.msrb.mxu2 %v9974_v0  ;;  %3833 = vmatpush.bf16.msrb.mxu3 %v10102_v49  ;;  %v16499_v0 = vld [vmem:[#allocation64_spill] sm:$0xff]  ;;  %v12592_v11 = vld [vmem:[#allocation7 + $0x22c] sm:$0xf]  ;;  %v12751_v41 = vld [vmem:[#allocation7 + $0x724] sm:$0xf] }
 0x316   :  { %v4045_v6 = vrot.slane %v16499_v0, 6  ;;  %4602 = vmatpush.bf16.msra.mxu0 %v10350_v59  ;;  %v16503_v49 = vld [vmem:[#allocation44_spill] sm:$0xff]  ;;  %v9382_v58 = vrot.slane %v16504_v48, 9  ;;  %v9923_v59 = vld [vmem:[#allocation7 + $0x138] sm:$0xf0]  ;;  %v10302_v9 = vor.u32 %v12751_v41, %v10299_v12 }
 0x317   :  { %4615 = vmatpush.bf16.msra.mxu1 %v10494_v63  ;;  %v10067_v63 = vld [vmem:[#allocation7 + $0x258] sm:$0xf0]  ;;  %v3848_v23 = vperm.slane %v16503_v49, 4  ;;  %v10315_v0 = vld [vmem:[#allocation7 + $0x750] sm:$0xf0]  ;;  %v10462_v49 = vor.u32 %v12791_v35, %v10459_v33  ;;  %v9926_v30 = vor.u32 %v12560_v44, %v9923_v59  ;;  %v15393_v59 = vunpack.c.l.b16 %v3863_v57 }
 0x318   :  { %v10070_v48 = vor.u32 %v12596_v14, %v10067_v63  ;;  %v10318_v47 = vor.u32 %v12755_v22, %v10315_v0  ;;  %v4046_v18 = vsel %vm2353_vm10, %v4045_v6, %v4044_v42  ;;  %v16511_v14 = vld [vmem:[#allocation68_spill] sm:$0xff]  ;;  %v15388_v63 = vld [vmem:[#allocation7 + $0x824] sm:$0xf]  ;;  %v9907_v0 = vld [vmem:[#allocation7 + $0x118] sm:$0xf0]  ;;  %v4006_v22 = vsel %vm2356_vm11, %v4005_v51, %v4004_v3 }
 0x319   :  { %3820 = vmatpush.bf16.msrb.mxu2 %v9958_v26  ;;  %3834 = vmatpush.bf16.msrb.mxu3 %v10086_v53  ;;  %v16508_v26 = vld [vmem:[#allocation26_spill] sm:$0xff]  ;;  %v3860_v60 = vpack.c.bf16 %v3848_v23, %v3848_v23  ;;  %v4049_v53 = vrot.slane %v16511_v14, 4  ;;  %v10446_v42 = vor.u32 %v12787_v21, %v10443_v20  ;;  %v10054_v6 = vor.u32 %v12592_v11, %v10051_v4  ;;  %v10427_v23 = vld [vmem:[#allocation7 + $0x830] sm:$0xf0]  ;;  %v12809_v44 = vld [vmem:[#allocation7 + $0x8ec] sm:$0xf0]  ;;  %v15403_v21 = vpop.f32.mrf.mxu0  ;;  %v2963_v4 = vpop.f32.mrf.mxu2 }
 0x31a   :  { %4603 = vmatpush.bf16.msra.mxu0 %v10334_v25  ;;  %v12556_v25 = vld [vmem:[#allocation7 + $0x10c] sm:$0xf]  ;;  %v15391_v54 = vpop.f32.mrf.mxu1  ;;  %16514 = vst [vmem:[#allocation41_spill] sm:$0xff] %v15393_v59  ;;  %v4048_v33 = vsel %vm2356_vm11, %v4047_v28, %v4046_v18  ;;  %v10035_v51 = vld [vmem:[#allocation7 + $0x218] sm:$0xf0]  ;;  %v16516_v20 = vrot.slane %v16495_v7, 6  ;;  %v15407_v12 = vadd.f32 %v2963_v4, %v15364_v29 }
 0x31b   :  { %4616 = vmatpush.bf16.msra.mxu1 %v10478_v39  ;;  %v16510_v39 = vld [vmem:[#allocation57_spill] sm:$0xff]  ;;  %v15386_v35 = vpop.f32.mrf.mxu3  ;;  %16513 = vst [vmem:[#allocation29_spill] sm:$0xff] %v15391_v54  ;;  %v12588_v3 = vld [vmem:[#allocation7 + $0x20c] sm:$0xf]  ;;  %v15399_v54 = vunpack.c.l.b16 %v3860_v60  ;;  %v9910_v57 = vor.u32 %v12556_v25, %v9907_v0  ;;  %v10283_v11 = vld [vmem:[#allocation7 + $0x710] sm:$0xf0]  ;;  %v4050_v60 = vsel %vm2359_vm13, %v4049_v53, %v4048_v33 }
 0x31c   :  { %16512 = vst [vmem:[#allocation51_spill] sm:$0xff] %v15386_v35  ;;  %v16515_v35 = vrot.slane %v16493_v2, 6  ;;  %v12743_v28 = vld [vmem:[#allocation7 + $0x6e4] sm:$0xf]  ;;  %v10267_v18 = vld [vmem:[#allocation7 + $0x6f0] sm:$0xf0]  ;;  %v4008_v2 = vsel %vm2359_vm13, %v4007_v43, %v4006_v22 }
 0x31d   :  { %3821 = vmatpush.bf16.msrb.mxu2 %v9942_v45  ;;  %3835 = vmatpush.bf16.msrb.mxu3 %v10070_v48  ;;  %v10521_v45 = vld [vmem:[#allocation7 + $0x8e0] sm:$0xf]  ;;  %v1801_v48 = vmax.f32 %v16516_v20, %v9382_v58  ;;  %16517 = vst [vmem:[#allocation52_spill] sm:$0xff] %v15403_v21  ;;  %v12810_v41 = vld [vmem:[#allocation7 + $0x8f4] sm:$0xf0]  ;;  %v16518_v7 = vld [vmem:[#allocation39_spill] sm:$0xff]  ;;  %v10270_v4 = vor.u32 %v12743_v28, %v10267_v18 }
 0x31e   :  { %v1789_v14 = vmax.f32 %v16515_v35, %v15356_v31  ;;  %4604 = vmatpush.bf16.msra.mxu0 %v10318_v47  ;;  %v10522_v47 = vor.u32 %v12809_v44, %v10521_v45  ;;  %v10529_v31 = vld [vmem:[#allocation7 + $0x8e8] sm:$0xf]  ;;  %v4053_v58 = vrot.slane %v16518_v7, 2  ;;  %v10038_v35 = vor.u32 %v12588_v3, %v10035_v51  ;;  %v10505_v43 = vld [vmem:[#allocation7 + $0x8c0] sm:$0xf] }
 0x31f   :  { %4617 = vmatpush.bf16.msra.mxu1 %v10462_v49  ;;  %v12747_v49 = vld [vmem:[#allocation7 + $0x704] sm:$0xf]  ;;  %v4055_v20 = vrot.slane %v15393_v59, 1  ;;  %v12805_v22 = vld [vmem:[#allocation7 + $0x8cc] sm:$0xf0]  ;;  %v16520_v33 = vld [vmem:[#allocation53_spill] sm:$0xff] }
 0x320   :  { %v16519_v25 = vld [vmem:[#allocation70_spill] sm:$0xff]  ;;  %v10286_v45 = vor.u32 %v12747_v49, %v10283_v11  ;;  %v10411_v29 = vld [vmem:[#allocation7 + $0x810] sm:$0xf0]  ;;  %v12744_v21 = vld [vmem:[#allocation7 + $0x6ec] sm:$0xf]  ;;  %v1843_v53 = vadd.f32 %v16520_v33, %v1789_v14  ;;  %v16522_v59 = vrot.slane %v16508_v26, 3  ;;  %v10506_v11 = vor.u32 %v12805_v22, %v10505_v43 }
 0x321   :  { %3822 = vmatpush.bf16.msrb.mxu2 %v9926_v30  ;;  %3836 = vmatpush.bf16.msrb.mxu3 %v10054_v6  ;;  %v10430_v30 = vor.u32 %v15388_v63, %v10427_v23  ;;  %v4051_v0 = vrot.slane %v16519_v25, 3  ;;  %v12779_v44 = vld [vmem:[#allocation7 + $0x804] sm:$0xf]  ;;  %v10275_v6 = vld [vmem:[#allocation7 + $0x6f8] sm:$0xf0]  ;;  %v15432_v43 = vpop.f32.mrf.mxu0 }
 0x322   :  { %4605 = vmatpush.bf16.msra.mxu0 %v10302_v9  ;;  %v12739_v23 = vld [vmem:[#allocation7 + $0x6c4] sm:$0xf]  ;;  %v10251_v3 = vld [vmem:[#allocation7 + $0x6d0] sm:$0xf0]  ;;  %v16521_v51 = vld [vmem:[#allocation25_spill] sm:$0xff]  ;;  %v4010_v9 = vsel %vm2362_vm12, %v16522_v59, %v4008_v2  ;;  %v15421_v14 = vpop.f32.mrf.mxu1  ;;  %v10278_v59 = vor.u32 %v12744_v21, %v10275_v6  ;;  %16524 = vst [vmem:[#allocation46_spill] sm:$0xff] %v15432_v43 }
 0x323   :  { %4618 = vmatpush.bf16.msra.mxu1 %v10446_v42  ;;  %v10530_v42 = vor.u32 %v12810_v41, %v10529_v31  ;;  %v4052_v63 = vsel %vm2362_vm12, %v4051_v0, %v4050_v60  ;;  %v1855_v7 = vadd.f32 %v16521_v51, %v1801_v48  ;;  %v10513_v28 = vld [vmem:[#allocation7 + $0x8c8] sm:$0xf]  ;;  %v12806_v18 = vld [vmem:[#allocation7 + $0x8d4] sm:$0xf0]  ;;  %v2977_v31 = vpop.f32.mrf.mxu3  ;;  %v16523_v41 = vrot.slane %v16510_v39, 2 }
 0x324   :  { %v4054_v49 = vsel %vm2365_vm14, %v4053_v58, %v4052_v63  ;;  %v10489_v60 = vld [vmem:[#allocation7 + $0x8a0] sm:$0xf]  ;;  %v12801_v0 = vld [vmem:[#allocation7 + $0x8ac] sm:$0xf0]  ;;  %v15428_v2 = vadd.f32 %v15350_v5, %v2977_v31  ;;  %v10254_v58 = vor.u32 %v12739_v23, %v10251_v3  ;;  %v10514_v22 = vor.u32 %v12806_v18, %v10513_v28  ;;  %v10235_v33 = vld [vmem:[#allocation7 + $0x6b0] sm:$0xf0]  ;;  %v15446_v18 = vpop.f32.mrf.mxu2 }
 0x325   :  { %3823 = vmatpush.bf16.msrb.mxu2 %v9910_v57  ;;  %3837 = vmatpush.bf16.msrb.mxu3 %v10038_v35  ;;  %v10414_v57 = vor.u32 %v12779_v44, %v10411_v29  ;;  %v4012_v48 = vsel %vm2365_vm14, %v16523_v41, %v4010_v9  ;;  %v4056_v35 = vsel %vm2368_vm15, %v4055_v20, %v4054_v49  ;;  %v10259_v44 = vld [vmem:[#allocation7 + $0x6d8] sm:$0xf0]  ;;  %v12735_v29 = vld [vmem:[#allocation7 + $0x6a4] sm:$0xf]  ;;  %v15434_v63 = vmax.f32 %v1843_v53, 0.0 }
 0x326   :  { %4606 = vmatpush.bf16.msra.mxu0 %v10286_v45  ;;  %v15436_v45 = vmax.f32 %v1855_v7, 0.0  ;;  %v10490_v5 = vor.u32 %v12801_v0, %v10489_v60  ;;  %v10497_v21 = vld [vmem:[#allocation7 + $0x8a8] sm:$0xf]  ;;  %v12736_v20 = vld [vmem:[#allocation7 + $0x6ac] sm:$0xf]  ;;  %v10238_v53 = vor.u32 %v12735_v29, %v10235_v33  ;;  %16525 = vst [vmem:[#allocation36_spill] sm:$0xff] %v15446_v18 }
 0x327   :  { %4619 = vmatpush.bf16.msra.mxu1 %v10430_v30  ;;  %v12740_v30 = vld [vmem:[#allocation7 + $0x6cc] sm:$0xf]  ;;  %v12797_v6 = vld [vmem:[#allocation7 + $0x88c] sm:$0xf0]  ;;  %v10243_v3 = vld [vmem:[#allocation7 + $0x6b8] sm:$0xf0] }
 0x328   :  { %3824 = vmatmul.bf16.vlgmr.msrb.gmra.mxu2 %v16492_v50  ;;  %3838 = vmatmul.bf16.vlgmr.msrb.gmra.mxu3 %v15161_v16  ;;  %v10262_v7 = vor.u32 %v12740_v30, %v10259_v44  ;;  %v12731_v16 = vld [vmem:[#allocation7 + $0x684] sm:$0xf]  ;;  %v10219_v51 = vld [vmem:[#allocation7 + $0x690] sm:$0xf0]  ;;  %v10481_v49 = vld [vmem:[#allocation7 + $0x888] sm:$0xf]  ;;  %v10246_v30 = vor.u32 %v12736_v20, %v10243_v3 }
 0x329   :  { %4571 = vmatpush.bf16.msra.mxu2 %v10522_v47  ;;  %v4013_v47 = vrot.slane %v15399_v54, 1  ;;  %4585 = vmatpush.bf16.msra.mxu3 %v10270_v4  ;;  %v12802_v4 = vld [vmem:[#allocation7 + $0x8b4] sm:$0xf0]  ;;  %v15443_v28 = vld [vmem:[#allocation7 + $0x68c] sm:$0xf]  ;;  %v5596_v44 = vperm.slane %v15434_v63, 0 }
 0x32a   :  { %4655 = vmatpush.bf16.msrb.mxu0 %v10530_v42  ;;  %v10473_v42 = vld [vmem:[#allocation7 + $0x880] sm:$0xf]  ;;  %v10498_v9 = vor.u32 %v12802_v4, %v10497_v21  ;;  %v10227_v31 = vld [vmem:[#allocation7 + $0x698] sm:$0xf0]  ;;  %v15449_v60 = vpop.f32.mrf.mxu1  ;;  %v12794_v21 = vld [vmem:[#allocation7 + $0x874] sm:$0xf0] }
 0x32b   :  { %4620 = vmatpush.bf16.msra.mxu1 %v10414_v57  ;;  %4607 = vmatmul.bf16.vlgmr.msra.gmra.mxu0 %v15348_v62  ;;  %v4014_v50 = vsel %vm2368_vm15, %v4013_v47, %v4012_v48  ;;  %v10474_v57 = vor.u32 %v12797_v6, %v10473_v42  ;;  %v10457_v41 = vld [vmem:[#allocation7 + $0x860] sm:$0xf]  ;;  %v12793_v48 = vld [vmem:[#allocation7 + $0x86c] sm:$0xf0]  ;;  %v4722_v47 = vperm.slane %v15176_v32, 2  ;;  %16526 = vst [vmem:[#allocation31_spill] sm:$0xff] %v15449_v60  ;;  %v15451_v0 = vpop.f32.mrf.mxu3 }
 0x32c   :  { %v15441_v23 = vpack.c.b16 %v4056_v35, %v4014_v50  ;;  %v10222_v35 = vor.u32 %v12731_v16, %v10219_v51  ;;  %v10230_v29 = vor.u32 %v15443_v28, %v10227_v31  ;;  %v10458_v33 = vor.u32 %v12793_v48, %v10457_v41  ;;  %v15457_v6 = vld [vmem:[#allocation7 + $0x66c] sm:$0xf]  ;;  %v3685_v16 = vpop.f32.mrf.mxu0  ;;  %v12789_v51 = vld [vmem:[#allocation7 + $0x84c] sm:$0xf0]  ;;  %v12723_v31 = vld [vmem:[#allocation7 + $0x644] sm:$0xf] }
 0x32d   :  { %4572 = vmatpush.bf16.msra.mxu2 %v10506_v11  ;;  %4586 = vmatpush.bf16.msra.mxu3 %v10254_v58  ;;  %v12798_v11 = vld [vmem:[#allocation7 + $0x894] sm:$0xf0]  ;;  %v10203_v58 = vld [vmem:[#allocation7 + $0x670] sm:$0xf0]  ;;  %v5723_v4 = vrot.slane %v14646_v8, 7  ;;  %v5725_v50 = vrot.slane %v14661_v1, 6 }
 0x32e   :  { %4656 = vmatpush.bf16.msrb.mxu0 %v10514_v22  ;;  %4621 = vmatmul.bf16.vlgmr.msra.gmra.mxu1 %v15441_v23  ;;  %v10482_v22 = vor.u32 %v12798_v11, %v10481_v49  ;;  %v5599_v20 = vperm.slane %v15436_v45, 0  ;;  %v5729_v3 = vrot.slane %v16472_v10, 4  ;;  %v5727_v49 = vrot.slane %v14729_v27, 5  ;;  %v10187_v41 = vld [vmem:[#allocation7 + $0x650] sm:$0xf0] }
 0x32f   :  { %4669 = vmatpush.bf16.msrb.mxu1 %v10278_v59  ;;  %v12727_v59 = vld [vmem:[#allocation7 + $0x664] sm:$0xf]  ;;  %v5731_v8 = vrot.slane %v15194_v19, 3  ;;  %v5765_v1 = vrot.slane %v14836_v46, 7  ;;  %v3686_v11 = vadd.f32 %v3685_v16, %v15407_v12  ;;  %v10449_v48 = vld [vmem:[#allocation7 + $0x848] sm:$0xf]  ;;  %v16527_v19 = vunpack.c.l.b16 %v15244_v52 }
 0x330   :  { %v10206_v42 = vor.u32 %v12727_v59, %v10203_v58  ;;  %v12790_v59 = vld [vmem:[#allocation7 + $0x854] sm:$0xf0]  ;;  %v5767_v46 = vrot.slane %v14852_v24, 6  ;;  %v4723_v12 = vperm.slane %v15176_v32, 4  ;;  %v5611_v52 = vpack.c.bf16 %v5599_v20, %v5599_v20  ;;  %v15551_v32 = vld [vmem:[#allocation7 + $0xa8c] sm:$0xf0] }
 0x331   :  { %4573 = vmatpush.bf16.msra.mxu2 %v10490_v5  ;;  %4587 = vmatpush.bf16.msra.mxu3 %v10238_v53  ;;  %v10465_v5 = vld [vmem:[#allocation7 + $0x868] sm:$0xf]  ;;  %v5608_v53 = vpack.c.bf16 %v5596_v44, %v5596_v44  ;;  %v5733_v58 = vrot.slane %v16527_v19, 2  ;;  %v5766_v44 = vsel %vm2350_vm9, %v5765_v1, %v14817_v38  ;;  %v10450_v16 = vor.u32 %v12790_v59, %v10449_v48  ;;  %v10195_v38 = vld [vmem:[#allocation7 + $0x658] sm:$0xf0] }
 0x332   :  { %4657 = vmatpush.bf16.msrb.mxu0 %v10498_v9  ;;  %v5724_v9 = vsel %vm2350_vm9, %v5723_v4, %v14628_v13  ;;  %v10466_v28 = vor.u32 %v12794_v21, %v10465_v5  ;;  %v10425_v21 = vld [vmem:[#allocation7 + $0x820] sm:$0xf]  ;;  %v12785_v4 = vld [vmem:[#allocation7 + $0x82c] sm:$0xf0]  ;;  %v10433_v1 = vld [vmem:[#allocation7 + $0x828] sm:$0xf] }
 0x333   :  { %4670 = vmatpush.bf16.msrb.mxu1 %v10262_v7  ;;  %v10441_v7 = vld [vmem:[#allocation7 + $0x840] sm:$0xf]  ;;  %v5726_v10 = vsel %vm2353_vm10, %v5725_v50, %v5724_v9  ;;  %v5717_v13 = vunpack.c.l.b16 %v5608_v53  ;;  %v4725_v50 = vperm.slane %v15188_v37, 2  ;;  %v12719_v9 = vld [vmem:[#allocation7 + $0x624] sm:$0xf]  ;;  %v4862_v59 = vrot.slane %v16420_v36, 7 }
 0x334   :  { %v5728_v27 = vsel %vm2356_vm11, %v5727_v49, %v5726_v10  ;;  %v10171_v49 = vld [vmem:[#allocation7 + $0x630] sm:$0xf0]  ;;  %v12720_v10 = vld [vmem:[#allocation7 + $0x62c] sm:$0xf]  ;;  %v12781_v48 = vld [vmem:[#allocation7 + $0x80c] sm:$0xf0] }
 0x335   :  { %4574 = vmatpush.bf16.msra.mxu2 %v10474_v57  ;;  %4588 = vmatpush.bf16.msra.mxu3 %v10222_v35  ;;  %v10211_v57 = vld [vmem:[#allocation7 + $0x678] sm:$0xf0]  ;;  %v5730_v35 = vsel %vm2359_vm13, %v5729_v3, %v5728_v27  ;;  %v10190_v3 = vor.u32 %v12723_v31, %v10187_v41  ;;  %v5771_v31 = vrot.slane %v16473_v15, 4  ;;  %v5773_v41 = vrot.slane %v15222_v17, 3  ;;  %v12746_v15 = vld [vmem:[#allocation7 + $0x6f4] sm:$0xf0] }
 0x336   :  { %4658 = vmatpush.bf16.msrb.mxu0 %v10482_v22  ;;  %v3699_v22 = vpop.f32.mrf.mxu1  ;;  %v10214_v5 = vor.u32 %v15457_v6, %v10211_v57  ;;  %v5732_v53 = vsel %vm2362_vm12, %v5731_v8, %v5730_v35  ;;  %v5735_v57 = vrot.slane %v5717_v13, 1  ;;  %v5768_v8 = vsel %vm2353_vm10, %v5767_v46, %v5766_v44  ;;  %v10273_v35 = vld [vmem:[#allocation7 + $0x6e8] sm:$0xf]  ;;  %v10569_v60 = vld [vmem:[#allocation7 + $0x940] sm:$0xf] }
 0x337   :  { %4671 = vmatpush.bf16.msrb.mxu1 %v10246_v30  ;;  %v10442_v30 = vor.u32 %v12789_v51, %v10441_v7  ;;  %v15479_v24 = vadd.f32 %v3699_v22, %v3686_v11  ;;  %v3033_v7 = vpop.f32.mrf.mxu3  ;;  %v12724_v51 = vld [vmem:[#allocation7 + $0x64c] sm:$0xf]  ;;  %v5734_v20 = vsel %vm2365_vm14, %v5733_v58, %v5732_v53  ;;  %v5769_v11 = vrot.slane %v14867_v40, 5  ;;  %v10179_v40 = vld [vmem:[#allocation7 + $0x638] sm:$0xf0] }
 0x338   :  { %v5720_v27 = vunpack.c.l.b16 %v5611_v52  ;;  %v5736_v19 = vsel %vm2368_vm15, %v5735_v57, %v5734_v20  ;;  %v16528_v13 = vunpack.c.l.b16 %v15255_v34  ;;  %v10198_v46 = vor.u32 %v12724_v51, %v10195_v38  ;;  %v12715_v22 = vld [vmem:[#allocation7 + $0x604] sm:$0xf]  ;;  %v12782_v34 = vld [vmem:[#allocation7 + $0x814] sm:$0xf0]  ;;  %v10649_v51 = vld [vmem:[#allocation7 + $0x9e0] sm:$0xf] }
 0x339   :  { %4575 = vmatpush.bf16.msra.mxu2 %v10458_v33  ;;  %4589 = vmatpush.bf16.msra.mxu3 %v10206_v42  ;;  %v3019_v33 = vpop.f32.mrf.mxu2  ;;  %v12786_v42 = vld [vmem:[#allocation7 + $0x834] sm:$0xf0]  ;;  %v5770_v17 = vsel %vm2356_vm11, %v5769_v11, %v5768_v8  ;;  %v12841_v38 = vld [vmem:[#allocation7 + $0x9ec] sm:$0xf0]  ;;  %v10257_v57 = vld [vmem:[#allocation7 + $0x6c8] sm:$0xf] }
 0x33a   :  { %4659 = vmatpush.bf16.msrb.mxu0 %v10466_v28  ;;  %v15481_v6 = vadd.f32 %v3033_v7, %v3019_v33  ;;  %v10409_v28 = vld [vmem:[#allocation7 + $0x800] sm:$0xf]  ;;  %v5775_v58 = vrot.slane %v16528_v13, 2  ;;  %v10434_v44 = vor.u32 %v12786_v42, %v10433_v1  ;;  %v5772_v52 = vsel %vm2359_vm13, %v5771_v31, %v5770_v17  ;;  %v10401_v33 = vld [vmem:[#allocation7 + $0x7e8] sm:$0xf]  ;;  %v16535_v42 = vld [vmem:[#allocation48_spill] sm:$0xff] }
 0x33b   :  { %4672 = vmatpush.bf16.msrb.mxu1 %v10230_v29  ;;  %v10426_v29 = vor.u32 %v12785_v4, %v10425_v21  ;;  %v10155_v21 = vld [vmem:[#allocation7 + $0x610] sm:$0xf0]  ;;  %v10417_v4 = vld [vmem:[#allocation7 + $0x808] sm:$0xf]  ;;  %v10410_v53 = vor.u32 %v12781_v48, %v10409_v28  ;;  %v5774_v7 = vsel %vm2362_vm12, %v5773_v41, %v5772_v52  ;;  %v10182_v1 = vor.u32 %v12720_v10, %v10179_v40  ;;  %v12742_v8 = vld [vmem:[#allocation7 + $0x6d4] sm:$0xf0] }
 0x33c   :  { %v10158_v20 = vor.u32 %v12715_v22, %v10155_v21  ;;  %v10418_v11 = vor.u32 %v12782_v34, %v10417_v4  ;;  %v12716_v31 = vld [vmem:[#allocation7 + $0x60c] sm:$0xf]  ;;  %v10163_v41 = vld [vmem:[#allocation7 + $0x618] sm:$0xf0]  ;;  %v10777_v48 = vld [vmem:[#allocation7 + $0xae0] sm:$0xf] }
 0x33d   :  { %4576 = vmatpush.bf16.msra.mxu2 %v10442_v30  ;;  %4590 = vmatpush.bf16.msra.mxu3 %v10190_v3  ;;  %v10174_v30 = vor.u32 %v12719_v9, %v10171_v49  ;;  %v10274_v3 = vor.u32 %v12746_v15, %v10273_v35  ;;  %v4864_v9 = vrot.slane %v16421_v56, 6  ;;  %v5777_v49 = vrot.slane %v5720_v27, 1  ;;  %v12774_v10 = vld [vmem:[#allocation7 + $0x7d4] sm:$0xf0]  ;;  %v10633_v15 = vld [vmem:[#allocation7 + $0x9c0] sm:$0xf] }
 0x33e   :  { %4660 = vmatpush.bf16.msrb.mxu0 %v10450_v16  ;;  %v5776_v16 = vsel %vm2365_vm14, %v5775_v58, %v5774_v7  ;;  %v10650_v27 = vor.u32 %v12841_v38, %v10649_v51  ;;  %v12873_v58 = vld [vmem:[#allocation7 + $0xaec] sm:$0xf0]  ;;  %v10258_v35 = vor.u32 %v12742_v8, %v10257_v57  ;;  %v10166_v52 = vor.u32 %v12716_v31, %v10163_v41  ;;  %v12738_v34 = vld [vmem:[#allocation7 + $0x6b4] sm:$0xf0]  ;;  %v10761_v51 = vld [vmem:[#allocation7 + $0xac0] sm:$0xf] }
 0x33f   :  { %4673 = vmatpush.bf16.msrb.mxu1 %v10214_v5  ;;  %v12778_v5 = vld [vmem:[#allocation7 + $0x7f4] sm:$0xf0]  ;;  %v5778_v13 = vsel %vm2368_vm15, %v5777_v49, %v5776_v16  ;;  %v12837_v17 = vld [vmem:[#allocation7 + $0x9cc] sm:$0xf0]  ;;  %v10778_v7 = vor.u32 %v12873_v58, %v10777_v48  ;;  %v10369_v16 = vld [vmem:[#allocation7 + $0x7a8] sm:$0xf] }
 0x340   :  { %v10402_v28 = vor.u32 %v12778_v5, %v10401_v33  ;;  %v15505_v40 = vpack.c.b16 %v5778_v13, %v5736_v19  ;;  %v16530_v21 = vld [vmem:[#allocation63_spill] sm:$0xff]  ;;  %v16531_v19 = vld [vmem:[#allocation65_spill] sm:$0xff]  ;;  %v5737_v5 = vrot.slane %v16421_v56, 7  ;;  %v16532_v49 = vld [vmem:[#allocation32_spill] sm:$0xff]  ;;  %v5600_v56 = vperm.slane %v15436_v45, 2 }
 0x341   :  { %4577 = vmatpush.bf16.msra.mxu2 %v10426_v29  ;;  %4591 = vmatpush.bf16.msra.mxu3 %v10174_v30  ;;  %v15503_v30 = vpack.c.bf16 %v4722_v47, %v4722_v47  ;;  %v4904_v4 = vrot.slane %v16530_v21, 7  ;;  %v15512_v47 = vpack.c.bf16 %v4725_v50, %v4725_v50  ;;  %v4906_v33 = vrot.slane %v16531_v19, 6  ;;  %v12869_v38 = vld [vmem:[#allocation7 + $0xacc] sm:$0xf0]  ;;  %v10617_v57 = vld [vmem:[#allocation7 + $0x9a0] sm:$0xf] }
 0x342   :  { %4661 = vmatpush.bf16.msrb.mxu0 %v10434_v44  ;;  %v16529_v44 = vld [vmem:[#allocation55_spill] sm:$0xff]  ;;  %v10634_v50 = vor.u32 %v12837_v17, %v10633_v15  ;;  %v16533_v31 = vld [vmem:[#allocation34_spill] sm:$0xff] }
 0x343   :  { %4674 = vmatpush.bf16.msrb.mxu1 %v10198_v46  ;;  %v10385_v46 = vld [vmem:[#allocation7 + $0x7c8] sm:$0xf]  ;;  %v12833_v8 = vld [vmem:[#allocation7 + $0x9ac] sm:$0xf0]  ;;  %v16541_v43 = vunpack.c.l.b16 %v15512_v47 }
 0x344   :  { %v15525_v48 = vld [vmem:[#allocation7 + $0xaac] sm:$0xf0]  ;;  %v10225_v13 = vld [vmem:[#allocation7 + $0x688] sm:$0xf] }
 0x345   :  { %4578 = vmatpush.bf16.msra.mxu2 %v10410_v53  ;;  %4592 = vmatpush.bf16.msra.mxu3 %v10158_v20  ;;  %v10241_v53 = vld [vmem:[#allocation7 + $0x6a8] sm:$0xf]  ;;  %v12770_v20 = vld [vmem:[#allocation7 + $0x7b4] sm:$0xf0]  ;;  %v12829_v22 = vld [vmem:[#allocation7 + $0x98c] sm:$0xf0] }
 0x346   :  { %4662 = vmatpush.bf16.msrb.mxu0 %v10418_v11  ;;  %v16307_v11 = vunpack.c.l.b16 %v15503_v30  ;;  %v10242_v41 = vor.u32 %v12738_v34, %v10241_v53  ;;  %v16534_v58 = vld [vmem:[#allocation58_spill] sm:$0xff]  ;;  %v10762_v34 = vor.u32 %v12869_v38, %v10761_v51  ;;  %v5789_v18 = vrot.slane %v16541_v43, 2 }
 0x347   :  { %4675 = vmatpush.bf16.msrb.mxu1 %v10182_v1  ;;  %v4863_v1 = vsel %vm2350_vm9, %v4862_v59, %v16532_v49  ;;  %v4905_v59 = vsel %vm2350_vm9, %v4904_v4, %v16534_v58  ;;  %v15532_v15 = vld [vmem:[#allocation7 + $0x788] sm:$0xf]  ;;  %v15543_v4 = vpack.c.bf16 %v4723_v12, %v4723_v12  ;;  %v10370_v49 = vor.u32 %v12770_v20, %v10369_v16  ;;  %v10601_v58 = vld [vmem:[#allocation7 + $0x980] sm:$0xf]  ;;  %v12730_v16 = vld [vmem:[#allocation7 + $0x674] sm:$0xf0] }
 0x348   :  { %4579 = vmatmul.bf16.vlgmr.msra.gmra.mxu2 %v15441_v23  ;;  %4593 = vmatmul.bf16.vlgmr.msra.gmra.mxu3 %v16533_v31  ;;  %v15538_v53 = vsel %vm2353_vm10, %v4864_v9, %v4863_v1  ;;  %v10618_v9 = vor.u32 %v12833_v8, %v10617_v57  ;;  %v15549_v1 = vld [vmem:[#allocation7 + $0xa80] sm:$0xf]  ;;  %v15554_v12 = vsel %vm2353_vm10, %v4906_v33, %v4905_v59  ;;  %v10209_v38 = vld [vmem:[#allocation7 + $0x668] sm:$0xf]  ;;  %v16538_v20 = vld [vmem:[#allocation72_spill] sm:$0xff] }
 0x349   :  { %4627 = vmatpush.bf16.msrb.mxu2 %v10274_v3  ;;  %4641 = vmatpush.bf16.msrb.mxu3 %v10402_v28  ;;  %v10386_v3 = vor.u32 %v12774_v10, %v10385_v46  ;;  %v15523_v28 = vld [vmem:[#allocation7 + $0xaa0] sm:$0xf]  ;;  %v5739_v46 = vrot.slane %v16422_v61, 6  ;;  %v12734_v10 = vld [vmem:[#allocation7 + $0x694] sm:$0xf0]  ;;  %v10602_v29 = vor.u32 %v12829_v22, %v10601_v58 }
 0x34a   :  { %5418 = vmatpush.bf16.msra.mxu0 %v10650_v27  ;;  %v5597_v27 = vperm.slane %v15434_v63, 2  ;;  %v10226_v51 = vor.u32 %v12734_v10, %v10225_v13  ;;  %v10746_v33 = vor.u32 %v15525_v48, %v15523_v28  ;;  %v10337_v13 = vld [vmem:[#allocation7 + $0x768] sm:$0xf]  ;;  %v5743_v10 = vrot.slane %v16529_v44, 4  ;;  %v12762_v48 = vld [vmem:[#allocation7 + $0x774] sm:$0xf0] }
 0x34b   :  { %4676 = vmatpush.bf16.msrb.mxu1 %v10166_v52  ;;  %4663 = vmatmul.bf16.vlgmr.msrb.gmra.mxu0 %v15441_v23  ;;  %v5738_v52 = vsel %vm2350_vm9, %v5737_v5, %v16420_v36  ;;  %v16536_v36 = vld [vmem:[#allocation67_spill] sm:$0xff]  ;;  %v15567_v5 = vpop.f32.mrf.mxu2  ;;  %v10210_v28 = vor.u32 %v12730_v16, %v10209_v38  ;;  %v15578_v58 = vld [vmem:[#allocation7 + $0xa60] sm:$0xf]  ;;  %v12726_v38 = vld [vmem:[#allocation7 + $0x654] sm:$0xf0] }
 0x34c   :  { %v15560_v57 = vpack.c.bf16 %v5597_v27, %v5597_v27  ;;  %v5740_v8 = vsel %vm2353_vm10, %v5739_v46, %v5738_v52  ;;  %v5612_v27 = vpack.c.bf16 %v5600_v56, %v5600_v56  ;;  %v5745_v46 = vrot.slane %v16535_v42, 3 }
 0x34d   :  { %4628 = vmatpush.bf16.msrb.mxu2 %v10258_v35  ;;  %v12766_v35 = vld [vmem:[#allocation7 + $0x794] sm:$0xf0]  ;;  %4642 = vmatpush.bf16.msrb.mxu3 %v10386_v3  ;;  %v5741_v3 = vrot.slane %v14735_v55, 5  ;;  %v5781_v52 = vrot.slane %v16536_v36, 6 }
 0x34e   :  { %5419 = vmatpush.bf16.msra.mxu0 %v10634_v50  ;;  %4677 = vmatmul.bf16.vlgmr.msrb.gmra.mxu1 %v16533_v31  ;;  %v10354_v59 = vor.u32 %v12766_v35, %v15532_v15  ;;  %v10585_v15 = vld [vmem:[#allocation7 + $0x960] sm:$0xf]  ;;  %v5779_v35 = vrot.slane %v16531_v19, 7  ;;  %v5718_v56 = vunpack.c.l.b16 %v15560_v57  ;;  %v10338_v57 = vor.u32 %v12762_v48, %v10337_v13  ;;  %v10177_v48 = vld [vmem:[#allocation7 + $0x628] sm:$0xf] }
 0x34f   :  { %5432 = vmatpush.bf16.msra.mxu1 %v10778_v7  ;;  %v16537_v7 = vld [vmem:[#allocation69_spill] sm:$0xff]  ;;  %v5742_v22 = vsel %vm2356_vm11, %v5741_v3, %v5740_v8  ;;  %v10193_v3 = vld [vmem:[#allocation7 + $0x648] sm:$0xf]  ;;  %v5721_v17 = vunpack.c.l.b16 %v5612_v27 }
 0x350   :  { %v5780_v16 = vsel %vm2350_vm9, %v5779_v35, %v16530_v21  ;;  %v16540_v8 = vld [vmem:[#allocation33_spill] sm:$0xff]  ;;  %v12821_v21 = vld [vmem:[#allocation7 + $0x94c] sm:$0xf0]  ;;  %v16542_v35 = vrot.slane %v16422_v61, 5  ;;  %v10194_v27 = vor.u32 %v12726_v38, %v10193_v3 }
 0x351   :  { %4629 = vmatpush.bf16.msrb.mxu2 %v10242_v41  ;;  %4643 = vmatpush.bf16.msrb.mxu3 %v10370_v49  ;;  %v10730_v41 = vor.u32 %v15551_v32, %v15549_v1  ;;  %v12825_v49 = vld [vmem:[#allocation7 + $0x96c] sm:$0xf0]  ;;  %v5744_v1 = vsel %vm2359_vm13, %v5743_v10, %v5742_v22  ;;  %v5785_v32 = vrot.slane %v16538_v20, 4  ;;  %v5787_v50 = vrot.slane %v16540_v8, 3  ;;  %v10321_v22 = vld [vmem:[#allocation7 + $0x748] sm:$0xf] }
 0x352   :  { %5420 = vmatpush.bf16.msra.mxu0 %v10618_v9  ;;  %v5747_v9 = vrot.slane %v16307_v11, 2  ;;  %v5746_v19 = vsel %vm2362_vm12, %v5745_v46, %v5744_v1  ;;  %v12857_v10 = vld [vmem:[#allocation7 + $0xa6c] sm:$0xf0]  ;;  %v5782_v11 = vsel %vm2353_vm10, %v5781_v52, %v5780_v16  ;;  %v10586_v46 = vor.u32 %v12825_v49, %v10585_v15  ;;  %v12758_v1 = vld [vmem:[#allocation7 + $0x754] sm:$0xf0] }
 0x353   :  { %5433 = vmatpush.bf16.msra.mxu1 %v10762_v34  ;;  %v15576_v34 = vpop.f32.mrf.mxu3  ;;  %v12722_v52 = vld [vmem:[#allocation7 + $0x634] sm:$0xf0]  ;;  %v5598_v15 = vperm.slane %v15434_v63, 4  ;;  %v10714_v49 = vor.u32 %v12857_v10, %v15578_v58  ;;  %v15603_v16 = vld [vmem:[#allocation7 + $0xa40] sm:$0xf]  ;;  %v10570_v38 = vor.u32 %v12821_v21, %v10569_v60 }
 0x354   :  { %16539 = vst [vmem:[#allocation60_spill] sm:$0xff] %v15576_v34  ;;  %v5748_v43 = vsel %vm2365_vm14, %v5747_v9, %v5746_v19  ;;  %v15605_v61 = vld [vmem:[#allocation7 + $0xa4c] sm:$0xf0]  ;;  %v3075_v9 = vpop.f32.mrf.mxu2  ;;  %v10305_v63 = vld [vmem:[#allocation7 + $0x728] sm:$0xf] }
 0x355   :  { %4630 = vmatpush.bf16.msrb.mxu2 %v10226_v51  ;;  %v5783_v51 = vrot.slane %v16537_v7, 5  ;;  %4644 = vmatpush.bf16.msrb.mxu3 %v10354_v59  ;;  %v12754_v19 = vld [vmem:[#allocation7 + $0x734] sm:$0xf0]  ;;  %v3076_v10 = vadd.f32 %v3075_v9, %v15421_v14  ;;  %v12817_v60 = vld [vmem:[#allocation7 + $0x92c] sm:$0xf0] }
 0x356   :  { %5421 = vmatpush.bf16.msra.mxu0 %v10602_v29  ;;  %v10531_v59 = vld [vmem:[#allocation7 + $0x8f8] sm:$0xf0]  ;;  %v12871_v34 = vld [vmem:[#allocation7 + $0xae4] sm:$0xf] }
 0x357   :  { %5434 = vmatpush.bf16.msra.mxu1 %v10746_v33  ;;  %v4867_v33 = vsel %vm2356_vm11, %v16542_v35, %v15538_v53  ;;  %v5784_v13 = vsel %vm2356_vm11, %v5783_v51, %v5782_v11  ;;  %v16543_v53 = vrot.slane %v16536_v36, 5  ;;  %v5791_v51 = vrot.slane %v5721_v17, 1  ;;  %v10553_v36 = vld [vmem:[#allocation7 + $0x920] sm:$0xf] }
 0x358   :  { %v5786_v29 = vsel %vm2359_vm13, %v5785_v32, %v5784_v13  ;;  %v10322_v32 = vor.u32 %v12758_v1, %v10321_v22  ;;  %v10178_v35 = vor.u32 %v12722_v52, %v10177_v48  ;;  %v10161_v22 = vld [vmem:[#allocation7 + $0x608] sm:$0xf]  ;;  %v15622_v17 = vpack.c.bf16 %v5598_v15, %v5598_v15  ;;  %v16547_v1 = vld [vmem:[#allocation45_spill] sm:$0xff] }
 0x359   :  { %4631 = vmatpush.bf16.msrb.mxu2 %v10210_v28  ;;  %v4909_v11 = vsel %vm2356_vm11, %v16543_v53, %v15554_v12  ;;  %v5749_v28 = vrot.slane %v5718_v56, 1  ;;  %v5788_v3 = vsel %vm2362_vm12, %v5787_v50, %v5786_v29  ;;  %4645 = vmatpush.bf16.msrb.mxu3 %v10338_v57  ;;  %v16544_v12 = vld [vmem:[#allocation50_spill] sm:$0xff]  ;;  %v5753_v21 = vrot.slane %v16547_v1, 6  ;;  %v12776_v53 = vld [vmem:[#allocation7 + $0x7ec] sm:$0xf] }
 0x35a   :  { %v5790_v58 = vsel %vm2365_vm14, %v5789_v18, %v5788_v3  ;;  %5422 = vmatpush.bf16.msra.mxu0 %v10586_v46  ;;  %v15616_v56 = vadd.f32 %v16544_v12, %v15428_v2  ;;  %v16546_v46 = vld [vmem:[#allocation43_spill] sm:$0xff]  ;;  %v10698_v2 = vor.u32 %v15605_v61, %v15603_v16  ;;  %v10306_v48 = vor.u32 %v12754_v19, %v10305_v63  ;;  %v15630_v52 = vld [vmem:[#allocation7 + $0xa20] sm:$0xf]  ;;  %v10403_v15 = vld [vmem:[#allocation7 + $0x7f8] sm:$0xf0] }
 0x35b   :  { %5435 = vmatpush.bf16.msra.mxu1 %v10730_v41  ;;  %v5750_v50 = vsel %vm2368_vm15, %v5749_v28, %v5748_v43  ;;  %v15619_v41 = vpop.f32.mrf.mxu1  ;;  %v3089_v57 = vpop.f32.mrf.mxu3  ;;  %v5792_v18 = vsel %vm2368_vm15, %v5791_v51, %v5790_v58  ;;  %v5751_v14 = vrot.slane %v16546_v46, 7  ;;  %v15632_v43 = vld [vmem:[#allocation7 + $0xa2c] sm:$0xf0]  ;;  %v10289_v29 = vld [vmem:[#allocation7 + $0x708] sm:$0xf]  ;;  %v5755_v58 = vrot.slane %v16508_v26, 5 }
 0x35c   :  { %16545 = vst [vmem:[#allocation61_spill] sm:$0xff] %v15619_v41  ;;  %v15626_v13 = vadd.f32 %v3089_v57, %v3076_v10  ;;  %v15634_v28 = vpack.c.b16 %v5792_v18, %v5750_v50  ;;  %v16548_v3 = vld [vmem:[#allocation40_spill] sm:$0xff]  ;;  %v5757_v16 = vrot.slane %v16510_v39, 4  ;;  %v5759_v61 = vrot.slane %v15399_v54, 3  ;;  %v10537_v51 = vld [vmem:[#allocation7 + $0x900] sm:$0xf] }
 0x35d   :  { %4632 = vmatpush.bf16.msrb.mxu2 %v10194_v27  ;;  %v12718_v27 = vld [vmem:[#allocation7 + $0x614] sm:$0xf0]  ;;  %4646 = vmatpush.bf16.msrb.mxu3 %v10322_v32  ;;  %v5752_v9 = vsel %vm2350_vm9, %v5751_v14, %v16548_v3  ;;  %v10554_v63 = vor.u32 %v12817_v60, %v10553_v36  ;;  %v12813_v10 = vld [vmem:[#allocation7 + $0x90c] sm:$0xf0]  ;;  %v16549_v12 = vrot.slane %v14735_v55, 4  ;;  %v16550_v32 = vrot.slane %v16537_v7, 4 }
 0x35e   :  { %5423 = vmatpush.bf16.msra.mxu0 %v10570_v38  ;;  %v12750_v19 = vld [vmem:[#allocation7 + $0x714] sm:$0xf0]  ;;  %v5754_v57 = vsel %vm2353_vm10, %v5753_v21, %v5752_v9  ;;  %v10162_v18 = vor.u32 %v12718_v27, %v10161_v22  ;;  %v12808_v14 = vld [vmem:[#allocation7 + $0x8ec] sm:$0xf]  ;;  %v5719_v38 = vunpack.c.l.b16 %v15622_v17  ;;  %v16551_v60 = vunpack.c.l.b16 %v15543_v4  ;;  %v10665_v27 = vld [vmem:[#allocation7 + $0xa00] sm:$0xf] }
 0x35f   :  { %5436 = vmatpush.bf16.msra.mxu1 %v10714_v49  ;;  %v4869_v49 = vsel %vm2359_vm13, %v16549_v12, %v4867_v33  ;;  %v4911_v50 = vsel %vm2359_vm13, %v16550_v32, %v4909_v11  ;;  %v5756_v36 = vsel %vm2356_vm11, %v5755_v58, %v5754_v57  ;;  %v10406_v55 = vor.u32 %v12776_v53, %v10403_v15  ;;  %v10779_v33 = vld [vmem:[#allocation7 + $0xaf0] sm:$0xf0]  ;;  %v12772_v9 = vld [vmem:[#allocation7 + $0x7cc] sm:$0xf]  ;;  %v10387_v58 = vld [vmem:[#allocation7 + $0x7d8] sm:$0xf0] }
 0x360   :  { %v5761_v41 = vrot.slane %v16551_v60, 2  ;;  %v16552_v7 = vrot.slane %v16538_v20, 3  ;;  %v4914_v21 = vrot.slane %v16540_v8, 2  ;;  %v10682_v22 = vor.u32 %v15632_v43, %v15630_v52  ;;  %v12845_v20 = vld [vmem:[#allocation7 + $0xa0c] sm:$0xf0] }
 0x361   :  { %4633 = vmatpush.bf16.msrb.mxu2 %v10178_v35  ;;  %v5758_v35 = vsel %vm2359_vm13, %v5757_v16, %v5756_v36  ;;  %4647 = vmatpush.bf16.msrb.mxu3 %v10306_v48  ;;  %v10290_v17 = vor.u32 %v12750_v19, %v10289_v29  ;;  %v10538_v15 = vor.u32 %v12813_v10, %v10537_v51  ;;  %v12903_v32 = vld [vmem:[#allocation7 + $0xbe4] sm:$0xf]  ;;  %v16553_v8 = vrot.slane %v16529_v44, 3  ;;  %v12804_v16 = vld [vmem:[#allocation7 + $0x8cc] sm:$0xf]  ;;  %v15668_v51 = vpop.f32.mrf.mxu0 }
 0x362   :  { %v4913_v11 = vsel %vm2362_vm12, %v16552_v7, %v4911_v50  ;;  %v5760_v53 = vsel %vm2362_vm12, %v5759_v61, %v5758_v35  ;;  %5424 = vmatpush.bf16.msra.mxu0 %v10554_v63  ;;  %v10534_v12 = vor.u32 %v12808_v14, %v10531_v59  ;;  %v10907_v50 = vld [vmem:[#allocation7 + $0xbf0] sm:$0xf0]  ;;  %v10782_v52 = vor.u32 %v12871_v34, %v10779_v33  ;;  %v10515_v19 = vld [vmem:[#allocation7 + $0x8d8] sm:$0xf0]  ;;  %v12867_v10 = vld [vmem:[#allocation7 + $0xac4] sm:$0xf] }
 0x363   :  { %5437 = vmatpush.bf16.msra.mxu1 %v10698_v2  ;;  %v4871_v2 = vsel %vm2362_vm12, %v16553_v8, %v4869_v49  ;;  %v15663_v48 = vpop.f32.mrf.mxu1  ;;  %v16554_v43 = vunpack.c.l.b16 %v15512_v47  ;;  %v5762_v61 = vsel %vm2365_vm14, %v5761_v41, %v5760_v53  ;;  %v5763_v63 = vrot.slane %v5719_v38, 1  ;;  %v10763_v49 = vld [vmem:[#allocation7 + $0xad0] sm:$0xf0]  ;;  %v12768_v14 = vld [vmem:[#allocation7 + $0x7ac] sm:$0xf] }
 0x364   :  { %v4915_v59 = vsel %vm2365_vm14, %v4914_v21, %v4913_v11  ;;  %v10390_v44 = vor.u32 %v12772_v9, %v10387_v58  ;;  %v4726_v57 = vperm.slane %v15188_v37, 4  ;;  %v10666_v34 = vor.u32 %v12845_v20, %v10665_v27  ;;  %v10371_v36 = vld [vmem:[#allocation7 + $0x7b8] sm:$0xf0]  ;;  %v12899_v37 = vld [vmem:[#allocation7 + $0xbc4] sm:$0xf] }
 0x365   :  { %4634 = vmatpush.bf16.msrb.mxu2 %v10162_v18  ;;  %v4916_v29 = vrot.slane %v16554_v43, 1  ;;  %4648 = vmatpush.bf16.msrb.mxu3 %v10290_v17  ;;  %v16555_v47 = vunpack.c.l.b16 %v15503_v30  ;;  %v15675_v41 = vsel %vm2368_vm15, %v5763_v63, %v5762_v61  ;;  %v10910_v38 = vor.u32 %v12903_v32, %v10907_v50  ;;  %v10891_v7 = vld [vmem:[#allocation7 + $0xbd0] sm:$0xf0]  ;;  %v12800_v21 = vld [vmem:[#allocation7 + $0x8ac] sm:$0xf]  ;;  %v16557_v58 = vld [vmem:[#allocation49_spill] sm:$0xff] }
 0x366   :  { %5425 = vmatpush.bf16.msra.mxu0 %v10538_v15  ;;  %v16556_v60 = vrot.slane %v16535_v42, 2  ;;  %v10518_v33 = vor.u32 %v12804_v16, %v10515_v19  ;;  %v10766_v11 = vor.u32 %v12867_v10, %v10763_v49  ;;  %v10499_v35 = vld [vmem:[#allocation7 + $0x8b8] sm:$0xf0]  ;;  %v10374_v17 = vor.u32 %v12768_v14, %v10371_v36  ;;  %v12863_v42 = vld [vmem:[#allocation7 + $0xaa4] sm:$0xf]  ;;  %v16559_v10 = vld [vmem:[#allocation64_spill] sm:$0xff]  ;;  %v15702_v36 = vpop.f32.mrf.mxu2 }
 0x367   :  { %5438 = vmatpush.bf16.msra.mxu1 %v10682_v22  ;;  %v4874_v18 = vrot.slane %v16555_v47, 1  ;;  %v4917_v30 = vsel %vm2368_vm15, %v4916_v29, %v4915_v59  ;;  %v5601_v22 = vperm.slane %v15436_v45, 4  ;;  %v10747_v27 = vld [vmem:[#allocation7 + $0xab0] sm:$0xf0]  ;;  %v15684_v9 = vpack.c.bf16 %v4726_v57, %v4726_v57  ;;  %v12764_v53 = vld [vmem:[#allocation7 + $0x78c] sm:$0xf] }
 0x368   :  { %4635 = vmatmul.bf16.vlgmr.msrb.gmra.mxu2 %v16533_v31  ;;  %4649 = vmatmul.bf16.vlgmr.msrb.gmra.mxu3 %v15348_v62  ;;  %v10355_v15 = vld [vmem:[#allocation7 + $0x798] sm:$0xf0]  ;;  %v16558_v20 = vld [vmem:[#allocation66_spill] sm:$0xff]  ;;  %v10894_v45 = vor.u32 %v12899_v37, %v10891_v7  ;;  %v10502_v50 = vor.u32 %v12800_v21, %v10499_v35  ;;  %v10750_v43 = vor.u32 %v12863_v42, %v10747_v27  ;;  %v10731_v19 = vld [vmem:[#allocation7 + $0xa90] sm:$0xf0]  ;;  %v4918_v49 = vrot.slane %v16559_v10, 7 }
 0x369   :  { %4683 = vmatpush.bf16.msra.mxu2 %v10406_v55  ;;  %4697 = vmatpush.bf16.msra.mxu3 %v10534_v12  ;;  %v4873_v55 = vsel %vm2365_vm14, %v16556_v60, %v4871_v2  ;;  %v5793_v12 = vrot.slane %v16558_v20, 7  ;;  %v12895_v8 = vld [vmem:[#allocation7 + $0xba4] sm:$0xf]  ;;  %v10875_v2 = vld [vmem:[#allocation7 + $0xbb0] sm:$0xf0]  ;;  %v5613_v61 = vpack.c.bf16 %v5601_v22, %v5601_v22  ;;  %v15691_v63 = vpop.f32.mrf.mxu0  ;;  %v10358_v59 = vor.u32 %v12764_v53, %v10355_v15  ;;  %v16562_v27 = vld [vmem:[#allocation41_spill] sm:$0xff] }
 0x36a   :  { %5474 = vmatpush.bf16.msrb.mxu0 %v10782_v52  ;;  %v4875_v31 = vsel %vm2368_vm15, %v4874_v18, %v4873_v55  ;;  %v12796_v52 = vld [vmem:[#allocation7 + $0x88c] sm:$0xf]  ;;  %v10483_v29 = vld [vmem:[#allocation7 + $0x898] sm:$0xf0]  ;;  %v12859_v16 = vld [vmem:[#allocation7 + $0xa84] sm:$0xf] }
 0x36b   :  { %5439 = vmatpush.bf16.msra.mxu1 %v10666_v34  ;;  %5426 = vmatmul.bf16.vlgmr.msra.gmra.mxu0 %v16557_v58  ;;  %v15689_v32 = vpack.c.b16 %v4917_v30, %v4875_v31  ;;  %v15696_v57 = vpop.f32.mrf.mxu1  ;;  %v15698_v34 = vld [vmem:[#allocation7 + $0xb84] sm:$0xf]  ;;  %v12760_v47 = vld [vmem:[#allocation7 + $0x76c] sm:$0xf]  ;;  %v10339_v18 = vld [vmem:[#allocation7 + $0x778] sm:$0xf0]  ;;  %v5794_v14 = vsel %vm2350_vm9, %v5793_v12, %v16559_v10  ;;  %v10486_v60 = vor.u32 %v12796_v52, %v10483_v29  ;;  %v5722_v35 = vunpack.c.l.b16 %v5613_v61 }
 0x36c   :  { %v10734_v55 = vor.u32 %v12859_v16, %v10731_v19  ;;  %v12792_v37 = vld [vmem:[#allocation7 + $0x86c] sm:$0xf]  ;;  %v16560_v7 = vld [vmem:[#allocation68_spill] sm:$0xff]  ;;  %v10467_v21 = vld [vmem:[#allocation7 + $0x878] sm:$0xf0]  ;;  %v5797_v22 = vrot.slane %v16519_v25, 5  ;;  %v10342_v53 = vor.u32 %v12760_v47, %v10339_v18 }
 0x36d   :  { %4684 = vmatpush.bf16.msra.mxu2 %v10390_v44  ;;  %4698 = vmatpush.bf16.msra.mxu3 %v10518_v33  ;;  %v16308_v44 = vunpack.c.l.b16 %v15684_v9  ;;  %v10859_v33 = vld [vmem:[#allocation7 + $0xb90] sm:$0xf0]  ;;  %v5795_v30 = vrot.slane %v16560_v7, 6  ;;  %v5801_v31 = vrot.slane %v16562_v27, 3  ;;  %v12855_v15 = vld [vmem:[#allocation7 + $0xa64] sm:$0xf] }
 0x36e   :  { %5475 = vmatpush.bf16.msrb.mxu0 %v10766_v11  ;;  %5440 = vmatmul.bf16.vlgmr.msra.gmra.mxu1 %v15689_v32  ;;  %v15705_v11 = vpop.f32.mrf.mxu3  ;;  %v10715_v12 = vld [vmem:[#allocation7 + $0xa70] sm:$0xf0]  ;;  %v10323_v52 = vld [vmem:[#allocation7 + $0x758] sm:$0xf0]  ;;  %v4920_v16 = vrot.slane %v16558_v20, 6  ;;  %v10862_v61 = vor.u32 %v15698_v34, %v10859_v33  ;;  %v4878_v47 = vrot.slane %v16546_v46, 6 }
 0x36f   :  { %5488 = vmatpush.bf16.msrb.mxu1 %v10910_v38  ;;  %v10878_v38 = vor.u32 %v12895_v8, %v10875_v2  ;;  %v5803_v8 = vrot.slane %v16308_v44, 2  ;;  %v12756_v2 = vld [vmem:[#allocation7 + $0x74c] sm:$0xf]  ;;  %v10843_v10 = vld [vmem:[#allocation7 + $0xb70] sm:$0xf0]  ;;  %v16564_v33 = vld [vmem:[#allocation38_spill] sm:$0xff] }
 0x370   :  { %v10451_v44 = vld [vmem:[#allocation7 + $0x858] sm:$0xf0]  ;;  %v10699_v34 = vld [vmem:[#allocation7 + $0xa50] sm:$0xf0]  ;;  %v4882_v46 = vrot.slane %v16508_v26, 4 }
 0x371   :  { %4685 = vmatpush.bf16.msra.mxu2 %v10374_v17  ;;  %4699 = vmatpush.bf16.msra.mxu3 %v10502_v50  ;;  %v16561_v17 = vld [vmem:[#allocation39_spill] sm:$0xff]  ;;  %v5796_v50 = vsel %vm2353_vm10, %v5795_v30, %v5794_v14  ;;  %v10718_v14 = vor.u32 %v12855_v15, %v10715_v12  ;;  %v10307_v12 = vld [vmem:[#allocation7 + $0x738] sm:$0xf0] }
 0x372   :  { %5476 = vmatpush.bf16.msrb.mxu0 %v10750_v43  ;;  %v5799_v42 = vrot.slane %v16561_v17, 4  ;;  %v16563_v43 = vld [vmem:[#allocation59_spill] sm:$0xff]  ;;  %v5798_v19 = vsel %vm2356_vm11, %v5797_v22, %v5796_v50  ;;  %v5805_v22 = vrot.slane %v5722_v35, 1 }
 0x373   :  { %5489 = vmatpush.bf16.msrb.mxu1 %v10894_v45  ;;  %v4876_v45 = vrot.slane %v16548_v3, 7  ;;  %v4919_v29 = vsel %vm2350_vm9, %v4918_v49, %v16563_v43  ;;  %v12887_v3 = vld [vmem:[#allocation7 + $0xb64] sm:$0xf]  ;;  %v12788_v30 = vld [vmem:[#allocation7 + $0x84c] sm:$0xf]  ;;  %v4880_v49 = vrot.slane %v16547_v1, 5  ;;  %v16565_v1 = vunpack.c.l.b16 %v15684_v9 }
 0x374   :  { %v5800_v18 = vsel %vm2359_vm13, %v5799_v42, %v5798_v19  ;;  %v10846_v42 = vor.u32 %v12887_v3, %v10843_v10  ;;  %v12752_v15 = vld [vmem:[#allocation7 + $0x72c] sm:$0xf]  ;;  %v4921_v50 = vsel %vm2353_vm10, %v4920_v16, %v4919_v29  ;;  %v4884_v43 = vrot.slane %v16510_v39, 3  ;;  %v10827_v3 = vld [vmem:[#allocation7 + $0xb50] sm:$0xf0] }
 0x375   :  { %4686 = vmatpush.bf16.msra.mxu2 %v10358_v59  ;;  %4700 = vmatpush.bf16.msra.mxu3 %v10486_v60  ;;  %v10470_v59 = vor.u32 %v12792_v37, %v10467_v21  ;;  %v5802_v20 = vsel %vm2362_vm12, %v5801_v31, %v5800_v18  ;;  %v12851_v60 = vld [vmem:[#allocation7 + $0xa44] sm:$0xf]  ;;  %v4877_v37 = vsel %vm2350_vm9, %v4876_v45, %v16564_v33  ;;  %v4922_v31 = vrot.slane %v16560_v7, 5  ;;  %v3713_v45 = vpop.f32.mrf.mxu2  ;;  %v12784_v10 = vld [vmem:[#allocation7 + $0x82c] sm:$0xf] }
 0x376   :  { %5477 = vmatpush.bf16.msrb.mxu0 %v10734_v55  ;;  %v5804_v21 = vsel %vm2365_vm14, %v5803_v8, %v5802_v20  ;;  %v3811_v55 = vpop.f32.mrf.mxu1  ;;  %v12883_v8 = vld [vmem:[#allocation7 + $0xb44] sm:$0xf]  ;;  %v15740_v7 = vadd.f32 %v3713_v45, %v15479_v24  ;;  %v3727_v29 = vpop.f32.mrf.mxu3  ;;  %v10702_v16 = vor.u32 %v12851_v60, %v10699_v34  ;;  %v10683_v18 = vld [vmem:[#allocation7 + $0xa30] sm:$0xf0]  ;;  %v4879_v24 = vsel %vm2353_vm10, %v4878_v47, %v4877_v37  ;;  %v10913_v45 = vld [vmem:[#allocation7 + $0xbe8] sm:$0xf] }
 0x377   :  { %5490 = vmatpush.bf16.msrb.mxu1 %v10878_v38  ;;  %v10326_v38 = vor.u32 %v12756_v2, %v10323_v52  ;;  %v5806_v35 = vsel %vm2368_vm15, %v5805_v22, %v5804_v21  ;;  %v15733_v2 = vadd.f32 %v3811_v55, %v15626_v13  ;;  %v10454_v52 = vor.u32 %v12788_v30, %v10451_v44  ;;  %v10435_v13 = vld [vmem:[#allocation7 + $0x838] sm:$0xf0]  ;;  %v12847_v44 = vld [vmem:[#allocation7 + $0xa24] sm:$0xf]  ;;  %v10811_v33 = vld [vmem:[#allocation7 + $0xb30] sm:$0xf0] }
 0x378   :  { %v15737_v19 = vpack.c.b16 %v5806_v35, %v15675_v41  ;;  %v4924_v30 = vrot.slane %v16519_v25, 4  ;;  %v4926_v41 = vrot.slane %v16561_v17, 3  ;;  %v12879_v20 = vld [vmem:[#allocation7 + $0xb24] sm:$0xf]  ;;  %v10291_v22 = vld [vmem:[#allocation7 + $0x718] sm:$0xf0]  ;;  %v4923_v60 = vsel %vm2356_vm11, %v4922_v31, %v4921_v50 }
 0x379   :  { %4687 = vmatpush.bf16.msra.mxu2 %v10342_v53  ;;  %v15730_v53 = vpop.f32.mrf.mxu0  ;;  %4701 = vmatpush.bf16.msra.mxu3 %v10470_v59  ;;  %v10310_v59 = vor.u32 %v12752_v15, %v10307_v12  ;;  %v10905_v21 = vld [vmem:[#allocation7 + $0xbe0] sm:$0xf]  ;;  %v12905_v55 = vld [vmem:[#allocation7 + $0xbec] sm:$0xf0]  ;;  %v10686_v25 = vor.u32 %v12847_v44, %v10683_v18  ;;  %v12780_v15 = vld [vmem:[#allocation7 + $0x80c] sm:$0xf] }
 0x37a   :  { %5478 = vmatpush.bf16.msrb.mxu0 %v10718_v14  ;;  %v12748_v14 = vld [vmem:[#allocation7 + $0x70c] sm:$0xf]  ;;  %v10419_v17 = vld [vmem:[#allocation7 + $0x818] sm:$0xf0]  ;;  %v12843_v12 = vld [vmem:[#allocation7 + $0xa04] sm:$0xf]  ;;  %v10906_v31 = vor.u32 %v12905_v55, %v10905_v21 }
 0x37b   :  { %5491 = vmatpush.bf16.msrb.mxu1 %v10862_v61  ;;  %v3728_v61 = vadd.f32 %v3727_v29, %v15616_v56  ;;  %v10830_v56 = vor.u32 %v12883_v8, %v10827_v3  ;;  %v10294_v47 = vor.u32 %v12748_v14, %v10291_v22  ;;  %v10667_v37 = vld [vmem:[#allocation7 + $0xa10] sm:$0xf0]  ;;  %v4886_v8 = vrot.slane %v15399_v54, 2  ;;  %v12875_v54 = vld [vmem:[#allocation7 + $0xb04] sm:$0xf] }
 0x37c   :  { %v10651_v50 = vld [vmem:[#allocation7 + $0x9f0] sm:$0xf0]  ;;  %v4925_v29 = vsel %vm2359_vm13, %v4924_v30, %v4923_v60  ;;  %v10814_v3 = vor.u32 %v12879_v20, %v10811_v33  ;;  %v10670_v44 = vor.u32 %v12843_v12, %v10667_v37  ;;  %v12840_v14 = vld [vmem:[#allocation7 + $0x9ec] sm:$0xf]  ;;  %v10659_v22 = vld [vmem:[#allocation7 + $0x9f8] sm:$0xf0] }
 0x37d   :  { %4688 = vmatpush.bf16.msra.mxu2 %v10326_v38  ;;  %v3742_v34 = vadd.f32 %v15691_v63, %v3728_v61  ;;  %4702 = vmatpush.bf16.msra.mxu3 %v10454_v52  ;;  %v10438_v38 = vor.u32 %v12784_v10, %v10435_v13  ;;  %v4881_v63 = vsel %vm2356_vm11, %v4880_v49, %v4879_v24  ;;  %v12906_v52 = vld [vmem:[#allocation7 + $0xbf4] sm:$0xf0]  ;;  %v4930_v49 = vrot.slane %v16565_v1, 1  ;;  %v10889_v61 = vld [vmem:[#allocation7 + $0xbc0] sm:$0xf] }
 0x37e   :  { %5479 = vmatpush.bf16.msrb.mxu0 %v10702_v16  ;;  %v4928_v16 = vrot.slane %v16562_v27, 2  ;;  %v10422_v10 = vor.u32 %v12780_v15, %v10419_v17  ;;  %v4927_v13 = vsel %vm2362_vm12, %v4926_v41, %v4925_v29  ;;  %v10795_v18 = vld [vmem:[#allocation7 + $0xb10] sm:$0xf0]  ;;  %v4883_v27 = vsel %vm2359_vm13, %v4882_v46, %v4881_v63  ;;  %v12835_v41 = vld [vmem:[#allocation7 + $0x9c4] sm:$0xf] }
 0x37f   :  { %5492 = vmatpush.bf16.msrb.mxu1 %v10846_v42  ;;  %v15749_v35 = vadd.f32 %v15663_v48, %v3742_v34  ;;  %v12839_v42 = vld [vmem:[#allocation7 + $0x9e4] sm:$0xf]  ;;  %v10914_v20 = vor.u32 %v12906_v52, %v10913_v45  ;;  %v4885_v9 = vsel %vm2362_vm12, %v4884_v43, %v4883_v27  ;;  %v10635_v24 = vld [vmem:[#allocation7 + $0x9d0] sm:$0xf0]  ;;  %v10798_v26 = vor.u32 %v12875_v54, %v10795_v18  ;;  %v10873_v21 = vld [vmem:[#allocation7 + $0xba0] sm:$0xf] }
 0x380   :  { %v10654_v30 = vor.u32 %v12839_v42, %v10651_v50  ;;  %v4929_v60 = vsel %vm2365_vm14, %v4928_v16, %v4927_v13  ;;  %v16566_v46 = vunpack.c.l.b16 %v15543_v4  ;;  %v12897_v55 = vld [vmem:[#allocation7 + $0xbac] sm:$0xf0]  ;;  %v10662_v39 = vor.u32 %v12840_v14, %v10659_v22  ;;  %v12836_v15 = vld [vmem:[#allocation7 + $0x9cc] sm:$0xf]  ;;  %v12831_v37 = vld [vmem:[#allocation7 + $0x9a4] sm:$0xf] }
 0x381   :  { %4689 = vmatpush.bf16.msra.mxu2 %v10310_v59  ;;  %v15757_v48 = vpop.f32.mrf.mxu0  ;;  %4703 = vmatpush.bf16.msra.mxu3 %v10438_v38  ;;  %v12901_v59 = vld [vmem:[#allocation7 + $0xbcc] sm:$0xf0]  ;;  %v12902_v38 = vld [vmem:[#allocation7 + $0xbd4] sm:$0xf0]  ;;  %v4887_v43 = vsel %vm2365_vm14, %v4886_v8, %v4885_v9  ;;  %v4931_v17 = vsel %vm2368_vm15, %v4930_v49, %v4929_v60  ;;  %v10619_v42 = vld [vmem:[#allocation7 + $0x9b0] sm:$0xf0]  ;;  %v10874_v4 = vor.u32 %v12897_v55, %v10873_v21  ;;  %v15786_v60 = vpop.f32.mrf.mxu3 }
 0x382   :  { %5480 = vmatpush.bf16.msrb.mxu0 %v10686_v25  ;;  %v10890_v34 = vor.u32 %v12901_v59, %v10889_v61  ;;  %v4888_v33 = vrot.slane %v16566_v46, 1  ;;  %v10638_v25 = vor.u32 %v12835_v41, %v10635_v24  ;;  %v10881_v50 = vld [vmem:[#allocation7 + $0xba8] sm:$0xf]  ;;  %v12898_v63 = vld [vmem:[#allocation7 + $0xbb4] sm:$0xf0]  ;;  %v10622_v29 = vor.u32 %v12831_v37, %v10619_v42 }
 0x383   :  { %5493 = vmatpush.bf16.msrb.mxu1 %v10830_v56  ;;  %v10897_v56 = vld [vmem:[#allocation7 + $0xbc8] sm:$0xf]  ;;  %v10857_v45 = vld [vmem:[#allocation7 + $0xb80] sm:$0xf]  ;;  %v12893_v52 = vld [vmem:[#allocation7 + $0xb8c] sm:$0xf0] }
 0x384   :  { %v10898_v12 = vor.u32 %v12902_v38, %v10897_v56  ;;  %v12832_v16 = vld [vmem:[#allocation7 + $0x9ac] sm:$0xf]  ;;  %v12827_v13 = vld [vmem:[#allocation7 + $0x984] sm:$0xf]  ;;  %v10603_v1 = vld [vmem:[#allocation7 + $0x990] sm:$0xf0]  ;;  %v10858_v49 = vor.u32 %v12893_v52, %v10857_v45 }
 0x385   :  { %4690 = vmatpush.bf16.msra.mxu2 %v10294_v47  ;;  %4704 = vmatpush.bf16.msra.mxu3 %v10422_v10  ;;  %v10643_v47 = vld [vmem:[#allocation7 + $0x9d8] sm:$0xf0]  ;;  %v10865_v61 = vld [vmem:[#allocation7 + $0xb88] sm:$0xf]  ;;  %v12894_v59 = vld [vmem:[#allocation7 + $0xb94] sm:$0xf0]  ;;  %v10606_v27 = vor.u32 %v12827_v13, %v10603_v1 }
 0x386   :  { %5481 = vmatpush.bf16.msrb.mxu0 %v10670_v44  ;;  %v10646_v8 = vor.u32 %v12836_v15, %v10643_v47  ;;  %v10627_v10 = vld [vmem:[#allocation7 + $0x9b8] sm:$0xf0]  ;;  %v15782_v44 = vpop.f32.mrf.mxu1  ;;  %v10841_v54 = vld [vmem:[#allocation7 + $0xb60] sm:$0xf]  ;;  %v12889_v18 = vld [vmem:[#allocation7 + $0xb6c] sm:$0xf0]  ;;  %v10866_v22 = vor.u32 %v12894_v59, %v10865_v61 }
 0x387   :  { %5494 = vmatpush.bf16.msrb.mxu1 %v10814_v3  ;;  %v10630_v14 = vor.u32 %v12832_v16, %v10627_v10  ;;  %v10611_v9 = vld [vmem:[#allocation7 + $0x998] sm:$0xf0]  ;;  %v12823_v41 = vld [vmem:[#allocation7 + $0x964] sm:$0xf]  ;;  %v10587_v24 = vld [vmem:[#allocation7 + $0x970] sm:$0xf0] }
 0x388   :  { %4691 = vmatmul.bf16.vlgmr.msra.gmra.mxu2 %v15348_v62  ;;  %4705 = vmatmul.bf16.vlgmr.msra.gmra.mxu3 %v15441_v23  ;;  %v10882_v23 = vor.u32 %v12898_v63, %v10881_v50  ;;  %v10849_v56 = vld [vmem:[#allocation7 + $0xb68] sm:$0xf]  ;;  %v12890_v38 = vld [vmem:[#allocation7 + $0xb74] sm:$0xf0]  ;;  %v12885_v46 = vld [vmem:[#allocation7 + $0xb4c] sm:$0xf0]  ;;  %v10590_v21 = vor.u32 %v12823_v41, %v10587_v24 }
 0x389   :  { %5446 = vmatpush.bf16.msrb.mxu2 %v10906_v31  ;;  %5460 = vmatpush.bf16.msrb.mxu3 %v10654_v30  ;;  %v4889_v31 = vsel %vm2368_vm15, %v4888_v33, %v4887_v43  ;;  %v15779_v3 = vpop.f32.mrf.mxu0  ;;  %v15784_v30 = vpop.f32.mrf.mxu2  ;;  %v12824_v55 = vld [vmem:[#allocation7 + $0x96c] sm:$0xf]  ;;  %v10850_v43 = vor.u32 %v12890_v38, %v10849_v56  ;;  %v12819_v15 = vld [vmem:[#allocation7 + $0x944] sm:$0xf]  ;;  %v10833_v47 = vld [vmem:[#allocation7 + $0xb48] sm:$0xf] }
 0x38a   :  { %5530 = vmatpush.bf16.msra.mxu0 %v10914_v20  ;;  %v15777_v62 = vpack.c.b16 %v4931_v17, %v4889_v31  ;;  %v12828_v20 = vld [vmem:[#allocation7 + $0x98c] sm:$0xf]  ;;  %v10571_v17 = vld [vmem:[#allocation7 + $0x950] sm:$0xf0]  ;;  %v12886_v37 = vld [vmem:[#allocation7 + $0xb54] sm:$0xf0] }
 0x38b   :  { %5495 = vmatpush.bf16.msrb.mxu1 %v10798_v26  ;;  %5482 = vmatmul.bf16.vlgmr.msrb.gmra.mxu0 %v15689_v32  ;;  %v10825_v26 = vld [vmem:[#allocation7 + $0xb40] sm:$0xf]  ;;  %v10614_v33 = vor.u32 %v12828_v20, %v10611_v9  ;;  %v12881_v31 = vld [vmem:[#allocation7 + $0xb2c] sm:$0xf0]  ;;  %v12820_v16 = vld [vmem:[#allocation7 + $0x94c] sm:$0xf]  ;;  %v10834_v10 = vor.u32 %v12886_v37, %v10833_v47  ;;  %v3783_v61 = vpop.f32.mrf.mxu3 }
 0x38c   :  { %v10809_v63 = vld [vmem:[#allocation7 + $0xb20] sm:$0xf]  ;;  %v10579_v13 = vld [vmem:[#allocation7 + $0x958] sm:$0xf0]  ;;  %v12815_v1 = vld [vmem:[#allocation7 + $0x924] sm:$0xf] }
 0x38d   :  { %5447 = vmatpush.bf16.msrb.mxu2 %v10890_v34  ;;  %5461 = vmatpush.bf16.msrb.mxu3 %v10638_v25  ;;  %v10842_v34 = vor.u32 %v12889_v18, %v10841_v54  ;;  %v10595_v25 = vld [vmem:[#allocation7 + $0x978] sm:$0xf0]  ;;  %v10810_v59 = vor.u32 %v12881_v31, %v10809_v63  ;;  %v12882_v54 = vld [vmem:[#allocation7 + $0xb34] sm:$0xf0]  ;;  %v12877_v20 = vld [vmem:[#allocation7 + $0xb0c] sm:$0xf0] }
 0x38e   :  { %5531 = vmatpush.bf16.msra.mxu0 %v10898_v12  ;;  %5496 = vmatmul.bf16.vlgmr.msrb.gmra.mxu1 %v15777_v62  ;;  %v10826_v12 = vor.u32 %v12885_v46, %v10825_v26  ;;  %v4566_v42 = vpop.f32.mrf.mxu1  ;;  %v10598_v52 = vor.u32 %v12824_v55, %v10595_v25  ;;  %v10563_v41 = vld [vmem:[#allocation7 + $0x938] sm:$0xf0]  ;;  %v10657_v24 = vld [vmem:[#allocation7 + $0x9e8] sm:$0xf]  ;;  %v12811_v26 = vld [vmem:[#allocation7 + $0x904] sm:$0xf] }
 0x38f   :  { %5544 = vmatpush.bf16.msra.mxu1 %v10662_v39  ;;  %v10539_v46 = vld [vmem:[#allocation7 + $0x910] sm:$0xf0]  ;;  %v12878_v55 = vld [vmem:[#allocation7 + $0xb14] sm:$0xf0]  ;;  %v10641_v37 = vld [vmem:[#allocation7 + $0x9c8] sm:$0xf] }
 0x390   :  { %v10542_v47 = vor.u32 %v12811_v26, %v10539_v46  ;;  %v11161_v31 = vld [vmem:[#allocation7 + $0xde0] sm:$0xf] }
 0x391   :  { %5448 = vmatpush.bf16.msrb.mxu2 %v10874_v4  ;;  %5462 = vmatpush.bf16.msrb.mxu3 %v10622_v29  ;;  %v4552_v39 = vpop.f32.mrf.mxu0  ;;  %v16567_v4 = vld [vmem:[#allocation52_spill] sm:$0xff]  ;;  %v10574_v29 = vor.u32 %v12819_v15, %v10571_v17  ;;  %v11033_v15 = vld [vmem:[#allocation7 + $0xce0] sm:$0xf] }
 0x392   :  { %5532 = vmatpush.bf16.msra.mxu0 %v10882_v23  ;;  %v3048_v50 = vadd.f32 %v16567_v4, %v15481_v6  ;;  %v15790_v45 = vadd.f32 %v4566_v42, %v4552_v39  ;;  %v10817_v6 = vld [vmem:[#allocation7 + $0xb28] sm:$0xf]  ;;  %v12937_v17 = vld [vmem:[#allocation7 + $0xcec] sm:$0xf0]  ;;  %v12812_v4 = vld [vmem:[#allocation7 + $0x90c] sm:$0xf] }
 0x393   :  { %5545 = vmatpush.bf16.msra.mxu1 %v10646_v8  ;;  %v3769_v8 = vpop.f32.mrf.mxu2  ;;  %v10818_v38 = vor.u32 %v12882_v54, %v10817_v6  ;;  %v10785_v39 = vld [vmem:[#allocation7 + $0xae8] sm:$0xf]  ;;  %v11145_v54 = vld [vmem:[#allocation7 + $0xdc0] sm:$0xf] }
 0x394   :  { %v3770_v23 = vadd.f32 %v3769_v8, %v3048_v50  ;;  %v10547_v50 = vld [vmem:[#allocation7 + $0x918] sm:$0xf0]  ;;  %v12969_v8 = vld [vmem:[#allocation7 + $0xdec] sm:$0xf0]  ;;  %v11129_v46 = vld [vmem:[#allocation7 + $0xda0] sm:$0xf] }
 0x395   :  { %5449 = vmatpush.bf16.msrb.mxu2 %v10858_v49  ;;  %5463 = vmatpush.bf16.msrb.mxu3 %v10606_v27  ;;  %v10555_v49 = vld [vmem:[#allocation7 + $0x930] sm:$0xf0]  ;;  %v10793_v27 = vld [vmem:[#allocation7 + $0xb00] sm:$0xf] }
 0x396   :  { %5533 = vmatpush.bf16.msra.mxu0 %v10866_v22  ;;  %v3784_v18 = vadd.f32 %v3783_v61, %v3770_v23  ;;  %v10582_v22 = vor.u32 %v12820_v16, %v10579_v13  ;;  %v10558_v9 = vor.u32 %v12815_v1, %v10555_v49  ;;  %v12870_v16 = vld [vmem:[#allocation7 + $0xad4] sm:$0xf0]  ;;  %v12933_v13 = vld [vmem:[#allocation7 + $0xccc] sm:$0xf0]  ;;  %v10550_v1 = vor.u32 %v12812_v4, %v10547_v50  ;;  %v10625_v49 = vld [vmem:[#allocation7 + $0x9a8] sm:$0xf] }
 0x397   :  { %5546 = vmatpush.bf16.msra.mxu1 %v10630_v14  ;;  %v12816_v14 = vld [vmem:[#allocation7 + $0x92c] sm:$0xf]  ;;  %v12834_v61 = vld [vmem:[#allocation7 + $0x9b4] sm:$0xf0]  ;;  %v12957_v50 = vld [vmem:[#allocation7 + $0xd8c] sm:$0xf0] }
 0x398   :  { %v15793_v56 = vadd.f32 %v15757_v48, %v3784_v18  ;;  %v12838_v48 = vld [vmem:[#allocation7 + $0x9d4] sm:$0xf0] }
 0x399   :  { %5450 = vmatpush.bf16.msrb.mxu2 %v10842_v34  ;;  %5464 = vmatpush.bf16.msrb.mxu3 %v10590_v21  ;;  %v12842_v34 = vld [vmem:[#allocation7 + $0x9f4] sm:$0xf0]  ;;  %v10794_v21 = vor.u32 %v12877_v20, %v10793_v27  ;;  %v10642_v23 = vor.u32 %v12838_v48, %v10641_v37  ;;  %v10753_v27 = vld [vmem:[#allocation7 + $0xaa8] sm:$0xf] }
 0x39a   :  { %5534 = vmatpush.bf16.msra.mxu0 %v10850_v43  ;;  %v12874_v43 = vld [vmem:[#allocation7 + $0xaf4] sm:$0xf0]  ;;  %v10658_v25 = vor.u32 %v12842_v34, %v10657_v24  ;;  %v10609_v24 = vld [vmem:[#allocation7 + $0x988] sm:$0xf] }
 0x39b   :  { %5547 = vmatpush.bf16.msra.mxu1 %v10614_v33  ;;  %v10801_v33 = vld [vmem:[#allocation7 + $0xb08] sm:$0xf]  ;;  %v10786_v63 = vor.u32 %v12874_v43, %v10785_v39  ;;  %v12866_v20 = vld [vmem:[#allocation7 + $0xab4] sm:$0xf0] }
 0x39c   :  { %v10802_v42 = vor.u32 %v12878_v55, %v10801_v33  ;;  %v12830_v34 = vld [vmem:[#allocation7 + $0x994] sm:$0xf0]  ;;  %v10754_v26 = vor.u32 %v12866_v20, %v10753_v27  ;;  %v10737_v55 = vld [vmem:[#allocation7 + $0xa88] sm:$0xf]  ;;  %v12917_v27 = vld [vmem:[#allocation7 + $0xc4c] sm:$0xf0] }
 0x39d   :  { %5451 = vmatpush.bf16.msrb.mxu2 %v10826_v12  ;;  %5465 = vmatpush.bf16.msrb.mxu3 %v10574_v29  ;;  %v10566_v12 = vor.u32 %v12816_v14, %v10563_v41  ;;  %v10769_v29 = vld [vmem:[#allocation7 + $0xac8] sm:$0xf]  ;;  %v12965_v14 = vld [vmem:[#allocation7 + $0xdcc] sm:$0xf0]  ;;  %v12862_v39 = vld [vmem:[#allocation7 + $0xa94] sm:$0xf0]  ;;  %v10610_v43 = vor.u32 %v12830_v34, %v10609_v24 }
 0x39e   :  { %5535 = vmatpush.bf16.msra.mxu0 %v10834_v10  ;;  %v11017_v10 = vld [vmem:[#allocation7 + $0xcc0] sm:$0xf]  ;;  %v10770_v6 = vor.u32 %v12870_v16, %v10769_v29  ;;  %v12929_v41 = vld [vmem:[#allocation7 + $0xcac] sm:$0xf0]  ;;  %v10738_v48 = vor.u32 %v12862_v39, %v10737_v55  ;;  %v10561_v20 = vld [vmem:[#allocation7 + $0x928] sm:$0xf] }
 0x39f   :  { %5548 = vmatpush.bf16.msra.mxu1 %v10598_v52  ;;  %v11034_v52 = vor.u32 %v12937_v17, %v11033_v15  ;;  %v11018_v18 = vor.u32 %v12933_v13, %v11017_v10  ;;  %v12925_v15 = vld [vmem:[#allocation7 + $0xc8c] sm:$0xf0]  ;;  %v10593_v17 = vld [vmem:[#allocation7 + $0x968] sm:$0xf]  ;;  %v10969_v29 = vld [vmem:[#allocation7 + $0xc60] sm:$0xf] }
 0x3a0   :  { %v12921_v16 = vld [vmem:[#allocation7 + $0xc6c] sm:$0xf0]  ;;  %v12822_v10 = vld [vmem:[#allocation7 + $0x954] sm:$0xf0]  ;;  %v11081_v34 = vld [vmem:[#allocation7 + $0xd40] sm:$0xf] }
 0x3a1   :  { %5452 = vmatpush.bf16.msrb.mxu2 %v10810_v59  ;;  %5466 = vmatpush.bf16.msrb.mxu3 %v10558_v9  ;;  %v11162_v59 = vor.u32 %v12969_v8, %v11161_v31  ;;  %v11001_v9 = vld [vmem:[#allocation7 + $0xca0] sm:$0xf]  ;;  %v12858_v31 = vld [vmem:[#allocation7 + $0xa74] sm:$0xf0] }
 0x3a2   :  { %5536 = vmatpush.bf16.msra.mxu0 %v10818_v38  ;;  %v11146_v38 = vor.u32 %v12965_v14, %v11145_v54  ;;  %v11002_v33 = vor.u32 %v12929_v41, %v11001_v9  ;;  %v12854_v54 = vld [vmem:[#allocation7 + $0xa54] sm:$0xf0]  ;;  %v10953_v14 = vld [vmem:[#allocation7 + $0xc40] sm:$0xf] }
 0x3a3   :  { %5549 = vmatpush.bf16.msra.mxu1 %v10582_v22  ;;  %v10626_v22 = vor.u32 %v12834_v61, %v10625_v49  ;;  %v11097_v49 = vld [vmem:[#allocation7 + $0xd60] sm:$0xf]  ;;  %v10970_v61 = vor.u32 %v12921_v16, %v10969_v29 }
 0x3a4   :  { %v10921_v29 = vld [vmem:[#allocation7 + $0xc00] sm:$0xf] }
 0x3a5   :  { %5453 = vmatpush.bf16.msrb.mxu2 %v10794_v21  ;;  %5467 = vmatpush.bf16.msrb.mxu3 %v10542_v47  ;;  %v12961_v21 = vld [vmem:[#allocation7 + $0xdac] sm:$0xf0]  ;;  %v15799_v47 = vpop.f32.mrf.mxu2 }
 0x3a6   :  { %5537 = vmatpush.bf16.msra.mxu0 %v10802_v42  ;;  %v11130_v37 = vor.u32 %v12961_v21, %v11129_v46  ;;  %v11113_v42 = vld [vmem:[#allocation7 + $0xd80] sm:$0xf]  ;;  %v12949_v46 = vld [vmem:[#allocation7 + $0xd4c] sm:$0xf0]  ;;  %v12850_v21 = vld [vmem:[#allocation7 + $0xa34] sm:$0xf0] }
 0x3a7   :  { %5550 = vmatpush.bf16.msra.mxu1 %v10566_v12  ;;  %v12826_v12 = vld [vmem:[#allocation7 + $0x974] sm:$0xf0]  ;;  %v11114_v13 = vor.u32 %v12957_v50, %v11113_v42  ;;  %v10787_v50 = vld [vmem:[#allocation7 + $0xaf8] sm:$0xf0] }
 0x3a8   :  { %5454 = vmatmul.bf16.vlgmr.msrb.gmra.mxu2 %v15777_v62  ;;  %5468 = vmatmul.bf16.vlgmr.msrb.gmra.mxu3 %v16557_v58  ;;  %v10594_v8 = vor.u32 %v12826_v12, %v10593_v17  ;;  %v11065_v17 = vld [vmem:[#allocation7 + $0xd20] sm:$0xf]  ;;  %v10545_v12 = vld [vmem:[#allocation7 + $0x908] sm:$0xf] }
 0x3a9   :  { %5502 = vmatpush.bf16.msra.mxu2 %v10658_v25  ;;  %5516 = vmatpush.bf16.msra.mxu3 %v10786_v63  ;;  %v10985_v25 = vld [vmem:[#allocation7 + $0xc80] sm:$0xf]  ;;  %v10721_v63 = vld [vmem:[#allocation7 + $0xa68] sm:$0xf] }
 0x3aa   :  { %6293 = vmatpush.bf16.msrb.mxu0 %v11034_v52  ;;  %v10986_v4 = vor.u32 %v12925_v15, %v10985_v25  ;;  %v15801_v52 = vpop.f32.mrf.mxu3  ;;  %v12913_v25 = vld [vmem:[#allocation7 + $0xc2c] sm:$0xf0] }
 0x3ab   :  { %5551 = vmatpush.bf16.msra.mxu1 %v10550_v1  ;;  %5538 = vmatmul.bf16.vlgmr.msra.gmra.mxu0 %v15777_v62  ;;  %v10722_v1 = vor.u32 %v12858_v31, %v10721_v63  ;;  %v10673_v31 = vld [vmem:[#allocation7 + $0xa08] sm:$0xf] }
 0x3ad   :  { %5503 = vmatpush.bf16.msra.mxu2 %v10642_v23  ;;  %5517 = vmatpush.bf16.msra.mxu3 %v10770_v6  ;;  %v10577_v23 = vld [vmem:[#allocation7 + $0x948] sm:$0xf]  ;;  %v3825_v41 = vpop.f32.mrf.mxu2 }
 0x3ae   :  { %6294 = vmatpush.bf16.msrb.mxu0 %v11018_v18  ;;  %5552 = vmatmul.bf16.vlgmr.msra.gmra.mxu1 %v16557_v58  ;;  %v10705_v6 = vld [vmem:[#allocation7 + $0xa48] sm:$0xf]  ;;  %v10578_v18 = vor.u32 %v12822_v10, %v10577_v23  ;;  %v12909_v23 = vld [vmem:[#allocation7 + $0xc0c] sm:$0xf0]  ;;  %v12904_v10 = vld [vmem:[#allocation7 + $0xbec] sm:$0xf] }
 0x3af   :  { %6307 = vmatpush.bf16.msrb.mxu1 %v11162_v59  ;;  %v12953_v59 = vld [vmem:[#allocation7 + $0xd6c] sm:$0xf0]  ;;  %v10706_v24 = vor.u32 %v12854_v54, %v10705_v6  ;;  %v12868_v54 = vld [vmem:[#allocation7 + $0xacc] sm:$0xf] }
 0x3b0   :  { %v11098_v9 = vor.u32 %v12953_v59, %v11097_v49  ;;  %v12967_v49 = vld [vmem:[#allocation7 + $0xde4] sm:$0xf] }
 0x3b1   :  { %5504 = vmatpush.bf16.msra.mxu2 %v10626_v22  ;;  %5518 = vmatpush.bf16.msra.mxu3 %v10754_v26  ;;  %v12818_v22 = vld [vmem:[#allocation7 + $0x934] sm:$0xf0]  ;;  %v10954_v26 = vor.u32 %v12917_v27, %v10953_v14  ;;  %v10922_v14 = vor.u32 %v12909_v23, %v10921_v29  ;;  %v11049_v27 = vld [vmem:[#allocation7 + $0xd00] sm:$0xf]  ;;  %v10739_v29 = vld [vmem:[#allocation7 + $0xa98] sm:$0xf0] }
 0x3b2   :  { %6295 = vmatpush.bf16.msrb.mxu0 %v11002_v33  ;;  %v10689_v33 = vld [vmem:[#allocation7 + $0xa28] sm:$0xf]  ;;  %v3839_v55 = vpop.f32.mrf.mxu3  ;;  %v10562_v39 = vor.u32 %v12818_v22, %v10561_v20  ;;  %v12941_v20 = vld [vmem:[#allocation7 + $0xd0c] sm:$0xf0] }
 0x3b3   :  { %6308 = vmatpush.bf16.msrb.mxu1 %v11146_v38  ;;  %v3826_v38 = vadd.f32 %v3825_v41, %v15733_v2  ;;  %v10690_v42 = vor.u32 %v12850_v21, %v10689_v33  ;;  %v12872_v2 = vld [vmem:[#allocation7 + $0xaec] sm:$0xf]  ;;  %v12963_v33 = vld [vmem:[#allocation7 + $0xdc4] sm:$0xf]  ;;  %v11147_v21 = vld [vmem:[#allocation7 + $0xdd0] sm:$0xf0] }
 0x3b5   :  { %5505 = vmatpush.bf16.msra.mxu2 %v10610_v43  ;;  %5519 = vmatpush.bf16.msra.mxu3 %v10738_v48  ;;  %v10937_v43 = vld [vmem:[#allocation7 + $0xc20] sm:$0xf]  ;;  %v15804_v15 = vadd.f32 %v3839_v55, %v3826_v38  ;;  %v11082_v48 = vor.u32 %v12949_v46, %v11081_v34  ;;  %v12900_v34 = vld [vmem:[#allocation7 + $0xbcc] sm:$0xf]  ;;  %v10899_v38 = vld [vmem:[#allocation7 + $0xbd8] sm:$0xf0]  ;;  %v11050_v55 = vor.u32 %v12941_v20, %v11049_v27  ;;  %v15814_v20 = vpop.f32.mrf.mxu2 }
 0x3b6   :  { %6296 = vmatpush.bf16.msrb.mxu0 %v10986_v4  ;;  %v12945_v4 = vld [vmem:[#allocation7 + $0xd2c] sm:$0xf0]  ;;  %v10938_v63 = vor.u32 %v12913_v25, %v10937_v43  ;;  %v10755_v43 = vld [vmem:[#allocation7 + $0xab8] sm:$0xf0]  ;;  %v15808_v25 = vpop.f32.mrf.mxu1 }
 0x3b7   :  { %6309 = vmatpush.bf16.msrb.mxu1 %v11130_v37  ;;  %v12814_v37 = vld [vmem:[#allocation7 + $0x914] sm:$0xf0]  ;;  %v11066_v59 = vor.u32 %v12945_v4, %v11065_v17  ;;  %v12896_v4 = vld [vmem:[#allocation7 + $0xbac] sm:$0xf] }
 0x3b8   :  { %v10546_v16 = vor.u32 %v12814_v37, %v10545_v12  ;;  %v10902_v12 = vor.u32 %v12900_v34, %v10899_v38  ;;  %v12995_v37 = vld [vmem:[#allocation7 + $0xec4] sm:$0xf]  ;;  %v11243_v38 = vld [vmem:[#allocation7 + $0xe90] sm:$0xf0] }
 0x3b9   :  { %5506 = vmatpush.bf16.msra.mxu2 %v10594_v8  ;;  %5520 = vmatpush.bf16.msra.mxu3 %v10722_v1  ;;  %v12846_v8 = vld [vmem:[#allocation7 + $0xa14] sm:$0xf0]  ;;  %v10790_v1 = vor.u32 %v12872_v2, %v10787_v50  ;;  %v10883_v2 = vld [vmem:[#allocation7 + $0xbb8] sm:$0xf0] }
 0x3ba   :  { %6297 = vmatpush.bf16.msrb.mxu0 %v10970_v61  ;;  %v11163_v61 = vld [vmem:[#allocation7 + $0xdf0] sm:$0xf0]  ;;  %v10674_v6 = vor.u32 %v12846_v8, %v10673_v31  ;;  %v12860_v8 = vld [vmem:[#allocation7 + $0xa8c] sm:$0xf]  ;;  %v10886_v23 = vor.u32 %v12896_v4, %v10883_v2 }
 0x3bb   :  { %6310 = vmatpush.bf16.msrb.mxu1 %v11114_v13  ;;  %v10915_v13 = vld [vmem:[#allocation7 + $0xbf8] sm:$0xf0]  ;;  %v11166_v41 = vor.u32 %v12967_v49, %v11163_v61  ;;  %v11131_v31 = vld [vmem:[#allocation7 + $0xdb0] sm:$0xf0]  ;;  %v12884_v2 = vld [vmem:[#allocation7 + $0xb4c] sm:$0xf] }
 0x3bc   :  { %v10918_v22 = vor.u32 %v12904_v10, %v10915_v13  ;;  %v11259_v13 = vld [vmem:[#allocation7 + $0xeb0] sm:$0xf0]  ;;  %v10867_v49 = vld [vmem:[#allocation7 + $0xb98] sm:$0xf0] }
 0x3bd   :  { %5507 = vmatpush.bf16.msra.mxu2 %v10578_v18  ;;  %5521 = vmatpush.bf16.msra.mxu3 %v10706_v24  ;;  %v10771_v18 = vld [vmem:[#allocation7 + $0xad8] sm:$0xf0]  ;;  %v11291_v24 = vld [vmem:[#allocation7 + $0xef0] sm:$0xf0] }
 0x3be   :  { %6298 = vmatpush.bf16.msrb.mxu0 %v10954_v26  ;;  %v15806_v26 = vpop.f32.mrf.mxu0  ;;  %v10774_v46 = vor.u32 %v12868_v54, %v10771_v18  ;;  %v11115_v54 = vld [vmem:[#allocation7 + $0xd90] sm:$0xf0]  ;;  %v12856_v18 = vld [vmem:[#allocation7 + $0xa6c] sm:$0xf]  ;;  %v4622_v27 = vpop.f32.mrf.mxu1 }
 0x3bf   :  { %6311 = vmatpush.bf16.msrb.mxu1 %v11098_v9  ;;  %v12999_v9 = vld [vmem:[#allocation7 + $0xee4] sm:$0xf]  ;;  %v11227_v4 = vld [vmem:[#allocation7 + $0xe70] sm:$0xf0] }
 0x3c0   :  { %v11294_v17 = vor.u32 %v12999_v9, %v11291_v24  ;;  %v15816_v24 = vpop.f32.mrf.mxu3 }
 0x3c1   :  { %5508 = vmatpush.bf16.msra.mxu2 %v10562_v39  ;;  %5522 = vmatpush.bf16.msra.mxu3 %v10690_v42  ;;  %v12864_v39 = vld [vmem:[#allocation7 + $0xaac] sm:$0xf]  ;;  %v11275_v42 = vld [vmem:[#allocation7 + $0xed0] sm:$0xf0] }
 0x3c2   :  { %6299 = vmatpush.bf16.msrb.mxu0 %v10938_v63  ;;  %v10758_v50 = vor.u32 %v12864_v39, %v10755_v43  ;;  %v12959_v63 = vld [vmem:[#allocation7 + $0xda4] sm:$0xf]  ;;  %v11099_v39 = vld [vmem:[#allocation7 + $0xd70] sm:$0xf0]  ;;  %v12852_v43 = vld [vmem:[#allocation7 + $0xa4c] sm:$0xf] }
 0x3c3   :  { %6312 = vmatpush.bf16.msrb.mxu1 %v11082_v48  ;;  %v11150_v48 = vor.u32 %v12963_v33, %v11147_v21  ;;  %v11134_v10 = vor.u32 %v12959_v63, %v11131_v31  ;;  %v10851_v33 = vld [vmem:[#allocation7 + $0xb78] sm:$0xf0]  ;;  %v12947_v31 = vld [vmem:[#allocation7 + $0xd44] sm:$0xf] }
 0x3c5   :  { %5509 = vmatpush.bf16.msra.mxu2 %v10546_v16  ;;  %5523 = vmatpush.bf16.msra.mxu3 %v10674_v6  ;;  %v11278_v16 = vor.u32 %v12995_v37, %v11275_v42  ;;  %v12955_v6 = vld [vmem:[#allocation7 + $0xd84] sm:$0xf] }
 0x3c6   :  { %6300 = vmatpush.bf16.msrb.mxu0 %v10922_v14  ;;  %v4608_v61 = vpop.f32.mrf.mxu0  ;;  %v10723_v14 = vld [vmem:[#allocation7 + $0xa78] sm:$0xf0]  ;;  %v11118_v34 = vor.u32 %v12955_v6, %v11115_v54  ;;  %v11211_v54 = vld [vmem:[#allocation7 + $0xe50] sm:$0xf0] }
 0x3c7   :  { %6313 = vmatpush.bf16.msrb.mxu1 %v11066_v59  ;;  %v10742_v59 = vor.u32 %v12860_v8, %v10739_v29  ;;  %v10726_v21 = vor.u32 %v12856_v18, %v10723_v14  ;;  %v11083_v8 = vld [vmem:[#allocation7 + $0xd50] sm:$0xf0]  ;;  %v12848_v29 = vld [vmem:[#allocation7 + $0xa2c] sm:$0xf]  ;;  %v10819_v14 = vld [vmem:[#allocation7 + $0xb38] sm:$0xf0] }
 0x3c8   :  { %5510 = vmatmul.bf16.vlgmr.msra.gmra.mxu2 %v16557_v58  ;;  %5524 = vmatmul.bf16.vlgmr.msra.gmra.mxu3 %v15689_v32  ;;  %v12991_v58 = vld [vmem:[#allocation7 + $0xea4] sm:$0xf]  ;;  %v11086_v6 = vor.u32 %v12947_v31, %v11083_v8  ;;  %v12880_v18 = vld [vmem:[#allocation7 + $0xb2c] sm:$0xf]  ;;  %v11035_v31 = vld [vmem:[#allocation7 + $0xcf0] sm:$0xf0] }
 0x3c9   :  { %5558 = vmatpush.bf16.msrb.mxu2 %v10790_v1  ;;  %5572 = vmatpush.bf16.msrb.mxu3 %v10918_v22  ;;  %v12892_v1 = vld [vmem:[#allocation7 + $0xb8c] sm:$0xf]  ;;  %v11262_v22 = vor.u32 %v12991_v58, %v11259_v13  ;;  %v11297_v8 = vld [vmem:[#allocation7 + $0xee8] sm:$0xf] }
 0x3ca   :  { %6349 = vmatpush.bf16.msra.mxu0 %v11166_v41  ;;  %v10870_v9 = vor.u32 %v12892_v1, %v10867_v49  ;;  %v12987_v41 = vld [vmem:[#allocation7 + $0xe84] sm:$0xf] }
 0x3cb   :  { %6314 = vmatpush.bf16.msrb.mxu1 %v11050_v55  ;;  %6301 = vmatmul.bf16.vlgmr.msrb.gmra.mxu0 %v15505_v40  ;;  %v12951_v55 = vld [vmem:[#allocation7 + $0xd64] sm:$0xf] }
 0x3cc   :  { %v11102_v42 = vor.u32 %v12951_v55, %v11099_v39  ;;  %v12979_v1 = vld [vmem:[#allocation7 + $0xe44] sm:$0xf]  ;;  %v10675_v55 = vld [vmem:[#allocation7 + $0xa18] sm:$0xf0] }
 0x3cd   :  { %5559 = vmatpush.bf16.msrb.mxu2 %v10774_v46  ;;  %5573 = vmatpush.bf16.msrb.mxu3 %v10902_v12  ;;  %v12888_v46 = vld [vmem:[#allocation7 + $0xb6c] sm:$0xf]  ;;  %v11246_v12 = vor.u32 %v12987_v41, %v11243_v38  ;;  %v11067_v38 = vld [vmem:[#allocation7 + $0xd30] sm:$0xf0]  ;;  %v11214_v39 = vor.u32 %v12979_v1, %v11211_v54  ;;  %v12997_v1 = vld [vmem:[#allocation7 + $0xecc] sm:$0xf0] }
 0x3ce   :  { %6350 = vmatpush.bf16.msra.mxu0 %v11150_v48  ;;  %6315 = vmatmul.bf16.vlgmr.msrb.gmra.mxu1 %v15634_v28  ;;  %v10854_v37 = vor.u32 %v12888_v46, %v10851_v33  ;;  %v12983_v48 = vld [vmem:[#allocation7 + $0xe64] sm:$0xf]  ;;  %v12936_v54 = vld [vmem:[#allocation7 + $0xcec] sm:$0xf] }
 0x3cf   :  { %6363 = vmatpush.bf16.msra.mxu1 %v11294_v17  ;;  %v10707_v17 = vld [vmem:[#allocation7 + $0xa58] sm:$0xf0]  ;;  %v11230_v58 = vor.u32 %v12983_v48, %v11227_v4  ;;  %v12975_v33 = vld [vmem:[#allocation7 + $0xe24] sm:$0xf]  ;;  %v12876_v48 = vld [vmem:[#allocation7 + $0xb0c] sm:$0xf] }
 0x3d0   :  { %v10710_v63 = vor.u32 %v12852_v43, %v10707_v17  ;;  %v10822_v43 = vor.u32 %v12880_v18, %v10819_v14  ;;  %v11195_v17 = vld [vmem:[#allocation7 + $0xe30] sm:$0xf0]  ;;  %v12939_v4 = vld [vmem:[#allocation7 + $0xd04] sm:$0xf] }
 0x3d1   :  { %5560 = vmatpush.bf16.msrb.mxu2 %v10758_v50  ;;  %5574 = vmatpush.bf16.msrb.mxu3 %v10886_v23  ;;  %v10835_v50 = vld [vmem:[#allocation7 + $0xb58] sm:$0xf0]  ;;  %v15818_v23 = vpop.f32.mrf.mxu0 }
 0x3d2   :  { %6351 = vmatpush.bf16.msra.mxu0 %v11134_v10  ;;  %v4580_v10 = vpop.f32.mrf.mxu2  ;;  %v10838_v13 = vor.u32 %v12884_v2, %v10835_v50  ;;  %v11051_v50 = vld [vmem:[#allocation7 + $0xd10] sm:$0xf0] }
 0x3d3   :  { %6364 = vmatpush.bf16.msra.mxu1 %v11278_v16  ;;  %v10691_v16 = vld [vmem:[#allocation7 + $0xa38] sm:$0xf0]  ;;  %v4581_v49 = vadd.f32 %v4580_v10, %v15790_v45 }
 0x3d4   :  { %v10694_v41 = vor.u32 %v12848_v29, %v10691_v16  ;;  %v13002_v29 = vld [vmem:[#allocation7 + $0xef4] sm:$0xf0] }
 0x3d5   :  { %5561 = vmatpush.bf16.msrb.mxu2 %v10742_v59  ;;  %5575 = vmatpush.bf16.msrb.mxu3 %v10870_v9  ;;  %v4594_v59 = vpop.f32.mrf.mxu3  ;;  %v15824_v46 = vadd.f32 %v4581_v49, %v15740_v7  ;;  %v11054_v49 = vor.u32 %v12939_v4, %v11051_v50  ;;  %v11298_v14 = vor.u32 %v13002_v29, %v11297_v8  ;;  %v12994_v50 = vld [vmem:[#allocation7 + $0xeb4] sm:$0xf0] }
 0x3d6   :  { %6352 = vmatpush.bf16.msra.mxu0 %v11118_v34  ;;  %v4609_v9 = vadd.f32 %v4608_v61, %v4594_v59  ;;  %v12943_v34 = vld [vmem:[#allocation7 + $0xd24] sm:$0xf]  ;;  %v11179_v59 = vld [vmem:[#allocation7 + $0xe10] sm:$0xf0] }
 0x3d7   :  { %6365 = vmatpush.bf16.msra.mxu1 %v11262_v22  ;;  %v15821_v22 = vpop.f32.mrf.mxu1  ;;  %v11070_v61 = vor.u32 %v12943_v34, %v11067_v38  ;;  %v11019_v34 = vld [vmem:[#allocation7 + $0xcd0] sm:$0xf0] }
 0x3d8   :  { %v4623_v45 = vadd.f32 %v4622_v27, %v4609_v9  ;;  %v11043_v9 = vld [vmem:[#allocation7 + $0xcf8] sm:$0xf0] }
 0x3d9   :  { %5562 = vmatpush.bf16.msrb.mxu2 %v10726_v21  ;;  %5576 = vmatpush.bf16.msrb.mxu3 %v10854_v37  ;;  %v12844_v21 = vld [vmem:[#allocation7 + $0xa0c] sm:$0xf]  ;;  %v13001_v37 = vld [vmem:[#allocation7 + $0xeec] sm:$0xf0]  ;;  %v15829_v16 = vpop.f32.mrf.mxu0 }
 0x3da   :  { %6353 = vmatpush.bf16.msra.mxu0 %v11102_v42  ;;  %v10803_v42 = vld [vmem:[#allocation7 + $0xb18] sm:$0xf0]  ;;  %v15827_v2 = vadd.f32 %v4623_v45, %v15749_v35  ;;  %v10678_v7 = vor.u32 %v12844_v21, %v10675_v55  ;;  %v12971_v35 = vld [vmem:[#allocation7 + $0xe04] sm:$0xf]  ;;  %v11281_v21 = vld [vmem:[#allocation7 + $0xec8] sm:$0xf] }
 0x3db   :  { %6366 = vmatpush.bf16.msra.mxu1 %v11246_v12  ;;  %v11289_v12 = vld [vmem:[#allocation7 + $0xee0] sm:$0xf]  ;;  %v10806_v10 = vor.u32 %v12876_v48, %v10803_v42  ;;  %v11182_v55 = vor.u32 %v12971_v35, %v11179_v59  ;;  %v12927_v48 = vld [vmem:[#allocation7 + $0xca4] sm:$0xf]  ;;  %v11003_v42 = vld [vmem:[#allocation7 + $0xcb0] sm:$0xf0] }
 0x3dc   :  { %v11290_v27 = vor.u32 %v13001_v37, %v11289_v12  ;;  %v11257_v45 = vld [vmem:[#allocation7 + $0xea0] sm:$0xf]  ;;  %v12932_v12 = vld [vmem:[#allocation7 + $0xccc] sm:$0xf]  ;;  %v11006_v8 = vor.u32 %v12927_v48, %v11003_v42  ;;  %v12990_v35 = vld [vmem:[#allocation7 + $0xe94] sm:$0xf0] }
 0x3dd   :  { %5563 = vmatpush.bf16.msrb.mxu2 %v10710_v63  ;;  %5577 = vmatpush.bf16.msrb.mxu3 %v10838_v13  ;;  %v12935_v63 = vld [vmem:[#allocation7 + $0xce4] sm:$0xf]  ;;  %v11273_v13 = vld [vmem:[#allocation7 + $0xec0] sm:$0xf]  ;;  %v12920_v42 = vld [vmem:[#allocation7 + $0xc6c] sm:$0xf] }
 0x3de   :  { %6354 = vmatpush.bf16.msra.mxu0 %v11086_v6  ;;  %v11038_v6 = vor.u32 %v12935_v63, %v11035_v31  ;;  %v11274_v38 = vor.u32 %v12997_v1, %v11273_v13  ;;  %v11241_v63 = vld [vmem:[#allocation7 + $0xe80] sm:$0xf]  ;;  %v12989_v31 = vld [vmem:[#allocation7 + $0xe8c] sm:$0xf0]  ;;  %v10987_v13 = vld [vmem:[#allocation7 + $0xc90] sm:$0xf0] }
 0x3df   :  { %6367 = vmatpush.bf16.msra.mxu1 %v11230_v58  ;;  %v11198_v58 = vor.u32 %v12975_v33, %v11195_v17  ;;  %v15831_v18 = vpop.f32.mrf.mxu1  ;;  %v12998_v33 = vld [vmem:[#allocation7 + $0xed4] sm:$0xf0]  ;;  %v11242_v1 = vor.u32 %v12989_v31, %v11241_v63  ;;  %v12915_v63 = vld [vmem:[#allocation7 + $0xc44] sm:$0xf]  ;;  %v10955_v31 = vld [vmem:[#allocation7 + $0xc50] sm:$0xf0] }
 0x3e0   :  { %v11282_v37 = vor.u32 %v12998_v33, %v11281_v21  ;;  %v10995_v33 = vld [vmem:[#allocation7 + $0xc98] sm:$0xf0] }
 0x3e1   :  { %5564 = vmatpush.bf16.msrb.mxu2 %v10694_v41  ;;  %5578 = vmatpush.bf16.msrb.mxu3 %v10822_v43  ;;  %v12931_v41 = vld [vmem:[#allocation7 + $0xcc4] sm:$0xf]  ;;  %v11046_v43 = vor.u32 %v12936_v54, %v11043_v9  ;;  %v15836_v29 = vpop.f32.mrf.mxu0  ;;  %v12985_v54 = vld [vmem:[#allocation7 + $0xe6c] sm:$0xf0] }
 0x3e2   :  { %6355 = vmatpush.bf16.msra.mxu0 %v11070_v61  ;;  %v11022_v17 = vor.u32 %v12931_v41, %v11019_v34  ;;  %v11027_v61 = vld [vmem:[#allocation7 + $0xcd8] sm:$0xf0]  ;;  %v12924_v34 = vld [vmem:[#allocation7 + $0xc8c] sm:$0xf] }
 0x3e3   :  { %6368 = vmatpush.bf16.msra.mxu1 %v11214_v39  ;;  %v12993_v39 = vld [vmem:[#allocation7 + $0xeac] sm:$0xf0] }
 0x3e4   :  { %v11258_v4 = vor.u32 %v12993_v39, %v11257_v45  ;;  %v10971_v45 = vld [vmem:[#allocation7 + $0xc70] sm:$0xf0] }
 0x3e5   :  { %5565 = vmatpush.bf16.msrb.mxu2 %v10678_v7  ;;  %5579 = vmatpush.bf16.msrb.mxu3 %v10806_v10  ;;  %v11265_v7 = vld [vmem:[#allocation7 + $0xea8] sm:$0xf]  ;;  %v11011_v10 = vld [vmem:[#allocation7 + $0xcb8] sm:$0xf0] }
 0x3e6   :  { %6356 = vmatpush.bf16.msra.mxu0 %v11054_v49  ;;  %v11249_v49 = vld [vmem:[#allocation7 + $0xe88] sm:$0xf] }
 0x3e7   :  { %6369 = vmatpush.bf16.msra.mxu1 %v11198_v58  ;;  %v11266_v58 = vor.u32 %v12994_v50, %v11265_v7  ;;  %v15839_v59 = vpop.f32.mrf.mxu1  ;;  %v11250_v21 = vor.u32 %v12990_v35, %v11249_v49  ;;  %v10979_v50 = vld [vmem:[#allocation7 + $0xc78] sm:$0xf0]  ;;  %v10958_v35 = vor.u32 %v12915_v63, %v10955_v31  ;;  %v12907_v63 = vld [vmem:[#allocation7 + $0xc04] sm:$0xf]  ;;  %v10923_v31 = vld [vmem:[#allocation7 + $0xc10] sm:$0xf0] }
 0x3e8   :  { %5566 = vmatmul.bf16.vlgmr.msrb.gmra.mxu2 %v15689_v32  ;;  %5580 = vmatmul.bf16.vlgmr.msrb.gmra.mxu3 %v15777_v62  ;;  %v12928_v32 = vld [vmem:[#allocation7 + $0xcac] sm:$0xf]  ;;  %v12923_v62 = vld [vmem:[#allocation7 + $0xc84] sm:$0xf] }
 0x3e9   :  { %6321 = vmatpush.bf16.msra.mxu2 %v11290_v27  ;;  %6335 = vmatpush.bf16.msra.mxu3 %v11038_v6  ;;  %v11030_v27 = vor.u32 %v12932_v12, %v11027_v61  ;;  %v11225_v6 = vld [vmem:[#allocation7 + $0xe60] sm:$0xf]  ;;  %v11014_v9 = vor.u32 %v12928_v32, %v11011_v10  ;;  %v10990_v41 = vor.u32 %v12923_v62, %v10987_v13  ;;  %v12982_v32 = vld [vmem:[#allocation7 + $0xe54] sm:$0xf0]  ;;  %v12977_v62 = vld [vmem:[#allocation7 + $0xe2c] sm:$0xf0] }
 0x3ea   :  { %6405 = vmatpush.bf16.msrb.mxu0 %v11298_v14  ;;  %v15841_v14 = vpop.f32.mrf.mxu2  ;;  %v11226_v39 = vor.u32 %v12985_v54, %v11225_v6  ;;  %v11209_v12 = vld [vmem:[#allocation7 + $0xe40] sm:$0xf]  ;;  %v10998_v61 = vor.u32 %v12924_v34, %v10995_v33  ;;  %v12916_v6 = vld [vmem:[#allocation7 + $0xc4c] sm:$0xf]  ;;  %v12911_v34 = vld [vmem:[#allocation7 + $0xc24] sm:$0xf] }
 0x3eb   :  { %6370 = vmatpush.bf16.msra.mxu1 %v11182_v55  ;;  %6357 = vmatmul.bf16.vlgmr.msra.gmra.mxu0 %v15634_v28  ;;  %v12919_v55 = vld [vmem:[#allocation7 + $0xc64] sm:$0xf]  ;;  %v11193_v10 = vld [vmem:[#allocation7 + $0xe20] sm:$0xf] }
 0x3ec   :  { %v10974_v48 = vor.u32 %v12919_v55, %v10971_v45  ;;  %v11194_v55 = vor.u32 %v12977_v62, %v11193_v10  ;;  %v11201_v45 = vld [vmem:[#allocation7 + $0xe28] sm:$0xf]  ;;  %v12970_v62 = vld [vmem:[#allocation7 + $0xdf4] sm:$0xf0] }
 0x3ed   :  { %6322 = vmatpush.bf16.msra.mxu2 %v11274_v38  ;;  %6336 = vmatpush.bf16.msra.mxu3 %v11022_v17  ;;  %v15843_v38 = vpop.f32.mrf.mxu3  ;;  %v12986_v17 = vld [vmem:[#allocation7 + $0xe74] sm:$0xf0]  ;;  %v11169_v10 = vld [vmem:[#allocation7 + $0xde8] sm:$0xf] }
 0x3ee   :  { %6406 = vmatpush.bf16.msrb.mxu0 %v11282_v37  ;;  %6371 = vmatmul.bf16.vlgmr.msra.gmra.mxu1 %v15737_v19  ;;  %v12981_v37 = vld [vmem:[#allocation7 + $0xe4c] sm:$0xf0] }
 0x3ef   :  { %6419 = vmatpush.bf16.msrb.mxu1 %v11046_v43  ;;  %v11233_v43 = vld [vmem:[#allocation7 + $0xe68] sm:$0xf] }
 0x3f0   :  { %v11234_v7 = vor.u32 %v12986_v17, %v11233_v43  ;;  %v12912_v43 = vld [vmem:[#allocation7 + $0xc2c] sm:$0xf]  ;;  %v11177_v17 = vld [vmem:[#allocation7 + $0xe00] sm:$0xf] }
 0x3f1   :  { %6323 = vmatpush.bf16.msra.mxu2 %v11258_v4  ;;  %6337 = vmatpush.bf16.msra.mxu3 %v11006_v8  ;;  %v5427_v4 = vpop.f32.mrf.mxu0  ;;  %v11217_v8 = vld [vmem:[#allocation7 + $0xe48] sm:$0xf] }
 0x3f2   :  { %6407 = vmatpush.bf16.msrb.mxu0 %v11266_v58  ;;  %v5441_v58 = vpop.f32.mrf.mxu1  ;;  %v4636_v49 = vpop.f32.mrf.mxu2 }
 0x3f3   :  { %6420 = vmatpush.bf16.msrb.mxu1 %v11030_v27  ;;  %v11210_v27 = vor.u32 %v12981_v37, %v11209_v12  ;;  %v15845_v13 = vadd.f32 %v5441_v58, %v5427_v4  ;;  %v12973_v12 = vld [vmem:[#allocation7 + $0xe0c] sm:$0xf0]  ;;  %v11041_v4 = vld [vmem:[#allocation7 + $0xce8] sm:$0xf]  ;;  %v12974_v58 = vld [vmem:[#allocation7 + $0xe14] sm:$0xf0] }
 0x3f5   :  { %6324 = vmatpush.bf16.msra.mxu2 %v11242_v1  ;;  %6338 = vmatpush.bf16.msra.mxu3 %v10990_v41  ;;  %v10982_v1 = vor.u32 %v12920_v42, %v10979_v50  ;;  %v4650_v54 = vpop.f32.mrf.mxu3  ;;  %v10963_v41 = vld [vmem:[#allocation7 + $0xc58] sm:$0xf0] }
 0x3f6   :  { %6408 = vmatpush.bf16.msrb.mxu0 %v11250_v21  ;;  %v10939_v21 = vld [vmem:[#allocation7 + $0xc30] sm:$0xf0]  ;;  %v4651_v33 = vadd.f32 %v4650_v54, %v4636_v49  ;;  %v10947_v42 = vld [vmem:[#allocation7 + $0xc38] sm:$0xf0]  ;;  %v10926_v49 = vor.u32 %v12907_v63, %v10923_v31  ;;  %v10977_v63 = vld [vmem:[#allocation7 + $0xc68] sm:$0xf] }
 0x3f7   :  { %6421 = vmatpush.bf16.msrb.mxu1 %v11014_v9  ;;  %v11218_v9 = vor.u32 %v12982_v32, %v11217_v8  ;;  %v11178_v32 = vor.u32 %v12973_v12, %v11177_v17  ;;  %v11137_v17 = vld [vmem:[#allocation7 + $0xda8] sm:$0xf]  ;;  %v12962_v12 = vld [vmem:[#allocation7 + $0xdb4] sm:$0xf0] }
 0x3f8   :  { %v4665_v37 = vadd.f32 %v15829_v16, %v4651_v33  ;;  %v12922_v31 = vld [vmem:[#allocation7 + $0xc74] sm:$0xf0] }
 0x3f9   :  { %6325 = vmatpush.bf16.msra.mxu2 %v11226_v39  ;;  %6339 = vmatpush.bf16.msra.mxu3 %v10974_v48  ;;  %v12978_v39 = vld [vmem:[#allocation7 + $0xe34] sm:$0xf0]  ;;  %v10942_v48 = vor.u32 %v12911_v34, %v10939_v21  ;;  %v11170_v34 = vor.u32 %v12970_v62, %v11169_v10 }
 0x3fa   :  { %6409 = vmatpush.bf16.msrb.mxu0 %v11234_v7  ;;  %v12938_v7 = vld [vmem:[#allocation7 + $0xcf4] sm:$0xf0]  ;;  %v11202_v50 = vor.u32 %v12978_v39, %v11201_v45  ;;  %v15849_v8 = vadd.f32 %v4665_v37, %v15793_v56  ;;  %v11153_v56 = vld [vmem:[#allocation7 + $0xdc8] sm:$0xf] }
 0x3fb   :  { %6422 = vmatpush.bf16.msrb.mxu1 %v10998_v61  ;;  %v10966_v61 = vor.u32 %v12916_v6, %v10963_v41  ;;  %v11042_v16 = vor.u32 %v12938_v7, %v11041_v4  ;;  %v12934_v6 = vld [vmem:[#allocation7 + $0xcd4] sm:$0xf0]  ;;  %v10931_v41 = vld [vmem:[#allocation7 + $0xc18] sm:$0xf0]  ;;  %v11009_v45 = vld [vmem:[#allocation7 + $0xca8] sm:$0xf] }
 0x3fc   :  { %v12966_v21 = vld [vmem:[#allocation7 + $0xdd4] sm:$0xf0]  ;;  %v11121_v4 = vld [vmem:[#allocation7 + $0xd88] sm:$0xf] }
 0x3fd   :  { %6326 = vmatpush.bf16.msra.mxu2 %v11210_v27  ;;  %6340 = vmatpush.bf16.msra.mxu3 %v10958_v35  ;;  %v11185_v27 = vld [vmem:[#allocation7 + $0xe08] sm:$0xf]  ;;  %v12930_v39 = vld [vmem:[#allocation7 + $0xcb4] sm:$0xf0]  ;;  %v15857_v62 = vpop.f32.mrf.mxu3 }
 0x3fe   :  { %6410 = vmatpush.bf16.msrb.mxu0 %v11218_v9  ;;  %v11025_v35 = vld [vmem:[#allocation7 + $0xcc8] sm:$0xf]  ;;  %v11186_v54 = vor.u32 %v12974_v58, %v11185_v27  ;;  %v12908_v9 = vld [vmem:[#allocation7 + $0xc0c] sm:$0xf]  ;;  %v11010_v37 = vor.u32 %v12930_v39, %v11009_v45  ;;  %v12958_v7 = vld [vmem:[#allocation7 + $0xd94] sm:$0xf0]  ;;  %v15855_v27 = vpop.f32.mrf.mxu2 }
 0x3ff   :  { %6423 = vmatpush.bf16.msrb.mxu1 %v10982_v1  ;;  %v10950_v1 = vor.u32 %v12912_v43, %v10947_v42  ;;  %v11026_v33 = vor.u32 %v12934_v6, %v11025_v35  ;;  %v11154_v43 = vor.u32 %v12966_v21, %v11153_v56  ;;  %v11138_v42 = vor.u32 %v12962_v12, %v11137_v17  ;;  %v11105_v58 = vld [vmem:[#allocation7 + $0xd68] sm:$0xf]  ;;  %v12954_v10 = vld [vmem:[#allocation7 + $0xd74] sm:$0xf0] }
 0x400   :  { %v11106_v35 = vor.u32 %v12954_v10, %v11105_v58  ;;  %v11089_v6 = vld [vmem:[#allocation7 + $0xd48] sm:$0xf]  ;;  %v12946_v45 = vld [vmem:[#allocation7 + $0xd34] sm:$0xf0]  ;;  %v12964_v10 = vld [vmem:[#allocation7 + $0xdcc] sm:$0xf] }
 0x401   :  { %6327 = vmatpush.bf16.msra.mxu2 %v11194_v55  ;;  %6341 = vmatpush.bf16.msra.mxu3 %v10942_v48  ;;  %v10934_v55 = vor.u32 %v12908_v9, %v10931_v41  ;;  %v12926_v48 = vld [vmem:[#allocation7 + $0xc94] sm:$0xf0]  ;;  %v10945_v41 = vld [vmem:[#allocation7 + $0xc28] sm:$0xf] }
 0x402   :  { %6411 = vmatpush.bf16.msrb.mxu0 %v11202_v50  ;;  %v10929_v12 = vld [vmem:[#allocation7 + $0xc08] sm:$0xf] }
 0x403   :  { %6424 = vmatpush.bf16.msrb.mxu1 %v10966_v61  ;;  %v10993_v61 = vld [vmem:[#allocation7 + $0xc88] sm:$0xf] }
 0x404   :  { %v10994_v50 = vor.u32 %v12926_v48, %v10993_v61  ;;  %v12968_v48 = vld [vmem:[#allocation7 + $0xdec] sm:$0xf] }
 0x405   :  { %6328 = vmatpush.bf16.msra.mxu2 %v11178_v32  ;;  %6342 = vmatpush.bf16.msra.mxu3 %v10926_v49  ;;  %v11122_v32 = vor.u32 %v12958_v7, %v11121_v4  ;;  %v12918_v49 = vld [vmem:[#allocation7 + $0xc54] sm:$0xf0]  ;;  %v11057_v7 = vld [vmem:[#allocation7 + $0xd08] sm:$0xf] }
 0x406   :  { %6412 = vmatpush.bf16.msrb.mxu0 %v11186_v54  ;;  %v12950_v54 = vld [vmem:[#allocation7 + $0xd54] sm:$0xf0] }
 0x407   :  { %6425 = vmatpush.bf16.msrb.mxu1 %v10950_v1  ;;  %v10961_v1 = vld [vmem:[#allocation7 + $0xc48] sm:$0xf]  ;;  %v11090_v21 = vor.u32 %v12950_v54, %v11089_v6  ;;  %v11139_v54 = vld [vmem:[#allocation7 + $0xdb8] sm:$0xf0] }
 0x408   :  { %6329 = vmatmul.bf16.vlgmr.msra.gmra.mxu2 %v15737_v19  ;;  %6343 = vmatmul.bf16.vlgmr.msra.gmra.mxu3 %v15505_v40  ;;  %v10962_v9 = vor.u32 %v12918_v49, %v10961_v1  ;;  %v12996_v49 = vld [vmem:[#allocation7 + $0xecc] sm:$0xf] }
 0x409   :  { %6377 = vmatpush.bf16.msrb.mxu2 %v11042_v16  ;;  %6391 = vmatpush.bf16.msrb.mxu3 %v11170_v34  ;;  %v10978_v16 = vor.u32 %v12922_v31, %v10977_v63  ;;  %v12914_v34 = vld [vmem:[#allocation7 + $0xc34] sm:$0xf0]  ;;  %v11299_v31 = vld [vmem:[#allocation7 + $0xef8] sm:$0xf0] }
 0x40a   :  { %6413 = vmatmul.bf16.vlgmr.msrb.gmra.mxu0 %v15737_v19 }
 0x40b   :  { %6426 = vmatpush.bf16.msrb.mxu1 %v10934_v55  ;;  %v4692_v56 = vpop.f32.mrf.mxu2  ;;  %v11073_v55 = vld [vmem:[#allocation7 + $0xd28] sm:$0xf]  ;;  %v4706_v39 = vpop.f32.mrf.mxu3 }
 0x40c   :  { %v11074_v61 = vor.u32 %v12946_v45, %v11073_v55  ;;  %v12988_v45 = vld [vmem:[#allocation7 + $0xe8c] sm:$0xf] }
 0x40d   :  { %6378 = vmatpush.bf16.msrb.mxu2 %v11026_v33  ;;  %6392 = vmatpush.bf16.msrb.mxu3 %v11154_v43  ;;  %v4693_v33 = vadd.f32 %v4692_v56, %v15831_v18  ;;  %v10946_v43 = vor.u32 %v12914_v34, %v10945_v41  ;;  %v13000_v18 = vld [vmem:[#allocation7 + $0xeec] sm:$0xf]  ;;  %v11267_v34 = vld [vmem:[#allocation7 + $0xeb8] sm:$0xf0] }
 0x40e   :  { %6427 = vmatmul.bf16.vlgmr.msrb.gmra.mxu1 %v15505_v40  ;;  %v11302_v1 = vor.u32 %v13000_v18, %v11299_v31  ;;  %v12992_v41 = vld [vmem:[#allocation7 + $0xeac] sm:$0xf]  ;;  %v11091_v31 = vld [vmem:[#allocation7 + $0xd58] sm:$0xf0] }
 0x40f   :  { %v4707_v17 = vadd.f32 %v4706_v39, %v4693_v33  ;;  %v11123_v33 = vld [vmem:[#allocation7 + $0xd98] sm:$0xf0]  ;;  %v11270_v55 = vor.u32 %v12992_v41, %v11267_v34  ;;  %v12948_v18 = vld [vmem:[#allocation7 + $0xd4c] sm:$0xf] }
 0x410   :  { %v11251_v39 = vld [vmem:[#allocation7 + $0xe98] sm:$0xf0]  ;;  %v12976_v41 = vld [vmem:[#allocation7 + $0xe2c] sm:$0xf] }
 0x411   :  { %6379 = vmatpush.bf16.msrb.mxu2 %v11010_v37  ;;  %6393 = vmatpush.bf16.msrb.mxu3 %v11138_v42  ;;  %v12910_v37 = vld [vmem:[#allocation7 + $0xc14] sm:$0xf0]  ;;  %v11171_v42 = vld [vmem:[#allocation7 + $0xdf8] sm:$0xf0]  ;;  %v15861_v4 = vadd.f32 %v4707_v17, %v15804_v15  ;;  %v12960_v15 = vld [vmem:[#allocation7 + $0xdac] sm:$0xf] }
 0x412   :  { %v10930_v63 = vor.u32 %v12910_v37, %v10929_v12  ;;  %v11142_v56 = vor.u32 %v12960_v15, %v11139_v54  ;;  %v12952_v17 = vld [vmem:[#allocation7 + $0xd6c] sm:$0xf]  ;;  %v11107_v12 = vld [vmem:[#allocation7 + $0xd78] sm:$0xf0] }
 0x413   :  { %16568 = vst [vmem:[#allocation23_spill] sm:$0xff] %v15861_v4  ;;  %v15865_v37 = vpop.f32.mrf.mxu2  ;;  %v11203_v34 = vld [vmem:[#allocation7 + $0xe38] sm:$0xf0]  ;;  %v13091_v4 = vld [vmem:[#allocation10 + $0x2c4] sm:$0xf] }
 0x415   :  { %6380 = vmatpush.bf16.msrb.mxu2 %v10994_v50  ;;  %6394 = vmatpush.bf16.msrb.mxu3 %v11122_v32  ;;  %v12942_v50 = vld [vmem:[#allocation7 + $0xd14] sm:$0xf0]  ;;  %v11174_v32 = vor.u32 %v12968_v48, %v11171_v42  ;;  %v15869_v48 = vpop.f32.mrf.mxu3  ;;  %v12984_v42 = vld [vmem:[#allocation7 + $0xe6c] sm:$0xf] }
 0x416   :  { %v11058_v58 = vor.u32 %v12942_v50, %v11057_v7  ;;  %v11235_v7 = vld [vmem:[#allocation7 + $0xe78] sm:$0xf0]  ;;  %v11110_v50 = vor.u32 %v12952_v17, %v11107_v12  ;;  %v11206_v17 = vor.u32 %v12976_v41, %v11203_v34  ;;  %v12972_v12 = vld [vmem:[#allocation7 + $0xe0c] sm:$0xf] }
 0x419   :  { %6381 = vmatpush.bf16.msrb.mxu2 %v10978_v16  ;;  %6395 = vmatpush.bf16.msrb.mxu3 %v11106_v35  ;;  %v11155_v16 = vld [vmem:[#allocation7 + $0xdd8] sm:$0xf0] }
 0x41a   :  { %v11283_v35 = vld [vmem:[#allocation7 + $0xed8] sm:$0xf0]  ;;  %v11158_v6 = vor.u32 %v12964_v10, %v11155_v16  ;;  %v11094_v16 = vor.u32 %v12948_v18, %v11091_v31 }
 0x41b   :  { %v11219_v10 = vld [vmem:[#allocation7 + $0xe58] sm:$0xf0] }
 0x41d   :  { %6382 = vmatpush.bf16.msrb.mxu2 %v10962_v9  ;;  %6396 = vmatpush.bf16.msrb.mxu3 %v11090_v21  ;;  %v11286_v9 = vor.u32 %v12996_v49, %v11283_v35  ;;  %v12956_v21 = vld [vmem:[#allocation7 + $0xd8c] sm:$0xf]  ;;  %v11075_v49 = vld [vmem:[#allocation7 + $0xd38] sm:$0xf0] }
 0x421   :  { %6383 = vmatpush.bf16.msrb.mxu2 %v10946_v43  ;;  %6397 = vmatpush.bf16.msrb.mxu3 %v11074_v61  ;;  %v11126_v43 = vor.u32 %v12956_v21, %v11123_v33  ;;  %v15867_v61 = vpop.f32.mrf.mxu0 }
 0x425   :  { %6384 = vmatpush.bf16.msrb.mxu2 %v10930_v63  ;;  %6398 = vmatpush.bf16.msrb.mxu3 %v11058_v58  ;;  %v15871_v63 = vpop.f32.mrf.mxu1  ;;  %v12980_v58 = vld [vmem:[#allocation7 + $0xe4c] sm:$0xf] }
 0x426   :  { %16569 = vst [vmem:[#allocation27_spill] sm:$0xff] %v15871_v63 }
 0x428   :  { %6385 = vmatmul.bf16.vlgmr.msrb.gmra.mxu2 %v15505_v40  ;;  %6399 = vmatmul.bf16.vlgmr.msrb.gmra.mxu3 %v15634_v28  ;;  %v11254_v40 = vor.u32 %v12988_v45, %v11251_v39  ;;  %v12940_v45 = vld [vmem:[#allocation7 + $0xd0c] sm:$0xf]  ;;  %v11059_v39 = vld [vmem:[#allocation7 + $0xd18] sm:$0xf0] }
 0x429   :  { %6433 = vmatpush.bf16.msra.mxu2 %v11174_v32  ;;  %6447 = vmatpush.bf16.msra.mxu3 %v11302_v1  ;;  %v11238_v32 = vor.u32 %v12984_v42, %v11235_v7  ;;  %v12944_v1 = vld [vmem:[#allocation7 + $0xd2c] sm:$0xf]  ;;  %v5483_v15 = vpop.f32.mrf.mxu0 }
 0x42a   :  { %v11078_v21 = vor.u32 %v12944_v1, %v11075_v49 }
 0x42b   :  { %v5455_v35 = vpop.f32.mrf.mxu2 }
 0x42c   :  { %v5456_v54 = vadd.f32 %v5455_v35, %v15845_v13  ;;  %v11062_v13 = vor.u32 %v12940_v45, %v11059_v39  ;;  %v13097_v45 = vld [vmem:[#allocation10 + $0x2ec] sm:$0xf0]  ;;  %v11553_v39 = vld [vmem:[#allocation10 + $0x3e0] sm:$0xf] }
 0x42d   :  { %6434 = vmatpush.bf16.msra.mxu2 %v11158_v6  ;;  %6448 = vmatpush.bf16.msra.mxu3 %v11286_v9  ;;  %v11222_v6 = vor.u32 %v12980_v58, %v11219_v10  ;;  %v5469_v9 = vpop.f32.mrf.mxu3  ;;  %v5497_v33 = vpop.f32.mrf.mxu1 }
 0x431   :  { %6435 = vmatpush.bf16.msra.mxu2 %v11142_v56  ;;  %6449 = vmatpush.bf16.msra.mxu3 %v11270_v55  ;;  %v5484_v56 = vadd.f32 %v5483_v15, %v5469_v9  ;;  %v15875_v55 = vadd.f32 %v5456_v54, %v15824_v46  ;;  %v15886_v18 = vpop.f32.mrf.mxu0 }
 0x432   :  { %16573 = vst [vmem:[#allocation71_spill] sm:$0xff] %v15886_v18  ;;  %v11491_v18 = vld [vmem:[#allocation10 + $0x370] sm:$0xf0] }
 0x433   :  { %v15882_v46 = vpop.f32.mrf.mxu2 }
 0x434   :  { %16571 = vst [vmem:[#allocation24_spill] sm:$0xff] %v15882_v46  ;;  %v11537_v46 = vld [vmem:[#allocation10 + $0x3c0] sm:$0xf] }
 0x435   :  { %6436 = vmatpush.bf16.msra.mxu2 %v11126_v43  ;;  %6450 = vmatpush.bf16.msra.mxu3 %v11254_v40  ;;  %v5498_v43 = vadd.f32 %v5497_v33, %v5484_v56  ;;  %v11187_v40 = vld [vmem:[#allocation7 + $0xe18] sm:$0xf0]  ;;  %v15899_v35 = vpop.f32.mrf.mxu1  ;;  %v11425_v33 = vld [vmem:[#allocation10 + $0x2e0] sm:$0xf] }
 0x436   :  { %v11190_v7 = vor.u32 %v12972_v12, %v11187_v40  ;;  %16577 = vst [vmem:[#allocation47_spill] sm:$0xff] %v15899_v35  ;;  %v13129_v12 = vld [vmem:[#allocation10 + $0x3ec] sm:$0xf0]  ;;  %v13095_v40 = vld [vmem:[#allocation10 + $0x2e4] sm:$0xf] }
 0x437   :  { %v15878_v42 = vadd.f32 %v5498_v43, %v15827_v2  ;;  %v11411_v35 = vld [vmem:[#allocation10 + $0x2d0] sm:$0xf0] }
 0x439   :  { %6437 = vmatpush.bf16.msra.mxu2 %v11110_v50  ;;  %6451 = vmatpush.bf16.msra.mxu3 %v11238_v32  ;;  %16570 = vst [vmem:[#allocation30_spill] sm:$0xff] %v15878_v42  ;;  %v15884_v50 = vpop.f32.mrf.mxu3  ;;  %v5539_v58 = vpop.f32.mrf.mxu0  ;;  %v13125_v42 = vld [vmem:[#allocation10 + $0x3cc] sm:$0xf0] }
 0x43a   :  { %16572 = vst [vmem:[#allocation54_spill] sm:$0xff] %v15884_v50 }
 0x43d   :  { %6438 = vmatpush.bf16.msra.mxu2 %v11094_v16  ;;  %6452 = vmatpush.bf16.msra.mxu3 %v11222_v6  ;;  %v15905_v54 = vpop.f32.mrf.mxu1 }
 0x441   :  { %6439 = vmatpush.bf16.msra.mxu2 %v11078_v21  ;;  %6453 = vmatpush.bf16.msra.mxu3 %v11206_v17  ;;  %v11426_v17 = vor.u32 %v13097_v45, %v11425_v33  ;;  %v13123_v33 = vld [vmem:[#allocation10 + $0x3c4] sm:$0xf]  ;;  %v11414_v45 = vor.u32 %v13091_v4, %v11411_v35  ;;  %v11377_v4 = vld [vmem:[#allocation10 + $0x280] sm:$0xf]  ;;  %v13085_v35 = vld [vmem:[#allocation10 + $0x28c] sm:$0xf0] }
 0x443   :  { %7066 = vmatpush.bf16.msra.mxu0 %v11426_v17  ;;  %v13121_v17 = vld [vmem:[#allocation10 + $0x3ac] sm:$0xf0] }
 0x445   :  { %6440 = vmatpush.bf16.msra.mxu2 %v11062_v13  ;;  %6454 = vmatpush.bf16.msra.mxu3 %v11190_v7  ;;  %v15915_v56 = vpop.f32.mrf.mxu1  ;;  %v11427_v13 = vld [vmem:[#allocation10 + $0x2f0] sm:$0xf0]  ;;  %v11554_v7 = vor.u32 %v13129_v12, %v11553_v39  ;;  %v11393_v39 = vld [vmem:[#allocation10 + $0x2a0] sm:$0xf]  ;;  %v13089_v12 = vld [vmem:[#allocation10 + $0x2ac] sm:$0xf0] }
 0x446   :  { %16582 = vst [vmem:[#allocation70_spill] sm:$0xff] %v15915_v56  ;;  %v11521_v56 = vld [vmem:[#allocation10 + $0x3a0] sm:$0xf] }
 0x447   :  { %7079 = vmatpush.bf16.msra.mxu1 %v11554_v7  ;;  %v11394_v7 = vor.u32 %v13089_v12, %v11393_v39  ;;  %v11378_v12 = vor.u32 %v13085_v35, %v11377_v4 }
 0x448   :  { %6441 = vmatmul.bf16.vlgmr.msra.gmra.mxu2 %v15634_v28  ;;  %6455 = vmatmul.bf16.vlgmr.msra.gmra.mxu3 %v15737_v19  ;;  %v15895_v28 = vpop.f32.mrf.mxu0 }
 0x449   :  { %16576 = vst [vmem:[#allocation62_spill] sm:$0xff] %v15895_v28  ;;  %v11538_v28 = vor.u32 %v13125_v42, %v11537_v46  ;;  %v11523_v42 = vld [vmem:[#allocation10 + $0x3b0] sm:$0xf0]  ;;  %v11522_v46 = vor.u32 %v13121_v17, %v11521_v56  ;;  %v13081_v17 = vld [vmem:[#allocation10 + $0x26c] sm:$0xf0] }
 0x44b   :  { %v5511_v31 = vpop.f32.mrf.mxu2  ;;  %v5525_v32 = vpop.f32.mrf.mxu3  ;;  %7080 = vmatpush.bf16.msra.mxu1 %v11538_v28 }
 0x44c   :  { %v5526_v2 = vadd.f32 %v5525_v32, %v5511_v31  ;;  %v11430_v31 = vor.u32 %v13095_v40, %v11427_v13  ;;  %v13127_v32 = vld [vmem:[#allocation10 + $0x3e4] sm:$0xf] }
 0x44d   :  { %v6316_v40 = vpop.f32.mrf.mxu1 }
 0x44e   :  { %v5540_v10 = vadd.f32 %v5539_v58, %v5526_v2  ;;  %v11555_v2 = vld [vmem:[#allocation10 + $0x3f0] sm:$0xf0]  ;;  %v11409_v58 = vld [vmem:[#allocation10 + $0x2c0] sm:$0xf]  ;;  %7092 = vmatpush.bf16.msrb.mxu2 %v11430_v31 }
 0x44f   :  { %v11395_v31 = vld [vmem:[#allocation10 + $0x2b0] sm:$0xf0]  ;;  %7081 = vmatpush.bf16.msra.mxu1 %v11522_v46 }
 0x450   :  { %v15889_v16 = vadd.f32 %v5540_v10, %v15849_v8  ;;  %v15903_v15 = vpop.f32.mrf.mxu0  ;;  %v11558_v10 = vor.u32 %v13127_v32, %v11555_v2  ;;  %v13087_v32 = vld [vmem:[#allocation10 + $0x2a4] sm:$0xf] }
 0x452   :  { %7105 = vmatpush.bf16.msrb.mxu3 %v11558_v10  ;;  %7093 = vmatpush.bf16.msrb.mxu2 %v11414_v45  ;;  %v11505_v10 = vld [vmem:[#allocation10 + $0x380] sm:$0xf] }
 0x453   :  { %v15891_v1 = vpop.f32.mrf.mxu2  ;;  %v15893_v49 = vpop.f32.mrf.mxu3  ;;  %v11361_v45 = vld [vmem:[#allocation10 + $0x260] sm:$0xf] }
 0x454   :  { %16574 = vst [vmem:[#allocation42_spill] sm:$0xff] %v15891_v1  ;;  %v13083_v1 = vld [vmem:[#allocation10 + $0x284] sm:$0xf]  ;;  %v11362_v63 = vor.u32 %v13081_v17, %v11361_v45  ;;  %v16590_v17 = vld [vmem:[#allocation36_spill] sm:$0xff] }
 0x455   :  { %16575 = vst [vmem:[#allocation37_spill] sm:$0xff] %v15893_v49  ;;  %v15928_v4 = vpop.f32.mrf.mxu1 }
 0x458   :  { %v15911_v41 = vpop.f32.mrf.mxu0 }
 0x459   :  { %16581 = vst [vmem:[#allocation57_spill] sm:$0xff] %v15911_v41  ;;  %v13093_v41 = vld [vmem:[#allocation10 + $0x2cc] sm:$0xf0] }
 0x468   :  { %v15919_v43 = vpop.f32.mrf.mxu0 }
 0x46b   :  { %v15897_v19 = vpop.f32.mrf.mxu2  ;;  %v15901_v6 = vpop.f32.mrf.mxu3 }
 0x46c   :  { %16578 = vst [vmem:[#allocation44_spill] sm:$0xff] %v15901_v6  ;;  %v11379_v6 = vld [vmem:[#allocation10 + $0x290] sm:$0xf0] }
 0x46d   :  { %v11382_v56 = vor.u32 %v13083_v1, %v11379_v6 }
 0x470   :  { %v15925_v39 = vpop.f32.mrf.mxu0 }
 0x473   :  { %v15907_v9 = vpop.f32.mrf.mxu2  ;;  %v15909_v8 = vpop.f32.mrf.mxu3 }
 0x474   :  { %16579 = vst [vmem:[#allocation56_spill] sm:$0xff] %v15907_v9  ;;  %v11539_v9 = vld [vmem:[#allocation10 + $0x3d0] sm:$0xf0] }
 0x475   :  { %16580 = vst [vmem:[#allocation26_spill] sm:$0xff] %v15909_v8  ;;  %v11410_v8 = vor.u32 %v13093_v41, %v11409_v58  ;;  %v11542_v13 = vor.u32 %v13123_v33, %v11539_v9  ;;  %v13119_v41 = vld [vmem:[#allocation10 + $0x3a4] sm:$0xf]  ;;  %v11398_v58 = vor.u32 %v13087_v32, %v11395_v31  ;;  %v13117_v33 = vld [vmem:[#allocation10 + $0x38c] sm:$0xf0] }
 0x476   :  { %v11526_v9 = vor.u32 %v13119_v41, %v11523_v42  ;;  %v11506_v28 = vor.u32 %v13117_v33, %v11505_v10  ;;  %v11489_v32 = vld [vmem:[#allocation10 + $0x360] sm:$0xf]  ;;  %v13079_v41 = vld [vmem:[#allocation10 + $0x264] sm:$0xf]  ;;  %v11363_v42 = vld [vmem:[#allocation10 + $0x270] sm:$0xf0]  ;;  %v15933_v33 = vpop.f32.mrf.mxu1 }
 0x477   :  { %7067 = vmatpush.bf16.msra.mxu0 %v11410_v8  ;;  %7106 = vmatpush.bf16.msrb.mxu3 %v11542_v13  ;;  %v11507_v8 = vld [vmem:[#allocation10 + $0x390] sm:$0xf0]  ;;  %v13113_v13 = vld [vmem:[#allocation10 + $0x36c] sm:$0xf0]  ;;  %v11366_v6 = vor.u32 %v13079_v41, %v11363_v42 }
 0x478   :  { %7094 = vmatpush.bf16.msrb.mxu2 %v11398_v58  ;;  %7082 = vmatpush.bf16.msra.mxu1 %v11506_v28  ;;  %v11490_v1 = vor.u32 %v13113_v13, %v11489_v32  ;;  %v6533_v32 = vld [vmem:[#allocation8] sm:$0x3]  ;;  %v16592_v13 = vld [vmem:[#allocation46_spill] sm:$0xff] }
 0x479   :  { %v6535_v42 = vperm.slane %v6533_v32, 0 }
 0x47b   :  { %7068 = vmatpush.bf16.msra.mxu0 %v11394_v7  ;;  %7107 = vmatpush.bf16.msrb.mxu3 %v11526_v9  ;;  %v6317_v7 = vadd.f32 %v6316_v40, %v15903_v15 }
 0x47c   :  { %7095 = vmatpush.bf16.msrb.mxu2 %v11382_v56  ;;  %7083 = vmatpush.bf16.msra.mxu1 %v11490_v1  ;;  %v16589_v56 = vld [vmem:[#allocation31_spill] sm:$0xff] }
 0x47d   :  { %v3078_v45 = vadd.f32 %v15702_v36, %v16589_v56  ;;  %v13077_v36 = vld [vmem:[#allocation10 + $0x24c] sm:$0xf0]  ;;  %v11329_v56 = vld [vmem:[#allocation10 + $0x220] sm:$0xf] }
 0x47f   :  { %7069 = vmatpush.bf16.msra.mxu0 %v11378_v12  ;;  %v16585_v12 = vld [vmem:[#allocation28_spill] sm:$0xff]  ;;  %v3092_v1 = vadd.f32 %v15705_v11, %v3078_v45 }
 0x480   :  { %7096 = vmatpush.bf16.msrb.mxu2 %v11366_v6  ;;  %v11347_v11 = vld [vmem:[#allocation10 + $0x250] sm:$0xf0]  ;;  %v13073_v45 = vld [vmem:[#allocation10 + $0x22c] sm:$0xf0] }
 0x483   :  { %7070 = vmatpush.bf16.msra.mxu0 %v11362_v63  ;;  %v16588_v63 = vld [vmem:[#allocation51_spill] sm:$0xff] }
 0x487   :  { %v6414_v10 = vpop.f32.mrf.mxu0 }
 0x48b   :  { %v15913_v34 = vpop.f32.mrf.mxu2  ;;  %v15917_v21 = vpop.f32.mrf.mxu3 }
 0x493   :  { %v15921_v2 = vpop.f32.mrf.mxu2  ;;  %v15923_v49 = vpop.f32.mrf.mxu3 }
 0x494   :  { %16583 = vst [vmem:[#allocation53_spill] sm:$0xff] %v15921_v2  ;;  %v13115_v2 = vld [vmem:[#allocation10 + $0x384] sm:$0xf] }
 0x495   :  { %16584 = vst [vmem:[#allocation25_spill] sm:$0xff] %v15923_v49  ;;  %v11510_v31 = vor.u32 %v13115_v2, %v11507_v8  ;;  %v13111_v49 = vld [vmem:[#allocation10 + $0x364] sm:$0xf]  ;;  %v6331_v2 = vadd.f32 %v15913_v34, %v6317_v7  ;;  %v16587_v34 = vld [vmem:[#allocation35_spill] sm:$0xff]  ;;  %v6536_v7 = vperm.slane %v6533_v32, 1 }
 0x496   :  { %v11494_v58 = vor.u32 %v13111_v49, %v11491_v18  ;;  %v2994_v18 = vadd.f32 %v16585_v12, %v15451_v0  ;;  %v16586_v49 = vld [vmem:[#allocation60_spill] sm:$0xff]  ;;  %v2952_v28 = vadd.f32 %v16588_v63, %v16587_v34  ;;  %v16593_v12 = vld [vmem:[#allocation61_spill] sm:$0xff] }
 0x497   :  { %7108 = vmatpush.bf16.msrb.mxu3 %v11510_v31  ;;  %v6461_v15 = vadd.f32 %v6331_v2, %v15875_v55  ;;  %v11473_v2 = vld [vmem:[#allocation10 + $0x340] sm:$0xf]  ;;  %v11475_v34 = vld [vmem:[#allocation10 + $0x350] sm:$0xf0] }
 0x498   :  { %v2966_v55 = vadd.f32 %v16590_v17, %v2952_v28  ;;  %v11457_v17 = vld [vmem:[#allocation10 + $0x320] sm:$0xf] }
 0x49a   :  { %v3688_v0 = vadd.f32 %v15668_v51, %v2966_v55  ;;  %v13109_v51 = vld [vmem:[#allocation10 + $0x34c] sm:$0xf0] }
 0x49b   :  { %7109 = vmatpush.bf16.msrb.mxu3 %v11494_v58  ;;  %v11345_v58 = vld [vmem:[#allocation10 + $0x240] sm:$0xf] }
 0x4ab   :  { %v6386_v50 = vpop.f32.mrf.mxu2  ;;  %v6400_v46 = vpop.f32.mrf.mxu3 }
 0x4ac   :  { %v6401_v35 = vadd.f32 %v6400_v46, %v6386_v50  ;;  %v3036_v50 = vadd.f32 %v16586_v49, %v15567_v5  ;;  %v6537_v46 = vrot.slane %v6536_v7, 6  ;;  %v11474_v49 = vor.u32 %v13109_v51, %v11473_v2  ;;  %v16595_v51 = vld [vmem:[#allocation54_spill] sm:$0xff] }
 0x4ad   :  { %v6359_v2 = vadd.f32 %v15919_v43, %v15917_v21  ;;  %v13069_v21 = vld [vmem:[#allocation10 + $0x20c] sm:$0xf0]  ;;  %v11441_v43 = vld [vmem:[#allocation10 + $0x300] sm:$0xf] }
 0x4ae   :  { %v6415_v9 = vadd.f32 %v6414_v10, %v6401_v35  ;;  %v3050_v41 = vadd.f32 %v16592_v13, %v3036_v50  ;;  %v3814_v35 = vadd.f32 %v15782_v44, %v3092_v1  ;;  %v4611_v10 = vadd.f32 %v15818_v23, %v15843_v38  ;;  %v13107_v44 = vld [vmem:[#allocation10 + $0x344] sm:$0xf]  ;;  %7084 = vmatpush.bf16.msra.mxu1 %v11474_v49 }
 0x4af   :  { %v11478_v28 = vor.u32 %v13107_v44, %v11475_v34  ;;  %v15976_v13 = vsel %vm1612_vm5, %v6535_v42, %v6537_v46  ;;  %v13067_v49 = vld [vmem:[#allocation10 + $0x204] sm:$0xf]  ;;  %v16599_v34 = vld [vmem:[#allocation37_spill] sm:$0xff] }
 0x4b0   :  { %v6463_v40 = vadd.f32 %v6415_v9, %v15889_v16  ;;  %v16591_v16 = vld [vmem:[#allocation29_spill] sm:$0xff]  ;;  %v3772_v6 = vadd.f32 %v15799_v47, %v3050_v41  ;;  %v15956_v9 = vsel %vm1615_vm6, %v6535_v42, %v6537_v46  ;;  %v4569_v47 = vadd.f32 %v15808_v25, %v15806_v26  ;;  %v11459_v41 = vld [vmem:[#allocation10 + $0x330] sm:$0xf0] }
 0x4b1   :  { %v3008_v31 = vadd.f32 %v16591_v16, %v2994_v18  ;;  %v15961_v18 = vpop.f32.mrf.mxu1  ;;  %v3828_v63 = vadd.f32 %v15814_v20, %v3814_v35  ;;  %v4653_v26 = vadd.f32 %v15857_v62, %v15855_v27  ;;  %v6540_v32 = vrot.slane %v15956_v9, 2  ;;  %v13071_v16 = vld [vmem:[#allocation10 + $0x224] sm:$0xf]  ;;  %7110 = vmatpush.bf16.msrb.mxu3 %v11478_v28  ;;  %v11331_v27 = vld [vmem:[#allocation10 + $0x230] sm:$0xf0] }
 0x4b2   :  { %v15935_v8 = vmax.f32 %v6461_v15, %v6463_v40  ;;  %v11346_v15 = vor.u32 %v13077_v36, %v11345_v58  ;;  %v13075_v40 = vld [vmem:[#allocation10 + $0x244] sm:$0xf]  ;;  %v3786_v38 = vadd.f32 %v15801_v52, %v3772_v6  ;;  %v4583_v55 = vadd.f32 %v15841_v14, %v4569_v47  ;;  %v13105_v52 = vld [vmem:[#allocation10 + $0x32c] sm:$0xf0]  ;;  %v11313_v35 = vld [vmem:[#allocation10 + $0x200] sm:$0xf] }
 0x4b3   :  { %v3730_v5 = vadd.f32 %v15786_v60, %v3008_v31  ;;  %v3702_v60 = vadd.f32 %v16593_v12, %v3688_v0  ;;  %v11350_v50 = vor.u32 %v13075_v40, %v11347_v11  ;;  %v15969_v25 = vpop.f32.mrf.mxu2  ;;  %v4625_v20 = vadd.f32 %v15821_v22, %v4611_v10  ;;  %v13103_v62 = vld [vmem:[#allocation10 + $0x324] sm:$0xf]  ;;  %v15978_v7 = vpop.f32.mrf.mxu3  ;;  %v16594_v10 = vld [vmem:[#allocation27_spill] sm:$0xff]  ;;  %v16597_v12 = vld [vmem:[#allocation44_spill] sm:$0xff] }
 0x4b4   :  { %7071 = vmatpush.bf16.msra.mxu0 %v11346_v15  ;;  %v4695_v31 = vadd.f32 %v15865_v37, %v15839_v59  ;;  %v11458_v14 = vor.u32 %v13105_v52, %v11457_v17  ;;  %v11334_v0 = vor.u32 %v13071_v16, %v11331_v27  ;;  %v11462_v1 = vor.u32 %v13103_v62, %v11459_v41  ;;  %v16596_v40 = vld [vmem:[#allocation71_spill] sm:$0xff]  ;;  %v13101_v47 = vld [vmem:[#allocation10 + $0x30c] sm:$0xf0]  ;;  %v16600_v17 = vld [vmem:[#allocation70_spill] sm:$0xff] }
 0x4b5   :  { %v3744_v23 = vadd.f32 %v15730_v53, %v3730_v5  ;;  %7097 = vmatpush.bf16.msrb.mxu2 %v11350_v50  ;;  %v11330_v53 = vor.u32 %v13073_v45, %v11329_v56  ;;  %v15981_v5 = vsel %vm1620_vm7, %v6535_v42, %v6537_v46  ;;  %v15984_v22 = vsel %vm283_vm0, %v6537_v46, %v6535_v42  ;;  %v11315_v50 = vld [vmem:[#allocation10 + $0x210] sm:$0xf0]  ;;  %v13099_v56 = vld [vmem:[#allocation10 + $0x304] sm:$0xf]  ;;  %v11433_v45 = vld [vmem:[#allocation10 + $0x2e8] sm:$0xf] }
 0x4b6   :  { %v3716_v59 = vadd.f32 %v15784_v30, %v3702_v60  ;;  %v5568_v37 = vadd.f32 %v15897_v19, %v15905_v54  ;;  %v3800_v58 = vadd.f32 %v15779_v3, %v3786_v38  ;;  %v4667_v36 = vadd.f32 %v15836_v29, %v4653_v26  ;;  %7085 = vmatpush.bf16.msra.mxu1 %v11458_v14  ;;  %v13130_v14 = vld [vmem:[#allocation10 + $0x3f4] sm:$0xf0] }
 0x4b7   :  { %v3758_v6 = vadd.f32 %v15696_v57, %v3744_v23  ;;  %v6545_v42 = vrot.slane %v15976_v13, 1  ;;  %v15997_v30 = vrot.slane %v6540_v32, 1  ;;  %7111 = vmatpush.bf16.msrb.mxu3 %v11462_v1  ;;  %v6542_v19 = vrot.slane %v15981_v5, 4  ;;  %v13096_v1 = vld [vmem:[#allocation10 + $0x2ec] sm:$0xf] }
 0x4b8   :  { %7072 = vmatpush.bf16.msra.mxu0 %v11330_v53  ;;  %v3842_v57 = vadd.f32 %v15816_v24, %v3828_v63  ;;  %v16001_v54 = vadd.f32 %v4583_v55, %v3716_v59  ;;  %v4709_v29 = vadd.f32 %v15869_v48, %v4695_v31  ;;  %v16008_v15 = vadd.f32 %v16594_v10, %v15867_v61  ;;  %v16598_v48 = vld [vmem:[#allocation42_spill] sm:$0xff]  ;;  %v11443_v61 = vld [vmem:[#allocation10 + $0x310] sm:$0xf0]  ;;  %v11561_v31 = vld [vmem:[#allocation10 + $0x3e8] sm:$0xf] }
 0x4b9   :  { %7098 = vmatpush.bf16.msrb.mxu2 %v11334_v0  ;;  %v16003_v3 = vadd.f32 %v4625_v20, %v3758_v6  ;;  %v6428_v46 = vpop.f32.mrf.mxu1  ;;  %v5486_v11 = vadd.f32 %v16596_v40, %v16595_v51  ;;  %v5582_v60 = vadd.f32 %v16597_v12, %v5568_v37  ;;  %v11314_v24 = vor.u32 %v13069_v21, %v11313_v35  ;;  %v16601_v55 = vld [vmem:[#allocation56_spill] sm:$0xff]  ;;  %v13098_v20 = vld [vmem:[#allocation10 + $0x2f4] sm:$0xf0]  ;;  %v11435_v59 = vld [vmem:[#allocation10 + $0x2f8] sm:$0xf0] }
 0x4ba   :  { %v16013_v44 = vadd.f32 %v4667_v36, %v3800_v58  ;;  %v5528_v23 = vadd.f32 %v16599_v34, %v16598_v48  ;;  %v11442_v63 = vor.u32 %v13101_v47, %v11441_v43  ;;  %v11318_v28 = vor.u32 %v13067_v49, %v11315_v50  ;;  %v13128_v37 = vld [vmem:[#allocation10 + $0x3ec] sm:$0xf]  ;;  %v11563_v35 = vld [vmem:[#allocation10 + $0x3f8] sm:$0xf0]  ;;  %v11417_v21 = vld [vmem:[#allocation10 + $0x2c8] sm:$0xf] }
 0x4bb   :  { %v5570_v26 = vadd.f32 %v16601_v55, %v16600_v17  ;;  %v6373_v53 = vadd.f32 %v15933_v33, %v6359_v2  ;;  %v11446_v16 = vor.u32 %v13099_v56, %v11443_v61  ;;  %v16020_v27 = vadd.f32 %v4709_v29, %v3842_v57  ;;  %v16602_v6 = vld [vmem:[#allocation47_spill] sm:$0xff]  ;;  %v13094_v43 = vld [vmem:[#allocation10 + $0x2d4] sm:$0xf0]  ;;  %v16604_v57 = vld [vmem:[#allocation62_spill] sm:$0xff] }
 0x4bc   :  { %7073 = vmatpush.bf16.msra.mxu0 %v11314_v24  ;;  %7086 = vmatpush.bf16.msra.mxu1 %v11442_v63  ;;  %v11434_v41 = vor.u32 %v13098_v20, %v11433_v45  ;;  %v11562_v0 = vor.u32 %v13130_v14, %v11561_v31  ;;  %v5500_v58 = vadd.f32 %v16602_v6, %v5486_v11  ;;  %v16603_v36 = vld [vmem:[#allocation23_spill] sm:$0xff]  ;;  %v13126_v12 = vld [vmem:[#allocation10 + $0x3d4] sm:$0xf0]  ;;  %v16605_v47 = vld [vmem:[#allocation26_spill] sm:$0xff]  ;;  %v6547_v9 = vrot.slane %v6542_v19, 1 }
 0x4bd   :  { %7099 = vmatpush.bf16.msrb.mxu2 %v11318_v28  ;;  %v5589_v33 = vadd.f32 %v5582_v60, %v16603_v36  ;;  %7112 = vmatpush.bf16.msrb.mxu3 %v11446_v16  ;;  %v5542_v29 = vadd.f32 %v16604_v57, %v5528_v23  ;;  %v11566_v10 = vor.u32 %v13128_v37, %v11563_v35  ;;  %v11545_v40 = vld [vmem:[#allocation10 + $0x3c8] sm:$0xf]  ;;  %v13092_v24 = vld [vmem:[#allocation10 + $0x2cc] sm:$0xf]  ;;  %v16606_v11 = vld [vmem:[#allocation30_spill] sm:$0xff]  ;;  %v6416_v36 = vpop.f32.mrf.mxu0 }
 0x4be   :  { %v11418_v51 = vor.u32 %v13094_v43, %v11417_v21  ;;  %v5584_v49 = vadd.f32 %v16605_v47, %v5570_v26  ;;  %v6462_v50 = vadd.f32 %v6373_v53, %v16606_v11  ;;  %v11546_v48 = vor.u32 %v13126_v12, %v11545_v40  ;;  %v11419_v34 = vld [vmem:[#allocation10 + $0x2d8] sm:$0xf0]  ;;  %v11401_v17 = vld [vmem:[#allocation10 + $0x2a8] sm:$0xf]  ;;  %v13090_v55 = vld [vmem:[#allocation10 + $0x2b4] sm:$0xf0] }
 0x4bf   :  { %v11547_v63 = vld [vmem:[#allocation10 + $0x3d8] sm:$0xf0]  ;;  %v6403_v56 = vadd.f32 %v15978_v7, %v15969_v25  ;;  %v11422_v61 = vor.u32 %v13092_v24, %v11419_v34  ;;  %v11529_v26 = vld [vmem:[#allocation10 + $0x3a8] sm:$0xf]  ;;  %v16608_v53 = vld [vmem:[#allocation24_spill] sm:$0xff]  ;;  %v5591_v16 = vadd.f32 %v5500_v58, %v16003_v3  ;;  %v5592_v25 = vadd.f32 %v5542_v29, %v16013_v44 }
 0x4c0   :  { %7118 = vmatpush.bf16.msrb.mxu0 %v11434_v41  ;;  %7131 = vmatpush.bf16.msrb.mxu1 %v11562_v0  ;;  %v16607_v28 = vld [vmem:[#allocation25_spill] sm:$0xff]  ;;  %v13120_v37 = vld [vmem:[#allocation10 + $0x3ac] sm:$0xf]  ;;  %v5593_v44 = vadd.f32 %v5584_v49, %v16020_v27 }
 0x4c1   :  { %v6361_v23 = vadd.f32 %v15925_v39, %v16607_v28  ;;  %7157 = vmatpush.bf16.msra.mxu3 %v11566_v10  ;;  %v16609_v20 = vld [vmem:[#allocation57_spill] sm:$0xff]  ;;  %v13088_v39 = vld [vmem:[#allocation10 + $0x2ac] sm:$0xf]  ;;  %v6430_v7 = vpop.f32.mrf.mxu1  ;;  %v6417_v21 = vadd.f32 %v6416_v36, %v6403_v56 }
 0x4c2   :  { %v6319_v31 = vadd.f32 %v15928_v4, %v16609_v20  ;;  %v11403_v41 = vld [vmem:[#allocation10 + $0x2b8] sm:$0xf0]  ;;  %v6544_v4 = vrot.slane %v15984_v22, 6  ;;  %v13118_v57 = vld [vmem:[#allocation10 + $0x394] sm:$0xf0] }
 0x4c3   :  { %v11531_v6 = vld [vmem:[#allocation10 + $0x3b8] sm:$0xf0]  ;;  %v6375_v35 = vadd.f32 %v15961_v18, %v6361_v23  ;;  %v13084_v29 = vld [vmem:[#allocation10 + $0x28c] sm:$0xf]  ;;  %v13082_v56 = vld [vmem:[#allocation10 + $0x274] sm:$0xf0] }
 0x4c4   :  { %7119 = vmatpush.bf16.msrb.mxu0 %v11418_v51  ;;  %7132 = vmatpush.bf16.msrb.mxu1 %v11546_v48  ;;  %v11534_v43 = vor.u32 %v13120_v37, %v11531_v6  ;;  %v11387_v10 = vld [vmem:[#allocation10 + $0x298] sm:$0xf0]  ;;  %v13116_v18 = vld [vmem:[#allocation10 + $0x38c] sm:$0xf]  ;;  %v11369_v48 = vld [vmem:[#allocation10 + $0x268] sm:$0xf] }
 0x4c5   :  { %v11515_v24 = vld [vmem:[#allocation10 + $0x398] sm:$0xf0]  ;;  %v11390_v23 = vor.u32 %v13084_v29, %v11387_v10  ;;  %v11370_v37 = vor.u32 %v13082_v56, %v11369_v48 }
 0x4c6   :  { %v16610_v34 = vld [vmem:[#allocation53_spill] sm:$0xff] }
 0x4c7   :  { %v11483_v29 = vld [vmem:[#allocation10 + $0x358] sm:$0xf0] }
 0x4cb   :  { %v6442_v38 = vpop.f32.mrf.mxu2  ;;  %v6456_v62 = vpop.f32.mrf.mxu3 }
 0x4cc   :  { %v6443_v52 = vadd.f32 %v6442_v38, %v6428_v46  ;;  %v11438_v46 = vor.u32 %v13096_v1, %v11435_v59  ;;  %v13124_v38 = vld [vmem:[#allocation10 + $0x3cc] sm:$0xf]  ;;  %v11402_v1 = vor.u32 %v13090_v55, %v11401_v17 }
 0x4cd   :  { %v11550_v45 = vor.u32 %v13124_v38, %v11547_v63  ;;  %v6333_v38 = vadd.f32 %v16610_v34, %v6319_v31  ;;  %v13112_v31 = vld [vmem:[#allocation10 + $0x36c] sm:$0xf] }
 0x4ce   :  { %v6457_v2 = vadd.f32 %v6456_v62, %v6443_v52  ;;  %7144 = vmatpush.bf16.msra.mxu2 %v11438_v46  ;;  %v5458_v52 = vadd.f32 %v16608_v53, %v16008_v15  ;;  %v13122_v62 = vld [vmem:[#allocation10 + $0x3b4] sm:$0xf0]  ;;  %v11385_v15 = vld [vmem:[#allocation10 + $0x288] sm:$0xf]  ;;  %7120 = vmatpush.bf16.msrb.mxu0 %v11402_v1  ;;  %v13080_v53 = vld [vmem:[#allocation10 + $0x26c] sm:$0xf] }
 0x4cf   :  { %v11530_v59 = vor.u32 %v13122_v62, %v11529_v26  ;;  %v11513_v46 = vld [vmem:[#allocation10 + $0x388] sm:$0xf]  ;;  %7158 = vmatpush.bf16.msra.mxu3 %v11550_v45  ;;  %v13114_v45 = vld [vmem:[#allocation10 + $0x374] sm:$0xf0]  ;;  %v11518_v26 = vor.u32 %v13116_v18, %v11515_v24  ;;  %v6467_v62 = vadd.f32 %v6417_v21, %v5592_v25  ;;  %v11355_v21 = vld [vmem:[#allocation10 + $0x258] sm:$0xf0] }
 0x4d0   :  { %v6464_v60 = vadd.f32 %v6457_v2, %v5589_v33  ;;  %v11406_v33 = vor.u32 %v13088_v39, %v11403_v41  ;;  %v13086_v2 = vld [vmem:[#allocation10 + $0x294] sm:$0xf0]  ;;  %v11514_v28 = vor.u32 %v13118_v57, %v11513_v46  ;;  %v5590_v20 = vadd.f32 %v5458_v52, %v16001_v54  ;;  %v11371_v41 = vld [vmem:[#allocation10 + $0x278] sm:$0xf0]  ;;  %v13108_v57 = vld [vmem:[#allocation10 + $0x34c] sm:$0xf] }
 0x4d1   :  { %7133 = vmatpush.bf16.msrb.mxu1 %v11530_v59  ;;  %v13074_v18 = vld [vmem:[#allocation10 + $0x234] sm:$0xf0]  ;;  %v11465_v24 = vld [vmem:[#allocation10 + $0x328] sm:$0xf]  ;;  %v11486_v48 = vor.u32 %v13108_v57, %v11483_v29  ;;  %v13072_v34 = vld [vmem:[#allocation10 + $0x22c] sm:$0xf] }
 0x4d2   :  { %v6470_v14 = vmax.f32 %v6462_v50, %v6464_v60  ;;  %7145 = vmatpush.bf16.msra.mxu2 %v11422_v61  ;;  %v11386_v60 = vor.u32 %v13086_v2, %v11385_v15  ;;  %v11497_v61 = vld [vmem:[#allocation10 + $0x368] sm:$0xf]  ;;  %v6465_v6 = vadd.f32 %v6333_v38, %v5590_v20  ;;  %v13110_v2 = vld [vmem:[#allocation10 + $0x354] sm:$0xf0]  ;;  %v11339_v38 = vld [vmem:[#allocation10 + $0x238] sm:$0xf0] }
 0x4d3   :  { %v6444_v0 = vpop.f32.mrf.mxu2  ;;  %v6458_v50 = vpop.f32.mrf.mxu3  ;;  %7159 = vmatpush.bf16.msra.mxu3 %v11534_v43  ;;  %v11498_v36 = vor.u32 %v13114_v45, %v11497_v61  ;;  %v11467_v45 = vld [vmem:[#allocation10 + $0x338] sm:$0xf0]  ;;  %v11681_v29 = vld [vmem:[#allocation10 + $0xe0] sm:$0xf] }
 0x4d4   :  { %v6477_v3 = vrot.slane %v6470_v14, 6  ;;  %v6445_v58 = vadd.f32 %v6444_v0, %v6430_v7  ;;  %v6466_v14 = vadd.f32 %v6375_v35, %v5591_v16  ;;  %v11499_v7 = vld [vmem:[#allocation10 + $0x378] sm:$0xf0]  ;;  %7121 = vmatpush.bf16.msrb.mxu0 %v11386_v60  ;;  %v11374_v16 = vor.u32 %v13080_v53, %v11371_v41  ;;  %v13076_v35 = vld [vmem:[#allocation10 + $0x24c] sm:$0xf] }
 0x4d5   :  { %7134 = vmatpush.bf16.msrb.mxu1 %v11514_v28  ;;  %v11502_v25 = vor.u32 %v13112_v31, %v11499_v7  ;;  %v16059_v46 = vmax.f32 %v6465_v6, %v6467_v62  ;;  %v13106_v60 = vld [vmem:[#allocation10 + $0x334] sm:$0xf0]  ;;  %v11342_v62 = vor.u32 %v13072_v34, %v11339_v38  ;;  %v13068_v7 = vld [vmem:[#allocation10 + $0x20c] sm:$0xf] }
 0x4d6   :  { %v16042_v51 = vsel %vm1612_vm5, %v15935_v8, %v6477_v3  ;;  %v6480_v40 = vsel %vm1615_vm6, %v15935_v8, %v6477_v3  ;;  %v6482_v12 = vsel %vm1620_vm7, %v15935_v8, %v6477_v3  ;;  %v6484_v27 = vsel %vm283_vm0, %v6477_v3, %v15935_v8  ;;  %7146 = vmatpush.bf16.msra.mxu2 %v11406_v33  ;;  %v11353_v3 = vld [vmem:[#allocation10 + $0x248] sm:$0xf]  ;;  %v13102_v41 = vld [vmem:[#allocation10 + $0x314] sm:$0xf0] }
 0x4d7   :  { %v6481_v47 = vrot.slane %v6480_v40, 2  ;;  %v6483_v49 = vrot.slane %v6482_v12, 4  ;;  %v6485_v11 = vrot.slane %v6484_v27, 6  ;;  %v6459_v63 = vadd.f32 %v6458_v50, %v6445_v58  ;;  %v13078_v58 = vld [vmem:[#allocation10 + $0x254] sm:$0xf0]  ;;  %7160 = vmatpush.bf16.msra.mxu3 %v11518_v26 }
 0x4d8   :  { %v11481_v33 = vld [vmem:[#allocation10 + $0x348] sm:$0xf]  ;;  %7122 = vmatpush.bf16.msrb.mxu0 %v11370_v37  ;;  %v11358_v50 = vor.u32 %v13076_v35, %v11355_v21  ;;  %v13070_v26 = vld [vmem:[#allocation10 + $0x214] sm:$0xf0] }
 0x4d9   :  { %v11304_v8 = vrot.slane %v6481_v47, 9  ;;  %v11305_v17 = vrot.slane %v6483_v49, 9  ;;  %v11306_v55 = vrot.slane %v6485_v11, 9  ;;  %v6468_v39 = vadd.f32 %v6459_v63, %v5593_v44  ;;  %7135 = vmatpush.bf16.msrb.mxu1 %v11498_v36  ;;  %v11337_v27 = vld [vmem:[#allocation10 + $0x228] sm:$0xf] }
 0x4da   :  { %7147 = vmatpush.bf16.msra.mxu2 %v11390_v23  ;;  %v11482_v12 = vor.u32 %v13110_v2, %v11481_v33  ;;  %v13104_v63 = vld [vmem:[#allocation10 + $0x32c] sm:$0xf]  ;;  %v11338_v61 = vor.u32 %v13074_v18, %v11337_v27  ;;  %v11451_v36 = vld [vmem:[#allocation10 + $0x318] sm:$0xf0] }
 0x4db   :  { %v6526_v0 = vmax.f32 %v6481_v47, %v11304_v8  ;;  %v6527_v1 = vmax.f32 %v6483_v49, %v11305_v17  ;;  %v6528_v59 = vmax.f32 %v6485_v11, %v11306_v55  ;;  %v6472_v15 = vmax.f32 %v6466_v14, %v6468_v39  ;;  %7161 = vmatpush.bf16.msra.mxu3 %v11502_v25  ;;  %v11321_v55 = vld [vmem:[#allocation10 + $0x208] sm:$0xf] }
 0x4dc   :  { %v11466_v17 = vor.u32 %v13106_v60, %v11465_v24  ;;  %v11449_v39 = vld [vmem:[#allocation10 + $0x308] sm:$0xf]  ;;  %v11470_v31 = vor.u32 %v13104_v63, %v11467_v45  ;;  %v11322_v6 = vor.u32 %v13070_v26, %v11321_v55  ;;  %v13065_v24 = vld [vmem:[#allocation10 + $0x1ec] sm:$0xf0]  ;;  %v11793_v45 = vld [vmem:[#allocation10 + $0x1c0] sm:$0xf] }
 0x4dd   :  { %v16054_v54 = vadd.f32 %v6540_v32, %v6527_v1  ;;  %v16057_v52 = vadd.f32 %v15997_v30, %v6528_v59  ;;  %v16061_v44 = vrot.slane %v6472_v15, 6  ;;  %v6558_v43 = vadd.f32 %v6545_v42, %v6526_v0  ;;  %7136 = vmatpush.bf16.msrb.mxu1 %v11482_v12  ;;  %v11323_v0 = vld [vmem:[#allocation10 + $0x218] sm:$0xf0]  ;;  %v13100_v15 = vld [vmem:[#allocation10 + $0x30c] sm:$0xf] }
 0x4de   :  { %v6548_v32 = vrot.slane %v6544_v4, 1  ;;  %v11354_v30 = vor.u32 %v13078_v58, %v11353_v3  ;;  %7148 = vmatpush.bf16.msra.mxu2 %v11374_v16  ;;  %v11450_v3 = vor.u32 %v13102_v41, %v11449_v39  ;;  %v11326_v16 = vor.u32 %v13068_v7, %v11323_v0  ;;  %v11667_v55 = vld [vmem:[#allocation10 + $0xd0] sm:$0xf0]  ;;  %v13059_v26 = vld [vmem:[#allocation10 + $0x1c4] sm:$0xf] }
 0x4df   :  { %v6487_v10 = vsel %vm1615_vm6, %v16059_v46, %v16061_v44  ;;  %v6489_v40 = vsel %vm1620_vm7, %v16059_v46, %v16061_v44  ;;  %v6491_v42 = vsel %vm283_vm0, %v16061_v44, %v16059_v46  ;;  %v6566_v8 = vmax.f32 %v6558_v43, 0.0  ;;  %7162 = vmatpush.bf16.msra.mxu3 %v11486_v48  ;;  %v11649_v41 = vld [vmem:[#allocation10 + $0xa0] sm:$0xf] }
 0x4e0   :  { %v6488_v47 = vrot.slane %v6487_v10, 2  ;;  %v6490_v49 = vrot.slane %v6489_v40, 4  ;;  %v6492_v11 = vrot.slane %v6491_v42, 6  ;;  %7123 = vmatpush.bf16.msrb.mxu0 %v11354_v30  ;;  %v11454_v2 = vor.u32 %v13100_v15, %v11451_v36  ;;  %v13033_v10 = vld [vmem:[#allocation10 + $0xec] sm:$0xf0] }
 0x4e1   :  { %7137 = vmatpush.bf16.msrb.mxu1 %v11466_v17  ;;  %v6653_v25 = vperm.slane %v6566_v8, 0  ;;  %v6654_v33 = vperm.slane %v6566_v8, 2  ;;  %v6486_v57 = vsel %vm1612_vm5, %v16059_v46, %v16061_v44  ;;  %v11809_v40 = vld [vmem:[#allocation10 + $0x1e0] sm:$0xf]  ;;  %v11682_v44 = vor.u32 %v13033_v10, %v11681_v29  ;;  %v13061_v8 = vld [vmem:[#allocation10 + $0x1cc] sm:$0xf0] }
 0x4e2   :  { %v11308_v28 = vrot.slane %v6488_v47, 9  ;;  %v11309_v23 = vrot.slane %v6490_v49, 9  ;;  %v11310_v56 = vrot.slane %v6492_v11, 9  ;;  %7149 = vmatpush.bf16.msra.mxu2 %v11358_v50  ;;  %v11811_v50 = vld [vmem:[#allocation10 + $0x1f0] sm:$0xf0]  ;;  %v11307_v60 = vrot.slane %v6486_v57, 9 }
 0x4e3   :  { %7163 = vmatpush.bf16.msra.mxu3 %v11470_v31  ;;  %v6662_v43 = vpack.c.bf16 %v6654_v33, %v6654_v33  ;;  %v11810_v63 = vor.u32 %v13065_v24, %v11809_v40  ;;  %v13027_v17 = vld [vmem:[#allocation10 + $0xc4] sm:$0xf]  ;;  %v11794_v39 = vor.u32 %v13061_v8, %v11793_v45  ;;  %v13025_v31 = vld [vmem:[#allocation10 + $0xac] sm:$0xf0]  ;;  %v11651_v36 = vld [vmem:[#allocation10 + $0xb0] sm:$0xf0] }
 0x4e4   :  { %v6530_v53 = vmax.f32 %v6488_v47, %v11308_v28  ;;  %v6531_v20 = vmax.f32 %v6490_v49, %v11309_v23  ;;  %v6532_v14 = vmax.f32 %v6492_v11, %v11310_v56  ;;  %7124 = vmatpush.bf16.msrb.mxu0 %v11338_v61  ;;  %v13031_v47 = vld [vmem:[#allocation10 + $0xe4] sm:$0xf]  ;;  %v11683_v49 = vld [vmem:[#allocation10 + $0xf0] sm:$0xf0]  ;;  %v11665_v28 = vld [vmem:[#allocation10 + $0xc0] sm:$0xf]  ;;  %v11670_v7 = vor.u32 %v13027_v17, %v11667_v55 }
 0x4e5   :  { %7138 = vmatpush.bf16.msrb.mxu1 %v11450_v3  ;;  %v6735_v27 = vunpack.c.l.b16 %v6662_v43  ;;  %v13063_v11 = vld [vmem:[#allocation10 + $0x1e4] sm:$0xf]  ;;  %v13029_v23 = vld [vmem:[#allocation10 + $0xcc] sm:$0xf0]  ;;  %v11686_v56 = vor.u32 %v13031_v47, %v11683_v49  ;;  %v11650_v33 = vor.u32 %v13025_v31, %v11649_v41  ;;  %v11761_v43 = vld [vmem:[#allocation10 + $0x180] sm:$0xf] }
 0x4e6   :  { %v6562_v1 = vadd.f32 %v6547_v9, %v6530_v53  ;;  %v16080_v59 = vadd.f32 %v6544_v4, %v6531_v20  ;;  %v16082_v37 = vadd.f32 %v6548_v32, %v6532_v14  ;;  %7150 = vmatpush.bf16.msra.mxu2 %v11342_v62  ;;  %v6661_v4 = vpack.c.bf16 %v6653_v25, %v6653_v25  ;;  %v11795_v53 = vld [vmem:[#allocation10 + $0x1d0] sm:$0xf0]  ;;  %v13023_v15 = vld [vmem:[#allocation10 + $0xa4] sm:$0xf]  ;;  %v11617_v40 = vld [vmem:[#allocation10 + $0x60] sm:$0xf] }
 0x4e7   :  { %7164 = vmatpush.bf16.msra.mxu3 %v11454_v2  ;;  %v11814_v61 = vor.u32 %v13063_v11, %v11811_v50  ;;  %v6529_v20 = vmax.f32 %v6486_v57, %v11307_v60  ;;  %v11303_v14 = vrot.slane %v16042_v51, 9  ;;  %v11666_v62 = vor.u32 %v13029_v23, %v11665_v28  ;;  %v13055_v3 = vld [vmem:[#allocation10 + $0x1a4] sm:$0xf]  ;;  %v11763_v29 = vld [vmem:[#allocation10 + $0x190] sm:$0xf0] }
 0x4e8   :  { %v6570_v58 = vmax.f32 %v6562_v1, 0.0  ;;  %7125 = vmatpush.bf16.msrb.mxu0 %v11322_v6  ;;  %v6734_v42 = vunpack.c.l.b16 %v6661_v4  ;;  %v11798_v0 = vor.u32 %v13059_v26, %v11795_v53  ;;  %v11777_v1 = vld [vmem:[#allocation10 + $0x1a0] sm:$0xf]  ;;  %v13057_v6 = vld [vmem:[#allocation10 + $0x1ac] sm:$0xf0]  ;;  %v11654_v4 = vor.u32 %v13023_v15, %v11651_v36 }
 0x4e9   :  { %v6525_v25 = vmax.f32 %v16042_v51, %v11303_v14  ;;  %v11778_v2 = vor.u32 %v13057_v6, %v11777_v1  ;;  %v13051_v57 = vld [vmem:[#allocation10 + $0x184] sm:$0xf]  ;;  %v13049_v24 = vld [vmem:[#allocation10 + $0x16c] sm:$0xf0]  ;;  %v11619_v49 = vld [vmem:[#allocation10 + $0x70] sm:$0xf0] }
 0x4ea   :  { %v6655_v35 = vperm.slane %v6570_v58, 0  ;;  %v6656_v22 = vperm.slane %v6570_v58, 2  ;;  %7151 = vmatpush.bf16.msra.mxu2 %v11326_v16  ;;  %v11779_v58 = vld [vmem:[#allocation10 + $0x1b0] sm:$0xf0]  ;;  %v6561_v16 = vadd.f32 %v6542_v19, %v6529_v20  ;;  %v13015_v47 = vld [vmem:[#allocation10 + $0x64] sm:$0xf] }
 0x4eb   :  { %v6557_v19 = vadd.f32 %v15976_v13, %v6525_v25  ;;  %v13047_v11 = vld [vmem:[#allocation10 + $0x164] sm:$0xf]  ;;  %v11747_v50 = vld [vmem:[#allocation10 + $0x170] sm:$0xf0]  ;;  %v13013_v28 = vld [vmem:[#allocation10 + $0x4c] sm:$0xf0]  ;;  %v11622_v23 = vor.u32 %v13015_v47, %v11619_v49 }
 0x4ec   :  { %v6663_v21 = vpack.c.bf16 %v6655_v35, %v6655_v35  ;;  %v6664_v9 = vpack.c.bf16 %v6656_v22, %v6656_v22  ;;  %v11633_v35 = vld [vmem:[#allocation10 + $0x80] sm:$0xf]  ;;  %v13021_v22 = vld [vmem:[#allocation10 + $0x8c] sm:$0xf0]  ;;  %v6569_v5 = vmax.f32 %v6561_v16, 0.0 }
 0x4ed   :  { %v11634_v51 = vor.u32 %v13021_v22, %v11633_v35  ;;  %v13045_v45 = vld [vmem:[#allocation10 + $0x14c] sm:$0xf0]  ;;  %v13011_v8 = vld [vmem:[#allocation10 + $0x44] sm:$0xf]  ;;  %v11603_v17 = vld [vmem:[#allocation10 + $0x50] sm:$0xf0] }
 0x4ee   :  { %v6736_v32 = vunpack.c.l.b16 %v6663_v21  ;;  %v6737_v30 = vunpack.c.l.b16 %v6664_v9  ;;  %v11782_v21 = vor.u32 %v13055_v3, %v11779_v58  ;;  %v13053_v9 = vld [vmem:[#allocation10 + $0x18c] sm:$0xf0]  ;;  %v6577_v60 = vperm.slane %v6569_v5, 0  ;;  %v13043_v55 = vld [vmem:[#allocation10 + $0x144] sm:$0xf] }
 0x4ef   :  { %v11762_v10 = vor.u32 %v13053_v9, %v11761_v43  ;;  %v11731_v26 = vld [vmem:[#allocation10 + $0x150] sm:$0xf0]  ;;  %v11585_v53 = vld [vmem:[#allocation10 + $0x20] sm:$0xf]  ;;  %v13009_v41 = vld [vmem:[#allocation10 + $0x2c] sm:$0xf0] }
 0x4f0   :  { %v6738_v12 = vrot.slane %v6736_v32, 7  ;;  %v6740_v18 = vrot.slane %v6737_v30, 7  ;;  %v13019_v32 = vld [vmem:[#allocation10 + $0x84] sm:$0xf]  ;;  %v11635_v30 = vld [vmem:[#allocation10 + $0x90] sm:$0xf0]  ;;  %v6585_v20 = vpack.c.bf16 %v6577_v60, %v6577_v60  ;;  %v11734_v1 = vor.u32 %v13043_v55, %v11731_v26 }
 0x4f1   :  { %v11713_v31 = vld [vmem:[#allocation10 + $0x120] sm:$0xf]  ;;  %v13007_v6 = vld [vmem:[#allocation10 + $0x24] sm:$0xf]  ;;  %v11587_v15 = vld [vmem:[#allocation10 + $0x30] sm:$0xf0] }
 0x4f2   :  { %v6739_v48 = vsel %vm2350_vm9, %v6738_v12, %v6734_v42  ;;  %v6741_v34 = vsel %vm2350_vm9, %v6740_v18, %v6735_v27  ;;  %v13017_v42 = vld [vmem:[#allocation10 + $0x6c] sm:$0xf0]  ;;  %v11638_v12 = vor.u32 %v13019_v32, %v11635_v30  ;;  %v11766_v27 = vor.u32 %v13051_v57, %v11763_v29  ;;  %v11745_v18 = vld [vmem:[#allocation10 + $0x160] sm:$0xf]  ;;  %v13039_v3 = vld [vmem:[#allocation10 + $0x124] sm:$0xf] }
 0x4f3   :  { %v16089_v38 = vpack.c.b16 %v6739_v48, %v6739_v48  ;;  %v16091_v46 = vpack.c.b16 %v6741_v34, %v6741_v34  ;;  %v6578_v48 = vperm.slane %v6569_v5, 2  ;;  %v6565_v34 = vmax.f32 %v6557_v19, 0.0  ;;  %v11569_v58 = vld [vmem:[#allocation10] sm:$0xf]  ;;  %v13005_v16 = vld [vmem:[#allocation10 + $0xc] sm:$0xf0] }
 0x4f4   :  { %v11618_v13 = vor.u32 %v13017_v42, %v11617_v40  ;;  %v7176_v25 = vunpack.c.l.b16 %v6585_v20  ;;  %v11590_v22 = vor.u32 %v13007_v6, %v11587_v15  ;;  %v13003_v43 = vld [vmem:[#allocation10 + $0x4] sm:$0xf]  ;;  %v11571_v32 = vld [vmem:[#allocation10 + $0x10] sm:$0xf0]  ;;  %v11689_v19 = vld [vmem:[#allocation10 + $0xe8] sm:$0xf] }
 0x4f5   :  { %7074 = vmatmul.bf16.vlgmr.msra.gmra.mxu0 %v16089_v38  ;;  %7087 = vmatmul.bf16.vlgmr.msra.gmra.mxu1 %v16091_v46  ;;  %v6586_v14 = vpack.c.bf16 %v6578_v48, %v6578_v48  ;;  %v6575_v36 = vperm.slane %v6565_v34, 0  ;;  %v13035_v30 = vld [vmem:[#allocation10 + $0x104] sm:$0xf]  ;;  %v11699_v57 = vld [vmem:[#allocation10 + $0x110] sm:$0xf0] }
 0x4f6   :  { %7100 = vmatmul.bf16.vlgmr.msrb.gmra.mxu2 %v16089_v38  ;;  %7113 = vmatmul.bf16.vlgmr.msrb.gmra.mxu3 %v16091_v46  ;;  %v13066_v40 = vld [vmem:[#allocation10 + $0x1f4] sm:$0xf0]  ;;  %v13032_v42 = vld [vmem:[#allocation10 + $0xec] sm:$0xf]  ;;  %v11691_v47 = vld [vmem:[#allocation10 + $0xf8] sm:$0xf0]  ;;  %v11702_v60 = vor.u32 %v13035_v30, %v11699_v57 }
 0x4f7   :  { %7506 = vmatpush.bf16.msra.mxu0 %v11682_v44  ;;  %7519 = vmatpush.bf16.msra.mxu1 %v11810_v63  ;;  %v11746_v44 = vor.u32 %v13049_v24, %v11745_v18  ;;  %v11601_v63 = vld [vmem:[#allocation10 + $0x40] sm:$0xf]  ;;  %v6583_v29 = vpack.c.bf16 %v6575_v36, %v6575_v36  ;;  %v11570_v18 = vor.u32 %v13005_v16, %v11569_v58  ;;  %v13064_v49 = vld [vmem:[#allocation10 + $0x1ec] sm:$0xf]  ;;  %v11675_v26 = vld [vmem:[#allocation10 + $0xd8] sm:$0xf0] }
 0x4f8   :  { %7532 = vmatpush.bf16.msrb.mxu2 %v11686_v56  ;;  %7545 = vmatpush.bf16.msrb.mxu3 %v11814_v61  ;;  %v11750_v56 = vor.u32 %v13047_v11, %v11747_v50  ;;  %v11729_v61 = vld [vmem:[#allocation10 + $0x140] sm:$0xf]  ;;  %v11819_v11 = vld [vmem:[#allocation10 + $0x1f8] sm:$0xf0]  ;;  %v11574_v50 = vor.u32 %v13003_v43, %v11571_v32  ;;  %v13028_v55 = vld [vmem:[#allocation10 + $0xcc] sm:$0xf] }
 0x4f9   :  { %v7174_v48 = vunpack.c.l.b16 %v6583_v29  ;;  %v11803_v20 = vld [vmem:[#allocation10 + $0x1d8] sm:$0xf0]  ;;  %v11785_v6 = vld [vmem:[#allocation10 + $0x1a8] sm:$0xf]  ;;  %v13058_v15 = vld [vmem:[#allocation10 + $0x1b4] sm:$0xf0] }
 0x4fa   :  { %v13024_v36 = vld [vmem:[#allocation10 + $0xac] sm:$0xf]  ;;  %v11786_v16 = vor.u32 %v13058_v15, %v11785_v6  ;;  %v11643_v43 = vld [vmem:[#allocation10 + $0x98] sm:$0xf0]  ;;  %v11625_v29 = vld [vmem:[#allocation10 + $0x68] sm:$0xf] }
 0x4fb   :  { %7507 = vmatpush.bf16.msra.mxu0 %v11666_v62  ;;  %7520 = vmatpush.bf16.msra.mxu1 %v11794_v39  ;;  %v11602_v62 = vor.u32 %v13013_v28, %v11601_v63  ;;  %v11730_v39 = vor.u32 %v13045_v45, %v11729_v61  ;;  %v11673_v63 = vld [vmem:[#allocation10 + $0xc8] sm:$0xf]  ;;  %v13030_v28 = vld [vmem:[#allocation10 + $0xd4] sm:$0xf0]  ;;  %v11771_v32 = vld [vmem:[#allocation10 + $0x198] sm:$0xf0] }
 0x4fc   :  { %7533 = vmatpush.bf16.msrb.mxu2 %v11670_v7  ;;  %7546 = vmatpush.bf16.msrb.mxu3 %v11798_v0  ;;  %v13041_v7 = vld [vmem:[#allocation10 + $0x12c] sm:$0xf0]  ;;  %v11606_v0 = vor.u32 %v13011_v8, %v11603_v17  ;;  %v11801_v8 = vld [vmem:[#allocation10 + $0x1c8] sm:$0xf]  ;;  %v13062_v17 = vld [vmem:[#allocation10 + $0x1d4] sm:$0xf0] }
 0x4fd   :  { %v11714_v35 = vor.u32 %v13041_v7, %v11713_v31  ;;  %v11657_v31 = vld [vmem:[#allocation10 + $0xa8] sm:$0xf]  ;;  %v13026_v7 = vld [vmem:[#allocation10 + $0xb4] sm:$0xf0] }
 0x4fe   :  { %v11658_v58 = vor.u32 %v13026_v7, %v11657_v31  ;;  %v11577_v31 = vld [vmem:[#allocation10 + $0x8] sm:$0xf]  ;;  %v13038_v15 = vld [vmem:[#allocation10 + $0x114] sm:$0xf0] }
 0x4ff   :  { %7508 = vmatpush.bf16.msra.mxu0 %v11650_v33  ;;  %7521 = vmatpush.bf16.msra.mxu1 %v11778_v2  ;;  %v7177_v33 = vunpack.c.l.b16 %v6586_v14  ;;  %v11586_v2 = vor.u32 %v13009_v41, %v11585_v53  ;;  %v13060_v53 = vld [vmem:[#allocation10 + $0x1cc] sm:$0xf]  ;;  %v11674_v14 = vor.u32 %v13030_v28, %v11673_v63  ;;  %v11802_v41 = vor.u32 %v13062_v17, %v11801_v8  ;;  %v11739_v28 = vld [vmem:[#allocation10 + $0x158] sm:$0xf0]  ;;  %v11705_v6 = vld [vmem:[#allocation10 + $0x108] sm:$0xf] }
 0x500   :  { %7534 = vmatpush.bf16.msrb.mxu2 %v11654_v4  ;;  %7547 = vmatpush.bf16.msrb.mxu3 %v11782_v21  ;;  %v11697_v4 = vld [vmem:[#allocation10 + $0x100] sm:$0xf]  ;;  %v13037_v21 = vld [vmem:[#allocation10 + $0x10c] sm:$0xf0]  ;;  %v13044_v63 = vld [vmem:[#allocation10 + $0x14c] sm:$0xf] }
 0x501   :  { %v11698_v24 = vor.u32 %v13037_v21, %v11697_v4  ;;  %v13054_v4 = vld [vmem:[#allocation10 + $0x194] sm:$0xf0]  ;;  %v13020_v21 = vld [vmem:[#allocation10 + $0x8c] sm:$0xf]  ;;  %v11742_v17 = vor.u32 %v13044_v63, %v11739_v28  ;;  %v13185_v28 = vld [vmem:[#allocation10 + $0x5ac] sm:$0xf0] }
 0x503   :  { %7509 = vmatpush.bf16.msra.mxu0 %v11634_v51  ;;  %7522 = vmatpush.bf16.msra.mxu1 %v11762_v10  ;;  %v13034_v51 = vld [vmem:[#allocation10 + $0xf4] sm:$0xf0]  ;;  %v11817_v10 = vld [vmem:[#allocation10 + $0x1e8] sm:$0xf] }
 0x504   :  { %7535 = vmatpush.bf16.msrb.mxu2 %v11638_v12  ;;  %7548 = vmatpush.bf16.msrb.mxu3 %v11766_v27  ;;  %v7178_v12 = vrot.slane %v7176_v25, 7  ;;  %v7180_v27 = vrot.slane %v7177_v33, 7  ;;  %v11641_v25 = vld [vmem:[#allocation10 + $0x88] sm:$0xf]  ;;  %v13022_v33 = vld [vmem:[#allocation10 + $0x94] sm:$0xf0] }
 0x505   :  { %7126 = vmatmul.bf16.vlgmr.msrb.gmra.mxu0 %v16089_v38  ;;  %7139 = vmatmul.bf16.vlgmr.msrb.gmra.mxu1 %v16091_v46  ;;  %v11642_v30 = vor.u32 %v13022_v33, %v11641_v25  ;;  %v11937_v25 = vld [vmem:[#allocation10 + $0x4e0] sm:$0xf]  ;;  %v13161_v33 = vld [vmem:[#allocation10 + $0x4ec] sm:$0xf0] }
 0x506   :  { %7152 = vmatmul.bf16.vlgmr.msra.gmra.mxu2 %v16089_v38  ;;  %7165 = vmatmul.bf16.vlgmr.msra.gmra.mxu3 %v16091_v46  ;;  %v6576_v38 = vperm.slane %v6565_v34, 2  ;;  %v11715_v46 = vld [vmem:[#allocation10 + $0x130] sm:$0xf0]  ;;  %v7179_v61 = vsel %vm2350_vm9, %v7178_v12, %v7174_v48  ;;  %v11627_v12 = vld [vmem:[#allocation10 + $0x78] sm:$0xf0] }
 0x507   :  { %7510 = vmatpush.bf16.msra.mxu0 %v11618_v13  ;;  %7523 = vmatpush.bf16.msra.mxu1 %v11746_v44  ;;  %v11718_v9 = vor.u32 %v13039_v3, %v11715_v46  ;;  %v11690_v13 = vor.u32 %v13034_v51, %v11689_v19  ;;  %v11818_v44 = vor.u32 %v13066_v40, %v11817_v10  ;;  %v13056_v3 = vld [vmem:[#allocation10 + $0x1ac] sm:$0xf]  ;;  %v11787_v46 = vld [vmem:[#allocation10 + $0x1b8] sm:$0xf0]  ;;  %v11753_v10 = vld [vmem:[#allocation10 + $0x168] sm:$0xf] }
 0x508   :  { %7536 = vmatpush.bf16.msrb.mxu2 %v11622_v23  ;;  %7549 = vmatpush.bf16.msrb.mxu3 %v11750_v56  ;;  %v6584_v5 = vpack.c.bf16 %v6576_v38, %v6576_v38  ;;  %v11694_v23 = vor.u32 %v13032_v42, %v11691_v47  ;;  %v11822_v56 = vor.u32 %v13064_v49, %v11819_v11  ;;  %v11659_v38 = vld [vmem:[#allocation10 + $0xb8] sm:$0xf0]  ;;  %v13050_v40 = vld [vmem:[#allocation10 + $0x174] sm:$0xf0]  ;;  %v13016_v42 = vld [vmem:[#allocation10 + $0x6c] sm:$0xf] }
 0x509   :  { %v11646_v19 = vor.u32 %v13020_v21, %v11643_v43  ;;  %v11754_v47 = vor.u32 %v13050_v40, %v11753_v10  ;;  %v11609_v49 = vld [vmem:[#allocation10 + $0x48] sm:$0xf]  ;;  %v13014_v11 = vld [vmem:[#allocation10 + $0x54] sm:$0xf0]  ;;  %v11706_v21 = vor.u32 %v13038_v15, %v11705_v6  ;;  %v11939_v43 = vld [vmem:[#allocation10 + $0x4f0] sm:$0xf0] }
 0x50a   :  { %v7175_v34 = vunpack.c.l.b16 %v6584_v5  ;;  %v13018_v5 = vld [vmem:[#allocation10 + $0x74] sm:$0xf0]  ;;  %v11737_v48 = vld [vmem:[#allocation10 + $0x148] sm:$0xf]  ;;  %v11921_v10 = vld [vmem:[#allocation10 + $0x4c0] sm:$0xf] }
 0x50b   :  { %7511 = vmatpush.bf16.msra.mxu0 %v11602_v62  ;;  %7524 = vmatpush.bf16.msra.mxu1 %v11730_v39  ;;  %v16108_v62 = vpack.c.b16 %v7179_v61, %v7179_v61  ;;  %v11593_v61 = vld [vmem:[#allocation10 + $0x28] sm:$0xf]  ;;  %v13157_v40 = vld [vmem:[#allocation10 + $0x4cc] sm:$0xf0] }
 0x50c   :  { %7537 = vmatpush.bf16.msrb.mxu2 %v11606_v0  ;;  %7550 = vmatpush.bf16.msrb.mxu3 %v11734_v1  ;;  %v7181_v45 = vsel %vm2350_vm9, %v7180_v27, %v7175_v34  ;;  %v11678_v0 = vor.u32 %v13028_v55, %v11675_v26  ;;  %v11806_v1 = vor.u32 %v13060_v53, %v11803_v20  ;;  %v13048_v27 = vld [vmem:[#allocation10 + $0x16c] sm:$0xf]  ;;  %v13046_v34 = vld [vmem:[#allocation10 + $0x154] sm:$0xf0]  ;;  %v11721_v55 = vld [vmem:[#allocation10 + $0x128] sm:$0xf] }
 0x50d   :  { %v16110_v39 = vpack.c.b16 %v7181_v45, %v7181_v45  ;;  %v13010_v45 = vld [vmem:[#allocation10 + $0x34] sm:$0xf0]  ;;  %v13008_v53 = vld [vmem:[#allocation10 + $0x2c] sm:$0xf]  ;;  %v11595_v20 = vld [vmem:[#allocation10 + $0x38] sm:$0xf0] }
 0x50e   :  { %v13042_v26 = vld [vmem:[#allocation10 + $0x134] sm:$0xf0]  ;;  %v11594_v7 = vor.u32 %v13010_v45, %v11593_v61  ;;  %v11907_v45 = vld [vmem:[#allocation10 + $0x4b0] sm:$0xf0] }
 0x50f   :  { %7512 = vmatpush.bf16.msra.mxu0 %v11586_v2  ;;  %7525 = vmatpush.bf16.msra.mxu1 %v11714_v35  ;;  %v11662_v2 = vor.u32 %v13024_v36, %v11659_v38  ;;  %v11790_v35 = vor.u32 %v13056_v3, %v11787_v46  ;;  %v11598_v36 = vor.u32 %v13008_v53, %v11595_v20  ;;  %v13004_v3 = vld [vmem:[#allocation10 + $0xc] sm:$0xf]  ;;  %v11579_v46 = vld [vmem:[#allocation10 + $0x18] sm:$0xf0] }
 0x510   :  { %7538 = vmatpush.bf16.msrb.mxu2 %v11590_v22  ;;  %7551 = vmatpush.bf16.msrb.mxu3 %v11718_v9  ;;  %v11769_v22 = vld [vmem:[#allocation10 + $0x188] sm:$0xf]  ;;  %v13052_v9 = vld [vmem:[#allocation10 + $0x18c] sm:$0xf] }
 0x511   :  { %v11770_v57 = vor.u32 %v13054_v4, %v11769_v22  ;;  %v11774_v51 = vor.u32 %v13052_v9, %v11771_v32  ;;  %v13159_v22 = vld [vmem:[#allocation10 + $0x4e4] sm:$0xf]  ;;  %v12067_v32 = vld [vmem:[#allocation10 + $0x5f0] sm:$0xf0] }
 0x512   :  { %v13191_v9 = vld [vmem:[#allocation10 + $0x5e4] sm:$0xf] }
 0x513   :  { %7513 = vmatpush.bf16.msra.mxu0 %v11570_v18  ;;  %7526 = vmatpush.bf16.msra.mxu1 %v11698_v24  ;;  %v11755_v18 = vld [vmem:[#allocation10 + $0x178] sm:$0xf0]  ;;  %v11626_v24 = vor.u32 %v13018_v5, %v11625_v29  ;;  %v6567_v29 = vmax.f32 %v16054_v54, 0.0  ;;  %v6571_v5 = vmax.f32 %v16080_v59, 0.0  ;;  %v11922_v54 = vor.u32 %v13157_v40, %v11921_v10 }
 0x514   :  { %7539 = vmatpush.bf16.msrb.mxu2 %v11574_v50  ;;  %7552 = vmatpush.bf16.msrb.mxu3 %v11702_v60  ;;  %v11630_v50 = vor.u32 %v13016_v42, %v11627_v12  ;;  %v11758_v60 = vor.u32 %v13048_v27, %v11755_v18  ;;  %v11942_v42 = vor.u32 %v13159_v22, %v11939_v43  ;;  %v12049_v27 = vld [vmem:[#allocation10 + $0x5c0] sm:$0xf]  ;;  %v13189_v18 = vld [vmem:[#allocation10 + $0x5cc] sm:$0xf0] }
 0x515   :  { %v12070_v12 = vor.u32 %v13191_v9, %v12067_v32  ;;  %v12050_v59 = vor.u32 %v13189_v18, %v12049_v27  ;;  %v7615_v61 = vperm.slane %v6571_v5, 2  ;;  %v11873_v22 = vld [vmem:[#allocation10 + $0x460] sm:$0xf] }
 0x516   :  { %7514 = vmatmul.bf16.vlgmr.msra.gmra.mxu0 %v16108_v62  ;;  %7527 = vmatmul.bf16.vlgmr.msra.gmra.mxu1 %v16110_v39  ;;  %v12001_v32 = vld [vmem:[#allocation10 + $0x560] sm:$0xf] }
 0x517   :  { %7558 = vmatpush.bf16.msrb.mxu0 %v11690_v13  ;;  %7571 = vmatpush.bf16.msrb.mxu1 %v11818_v44  ;;  %v13012_v13 = vld [vmem:[#allocation10 + $0x4c] sm:$0xf]  ;;  %v11611_v44 = vld [vmem:[#allocation10 + $0x58] sm:$0xf0]  ;;  %v7623_v20 = vpack.c.bf16 %v7615_v61, %v7615_v61  ;;  %v13167_v61 = vld [vmem:[#allocation10 + $0x524] sm:$0xf] }
 0x518   :  { %7584 = vmatpush.bf16.msra.mxu2 %v11694_v23  ;;  %7597 = vmatpush.bf16.msra.mxu3 %v11822_v56  ;;  %v11610_v23 = vor.u32 %v13014_v11, %v11609_v49  ;;  %v11738_v56 = vor.u32 %v13046_v34, %v11737_v48  ;;  %v11614_v8 = vor.u32 %v13012_v13, %v11611_v44  ;;  %v13187_v49 = vld [vmem:[#allocation10 + $0x5c4] sm:$0xf]  ;;  %v12051_v11 = vld [vmem:[#allocation10 + $0x5d0] sm:$0xf0]  ;;  %v12033_v48 = vld [vmem:[#allocation10 + $0x5a0] sm:$0xf] }
 0x519   :  { %7540 = vmatmul.bf16.vlgmr.msrb.gmra.mxu2 %v16108_v62  ;;  %7553 = vmatmul.bf16.vlgmr.msrb.gmra.mxu3 %v16110_v39  ;;  %v7612_v34 = vperm.slane %v6567_v29, 0  ;;  %v7614_v13 = vperm.slane %v6571_v5, 0  ;;  %v12054_v63 = vor.u32 %v13187_v49, %v12051_v11  ;;  %v11875_v5 = vld [vmem:[#allocation10 + $0x470] sm:$0xf0]  ;;  %v13139_v49 = vld [vmem:[#allocation10 + $0x444] sm:$0xf] }
 0x51a   :  { %v11859_v11 = vld [vmem:[#allocation10 + $0x450] sm:$0xf0] }
 0x51b   :  { %7559 = vmatpush.bf16.msrb.mxu0 %v11674_v14  ;;  %7572 = vmatpush.bf16.msrb.mxu1 %v11802_v41  ;;  %v13040_v14 = vld [vmem:[#allocation10 + $0x12c] sm:$0xf]  ;;  %v11723_v41 = vld [vmem:[#allocation10 + $0x138] sm:$0xf0] }
 0x51c   :  { %7585 = vmatpush.bf16.msra.mxu2 %v11678_v0  ;;  %7598 = vmatpush.bf16.msra.mxu3 %v11806_v1  ;;  %v11722_v0 = vor.u32 %v13042_v26, %v11721_v55  ;;  %v13006_v1 = vld [vmem:[#allocation10 + $0x14] sm:$0xf0]  ;;  %v11726_v38 = vor.u32 %v13040_v14, %v11723_v41  ;;  %v7620_v55 = vpack.c.bf16 %v7612_v34, %v7612_v34  ;;  %v13137_v34 = vld [vmem:[#allocation10 + $0x42c] sm:$0xf0] }
 0x51d   :  { %v11578_v4 = vor.u32 %v13006_v1, %v11577_v31  ;;  %v7622_v26 = vpack.c.bf16 %v7614_v13, %v7614_v13  ;;  %v12034_v41 = vor.u32 %v13185_v28, %v12033_v48  ;;  %v11889_v31 = vld [vmem:[#allocation10 + $0x480] sm:$0xf]  ;;  %v11862_v13 = vor.u32 %v13139_v49, %v11859_v11  ;;  %v13169_v28 = vld [vmem:[#allocation10 + $0x52c] sm:$0xf0]  ;;  %v12041_v49 = vld [vmem:[#allocation10 + $0x5a8] sm:$0xf] }
 0x51e   :  { %v11841_v48 = vld [vmem:[#allocation10 + $0x420] sm:$0xf]  ;;  %v13186_v11 = vld [vmem:[#allocation10 + $0x5b4] sm:$0xf0] }
 0x51f   :  { %7560 = vmatpush.bf16.msrb.mxu0 %v11658_v58  ;;  %7573 = vmatpush.bf16.msrb.mxu1 %v11786_v16  ;;  %v13036_v58 = vld [vmem:[#allocation10 + $0x10c] sm:$0xf]  ;;  %v11707_v16 = vld [vmem:[#allocation10 + $0x118] sm:$0xf0]  ;;  %v7695_v1 = vunpack.c.l.b16 %v7622_v26  ;;  %v13133_v26 = vld [vmem:[#allocation10 + $0x40c] sm:$0xf0] }
 0x520   :  { %7586 = vmatpush.bf16.msra.mxu2 %v11662_v2  ;;  %7599 = vmatpush.bf16.msra.mxu3 %v11790_v35  ;;  %v12065_v2 = vld [vmem:[#allocation10 + $0x5e0] sm:$0xf]  ;;  %v13193_v35 = vld [vmem:[#allocation10 + $0x5ec] sm:$0xf0] }
 0x523   :  { %7561 = vmatpush.bf16.msrb.mxu0 %v11642_v30  ;;  %7574 = vmatpush.bf16.msrb.mxu1 %v11770_v57  ;;  %v11582_v30 = vor.u32 %v13004_v3, %v11579_v46  ;;  %v11710_v57 = vor.u32 %v13036_v58, %v11707_v16  ;;  %v11891_v3 = vld [vmem:[#allocation10 + $0x490] sm:$0xf0]  ;;  %v13179_v46 = vld [vmem:[#allocation10 + $0x584] sm:$0xf]  ;;  %v7693_v58 = vunpack.c.l.b16 %v7620_v55  ;;  %v7697_v16 = vrot.slane %v7695_v1, 7 }
 0x524   :  { %7587 = vmatpush.bf16.msra.mxu2 %v11646_v19  ;;  %7600 = vmatpush.bf16.msra.mxu3 %v11774_v51  ;;  %v11938_v19 = vor.u32 %v13161_v33, %v11937_v25  ;;  %v12066_v51 = vor.u32 %v13193_v35, %v12065_v2  ;;  %v11955_v1 = vld [vmem:[#allocation10 + $0x510] sm:$0xf0] }
 0x527   :  { %7562 = vmatpush.bf16.msrb.mxu0 %v11626_v24  ;;  %7575 = vmatpush.bf16.msrb.mxu1 %v11754_v47  ;;  %v13155_v24 = vld [vmem:[#allocation10 + $0x4c4] sm:$0xf]  ;;  %v11923_v47 = vld [vmem:[#allocation10 + $0x4d0] sm:$0xf0] }
 0x528   :  { %7588 = vmatpush.bf16.msra.mxu2 %v11630_v50  ;;  %7601 = vmatpush.bf16.msra.mxu3 %v11758_v60  ;;  %v11905_v50 = vld [vmem:[#allocation10 + $0x4a0] sm:$0xf]  ;;  %v13153_v60 = vld [vmem:[#allocation10 + $0x4ac] sm:$0xf0]  ;;  %v11926_v44 = vor.u32 %v13155_v24, %v11923_v47 }
 0x529   :  { %v11906_v14 = vor.u32 %v13153_v60, %v11905_v50  ;;  %v11985_v24 = vld [vmem:[#allocation10 + $0x540] sm:$0xf]  ;;  %v13173_v47 = vld [vmem:[#allocation10 + $0x54c] sm:$0xf0]  ;;  %v13171_v50 = vld [vmem:[#allocation10 + $0x544] sm:$0xf] }
 0x52a   :  { %v11986_v60 = vor.u32 %v13173_v47, %v11985_v24 }
 0x52b   :  { %7563 = vmatpush.bf16.msrb.mxu0 %v11610_v23  ;;  %7576 = vmatpush.bf16.msrb.mxu1 %v11738_v56  ;;  %v13151_v23 = vld [vmem:[#allocation10 + $0x4a4] sm:$0xf]  ;;  %v7613_v56 = vperm.slane %v6567_v29, 2 }
 0x52c   :  { %7589 = vmatpush.bf16.msra.mxu2 %v11614_v8  ;;  %7602 = vmatpush.bf16.msra.mxu3 %v11742_v17  ;;  %v13183_v8 = vld [vmem:[#allocation10 + $0x5a4] sm:$0xf]  ;;  %v12035_v17 = vld [vmem:[#allocation10 + $0x5b0] sm:$0xf0]  ;;  %v11910_v6 = vor.u32 %v13151_v23, %v11907_v45 }
 0x52d   :  { %v7621_v53 = vpack.c.bf16 %v7613_v56, %v7613_v56  ;;  %v12038_v15 = vor.u32 %v13183_v8, %v12035_v17  ;;  %v13135_v23 = vld [vmem:[#allocation10 + $0x424] sm:$0xf]  ;;  %v11843_v56 = vld [vmem:[#allocation10 + $0x430] sm:$0xf0]  ;;  %v11825_v8 = vld [vmem:[#allocation10 + $0x400] sm:$0xf]  ;;  %v11842_v17 = vor.u32 %v13137_v34, %v11841_v48 }
 0x52e   :  { %v11971_v45 = vld [vmem:[#allocation10 + $0x530] sm:$0xf0]  ;;  %v11897_v48 = vld [vmem:[#allocation10 + $0x488] sm:$0xf]  ;;  %v13150_v34 = vld [vmem:[#allocation10 + $0x494] sm:$0xf0] }
 0x52f   :  { %7564 = vmatpush.bf16.msrb.mxu0 %v11594_v7  ;;  %7577 = vmatpush.bf16.msrb.mxu1 %v11722_v0  ;;  %v13149_v7 = vld [vmem:[#allocation10 + $0x48c] sm:$0xf0]  ;;  %v12017_v0 = vld [vmem:[#allocation10 + $0x580] sm:$0xf]  ;;  %v7694_v25 = vunpack.c.l.b16 %v7621_v53 }
 0x530   :  { %7590 = vmatpush.bf16.msra.mxu2 %v11598_v36  ;;  %7603 = vmatpush.bf16.msra.mxu3 %v11726_v38  ;;  %v13181_v36 = vld [vmem:[#allocation10 + $0x58c] sm:$0xf0]  ;;  %v13147_v38 = vld [vmem:[#allocation10 + $0x484] sm:$0xf]  ;;  %v11890_v2 = vor.u32 %v13149_v7, %v11889_v31  ;;  %v11953_v53 = vld [vmem:[#allocation10 + $0x500] sm:$0xf] }
 0x531   :  { %v12018_v35 = vor.u32 %v13181_v36, %v12017_v0  ;;  %v11894_v43 = vor.u32 %v13147_v38, %v11891_v3  ;;  %v13131_v31 = vld [vmem:[#allocation10 + $0x404] sm:$0xf]  ;;  %v11827_v7 = vld [vmem:[#allocation10 + $0x410] sm:$0xf0]  ;;  %v12073_v36 = vld [vmem:[#allocation10 + $0x5e8] sm:$0xf] }
 0x532   :  { %v13163_v0 = vld [vmem:[#allocation10 + $0x504] sm:$0xf]  ;;  %v13194_v38 = vld [vmem:[#allocation10 + $0x5f4] sm:$0xf0]  ;;  %v13160_v3 = vld [vmem:[#allocation10 + $0x4ec] sm:$0xf] }
 0x533   :  { %7565 = vmatpush.bf16.msrb.mxu0 %v11578_v4  ;;  %7578 = vmatpush.bf16.msrb.mxu1 %v11706_v21  ;;  %v13145_v4 = vld [vmem:[#allocation10 + $0x46c] sm:$0xf0]  ;;  %v16123_v21 = vsel %vm2350_vm9, %v7697_v16, %v7693_v58  ;;  %v13192_v58 = vld [vmem:[#allocation10 + $0x5ec] sm:$0xf]  ;;  %v12075_v16 = vld [vmem:[#allocation10 + $0x5f8] sm:$0xf0] }
 0x534   :  { %7591 = vmatpush.bf16.msra.mxu2 %v11582_v30  ;;  %7604 = vmatpush.bf16.msra.mxu3 %v11710_v57  ;;  %v13177_v30 = vld [vmem:[#allocation10 + $0x56c] sm:$0xf0]  ;;  %v13143_v57 = vld [vmem:[#allocation10 + $0x464] sm:$0xf]  ;;  %v11874_v10 = vor.u32 %v13145_v4, %v11873_v22  ;;  %v11929_v22 = vld [vmem:[#allocation10 + $0x4c8] sm:$0xf] }
 0x535   :  { %v12002_v40 = vor.u32 %v13177_v30, %v12001_v32  ;;  %v11878_v27 = vor.u32 %v13143_v57, %v11875_v5  ;;  %v13158_v4 = vld [vmem:[#allocation10 + $0x4d4] sm:$0xf0]  ;;  %v12057_v32 = vld [vmem:[#allocation10 + $0x5c8] sm:$0xf]  ;;  %v13156_v57 = vld [vmem:[#allocation10 + $0x4cc] sm:$0xf] }
 0x536   :  { %7566 = vmatmul.bf16.vlgmr.msrb.gmra.mxu0 %v16108_v62  ;;  %7579 = vmatmul.bf16.vlgmr.msrb.gmra.mxu1 %v16110_v39  ;;  %v13190_v30 = vld [vmem:[#allocation10 + $0x5d4] sm:$0xf0]  ;;  %v11931_v5 = vld [vmem:[#allocation10 + $0x4d8] sm:$0xf0] }
 0x537   :  { %8025 = vmatpush.bf16.msra.mxu0 %v11938_v19  ;;  %8038 = vmatpush.bf16.msra.mxu1 %v12066_v51  ;;  %v13175_v19 = vld [vmem:[#allocation10 + $0x564] sm:$0xf]  ;;  %v12003_v51 = vld [vmem:[#allocation10 + $0x570] sm:$0xf0]  ;;  %v11934_v24 = vor.u32 %v13156_v57, %v11931_v5  ;;  %v13136_v57 = vld [vmem:[#allocation10 + $0x42c] sm:$0xf] }
 0x538   :  { %8051 = vmatpush.bf16.msrb.mxu2 %v11942_v42  ;;  %8064 = vmatpush.bf16.msrb.mxu3 %v12070_v12  ;;  %v11857_v42 = vld [vmem:[#allocation10 + $0x440] sm:$0xf]  ;;  %v13141_v12 = vld [vmem:[#allocation10 + $0x44c] sm:$0xf0]  ;;  %v12006_v18 = vor.u32 %v13175_v19, %v12003_v51  ;;  %v13188_v19 = vld [vmem:[#allocation10 + $0x5cc] sm:$0xf] }
 0x539   :  { %7592 = vmatmul.bf16.vlgmr.msra.gmra.mxu2 %v16108_v62  ;;  %7605 = vmatmul.bf16.vlgmr.msra.gmra.mxu3 %v16110_v39  ;;  %v7696_v62 = vunpack.c.l.b16 %v7623_v20  ;;  %v12019_v39 = vld [vmem:[#allocation10 + $0x590] sm:$0xf0]  ;;  %v13165_v20 = vld [vmem:[#allocation10 + $0x50c] sm:$0xf0]  ;;  %v12059_v51 = vld [vmem:[#allocation10 + $0x5d8] sm:$0xf0] }
 0x53a   :  { %v12022_v9 = vor.u32 %v13179_v46, %v12019_v39  ;;  %v11954_v46 = vor.u32 %v13165_v20, %v11953_v53  ;;  %v11947_v39 = vld [vmem:[#allocation10 + $0x4f8] sm:$0xf0]  ;;  %v12062_v47 = vor.u32 %v13188_v19, %v12059_v51  ;;  %v13168_v19 = vld [vmem:[#allocation10 + $0x52c] sm:$0xf] }
 0x53b   :  { %8026 = vmatpush.bf16.msra.mxu0 %v11922_v54  ;;  %8039 = vmatpush.bf16.msra.mxu1 %v12050_v59  ;;  %v7699_v33 = vrot.slane %v7696_v62, 7  ;;  %v11987_v54 = vld [vmem:[#allocation10 + $0x550] sm:$0xf0]  ;;  %v11858_v59 = vor.u32 %v13141_v12, %v11857_v42  ;;  %v11826_v62 = vor.u32 %v13133_v26, %v11825_v8  ;;  %v12058_v12 = vor.u32 %v13190_v30, %v12057_v32  ;;  %v13146_v26 = vld [vmem:[#allocation10 + $0x474] sm:$0xf0] }
 0x53c   :  { %8052 = vmatpush.bf16.msrb.mxu2 %v11926_v44  ;;  %8065 = vmatpush.bf16.msrb.mxu3 %v12054_v63  ;;  %v11990_v44 = vor.u32 %v13171_v50, %v11987_v54  ;;  %v11969_v63 = vld [vmem:[#allocation10 + $0x520] sm:$0xf]  ;;  %v13152_v50 = vld [vmem:[#allocation10 + $0x4ac] sm:$0xf]  ;;  %v11898_v8 = vor.u32 %v13150_v34, %v11897_v48  ;;  %v11977_v32 = vld [vmem:[#allocation10 + $0x528] sm:$0xf] }
 0x53d   :  { %v16126_v29 = vsel %vm2350_vm9, %v7699_v33, %v7694_v25  ;;  %v11970_v55 = vor.u32 %v13169_v28, %v11969_v63  ;;  %v11830_v25 = vor.u32 %v13131_v31, %v11827_v7  ;;  %v11958_v33 = vor.u32 %v13163_v0, %v11955_v1  ;;  %v13184_v54 = vld [vmem:[#allocation10 + $0x5ac] sm:$0xf]  ;;  %v12025_v63 = vld [vmem:[#allocation10 + $0x588] sm:$0xf]  ;;  %v13182_v28 = vld [vmem:[#allocation10 + $0x594] sm:$0xf0] }
 0x53e   :  { %v16134_v42 = vpack.c.b16 %v16126_v29, %v16126_v29  ;;  %v13144_v31 = vld [vmem:[#allocation10 + $0x46c] sm:$0xf]  ;;  %v11883_v7 = vld [vmem:[#allocation10 + $0x478] sm:$0xf0]  ;;  %v13170_v30 = vld [vmem:[#allocation10 + $0x534] sm:$0xf0] }
 0x53f   :  { %8027 = vmatpush.bf16.msra.mxu0 %v11906_v14  ;;  %8040 = vmatpush.bf16.msra.mxu1 %v12034_v41  ;;  %v11846_v14 = vor.u32 %v13135_v23, %v11843_v56  ;;  %v11974_v41 = vor.u32 %v13167_v61, %v11971_v45  ;;  %v13148_v23 = vld [vmem:[#allocation10 + $0x48c] sm:$0xf]  ;;  %v11899_v56 = vld [vmem:[#allocation10 + $0x498] sm:$0xf0]  ;;  %v12321_v48 = vld [vmem:[#allocation10 + $0x7e0] sm:$0xf] }
 0x540   :  { %8053 = vmatpush.bf16.msrb.mxu2 %v11910_v6  ;;  %8066 = vmatpush.bf16.msrb.mxu3 %v12038_v15  ;;  %v11945_v6 = vld [vmem:[#allocation10 + $0x4e8] sm:$0xf]  ;;  %v13162_v15 = vld [vmem:[#allocation10 + $0x4f4] sm:$0xf0]  ;;  %v13180_v61 = vld [vmem:[#allocation10 + $0x58c] sm:$0xf]  ;;  %v11902_v53 = vor.u32 %v13148_v23, %v11899_v56 }
 0x541   :  { %v12027_v45 = vld [vmem:[#allocation10 + $0x598] sm:$0xf0]  ;;  %v13176_v0 = vld [vmem:[#allocation10 + $0x56c] sm:$0xf]  ;;  %v13257_v34 = vld [vmem:[#allocation10 + $0x7ec] sm:$0xf0] }
 0x542   :  { %v12030_v20 = vor.u32 %v13180_v61, %v12027_v45  ;;  %v12011_v1 = vld [vmem:[#allocation10 + $0x578] sm:$0xf0]  ;;  %v13255_v23 = vld [vmem:[#allocation10 + $0x7e4] sm:$0xf]  ;;  %v12323_v56 = vld [vmem:[#allocation10 + $0x7f0] sm:$0xf0] }
 0x543   :  { %8028 = vmatpush.bf16.msra.mxu0 %v11890_v2  ;;  %8041 = vmatpush.bf16.msra.mxu1 %v12018_v35  ;;  %v11946_v2 = vor.u32 %v13162_v15, %v11945_v6  ;;  %v12074_v35 = vor.u32 %v13194_v38, %v12073_v36  ;;  %v11865_v36 = vld [vmem:[#allocation10 + $0x448] sm:$0xf]  ;;  %v13142_v38 = vld [vmem:[#allocation10 + $0x454] sm:$0xf0]  ;;  %v11851_v5 = vld [vmem:[#allocation10 + $0x438] sm:$0xf0] }
 0x544   :  { %8054 = vmatpush.bf16.msrb.mxu2 %v11894_v43  ;;  %8067 = vmatpush.bf16.msrb.mxu3 %v12022_v9  ;;  %v11950_v43 = vor.u32 %v13160_v3, %v11947_v39  ;;  %v12078_v9 = vor.u32 %v13192_v58, %v12075_v16  ;;  %v11886_v3 = vor.u32 %v13144_v31, %v11883_v7  ;;  %v13174_v39 = vld [vmem:[#allocation10 + $0x554] sm:$0xf0]  ;;  %v13140_v58 = vld [vmem:[#allocation10 + $0x44c] sm:$0xf]  ;;  %v11867_v16 = vld [vmem:[#allocation10 + $0x458] sm:$0xf0] }
 0x545   :  { %v11979_v51 = vld [vmem:[#allocation10 + $0x538] sm:$0xf0]  ;;  %v12305_v31 = vld [vmem:[#allocation10 + $0x7c0] sm:$0xf]  ;;  %v13253_v7 = vld [vmem:[#allocation10 + $0x7cc] sm:$0xf0] }
 0x547   :  { %8029 = vmatpush.bf16.msra.mxu0 %v11874_v10  ;;  %8042 = vmatpush.bf16.msra.mxu1 %v12002_v40  ;;  %v11930_v10 = vor.u32 %v13158_v4, %v11929_v22  ;;  %v16130_v40 = vpack.c.b16 %v16123_v21, %v16123_v21  ;;  %v11915_v21 = vld [vmem:[#allocation10 + $0x4b8] sm:$0xf0]  ;;  %v11849_v22 = vld [vmem:[#allocation10 + $0x428] sm:$0xf]  ;;  %v13138_v4 = vld [vmem:[#allocation10 + $0x434] sm:$0xf0] }
 0x548   :  { %8055 = vmatpush.bf16.msrb.mxu2 %v11878_v27  ;;  %8068 = vmatpush.bf16.msrb.mxu3 %v12006_v18  ;;  %v11913_v27 = vld [vmem:[#allocation10 + $0x4a8] sm:$0xf]  ;;  %v13154_v18 = vld [vmem:[#allocation10 + $0x4b4] sm:$0xf0] }
 0x549   :  { %v11914_v29 = vor.u32 %v13154_v18, %v11913_v27  ;;  %v11978_v27 = vor.u32 %v13170_v30, %v11977_v32  ;;  %v13134_v18 = vld [vmem:[#allocation10 + $0x414] sm:$0xf0] }
 0x54b   :  { %8030 = vmatpush.bf16.msra.mxu0 %v11858_v59  ;;  %8043 = vmatpush.bf16.msra.mxu1 %v11986_v60  ;;  %v12043_v59 = vld [vmem:[#allocation10 + $0x5b8] sm:$0xf0]  ;;  %v12042_v60 = vor.u32 %v13186_v11, %v12041_v49  ;;  %v11854_v49 = vor.u32 %v13136_v57, %v11851_v5  ;;  %v11982_v11 = vor.u32 %v13168_v19, %v11979_v51 }
 0x54c   :  { %8056 = vmatpush.bf16.msrb.mxu2 %v11862_v13  ;;  %8069 = vmatpush.bf16.msrb.mxu3 %v11990_v44  ;;  %v11918_v13 = vor.u32 %v13152_v50, %v11915_v21  ;;  %v12046_v44 = vor.u32 %v13184_v54, %v12043_v59  ;;  %v13132_v50 = vld [vmem:[#allocation10 + $0x40c] sm:$0xf]  ;;  %v11835_v21 = vld [vmem:[#allocation10 + $0x418] sm:$0xf0] }
 0x54d   :  { %v13164_v54 = vld [vmem:[#allocation10 + $0x50c] sm:$0xf]  ;;  %v11963_v59 = vld [vmem:[#allocation10 + $0x518] sm:$0xf0]  ;;  %v11838_v61 = vor.u32 %v13132_v50, %v11835_v21  ;;  %v13243_v21 = vld [vmem:[#allocation10 + $0x784] sm:$0xf] }
 0x54e   :  { %v11966_v45 = vor.u32 %v13164_v54, %v11963_v59  ;;  %v12275_v54 = vld [vmem:[#allocation10 + $0x790] sm:$0xf0] }
 0x54f   :  { %8031 = vmatpush.bf16.msra.mxu0 %v11842_v17  ;;  %8044 = vmatpush.bf16.msra.mxu1 %v11970_v55  ;;  %v12026_v17 = vor.u32 %v13182_v28, %v12025_v63  ;;  %v11881_v55 = vld [vmem:[#allocation10 + $0x468] sm:$0xf]  ;;  %v12195_v28 = vld [vmem:[#allocation10 + $0x6f0] sm:$0xf0] }
 0x550   :  { %8057 = vmatpush.bf16.msrb.mxu2 %v11846_v14  ;;  %8070 = vmatpush.bf16.msrb.mxu3 %v11974_v41  ;;  %v12009_v14 = vld [vmem:[#allocation10 + $0x568] sm:$0xf]  ;;  %v13178_v41 = vld [vmem:[#allocation10 + $0x574] sm:$0xf0]  ;;  %v11882_v6 = vor.u32 %v13146_v26, %v11881_v55  ;;  %v12322_v26 = vor.u32 %v13257_v34, %v12321_v48 }
 0x551   :  { %v12010_v15 = vor.u32 %v13178_v41, %v12009_v14  ;;  %v12326_v41 = vor.u32 %v13255_v23, %v12323_v56  ;;  %v12278_v56 = vor.u32 %v13243_v21, %v12275_v54  ;;  %v12083_v21 = vld [vmem:[#allocation10 + $0x610] sm:$0xf0]  ;;  %v13227_v54 = vld [vmem:[#allocation10 + $0x704] sm:$0xf] }
 0x553   :  { %8032 = vmatpush.bf16.msra.mxu0 %v11826_v62  ;;  %8045 = vmatpush.bf16.msra.mxu1 %v11954_v46  ;;  %v12014_v62 = vor.u32 %v13176_v0, %v12011_v1  ;;  %v11993_v46 = vld [vmem:[#allocation10 + $0x548] sm:$0xf]  ;;  %v13219_v0 = vld [vmem:[#allocation10 + $0x6c4] sm:$0xf]  ;;  %v12179_v1 = vld [vmem:[#allocation10 + $0x6d0] sm:$0xf0] }
 0x554   :  { %8058 = vmatpush.bf16.msrb.mxu2 %v11830_v25  ;;  %8071 = vmatpush.bf16.msrb.mxu3 %v11958_v33  ;;  %v13172_v25 = vld [vmem:[#allocation10 + $0x54c] sm:$0xf]  ;;  %v11995_v33 = vld [vmem:[#allocation10 + $0x558] sm:$0xf0] }
 0x556   :  { %8033 = vmatmul.bf16.vlgmr.msra.gmra.mxu0 %v16130_v40  ;;  %8046 = vmatmul.bf16.vlgmr.msra.gmra.mxu1 %v16134_v42 }
 0x557   :  { %8077 = vmatpush.bf16.msrb.mxu0 %v11946_v2  ;;  %8090 = vmatpush.bf16.msrb.mxu1 %v12074_v35  ;;  %v11866_v2 = vor.u32 %v13142_v38, %v11865_v36  ;;  %v11994_v35 = vor.u32 %v13174_v39, %v11993_v46  ;;  %v12161_v36 = vld [vmem:[#allocation10 + $0x6a0] sm:$0xf]  ;;  %v13217_v38 = vld [vmem:[#allocation10 + $0x6ac] sm:$0xf0]  ;;  %v12182_v39 = vor.u32 %v13219_v0, %v12179_v1 }
 0x558   :  { %8103 = vmatpush.bf16.msra.mxu2 %v11950_v43  ;;  %8116 = vmatpush.bf16.msra.mxu3 %v12078_v9  ;;  %v11870_v43 = vor.u32 %v13140_v58, %v11867_v16  ;;  %v11998_v9 = vor.u32 %v13172_v25, %v11995_v33  ;;  %v13249_v16 = vld [vmem:[#allocation10 + $0x7ac] sm:$0xf0]  ;;  %v13215_v25 = vld [vmem:[#allocation10 + $0x6a4] sm:$0xf]  ;;  %v12162_v19 = vor.u32 %v13217_v38, %v12161_v36 }
 0x559   :  { %8059 = vmatmul.bf16.vlgmr.msrb.gmra.mxu2 %v16130_v40  ;;  %8072 = vmatmul.bf16.vlgmr.msrb.gmra.mxu3 %v16134_v42  ;;  %v13237_v38 = vld [vmem:[#allocation10 + $0x74c] sm:$0xf0] }
 0x55b   :  { %8078 = vmatpush.bf16.msrb.mxu0 %v11930_v10  ;;  %8091 = vmatpush.bf16.msrb.mxu1 %v12058_v12  ;;  %v11833_v10 = vld [vmem:[#allocation10 + $0x408] sm:$0xf]  ;;  %v11850_v12 = vor.u32 %v13138_v4, %v11849_v22  ;;  %v13247_v22 = vld [vmem:[#allocation10 + $0x7a4] sm:$0xf]  ;;  %v12291_v4 = vld [vmem:[#allocation10 + $0x7b0] sm:$0xf0] }
 0x55c   :  { %8104 = vmatpush.bf16.msra.mxu2 %v11934_v24  ;;  %8117 = vmatpush.bf16.msra.mxu3 %v12062_v47  ;;  %v11961_v24 = vld [vmem:[#allocation10 + $0x508] sm:$0xf]  ;;  %v13166_v47 = vld [vmem:[#allocation10 + $0x514] sm:$0xf0] }
 0x55d   :  { %v11962_v63 = vor.u32 %v13166_v47, %v11961_v24 }
 0x55f   :  { %8079 = vmatpush.bf16.msrb.mxu0 %v11914_v29  ;;  %8092 = vmatpush.bf16.msrb.mxu1 %v12042_v60  ;;  %v12193_v29 = vld [vmem:[#allocation10 + $0x6e0] sm:$0xf]  ;;  %v13225_v60 = vld [vmem:[#allocation10 + $0x6ec] sm:$0xf0] }
 0x560   :  { %8105 = vmatpush.bf16.msra.mxu2 %v11918_v13  ;;  %8118 = vmatpush.bf16.msra.mxu3 %v12046_v44  ;;  %v13223_v13 = vld [vmem:[#allocation10 + $0x6e4] sm:$0xf]  ;;  %v11834_v44 = vor.u32 %v13134_v18, %v11833_v10  ;;  %v12194_v55 = vor.u32 %v13225_v60, %v12193_v29  ;;  %v12273_v18 = vld [vmem:[#allocation10 + $0x780] sm:$0xf] }
 0x561   :  { %v12198_v14 = vor.u32 %v13223_v13, %v12195_v28 }
 0x563   :  { %8080 = vmatpush.bf16.msrb.mxu0 %v11898_v8  ;;  %8093 = vmatpush.bf16.msrb.mxu1 %v12026_v17  ;;  %v6568_v8 = vmax.f32 %v16057_v52, 0.0  ;;  %v6572_v17 = vmax.f32 %v16082_v37, 0.0  ;;  %v12306_v37 = vor.u32 %v13253_v7, %v12305_v31 }
 0x564   :  { %8106 = vmatpush.bf16.msra.mxu2 %v11902_v53  ;;  %8119 = vmatpush.bf16.msra.mxu3 %v12030_v20  ;;  %v12177_v53 = vld [vmem:[#allocation10 + $0x6c0] sm:$0xf]  ;;  %v13221_v20 = vld [vmem:[#allocation10 + $0x6cc] sm:$0xf0] }
 0x565   :  { %v12178_v52 = vor.u32 %v13221_v20, %v12177_v53  ;;  %v8137_v46 = vperm.slane %v6572_v17, 0  ;;  %v8136_v33 = vperm.slane %v6568_v8, 2  ;;  %v12131_v53 = vld [vmem:[#allocation10 + $0x670] sm:$0xf0]  ;;  %v13239_v20 = vld [vmem:[#allocation10 + $0x764] sm:$0xf] }
 0x567   :  { %8081 = vmatpush.bf16.msrb.mxu0 %v11882_v6  ;;  %8094 = vmatpush.bf16.msrb.mxu1 %v12010_v15  ;;  %v13251_v6 = vld [vmem:[#allocation10 + $0x7c4] sm:$0xf]  ;;  %v12307_v15 = vld [vmem:[#allocation10 + $0x7d0] sm:$0xf0]  ;;  %v8144_v57 = vpack.c.bf16 %v8136_v33, %v8136_v33  ;;  %v13201_v33 = vld [vmem:[#allocation10 + $0x62c] sm:$0xf0] }
 0x568   :  { %8107 = vmatpush.bf16.msra.mxu2 %v11886_v3  ;;  %8120 = vmatpush.bf16.msra.mxu3 %v12014_v62  ;;  %v12289_v3 = vld [vmem:[#allocation10 + $0x7a0] sm:$0xf]  ;;  %v8135_v62 = vperm.slane %v6568_v8, 0  ;;  %v12310_v58 = vor.u32 %v13251_v6, %v12307_v15  ;;  %v13207_v8 = vld [vmem:[#allocation10 + $0x664] sm:$0xf] }
 0x569   :  { %v12290_v51 = vor.u32 %v13249_v16, %v12289_v3  ;;  %v8217_v60 = vunpack.c.l.b16 %v8144_v57  ;;  %v12113_v6 = vld [vmem:[#allocation10 + $0x640] sm:$0xf]  ;;  %v13205_v15 = vld [vmem:[#allocation10 + $0x64c] sm:$0xf0]  ;;  %v12134_v36 = vor.u32 %v13207_v8, %v12131_v53  ;;  %v13203_v3 = vld [vmem:[#allocation10 + $0x644] sm:$0xf] }
 0x56a   :  { %v13231_v57 = vld [vmem:[#allocation10 + $0x724] sm:$0xf] }
 0x56b   :  { %8082 = vmatpush.bf16.msrb.mxu0 %v11866_v2  ;;  %8095 = vmatpush.bf16.msrb.mxu1 %v11994_v35  ;;  %v8138_v2 = vperm.slane %v6572_v17, 2  ;;  %v12163_v35 = vld [vmem:[#allocation10 + $0x6b0] sm:$0xf0] }
 0x56c   :  { %8108 = vmatpush.bf16.msra.mxu2 %v11870_v43  ;;  %8121 = vmatpush.bf16.msra.mxu3 %v11998_v9  ;;  %v8143_v43 = vpack.c.bf16 %v8135_v62, %v8135_v62  ;;  %v8145_v9 = vpack.c.bf16 %v8137_v46, %v8137_v46  ;;  %v12166_v47 = vor.u32 %v13215_v25, %v12163_v35  ;;  %v12115_v62 = vld [vmem:[#allocation10 + $0x650] sm:$0xf0]  ;;  %v13235_v46 = vld [vmem:[#allocation10 + $0x744] sm:$0xf]  ;;  %v12097_v25 = vld [vmem:[#allocation10 + $0x620] sm:$0xf] }
 0x56d   :  { %v8146_v5 = vpack.c.bf16 %v8138_v2, %v8138_v2  ;;  %v12118_v2 = vor.u32 %v13203_v3, %v12115_v62  ;;  %v13252_v3 = vld [vmem:[#allocation10 + $0x7cc] sm:$0xf]  ;;  %v12315_v62 = vld [vmem:[#allocation10 + $0x7d8] sm:$0xf0] }
 0x56e   :  { %v8218_v24 = vunpack.c.l.b16 %v8145_v9  ;;  %v8216_v59 = vunpack.c.l.b16 %v8143_v43  ;;  %v13199_v43 = vld [vmem:[#allocation10 + $0x624] sm:$0xf] }
 0x56f   :  { %8083 = vmatpush.bf16.msrb.mxu0 %v11850_v12  ;;  %8096 = vmatpush.bf16.msrb.mxu1 %v11978_v27  ;;  %v12145_v12 = vld [vmem:[#allocation10 + $0x680] sm:$0xf]  ;;  %v13213_v27 = vld [vmem:[#allocation10 + $0x68c] sm:$0xf0]  ;;  %v8219_v50 = vunpack.c.l.b16 %v8146_v5  ;;  %v12227_v5 = vld [vmem:[#allocation10 + $0x730] sm:$0xf0] }
 0x570   :  { %8109 = vmatpush.bf16.msra.mxu2 %v11854_v49  ;;  %8122 = vmatpush.bf16.msra.mxu3 %v11982_v11  ;;  %v13245_v49 = vld [vmem:[#allocation10 + $0x78c] sm:$0xf0]  ;;  %v12147_v11 = vld [vmem:[#allocation10 + $0x690] sm:$0xf0]  ;;  %v8220_v29 = vrot.slane %v8218_v24, 7  ;;  %v12146_v34 = vor.u32 %v13213_v27, %v12145_v12  ;;  %v12098_v27 = vor.u32 %v13201_v33, %v12097_v25 }
 0x571   :  { %v8222_v48 = vrot.slane %v8219_v50, 7  ;;  %v12274_v13 = vor.u32 %v13245_v49, %v12273_v18  ;;  %v12081_v12 = vld [vmem:[#allocation10 + $0x600] sm:$0xf]  ;;  %v13229_v49 = vld [vmem:[#allocation10 + $0x70c] sm:$0xf0] }
 0x572   :  { %v7075_v32 = vpop.f32.mrf.mxu0  ;;  %v7088_v30 = vpop.f32.mrf.mxu1  ;;  %v16149_v28 = vsel %vm2350_vm9, %v8220_v29, %v8216_v59  ;;  %v13195_v50 = vld [vmem:[#allocation10 + $0x604] sm:$0xf]  ;;  %v12211_v59 = vld [vmem:[#allocation10 + $0x710] sm:$0xf0]  ;;  %v12201_v29 = vld [vmem:[#allocation10 + $0x6e8] sm:$0xf] }
 0x573   :  { %8084 = vmatpush.bf16.msrb.mxu0 %v11834_v44  ;;  %8097 = vmatpush.bf16.msrb.mxu1 %v11962_v63  ;;  %v16146_v10 = vadd.f32 %v7088_v30, %v7075_v32  ;;  %v12129_v44 = vld [vmem:[#allocation10 + $0x660] sm:$0xf]  ;;  %v13209_v63 = vld [vmem:[#allocation10 + $0x66c] sm:$0xf0]  ;;  %v16152_v17 = vsel %vm2350_vm9, %v8222_v48, %v8217_v60  ;;  %v12099_v30 = vld [vmem:[#allocation10 + $0x630] sm:$0xf0]  ;;  %v12214_v8 = vor.u32 %v13227_v54, %v12211_v59 }
 0x574   :  { %8110 = vmatpush.bf16.msra.mxu2 %v11838_v61  ;;  %8123 = vmatpush.bf16.msra.mxu3 %v11966_v45  ;;  %v12257_v61 = vld [vmem:[#allocation10 + $0x760] sm:$0xf]  ;;  %v13241_v45 = vld [vmem:[#allocation10 + $0x76c] sm:$0xf0]  ;;  %v12130_v0 = vor.u32 %v13209_v63, %v12129_v44  ;;  %v13226_v60 = vld [vmem:[#allocation10 + $0x6f4] sm:$0xf0] }
 0x575   :  { %v12258_v1 = vor.u32 %v13241_v45, %v12257_v61  ;;  %v12329_v48 = vld [vmem:[#allocation10 + $0x7e8] sm:$0xf]  ;;  %v12331_v61 = vld [vmem:[#allocation10 + $0x7f8] sm:$0xf0]  ;;  %v12086_v45 = vor.u32 %v13195_v50, %v12083_v21  ;;  %v13218_v33 = vld [vmem:[#allocation10 + $0x6b4] sm:$0xf0] }
 0x576   :  { %8085 = vmatmul.bf16.vlgmr.msrb.gmra.mxu0 %v16130_v40  ;;  %8098 = vmatmul.bf16.vlgmr.msrb.gmra.mxu1 %v16134_v42  ;;  %v12169_v25 = vld [vmem:[#allocation10 + $0x6a8] sm:$0xf] }
 0x577   :  { %8548 = vmatpush.bf16.msra.mxu0 %v12194_v55  ;;  %8561 = vmatpush.bf16.msra.mxu1 %v12322_v26 }
 0x578   :  { %8574 = vmatpush.bf16.msrb.mxu2 %v12198_v14  ;;  %8587 = vmatpush.bf16.msrb.mxu3 %v12326_v41  ;;  %v12259_v14 = vld [vmem:[#allocation10 + $0x770] sm:$0xf0] }
 0x579   :  { %8111 = vmatmul.bf16.vlgmr.msra.gmra.mxu2 %v16130_v40  ;;  %8124 = vmatmul.bf16.vlgmr.msra.gmra.mxu3 %v16134_v42  ;;  %v12294_v40 = vor.u32 %v13247_v22, %v12291_v4  ;;  %v13211_v42 = vld [vmem:[#allocation10 + $0x684] sm:$0xf]  ;;  %v7101_v55 = vpop.f32.mrf.mxu2  ;;  %v7114_v26 = vpop.f32.mrf.mxu3  ;;  %v12225_v22 = vld [vmem:[#allocation10 + $0x720] sm:$0xf]  ;;  %v13233_v4 = vld [vmem:[#allocation10 + $0x72c] sm:$0xf0] }
 0x57a   :  { %v12150_v23 = vor.u32 %v13211_v42, %v12147_v11  ;;  %v16154_v41 = vadd.f32 %v7114_v26, %v7101_v55  ;;  %v7077_v31 = vpop.f32.mrf.mxu0  ;;  %v7090_v7 = vpop.f32.mrf.mxu1  ;;  %v12226_v18 = vor.u32 %v13233_v4, %v12225_v22  ;;  %v12102_v42 = vor.u32 %v13199_v43, %v12099_v30  ;;  %v12297_v22 = vld [vmem:[#allocation10 + $0x7a8] sm:$0xf]  ;;  %v13250_v4 = vld [vmem:[#allocation10 + $0x7b4] sm:$0xf0]  ;;  %v13216_v43 = vld [vmem:[#allocation10 + $0x6ac] sm:$0xf] }
 0x57b   :  { %8549 = vmatpush.bf16.msra.mxu0 %v12178_v52  ;;  %8562 = vmatpush.bf16.msra.mxu1 %v12306_v37  ;;  %v12262_v52 = vor.u32 %v13239_v20, %v12259_v14  ;;  %v12241_v37 = vld [vmem:[#allocation10 + $0x740] sm:$0xf]  ;;  %v12230_v11 = vor.u32 %v13231_v57, %v12227_v5  ;;  %v12202_v55 = vor.u32 %v13226_v60, %v12201_v29  ;;  %v12185_v14 = vld [vmem:[#allocation10 + $0x6c8] sm:$0xf]  ;;  %v13222_v31 = vld [vmem:[#allocation10 + $0x6d4] sm:$0xf0] }
 0x57c   :  { %8575 = vmatpush.bf16.msrb.mxu2 %v12182_v39  ;;  %8588 = vmatpush.bf16.msrb.mxu3 %v12310_v58  ;;  %v12243_v39 = vld [vmem:[#allocation10 + $0x750] sm:$0xf0]  ;;  %v12114_v58 = vor.u32 %v13205_v15, %v12113_v6  ;;  %v12242_v16 = vor.u32 %v13237_v38, %v12241_v37  ;;  %v13220_v37 = vld [vmem:[#allocation10 + $0x6cc] sm:$0xf]  ;;  %v12187_v38 = vld [vmem:[#allocation10 + $0x6d8] sm:$0xf0]  ;;  %v12298_v30 = vor.u32 %v13250_v4, %v12297_v22 }
 0x57d   :  { %v12246_v35 = vor.u32 %v13235_v46, %v12243_v39  ;;  %v12186_v46 = vor.u32 %v13222_v31, %v12185_v14  ;;  %v16162_v39 = vpack.c.b16 %v16149_v28, %v16149_v28  ;;  %v12171_v28 = vld [vmem:[#allocation10 + $0x6b8] sm:$0xf0]  ;;  %v12137_v60 = vld [vmem:[#allocation10 + $0x668] sm:$0xf] }
 0x57e   :  { %v12249_v31 = vld [vmem:[#allocation10 + $0x748] sm:$0xf] }
 0x57f   :  { %8550 = vmatpush.bf16.msra.mxu0 %v12162_v19  ;;  %8563 = vmatpush.bf16.msra.mxu1 %v12290_v51  ;;  %v12233_v4 = vld [vmem:[#allocation10 + $0x728] sm:$0xf] }
 0x580   :  { %8576 = vmatpush.bf16.msrb.mxu2 %v12166_v47  ;;  %8589 = vmatpush.bf16.msrb.mxu3 %v12294_v40  ;;  %v13197_v47 = vld [vmem:[#allocation10 + $0x60c] sm:$0xf0]  ;;  %v12209_v40 = vld [vmem:[#allocation10 + $0x700] sm:$0xf] }
 0x581   :  { %v7103_v9 = vpop.f32.mrf.mxu2  ;;  %v7116_v32 = vpop.f32.mrf.mxu3  ;;  %v12082_v44 = vor.u32 %v13197_v47, %v12081_v12  ;;  %v12210_v63 = vor.u32 %v13229_v49, %v12209_v40  ;;  %v12174_v12 = vor.u32 %v13216_v43, %v12171_v28  ;;  %v13246_v47 = vld [vmem:[#allocation10 + $0x794] sm:$0xf0]  ;;  %v13212_v40 = vld [vmem:[#allocation10 + $0x68c] sm:$0xf]  ;;  %v12155_v49 = vld [vmem:[#allocation10 + $0x698] sm:$0xf0] }
 0x582   :  { %v7127_v19 = vpop.f32.mrf.mxu0  ;;  %v7140_v51 = vpop.f32.mrf.mxu1  ;;  %v13248_v9 = vld [vmem:[#allocation10 + $0x7ac] sm:$0xf]  ;;  %v12299_v32 = vld [vmem:[#allocation10 + $0x7b8] sm:$0xf0]  ;;  %v13234_v43 = vld [vmem:[#allocation10 + $0x734] sm:$0xf0] }
 0x583   :  { %8551 = vmatpush.bf16.msra.mxu0 %v12146_v34  ;;  %8564 = vmatpush.bf16.msra.mxu1 %v12274_v13  ;;  %v16156_v24 = vadd.f32 %v7140_v51, %v7127_v19  ;;  %v13258_v34 = vld [vmem:[#allocation10 + $0x7f4] sm:$0xf0]  ;;  %v13224_v13 = vld [vmem:[#allocation10 + $0x6ec] sm:$0xf]  ;;  %v12153_v19 = vld [vmem:[#allocation10 + $0x688] sm:$0xf] }
 0x584   :  { %8577 = vmatpush.bf16.msrb.mxu2 %v12150_v23  ;;  %8590 = vmatpush.bf16.msrb.mxu3 %v12278_v56  ;;  %v12203_v23 = vld [vmem:[#allocation10 + $0x6f8] sm:$0xf0]  ;;  %v13256_v56 = vld [vmem:[#allocation10 + $0x7ec] sm:$0xf]  ;;  %v12330_v26 = vor.u32 %v13258_v34, %v12329_v48  ;;  %v13214_v51 = vld [vmem:[#allocation10 + $0x694] sm:$0xf0]  ;;  %v12158_v34 = vor.u32 %v13212_v40, %v12155_v49 }
 0x585   :  { %v12206_v7 = vor.u32 %v13224_v13, %v12203_v23  ;;  %v12154_v59 = vor.u32 %v13214_v51, %v12153_v19  ;;  %v13210_v48 = vld [vmem:[#allocation10 + $0x674] sm:$0xf0]  ;;  %v13208_v23 = vld [vmem:[#allocation10 + $0x66c] sm:$0xf]  ;;  %v12091_v49 = vld [vmem:[#allocation10 + $0x618] sm:$0xf0] }
 0x586   :  { %v13200_v28 = vld [vmem:[#allocation10 + $0x62c] sm:$0xf] }
 0x587   :  { %8552 = vmatpush.bf16.msra.mxu0 %v12130_v0  ;;  %8565 = vmatpush.bf16.msra.mxu1 %v12258_v1  ;;  %v12334_v0 = vor.u32 %v13256_v56, %v12331_v61  ;;  %v12139_v61 = vld [vmem:[#allocation10 + $0x678] sm:$0xf0] }
 0x588   :  { %8578 = vmatpush.bf16.msrb.mxu2 %v12134_v36  ;;  %8591 = vmatpush.bf16.msrb.mxu3 %v12262_v52  ;;  %v12313_v36 = vld [vmem:[#allocation10 + $0x7c8] sm:$0xf]  ;;  %v13254_v52 = vld [vmem:[#allocation10 + $0x7d4] sm:$0xf0] }
 0x589   :  { %v7153_v53 = vpop.f32.mrf.mxu2  ;;  %v7166_v20 = vpop.f32.mrf.mxu3 }
 0x58a   :  { %v16158_v1 = vadd.f32 %v7166_v20, %v7153_v53  ;;  %v7129_v6 = vpop.f32.mrf.mxu0  ;;  %v7142_v15 = vpop.f32.mrf.mxu1  ;;  %v13206_v53 = vld [vmem:[#allocation10 + $0x654] sm:$0xf0]  ;;  %v12142_v20 = vor.u32 %v13208_v23, %v12139_v61 }
 0x58b   :  { %8553 = vmatpush.bf16.msra.mxu0 %v12114_v58  ;;  %8566 = vmatpush.bf16.msra.mxu1 %v12242_v16  ;;  %v16166_v58 = vpack.c.b16 %v16152_v17, %v16152_v17  ;;  %v12314_v16 = vor.u32 %v13254_v52, %v12313_v36  ;;  %v12170_v17 = vor.u32 %v13218_v33, %v12169_v25  ;;  %v12123_v36 = vld [vmem:[#allocation10 + $0x658] sm:$0xf0]  ;;  %v13236_v52 = vld [vmem:[#allocation10 + $0x74c] sm:$0xf]  ;;  %v12105_v25 = vld [vmem:[#allocation10 + $0x628] sm:$0xf] }
 0x58c   :  { %8579 = vmatpush.bf16.msrb.mxu2 %v12118_v2  ;;  %8592 = vmatpush.bf16.msrb.mxu3 %v12246_v35  ;;  %v12190_v2 = vor.u32 %v13220_v37, %v12187_v38  ;;  %v12318_v35 = vor.u32 %v13252_v3, %v12315_v62  ;;  %v12251_v37 = vld [vmem:[#allocation10 + $0x758] sm:$0xf0]  ;;  %v13202_v33 = vld [vmem:[#allocation10 + $0x634] sm:$0xf0] }
 0x58d   :  { %v12254_v22 = vor.u32 %v13236_v52, %v12251_v37  ;;  %v13262_v52 = vld [vmem:[#allocation13 + $0x18] sm:$0xff]  ;;  %v13271_v37 = vld [vmem:[#allocation13 + $0x60] sm:$0xff] }
 0x58f   :  { %8554 = vmatpush.bf16.msra.mxu0 %v12098_v27  ;;  %8567 = vmatpush.bf16.msra.mxu1 %v12226_v18  ;;  %v12302_v27 = vor.u32 %v13248_v9, %v12299_v32  ;;  %v12281_v18 = vld [vmem:[#allocation10 + $0x788] sm:$0xf]  ;;  %v12107_v9 = vld [vmem:[#allocation10 + $0x638] sm:$0xf0]  ;;  %v13232_v32 = vld [vmem:[#allocation10 + $0x72c] sm:$0xf] }
 0x590   :  { %8580 = vmatpush.bf16.msrb.mxu2 %v12102_v42  ;;  %8593 = vmatpush.bf16.msrb.mxu3 %v12230_v11  ;;  %v13244_v42 = vld [vmem:[#allocation10 + $0x78c] sm:$0xf]  ;;  %v12283_v11 = vld [vmem:[#allocation10 + $0x798] sm:$0xf0]  ;;  %v12282_v29 = vor.u32 %v13246_v47, %v12281_v18  ;;  %v12110_v19 = vor.u32 %v13200_v28, %v12107_v9 }
 0x591   :  { %v7155_v57 = vpop.f32.mrf.mxu2  ;;  %v7168_v5 = vpop.f32.mrf.mxu3  ;;  %v12286_v13 = vor.u32 %v13244_v42, %v12283_v11  ;;  %v13196_v18 = vld [vmem:[#allocation10 + $0x60c] sm:$0xf]  ;;  %v12219_v11 = vld [vmem:[#allocation10 + $0x718] sm:$0xf0] }
 0x592   :  { %v12089_v57 = vld [vmem:[#allocation10 + $0x608] sm:$0xf]  ;;  %v13198_v5 = vld [vmem:[#allocation10 + $0x614] sm:$0xf0]  ;;  %v13228_v42 = vld [vmem:[#allocation10 + $0x70c] sm:$0xf] }
 0x593   :  { %8555 = vmatpush.bf16.msra.mxu0 %v12082_v44  ;;  %8568 = vmatpush.bf16.msra.mxu1 %v12210_v63  ;;  %v7515_v50 = vpop.f32.mrf.mxu0  ;;  %v7528_v21 = vpop.f32.mrf.mxu1  ;;  %v12265_v44 = vld [vmem:[#allocation10 + $0x768] sm:$0xf]  ;;  %v13242_v63 = vld [vmem:[#allocation10 + $0x774] sm:$0xf0]  ;;  %v13282_v28 = vld [vmem:[#allocation13 + $0xb8] sm:$0xff] }
 0x594   :  { %8581 = vmatpush.bf16.msrb.mxu2 %v12086_v45  ;;  %8594 = vmatpush.bf16.msrb.mxu3 %v12214_v8  ;;  %v7516_v54 = vadd.f32 %v7515_v50, %v16146_v10  ;;  %v13240_v45 = vld [vmem:[#allocation10 + $0x76c] sm:$0xf]  ;;  %v12267_v8 = vld [vmem:[#allocation10 + $0x778] sm:$0xf0]  ;;  %v12266_v10 = vor.u32 %v13242_v63, %v12265_v44  ;;  %v12090_v50 = vor.u32 %v13198_v5, %v12089_v57  ;;  %v13289_v57 = vld [vmem:[#allocation13 + $0xf0] sm:$0xff] }
 0x595   :  { %v12270_v14 = vor.u32 %v13240_v45, %v12267_v8  ;;  %v13267_v5 = vld [vmem:[#allocation13 + $0x40] sm:$0xff] }
 0x596   :  { %8556 = vmatmul.bf16.vlgmr.msra.gmra.mxu0 %v16162_v39  ;;  %8569 = vmatmul.bf16.vlgmr.msra.gmra.mxu1 %v16166_v58  ;;  %v16173_v56 = vadd.f32 %v7528_v21, %v7516_v54  ;;  %v12094_v54 = vor.u32 %v13196_v18, %v12091_v49 }
 0x597   :  { %8600 = vmatpush.bf16.msrb.mxu0 %v12202_v55  ;;  %8613 = vmatpush.bf16.msrb.mxu1 %v12330_v26  ;;  %v12138_v55 = vor.u32 %v13210_v48, %v12137_v60  ;;  %v12121_v26 = vld [vmem:[#allocation10 + $0x648] sm:$0xf] }
 0x598   :  { %8626 = vmatpush.bf16.msra.mxu2 %v12206_v7  ;;  %8639 = vmatpush.bf16.msra.mxu3 %v12334_v0  ;;  %v13238_v7 = vld [vmem:[#allocation10 + $0x754] sm:$0xf0]  ;;  %v13204_v0 = vld [vmem:[#allocation10 + $0x64c] sm:$0xf] }
 0x599   :  { %8582 = vmatmul.bf16.vlgmr.msrb.gmra.mxu2 %v16162_v39  ;;  %8595 = vmatmul.bf16.vlgmr.msrb.gmra.mxu3 %v16166_v58 }
 0x59b   :  { %8601 = vmatpush.bf16.msrb.mxu0 %v12186_v46  ;;  %8614 = vmatpush.bf16.msrb.mxu1 %v12314_v16  ;;  %v7517_v3 = vpop.f32.mrf.mxu0  ;;  %v7530_v62 = vpop.f32.mrf.mxu1  ;;  %v12122_v46 = vor.u32 %v13206_v53, %v12121_v26  ;;  %v12250_v16 = vor.u32 %v13238_v7, %v12249_v31  ;;  %v13274_v31 = vld [vmem:[#allocation13 + $0x78] sm:$0xff] }
 0x59c   :  { %8627 = vmatpush.bf16.msra.mxu2 %v12190_v2  ;;  %8640 = vmatpush.bf16.msra.mxu3 %v12318_v35  ;;  %v7541_v6 = vpop.f32.mrf.mxu2  ;;  %v7554_v15 = vpop.f32.mrf.mxu3  ;;  %v12126_v35 = vor.u32 %v13204_v0, %v12123_v36  ;;  %v13272_v36 = vld [vmem:[#allocation13 + $0x68] sm:$0xff] }
 0x59d   :  { %v7542_v38 = vadd.f32 %v7541_v6, %v16154_v41  ;;  %v12235_v41 = vld [vmem:[#allocation10 + $0x738] sm:$0xf0]  ;;  %v13273_v6 = vld [vmem:[#allocation13 + $0x70] sm:$0xff] }
 0x59e   :  { %v12238_v51 = vor.u32 %v13232_v32, %v12235_v41  ;;  %v13268_v41 = vld [vmem:[#allocation13 + $0x48] sm:$0xff] }
 0x59f   :  { %8602 = vmatpush.bf16.msrb.mxu0 %v12170_v17  ;;  %8615 = vmatpush.bf16.msrb.mxu1 %v12298_v30  ;;  %v16176_v2 = vadd.f32 %v7554_v15, %v7542_v38  ;;  %v12106_v17 = vor.u32 %v13202_v33, %v12105_v25  ;;  %v12234_v30 = vor.u32 %v13234_v43, %v12233_v4  ;;  %v13263_v15 = vld [vmem:[#allocation13 + $0x20] sm:$0xff]  ;;  %v13270_v25 = vld [vmem:[#allocation13 + $0x58] sm:$0xff]  ;;  %v13269_v4 = vld [vmem:[#allocation13 + $0x50] sm:$0xff] }
 0x5a0   :  { %8628 = vmatpush.bf16.msra.mxu2 %v12174_v12  ;;  %8641 = vmatpush.bf16.msra.mxu3 %v12302_v27  ;;  %v12217_v12 = vld [vmem:[#allocation10 + $0x708] sm:$0xf]  ;;  %v13230_v27 = vld [vmem:[#allocation10 + $0x714] sm:$0xf0] }
 0x5a1   :  { %v12218_v21 = vor.u32 %v13230_v27, %v12217_v12  ;;  %v13259_v43 = vld [vmem:[#allocation13] sm:$0xff] }
 0x5a2   :  { %v13279_v12 = vld [vmem:[#allocation13 + $0xa0] sm:$0xff] }
 0x5a3   :  { %8603 = vmatpush.bf16.msrb.mxu0 %v12154_v59  ;;  %8616 = vmatpush.bf16.msrb.mxu1 %v12282_v29  ;;  %v12222_v59 = vor.u32 %v13228_v42, %v12219_v11  ;;  %v13287_v27 = vld [vmem:[#allocation13 + $0xe0] sm:$0xff] }
 0x5a4   :  { %8629 = vmatpush.bf16.msra.mxu2 %v12158_v34  ;;  %8642 = vmatpush.bf16.msra.mxu3 %v12286_v13  ;;  %v7543_v47 = vpop.f32.mrf.mxu2  ;;  %v7556_v40 = vpop.f32.mrf.mxu3 }
 0x5a5   :  { %v16200_v47 = vld [vmem:[#allocation11] sm:$0xf] }
 0x5a6   :  { %v13278_v40 = vld [vmem:[#allocation13 + $0x98] sm:$0xff] }
 0x5a7   :  { %8604 = vmatpush.bf16.msrb.mxu0 %v12138_v55  ;;  %8617 = vmatpush.bf16.msrb.mxu1 %v12266_v10 }
 0x5a8   :  { %8630 = vmatpush.bf16.msra.mxu2 %v12142_v20  ;;  %8643 = vmatpush.bf16.msra.mxu3 %v12270_v14  ;;  %v13266_v20 = vld [vmem:[#allocation13 + $0x38] sm:$0xff]  ;;  %v13265_v14 = vld [vmem:[#allocation13 + $0x30] sm:$0xff] }
 0x5ab   :  { %8605 = vmatpush.bf16.msrb.mxu0 %v12122_v46  ;;  %8618 = vmatpush.bf16.msrb.mxu1 %v12250_v16  ;;  %v13261_v16 = vld [vmem:[#allocation13 + $0x10] sm:$0xff] }
 0x5ac   :  { %8631 = vmatpush.bf16.msra.mxu2 %v12126_v35  ;;  %8644 = vmatpush.bf16.msra.mxu3 %v12254_v22  ;;  %v13260_v22 = vld [vmem:[#allocation13 + $0x8] sm:$0xff] }
 0x5af   :  { %8606 = vmatpush.bf16.msrb.mxu0 %v12106_v17  ;;  %8619 = vmatpush.bf16.msrb.mxu1 %v12234_v30  ;;  %v13281_v17 = vld [vmem:[#allocation13 + $0xb0] sm:$0xff]  ;;  %v13290_v30 = vld [vmem:[#allocation13 + $0xf8] sm:$0xff] }
 0x5b0   :  { %8632 = vmatpush.bf16.msra.mxu2 %v12110_v19  ;;  %8645 = vmatpush.bf16.msra.mxu3 %v12238_v51  ;;  %v13280_v19 = vld [vmem:[#allocation13 + $0xa8] sm:$0xff] }
 0x5b1   :  { %v13288_v51 = vld [vmem:[#allocation13 + $0xe8] sm:$0xff] }
 0x5b3   :  { %8607 = vmatpush.bf16.msrb.mxu0 %v12090_v50  ;;  %8620 = vmatpush.bf16.msrb.mxu1 %v12218_v21  ;;  %v7567_v29 = vpop.f32.mrf.mxu0  ;;  %v7580_v60 = vpop.f32.mrf.mxu1  ;;  %v8658_v21 = vperm.slane %v16200_v47, 0 }
 0x5b4   :  { %8633 = vmatpush.bf16.msra.mxu2 %v12094_v54  ;;  %8646 = vmatpush.bf16.msra.mxu3 %v12222_v59  ;;  %v7568_v48 = vadd.f32 %v7567_v29, %v16156_v24 }
 0x5b6   :  { %8608 = vmatmul.bf16.vlgmr.msrb.gmra.mxu0 %v16162_v39  ;;  %8621 = vmatmul.bf16.vlgmr.msrb.gmra.mxu1 %v16166_v58  ;;  %v16183_v34 = vadd.f32 %v7580_v60, %v7568_v48  ;;  %v13277_v60 = vld [vmem:[#allocation13 + $0x90] sm:$0xff]  ;;  %v13286_v48 = vld [vmem:[#allocation13 + $0xd8] sm:$0xff] }
 0x5b7   :  { %8634 = vmatmul.bf16.vlgmr.msra.gmra.mxu2 %v16162_v39  ;;  %8647 = vmatmul.bf16.vlgmr.msra.gmra.mxu3 %v16166_v58 }
 0x5b8   :  { %8938 = vmatpush.bf16.msra.mxu0 %v13266_v20  ;;  %8951 = vmatpush.bf16.msra.mxu1 %v13274_v31 }
 0x5b9   :  { %8964 = vmatpush.bf16.msrb.mxu2 %v13282_v28  ;;  %8977 = vmatpush.bf16.msrb.mxu3 %v13290_v30 }
 0x5bb   :  { %v7569_v23 = vpop.f32.mrf.mxu0  ;;  %v7582_v61 = vpop.f32.mrf.mxu1 }
 0x5bc   :  { %v7593_v13 = vpop.f32.mrf.mxu2  ;;  %v7606_v44 = vpop.f32.mrf.mxu3  ;;  %8939 = vmatpush.bf16.msra.mxu0 %v13265_v14  ;;  %8952 = vmatpush.bf16.msra.mxu1 %v13273_v6 }
 0x5bd   :  { %v7594_v63 = vadd.f32 %v7593_v13, %v16158_v1  ;;  %v13264_v1 = vld [vmem:[#allocation13 + $0x28] sm:$0xff]  ;;  %8965 = vmatpush.bf16.msrb.mxu2 %v13281_v17  ;;  %8978 = vmatpush.bf16.msrb.mxu3 %v13289_v57 }
 0x5bf   :  { %v16186_v45 = vadd.f32 %v7606_v44, %v7594_v63 }
 0x5c0   :  { %8940 = vmatpush.bf16.msra.mxu0 %v13264_v1  ;;  %8953 = vmatpush.bf16.msra.mxu1 %v13272_v36 }
 0x5c1   :  { %8966 = vmatpush.bf16.msrb.mxu2 %v13280_v19  ;;  %8979 = vmatpush.bf16.msrb.mxu3 %v13288_v51 }
 0x5c4   :  { %v7595_v8 = vpop.f32.mrf.mxu2  ;;  %v7608_v55 = vpop.f32.mrf.mxu3  ;;  %8941 = vmatpush.bf16.msra.mxu0 %v13263_v15  ;;  %8954 = vmatpush.bf16.msra.mxu1 %v13271_v37  ;;  %v8660_v37 = vperm.slane %v16200_v47, 2 }
 0x5c5   :  { %8967 = vmatpush.bf16.msrb.mxu2 %v13279_v12  ;;  %8980 = vmatpush.bf16.msrb.mxu3 %v13287_v27  ;;  %v8659_v8 = vperm.slane %v16200_v47, 1  ;;  %v13306_v12 = vld [vmem:[#allocation14] ss:$0 sm:$0xff] }
 0x5c8   :  { %8942 = vmatpush.bf16.msra.mxu0 %v13262_v52  ;;  %8955 = vmatpush.bf16.msra.mxu1 %v13270_v25 }
 0x5c9   :  { %8968 = vmatpush.bf16.msrb.mxu2 %v13278_v40  ;;  %8981 = vmatpush.bf16.msrb.mxu3 %v13286_v48 }
 0x5cc   :  { %8943 = vmatpush.bf16.msra.mxu0 %v13261_v16  ;;  %8956 = vmatpush.bf16.msra.mxu1 %v13269_v4 }
 0x5cd   :  { %8969 = vmatpush.bf16.msrb.mxu2 %v13277_v60 }
 0x5d0   :  { %8944 = vmatpush.bf16.msra.mxu0 %v13260_v22  ;;  %8957 = vmatpush.bf16.msra.mxu1 %v13268_v41 }
 0x5d3   :  { %v8034_v10 = vpop.f32.mrf.mxu0  ;;  %v8047_v39 = vpop.f32.mrf.mxu1 }
 0x5d4   :  { %8945 = vmatpush.bf16.msra.mxu0 %v13259_v43  ;;  %8958 = vmatpush.bf16.msra.mxu1 %v13267_v5  ;;  %v8048_v18 = vadd.f32 %v8047_v39, %v8034_v10  ;;  %v13276_v10 = vld [vmem:[#allocation13 + $0x88] sm:$0xff] }
 0x5d5   :  { %8970 = vmatpush.bf16.msrb.mxu2 %v13276_v10 }
 0x5d6   :  { %v8129_v11 = vadd.f32 %v8048_v18, %v16173_v56 }
 0x5db   :  { %v8036_v53 = vpop.f32.mrf.mxu0  ;;  %v8049_v24 = vpop.f32.mrf.mxu1 }
 0x5dc   :  { %v16188_v26 = vpop.f32.mrf.mxu2  ;;  %v16190_v58 = vpop.f32.mrf.mxu3  ;;  %v13275_v24 = vld [vmem:[#allocation13 + $0x80] sm:$0xff] }
 0x5dd   :  { %v8074_v59 = vadd.f32 %v16190_v58, %v16188_v26  ;;  %v13285_v58 = vld [vmem:[#allocation13 + $0xd0] sm:$0xff]  ;;  %8971 = vmatpush.bf16.msrb.mxu2 %v13275_v24 }
 0x5de   :  { %8982 = vmatpush.bf16.msrb.mxu3 %v13285_v58 }
 0x5df   :  { %v8130_v23 = vadd.f32 %v8074_v59, %v16176_v2  ;;  %v13284_v2 = vld [vmem:[#allocation13 + $0xc8] sm:$0xff] }
 0x5e2   :  { %8983 = vmatpush.bf16.msrb.mxu3 %v13284_v2 }
 0x5e4   :  { %v8062_v7 = vpop.f32.mrf.mxu2  ;;  %v8075_v0 = vpop.f32.mrf.mxu3 }
 0x5e5   :  { %v13283_v7 = vld [vmem:[#allocation13 + $0xc0] sm:$0xff] }
 0x5e6   :  { %8984 = vmatpush.bf16.msrb.mxu3 %v13283_v7 }
 0x5f3   :  { %v16192_v38 = vpop.f32.mrf.mxu0  ;;  %v16194_v3 = vpop.f32.mrf.mxu1 }
 0x5f4   :  { %v8100_v0 = vadd.f32 %v16194_v3, %v16192_v38  ;;  %v8661_v38 = vperm.slane %v16200_v47, 3 }
 0x5f6   :  { %v8131_v36 = vadd.f32 %v8100_v0, %v16183_v34 }
 0x5fb   :  { %v8088_v33 = vpop.f32.mrf.mxu0  ;;  %v8101_v35 = vpop.f32.mrf.mxu1 }
 0x5fc   :  { %v16196_v62 = vpop.f32.mrf.mxu2  ;;  %v16198_v46 = vpop.f32.mrf.mxu3 }
 0x5fd   :  { %v8126_v25 = vadd.f32 %v16198_v46, %v16196_v62 }
 0x5ff   :  { %v8132_v43 = vadd.f32 %v8126_v25, %v16186_v45  ;;  %v8990_v45 = vlaneseq }
 0x601   :  { %v8991_v47 = vand.u32 127, %v8990_v45 }
 0x603   :  { %vm8992_vm0 = vcmp.lt.s32.totalorder %v8991_v47, 10 }
 0x604   :  { %v8114_v9 = vpop.f32.mrf.mxu2  ;;  %v8127_v32 = vpop.f32.mrf.mxu3 }
 0x613   :  { %v8557_v49 = vpop.f32.mrf.mxu0  ;;  %v8570_v42 = vpop.f32.mrf.mxu1 }
 0x614   :  { %v8571_v50 = vadd.f32 %v8570_v42, %v8557_v49 }
 0x616   :  { %v8652_v54 = vadd.f32 %v8571_v50, %v8129_v11 }
 0x618   :  { %v8666_v29 = vadd.f32 %v8658_v21, %v8652_v54 }
 0x61a   :  { %v8670_v13 = vmax.f32 %v8666_v29, 0.0 }
 0x61b   :  { %v8559_v56 = vpop.f32.mrf.mxu0  ;;  %v8572_v55 = vpop.f32.mrf.mxu1 }
 0x61c   :  { %v8583_v44 = vpop.f32.mrf.mxu2  ;;  %v8596_v63 = vpop.f32.mrf.mxu3  ;;  %v8674_v39 = vpack.c.bf16 %v8670_v13, %v8670_v13 }
 0x61d   :  { %v8597_v61 = vadd.f32 %v8596_v63, %v8583_v44 }
 0x61e   :  { %8946 = vmatmul.bf16.vlgmr.msra.gmra.mxu0 %v8674_v39 }
 0x61f   :  { %v8653_v53 = vadd.f32 %v8597_v61, %v8130_v23 }
 0x621   :  { %v8667_v26 = vadd.f32 %v8659_v8, %v8653_v53 }
 0x623   :  { %v8671_v20 = vmax.f32 %v8667_v26, 0.0 }
 0x624   :  { %v8585_v14 = vpop.f32.mrf.mxu2  ;;  %v8598_v31 = vpop.f32.mrf.mxu3 }
 0x625   :  { %v8675_v1 = vpack.c.bf16 %v8671_v20, %v8671_v20 }
 0x627   :  { %8959 = vmatmul.bf16.vlgmr.msra.gmra.mxu1 %v8675_v1 }
 0x633   :  { %v8609_v6 = vpop.f32.mrf.mxu0  ;;  %v8622_v15 = vpop.f32.mrf.mxu1 }
 0x634   :  { %v8623_v52 = vadd.f32 %v8622_v15, %v8609_v6 }
 0x636   :  { %v8654_v16 = vadd.f32 %v8623_v52, %v8131_v36 }
 0x638   :  { %v8668_v33 = vadd.f32 %v8660_v37, %v8654_v16 }
 0x63a   :  { %v8672_v35 = vmax.f32 %v8668_v33, 0.0  ;;  %v8635_v22 = vpop.f32.mrf.mxu2  ;;  %v8648_v4 = vpop.f32.mrf.mxu3 }
 0x63b   :  { %v8649_v28 = vadd.f32 %v8648_v4, %v8635_v22  ;;  %v8611_v3 = vpop.f32.mrf.mxu0  ;;  %v8624_v9 = vpop.f32.mrf.mxu1 }
 0x63c   :  { %v8676_v32 = vpack.c.bf16 %v8672_v35, %v8672_v35 }
 0x63d   :  { %v8655_v34 = vadd.f32 %v8649_v28, %v8132_v43 }
 0x63e   :  { %8972 = vmatmul.bf16.vlgmr.msrb.gmra.mxu2 %v8676_v32 }
 0x63f   :  { %v8669_v41 = vadd.f32 %v8661_v38, %v8655_v34 }
 0x641   :  { %v8673_v17 = vmax.f32 %v8669_v41, 0.0 }
 0x642   :  { %v8637_v30 = vpop.f32.mrf.mxu2  ;;  %v8650_v57 = vpop.f32.mrf.mxu3 }
 0x643   :  { %v8677_v5 = vpack.c.bf16 %v8673_v17, %v8673_v17 }
 0x645   :  { %8985 = vmatmul.bf16.vlgmr.msrb.gmra.mxu3 %v8677_v5 }
 0x69b   :  { %v8947_v62 = vpop.f32.mrf.mxu0 }
 0x69c   :  { %v8948_v18 = vadd.f32 %v13306_v12, %v8947_v62 }
 0x6a3   :  { %v8949_v19 = vpop.f32.mrf.mxu0 }
 0x6a4   :  { %v8960_v46 = vpop.f32.mrf.mxu1 }
 0x6a5   :  { %v8961_v40 = vadd.f32 %v8960_v46, %v8948_v18 }
 0x6ac   :  { %v8962_v51 = vpop.f32.mrf.mxu1 }
 0x6c1   :  { %v8973_v27 = vpop.f32.mrf.mxu2 }
 0x6c2   :  { %v8974_v49 = vadd.f32 %v8973_v27, %v8961_v40 }
 0x6c8   :  { %v8986_v42 = vpop.f32.mrf.mxu3 }
 0x6c9   :  { %v8987_v11 = vadd.f32 %v8986_v42, %v8974_v49  ;;  %v8975_v50 = vpop.f32.mrf.mxu2 }
 0x6cb   :  { %v8993_v21 = vsel %vm8992_vm0, %v8987_v11, -1e+30 }
 0x6cc   :  { %v8994_v54 = vsel %vm1612_vm5, %v8993_v21, -inf }
 0x6cd   :  { %8995 = vmax.xlane.f32.xlu0 %v8994_v54 }
 0x6d0   :  { %v8988_v59 = vpop.f32.mrf.mxu3 }
 0x740   :  { %v8996_v29 = vpop.xlane.xlu0 %8995 }
 0x741   :  { %v8997_v60 = vsub.f32 %v8993_v21, %v8996_v29 }
 0x743   :  { %v8998_v48 = vmul.f32 1.442695, %v8997_v60 }
 0x745   :  { %13307 = vpow2.f32 %v8998_v48 }
 0x74b   :  { %v13308_v13 = vpop.eup %13307 }
 0x74c   :  { %v9000_v44 = vsel %vm8992_vm0, %v13308_v13, 0.0 }
 0x74d   :  { %v9001_v63 = vsel %vm1612_vm5, %v9000_v44, 0.0 }
 0x74e   :  { %9002 = vadd.xlane.f32.xlu0 %v9001_v63 }
 0x7c1   :  { %v9003_v23 = vpop.xlane.xlu0 %9002 }
 0x7c2   :  { %13309 = vlog2.f32 %v9003_v23 }
 0x7c8   :  { %v13310_v61 = vpop.eup %13309 }
 0x7c9   :  { %v9005_v8 = vmul.f32 0.6931472, %v13310_v61 }
 0x7cb   :  { %v9006_v56 = vsub.f32 %v8997_v60, %v9005_v8 }
 0x7cd   :  { %9007 = vst [vmem:[#allocation16] sm:$0x3] %v9006_v56 }
 0x7ce   :  { %9018 = dma.vmem_to_hbm [thread:$0]  %s9014_s17, 32, %s9016_s20, [#allocation4]  }
 0x7cf   :  { %13537 = dma.done.wait [#allocation4], 32  }
 0x7d0   :  { %13538 = vsyncadd [#allocation4], 4294967264 }
 0x7d1   :  { %9023 = vsyncpa [#allocation3], 1 }
 0x7d2   :  { %9024 = vsyncpa [#allocation6], 1 }
 0x7d3   :  { %9025 = vsyncpa [#allocation9], 1 }
 0x7d4   :  { %9026 = vsyncpa [#allocation12], 1 }
 0x7d5   :  { %9027 = vsyncpa [#allocation15], 1 }
 0x7d6   :  { %9028 = vsyncpa [#allocation4], 1 }

</bundles_post_ra>
